<compile_context>
chip_gen: v5e
topology: v5e:2x2
jax: 0.10.0
libtpu: 0.0.40
codegen_flags: <defaults>
</compile_context>

<pallas_src>
from collections import OrderedDict
from functools import partial

import jax
import jax.numpy as jnp
from jax import lax
from jax.experimental import pallas as pl
from jax.experimental.pallas import tpu as pltpu

# Synthetic Compose instantiation sizes
C_IN, C1, C2, C_NECK, N_CLS = 4, 8, 16, 16, 4
GUARD = 24  # guard rows around each image's padded slab (>= Wp+1, multiple of 8)


# ----------------------------------------------------------------------------
# Fused Pallas kernel: backbone -> neck -> packed heads -> masked MSE partials
# ----------------------------------------------------------------------------
def _fused_compose_kernel(xg_ref, tgt_ref, mask_ref,
                          w1_ref, b1_ref, w2_ref, b2_ref,
                          wn_ref, bn_ref, wh_ref, bh_ref,
                          logits_ref, tl_ref, al_ref,
                          a1g_ref, *, H, W):
    """One grid step == one image.  Only the (padded) logits slab and two
    per-image squared-error partials ever go back to HBM."""
    Hp, Wp = H + 2, W + 2
    P = Hp * Wp                 # rows of the per-image zero-padded slab
    G = GUARD
    R = P + 2 * G
    bf16 = jnp.bfloat16
    f32 = jnp.float32

    mask = mask_ref[...]        # (P, 1): 1.0 at interior pixels, 0.0 at pad rows

    def conv3x3(src_ref, w_ref):
        # src_ref: (R, Cin) guarded padded slab; w_ref: (9, Cin, Cout).
        # Conv output at every padded position r is sum_k src[r + off_k] @ w_k;
        # values at border/guard rows are garbage but finite and get masked.
        cout = w_ref.shape[-1]
        acc = jnp.zeros((P, cout), f32)
        for k in range(9):
            dh, dw = divmod(k, 3)
            off = (dh - 1) * Wp + (dw - 1)
            tap = src_ref[G + off:G + off + P, :]       # shifted-row window
            acc += jnp.dot(tap.astype(bf16), w_ref[k].astype(bf16),
                           preferred_element_type=f32)
        return acc

    # ---- backbone stage 1 : conv3x3(C_IN -> C1) + ReLU ----
    a1 = jnp.maximum(conv3x3(xg_ref, w1_ref) + b1_ref[...], 0.0) * mask
    # Stash into the guarded VMEM slab; guards + spatial border stay zero so
    # they act as conv2's zero padding.
    a1g_ref[0:G, :] = jnp.zeros((G, C1), f32)
    a1g_ref[G + P:R, :] = jnp.zeros((G, C1), f32)
    a1g_ref[G:G + P, :] = a1

    # ---- backbone stage 2 : conv3x3(C1 -> C2) + ReLU ----
    a2 = jnp.maximum(conv3x3(a1g_ref, w2_ref) + b2_ref[...], 0.0)

    # ---- neck : conv1x1(C2 -> C_NECK) + ReLU ----
    feat = jnp.maximum(
        jnp.dot(a2.astype(bf16), wn_ref[...].astype(bf16),
                preferred_element_type=f32) + bn_ref[...], 0.0)

    # ---- both decode heads packed into one matmul: C_NECK -> 2*N_CLS ----
    logits = jnp.dot(feat.astype(bf16), wh_ref[...].astype(bf16),
                     preferred_element_type=f32) + bh_ref[...]
    logits_ref[...] = logits

    # ---- per-head masked MSE partial sums (interior pixels only) ----
    d = logits - tgt_ref[...]
    sq = d * d * mask
    lane = lax.broadcasted_iota(jnp.int32, (1, 2 * N_CLS), 1)
    trunk_sel = (lane < N_CLS).astype(f32)
    tl_ref[...] = jnp.sum(sq * trunk_sel).reshape(1, 1)
    al_ref[...] = jnp.sum(sq * (1.0 - trunk_sel)).reshape(1, 1)


def _fused_forward_pallas(xg, tgt_pad, mask, w1, b1, w2, b2, wn, bn, wh, bh,
                          *, H, W):
    N = xg.shape[0]
    Hp, Wp = H + 2, W + 2
    P = Hp * Wp
    R = P + 2 * GUARD
    assert GUARD >= Wp + 1, (GUARD, Wp)

    kern = partial(_fused_compose_kernel, H=H, W=W)
    return pl.pallas_call(
        kern,
        out_shape=(
            jax.ShapeDtypeStruct((N, P, 2 * N_CLS), jnp.float32),  # padded logits slab
            jax.ShapeDtypeStruct((N, 1, 1), jnp.float32),          # trunk sq-err partial
            jax.ShapeDtypeStruct((N, 1, 1), jnp.float32),          # aux   sq-err partial
        ),
        grid_spec=pltpu.PrefetchScalarGridSpec(
            num_scalar_prefetch=0,
            grid=(N,),
            in_specs=[
                pl.BlockSpec((None, R, C_IN), lambda i: (i, 0, 0)),       # guarded image slab
                pl.BlockSpec((None, P, 2 * N_CLS), lambda i: (i, 0, 0)),  # packed padded targets
                pl.BlockSpec((P, 1), lambda i: (0, 0)),                   # interior mask
                pl.BlockSpec((9, C_IN, C1), lambda i: (0, 0, 0)),         # conv1 per-tap weights
                pl.BlockSpec((1, C1), lambda i: (0, 0)),
                pl.BlockSpec((9, C1, C2), lambda i: (0, 0, 0)),           # conv2 per-tap weights
                pl.BlockSpec((1, C2), lambda i: (0, 0)),
                pl.BlockSpec((C2, C_NECK), lambda i: (0, 0)),             # neck 1x1
                pl.BlockSpec((1, C_NECK), lambda i: (0, 0)),
                pl.BlockSpec((C_NECK, 2 * N_CLS), lambda i: (0, 0)),      # packed heads 1x1
                pl.BlockSpec((1, 2 * N_CLS), lambda i: (0, 0)),
            ],
            out_specs=(
                pl.BlockSpec((None, P, 2 * N_CLS), lambda i: (i, 0, 0)),
                pl.BlockSpec((None, 1, 1), lambda i: (i, 0, 0)),
                pl.BlockSpec((None, 1, 1), lambda i: (i, 0, 0)),
            ),
            scratch_shapes=[pltpu.VMEM((R, C1), jnp.float32)],            # guarded stage-1 slab
        ),
        compiler_params=pltpu.CompilerParams(
            dimension_semantics=("parallel",)),   # v7x: one image per TensorCore
    )(xg, tgt_pad, mask, w1, b1, w2, b2, wn, bn, wh, bh)


# ----------------------------------------------------------------------------
# Jitted forward (layout plumbing + one fused pallas_call)
# ----------------------------------------------------------------------------
@jax.jit
def _forward_impl(params, image, trunk_target, aux_target):
    N, _, H, W = image.shape
    Hp, Wp = H + 2, W + 2
    P = Hp * Wp

    # NCHW -> NHWC, zero-pad spatially, flatten rows, add guard rows.
    x = jnp.transpose(image, (0, 2, 3, 1))
    xp = jnp.pad(x, ((0, 0), (1, 1), (1, 1), (0, 0))).reshape(N, P, C_IN)
    xg = jnp.pad(xp, ((0, 0), (GUARD, GUARD), (0, 0)))

    # Pack both heads' targets in the same padded-row layout as the logits slab.
    tt = jnp.transpose(trunk_target, (0, 2, 3, 1))
    at = jnp.transpose(aux_target, (0, 2, 3, 1))
    tgt = jnp.concatenate([tt, at], axis=-1)                         # (N,H,W,2*N_CLS)
    tgt_pad = jnp.pad(tgt, ((0, 0), (1, 1), (1, 1), (0, 0))).reshape(N, P, 2 * N_CLS)

    # Interior-pixel mask in padded-row layout.
    mask = jnp.zeros((Hp, Wp), jnp.float32).at[1:H + 1, 1:W + 1].set(1.0).reshape(P, 1)

    # Per-tap conv weights; both decode heads packed column-wise.
    w1 = params["bb_w1"].reshape(9, C_IN, C1)
    w2 = params["bb_w2"].reshape(9, C1, C2)
    wh = jnp.concatenate([params["trunk_seg_w"], params["aux_seg_w"]], axis=-1)
    bh = jnp.concatenate([params["trunk_seg_b"], params["aux_seg_b"]], axis=-1)

    logits_pad, trunk_sq, aux_sq = _fused_forward_pallas(
        xg, tgt_pad, mask, w1, params["bb_b1"], w2, params["bb_b2"],
        params["neck_w"], params["neck_b"], wh, bh, H=H, W=W)

    # Un-pad, split heads, back to NCHW.
    lg = logits_pad.reshape(N, Hp, Wp, 2 * N_CLS)[:, 1:H + 1, 1:W + 1, :]
    trunk_out = jnp.transpose(lg[..., :N_CLS], (0, 3, 1, 2))
    aux_out = jnp.transpose(lg[..., N_CLS:], (0, 3, 1, 2))

    denom = jnp.float32(N * H * W * N_CLS)
    trunk_loss = jnp.sum(trunk_sq) / denom
    aux_loss = jnp.sum(aux_sq) / denom
    return trunk_out, aux_out, trunk_loss, aux_loss


# ----------------------------------------------------------------------------
# Compose control flow (forward_train / forward_val / _parse_losses)
# ----------------------------------------------------------------------------
def init_params(key):
    ks = jax.random.split(key, 5)
    sc = 0.1
    return {
        "bb_w1": sc * jax.random.normal(ks[0], (3, 3, C_IN, C1), jnp.float32),
        "bb_b1": jnp.zeros((1, C1), jnp.float32),
        "bb_w2": sc * jax.random.normal(ks[1], (3, 3, C1, C2), jnp.float32),
        "bb_b2": jnp.zeros((1, C2), jnp.float32),
        "neck_w": sc * jax.random.normal(ks[2], (C2, C_NECK), jnp.float32),
        "neck_b": jnp.zeros((1, C_NECK), jnp.float32),
        "trunk_seg_w": sc * jax.random.normal(ks[3], (C_NECK, N_CLS), jnp.float32),
        "trunk_seg_b": jnp.zeros((1, N_CLS), jnp.float32),
        "aux_seg_w": sc * jax.random.normal(ks[4], (C_NECK, N_CLS), jnp.float32),
        "aux_seg_b": jnp.zeros((1, N_CLS), jnp.float32),
    }


def _parse_losses(losses):
    """Mirror of Compose._parse_losses."""
    log_vars = OrderedDict()
    for loss_name, loss_value in losses.items():
        log_vars[loss_name] = jnp.mean(loss_value)
    # TODO(synk): dist.all_reduce of log_vars is skipped (single-host synthetic run).
    return OrderedDict((k, float(v)) for k, v in log_vars.items())


def compose_forward(params, data_batch, train_mode, optimizer=None):
    """Equivalent of Compose.forward(data_batch, optimizer, train_mode)."""
    trunk_out, aux_out, trunk_loss, aux_loss = _forward_impl(
        params, data_batch["image"],
        data_batch["trunk_seg_target"], data_batch["aux_seg_target"])

    head_results = OrderedDict(
        trunk_seg={"out": trunk_out, "loss": trunk_loss},
        aux_seg={"out": aux_out, "loss": aux_loss},
    )

    losses = OrderedDict()
    head_outs = OrderedDict()
    for head_key, results in head_results.items():
        if (not train_mode) and ("trunk" not in head_key):
            continue  # forward_val skips auxiliary heads
        for key, value in results.items():
            if "out" in key:
                head_outs[head_key + "_" + key] = value
            if "loss" in key:
                losses[head_key + "_" + key] = value
                if "loss" not in losses:
                    losses.setdefault("loss", value)
                else:
                    losses["loss"] = losses["loss"] + value

    log_vars = _parse_losses(losses)
    outputs = dict(
        log_vars=log_vars,
        num_samples=int(data_batch["image"].shape[0]),
        **losses,
        **head_outs,
    )
    return outputs


# ----------------------------------------------------------------------------
# Pure-JAX (f32) reference of the same synthetic Compose forward
# ----------------------------------------------------------------------------
def _reference_forward(params, image, trunk_target, aux_target):
    x = jnp.transpose(image, (0, 2, 3, 1))

    def conv3x3(h, w, b):
        y = lax.conv_general_dilated(h, w, (1, 1), "SAME",
                                     dimension_numbers=("NHWC", "HWIO", "NHWC"))
        return jax.nn.relu(y + b.reshape(1, 1, 1, -1))

    f = conv3x3(x, params["bb_w1"], params["bb_b1"])
    f = conv3x3(f, params["bb_w2"], params["bb_b2"])
    feat = jax.nn.relu(jnp.einsum("nhwc,cd->nhwd", f, params["neck_w"])
                       + params["neck_b"].reshape(1, 1, 1, -1))
    out = {}
    for hk, tgt in (("trunk_seg", trunk_target), ("aux_seg", aux_target)):
        lg = (jnp.einsum("nhwc,cd->nhwd", feat, params[hk + "_w"])
              + params[hk + "_b"].reshape(1, 1, 1, -1))
        out[hk + "_out"] = jnp.transpose(lg, (0, 3, 1, 2))
        out[hk + "_loss"] = jnp.mean((lg - jnp.transpose(tgt, (0, 2, 3, 1))) ** 2)
    return out


# ----------------------------------------------------------------------------
if __name__ == "__main__":
    key = jax.random.PRNGKey(0)
    k_param, k_img, k_t1, k_t2 = jax.random.split(key, 4)

    B, H, W = 2, 16, 16
    params = init_params(k_param)

    data_batch = {
        "image": jax.random.normal(k_img, (B, C_IN, H, W), jnp.float32),
        "trunk_seg_target": jax.random.normal(k_t1, (B, N_CLS, H, W), jnp.float32),
        "aux_seg_target": jax.random.normal(k_t2, (B, N_CLS, H, W), jnp.float32),
    }

    # train-mode forward (all heads) and val-mode forward (trunk heads only)
    out_train = compose_forward(params, data_batch, train_mode=True)
    out_val = compose_forward(params, data_batch, train_mode=False)

    jax.block_until_ready(out_train["trunk_seg_out"])
    jax.block_until_ready(out_train["aux_seg_out"])
    jax.block_until_ready(out_val["trunk_seg_out"])

    # structural checks (Compose.forward_train / forward_val semantics)
    assert out_train["trunk_seg_out"].shape == (B, N_CLS, H, W)
    assert out_train["aux_seg_out"].shape == (B, N_CLS, H, W)
    assert "aux_seg_out" not in out_val and "aux_seg_loss" not in out_val
    assert set(out_train["log_vars"]) == {"loss", "trunk_seg_loss", "aux_seg_loss"}
    assert set(out_val["log_vars"]) == {"loss", "trunk_seg_loss"}

    # numerical check vs. pure-JAX f32 reference (kernel uses bf16 MXU operands)
    ref = _reference_forward(params, data_batch["image"],
                             data_batch["trunk_seg_target"],
                             data_batch["aux_seg_target"])
    assert jnp.allclose(out_train["trunk_seg_out"], ref["trunk_seg_out"],
                        rtol=5e-2, atol=5e-3)
    assert jnp.allclose(out_train["aux_seg_out"], ref["aux_seg_out"],
                        rtol=5e-2, atol=5e-3)
    assert jnp.allclose(out_train["trunk_seg_loss"], ref["trunk_seg_loss"],
                        rtol=2e-2, atol=1e-3)
    assert jnp.allclose(out_train["aux_seg_loss"], ref["aux_seg_loss"],
                        rtol=2e-2, atol=1e-3)

    print("KERNEL_OK")
</pallas_src>

<mosaic_0001>
module attributes {stable_mosaic.version = 11 : i64} {
  func.func @_fused_compose_kernel(%arg0: i32, %arg1: memref<1x372x4xf32, #tpu.memory_space<vmem>>, %arg2: memref<1x324x8xf32, #tpu.memory_space<vmem>>, %arg3: memref<324x1xf32, #tpu.memory_space<vmem>>, %arg4: memref<9x4x8xf32, #tpu.memory_space<vmem>>, %arg5: memref<1x8xf32, #tpu.memory_space<vmem>>, %arg6: memref<9x8x16xf32, #tpu.memory_space<vmem>>, %arg7: memref<1x16xf32, #tpu.memory_space<vmem>>, %arg8: memref<16x16xf32, #tpu.memory_space<vmem>>, %arg9: memref<1x16xf32, #tpu.memory_space<vmem>>, %arg10: memref<16x8xf32, #tpu.memory_space<vmem>>, %arg11: memref<1x8xf32, #tpu.memory_space<vmem>>, %arg12: memref<1x324x8xf32, #tpu.memory_space<vmem>>, %arg13: memref<1x1x1xf32, #tpu.memory_space<vmem>>, %arg14: memref<1x1x1xf32, #tpu.memory_space<vmem>>, %arg15: memref<372x8xf32, #tpu.memory_space<vmem>>) attributes {dimension_semantics = [#tpu.dimension_semantics<parallel>], iteration_bounds = array<i64: 2>, scalar_prefetch = 0 : i64, scratch_operands = 1 : i64, tpu.core_type = #tpu.core_type<tc>, window_params = [{transform_indices = @transform_0, window_bounds = array<i64: 1, 372, 4>}, {transform_indices = @transform_1, window_bounds = array<i64: 1, 324, 8>}, {pipeline_mode = #tpu.pipeline_mode<synchronous>, transform_indices = @transform_2, window_bounds = array<i64: 324, 1>}, {pipeline_mode = #tpu.pipeline_mode<synchronous>, transform_indices = @transform_3, window_bounds = array<i64: 9, 4, 8>}, {pipeline_mode = #tpu.pipeline_mode<synchronous>, transform_indices = @transform_4, window_bounds = array<i64: 1, 8>}, {pipeline_mode = #tpu.pipeline_mode<synchronous>, transform_indices = @transform_5, window_bounds = array<i64: 9, 8, 16>}, {pipeline_mode = #tpu.pipeline_mode<synchronous>, transform_indices = @transform_6, window_bounds = array<i64: 1, 16>}, {pipeline_mode = #tpu.pipeline_mode<synchronous>, transform_indices = @transform_7, window_bounds = array<i64: 16, 16>}, {pipeline_mode = #tpu.pipeline_mode<synchronous>, transform_indices = @transform_8, window_bounds = array<i64: 1, 16>}, {pipeline_mode = #tpu.pipeline_mode<synchronous>, transform_indices = @transform_9, window_bounds = array<i64: 16, 8>}, {pipeline_mode = #tpu.pipeline_mode<synchronous>, transform_indices = @transform_10, window_bounds = array<i64: 1, 8>}, {transform_indices = @transform_11, window_bounds = array<i64: 1, 324, 8>}, {transform_indices = @transform_12, window_bounds = array<i64: 1, 1, 1>}, {transform_indices = @transform_13, window_bounds = array<i64: 1, 1, 1>}]} {
    %c0 = arith.constant 0 : index
    %c0_0 = arith.constant 0 : index
    %0 = vector.load %arg3[%c0, %c0_0] : memref<324x1xf32, #tpu.memory_space<vmem>>, vector<324x1xf32>
    %cst = arith.constant 0.000000e+00 : f32
    %1 = vector.broadcast %cst : f32 to vector<324x8xf32>
    %c0_1 = arith.constant 0 : index
    %c5 = arith.constant 5 : index
    %c0_2 = arith.constant 0 : index
    %2 = vector.load %arg1[%c0_1, %c5, %c0_2] : memref<1x372x4xf32, #tpu.memory_space<vmem>>, vector<1x324x4xf32>
    %3 = vector.shape_cast %2 : vector<1x324x4xf32> to vector<324x4xf32>
    %4 = arith.truncf %3 : vector<324x4xf32> to vector<324x4xbf16>
    %c0_3 = arith.constant 0 : index
    %c0_4 = arith.constant 0 : index
    %c0_5 = arith.constant 0 : index
    %5 = vector.load %arg4[%c0_3, %c0_4, %c0_5] : memref<9x4x8xf32, #tpu.memory_space<vmem>>, vector<1x4x8xf32>
    %6 = vector.shape_cast %5 : vector<1x4x8xf32> to vector<4x8xf32>
    %7 = arith.truncf %6 : vector<4x8xf32> to vector<4x8xbf16>
    %cst_6 = arith.constant dense<0.000000e+00> : vector<324x8xf32>
    %8 = tpu.matmul %4, %7, %cst_6 {dimension_numbers = #tpu.dot_dimension_numbers<[1], [0], [0], [1], [0, 0, 1, 1], [], []>} : vector<324x4xbf16>, vector<4x8xbf16>, vector<324x8xf32> -> vector<324x8xf32>
    %9 = arith.addf %1, %8 : vector<324x8xf32>
    %c0_7 = arith.constant 0 : index
    %c6 = arith.constant 6 : index
    %c0_8 = arith.constant 0 : index
    %10 = vector.load %arg1[%c0_7, %c6, %c0_8] : memref<1x372x4xf32, #tpu.memory_space<vmem>>, vector<1x324x4xf32>
    %11 = vector.shape_cast %10 : vector<1x324x4xf32> to vector<324x4xf32>
    %12 = arith.truncf %11 : vector<324x4xf32> to vector<324x4xbf16>
    %c1 = arith.constant 1 : index
    %c0_9 = arith.constant 0 : index
    %c0_10 = arith.constant 0 : index
    %13 = vector.load %arg4[%c1, %c0_9, %c0_10] : memref<9x4x8xf32, #tpu.memory_space<vmem>>, vector<1x4x8xf32>
    %14 = vector.shape_cast %13 : vector<1x4x8xf32> to vector<4x8xf32>
    %15 = arith.truncf %14 : vector<4x8xf32> to vector<4x8xbf16>
    %cst_11 = arith.constant dense<0.000000e+00> : vector<324x8xf32>
    %16 = tpu.matmul %12, %15, %cst_11 {dimension_numbers = #tpu.dot_dimension_numbers<[1], [0], [0], [1], [0, 0, 1, 1], [], []>} : vector<324x4xbf16>, vector<4x8xbf16>, vector<324x8xf32> -> vector<324x8xf32>
    %17 = arith.addf %9, %16 : vector<324x8xf32>
    %c0_12 = arith.constant 0 : index
    %c7 = arith.constant 7 : index
    %c0_13 = arith.constant 0 : index
    %18 = vector.load %arg1[%c0_12, %c7, %c0_13] : memref<1x372x4xf32, #tpu.memory_space<vmem>>, vector<1x324x4xf32>
    %19 = vector.shape_cast %18 : vector<1x324x4xf32> to vector<324x4xf32>
    %20 = arith.truncf %19 : vector<324x4xf32> to vector<324x4xbf16>
    %c2 = arith.constant 2 : index
    %c0_14 = arith.constant 0 : index
    %c0_15 = arith.constant 0 : index
    %21 = vector.load %arg4[%c2, %c0_14, %c0_15] : memref<9x4x8xf32, #tpu.memory_space<vmem>>, vector<1x4x8xf32>
    %22 = vector.shape_cast %21 : vector<1x4x8xf32> to vector<4x8xf32>
    %23 = arith.truncf %22 : vector<4x8xf32> to vector<4x8xbf16>
    %cst_16 = arith.constant dense<0.000000e+00> : vector<324x8xf32>
    %24 = tpu.matmul %20, %23, %cst_16 {dimension_numbers = #tpu.dot_dimension_numbers<[1], [0], [0], [1], [0, 0, 1, 1], [], []>} : vector<324x4xbf16>, vector<4x8xbf16>, vector<324x8xf32> -> vector<324x8xf32>
    %25 = arith.addf %17, %24 : vector<324x8xf32>
    %c0_17 = arith.constant 0 : index
    %c23 = arith.constant 23 : index
    %c0_18 = arith.constant 0 : index
    %26 = vector.load %arg1[%c0_17, %c23, %c0_18] : memref<1x372x4xf32, #tpu.memory_space<vmem>>, vector<1x324x4xf32>
    %27 = vector.shape_cast %26 : vector<1x324x4xf32> to vector<324x4xf32>
    %28 = arith.truncf %27 : vector<324x4xf32> to vector<324x4xbf16>
    %c3 = arith.constant 3 : index
    %c0_19 = arith.constant 0 : index
    %c0_20 = arith.constant 0 : index
    %29 = vector.load %arg4[%c3, %c0_19, %c0_20] : memref<9x4x8xf32, #tpu.memory_space<vmem>>, vector<1x4x8xf32>
    %30 = vector.shape_cast %29 : vector<1x4x8xf32> to vector<4x8xf32>
    %31 = arith.truncf %30 : vector<4x8xf32> to vector<4x8xbf16>
    %cst_21 = arith.constant dense<0.000000e+00> : vector<324x8xf32>
    %32 = tpu.matmul %28, %31, %cst_21 {dimension_numbers = #tpu.dot_dimension_numbers<[1], [0], [0], [1], [0, 0, 1, 1], [], []>} : vector<324x4xbf16>, vector<4x8xbf16>, vector<324x8xf32> -> vector<324x8xf32>
    %33 = arith.addf %25, %32 : vector<324x8xf32>
    %c0_22 = arith.constant 0 : index
    %c24 = arith.constant 24 : index
    %c0_23 = arith.constant 0 : index
    %34 = vector.load %arg1[%c0_22, %c24, %c0_23] : memref<1x372x4xf32, #tpu.memory_space<vmem>>, vector<1x324x4xf32>
    %35 = vector.shape_cast %34 : vector<1x324x4xf32> to vector<324x4xf32>
    %36 = arith.truncf %35 : vector<324x4xf32> to vector<324x4xbf16>
    %c4 = arith.constant 4 : index
    %c0_24 = arith.constant 0 : index
    %c0_25 = arith.constant 0 : index
    %37 = vector.load %arg4[%c4, %c0_24, %c0_25] : memref<9x4x8xf32, #tpu.memory_space<vmem>>, vector<1x4x8xf32>
    %38 = vector.shape_cast %37 : vector<1x4x8xf32> to vector<4x8xf32>
    %39 = arith.truncf %38 : vector<4x8xf32> to vector<4x8xbf16>
    %cst_26 = arith.constant dense<0.000000e+00> : vector<324x8xf32>
    %40 = tpu.matmul %36, %39, %cst_26 {dimension_numbers = #tpu.dot_dimension_numbers<[1], [0], [0], [1], [0, 0, 1, 1], [], []>} : vector<324x4xbf16>, vector<4x8xbf16>, vector<324x8xf32> -> vector<324x8xf32>
    %41 = arith.addf %33, %40 : vector<324x8xf32>
    %c0_27 = arith.constant 0 : index
    %c25 = arith.constant 25 : index
    %c0_28 = arith.constant 0 : index
    %42 = vector.load %arg1[%c0_27, %c25, %c0_28] : memref<1x372x4xf32, #tpu.memory_space<vmem>>, vector<1x324x4xf32>
    %43 = vector.shape_cast %42 : vector<1x324x4xf32> to vector<324x4xf32>
    %44 = arith.truncf %43 : vector<324x4xf32> to vector<324x4xbf16>
    %c5_29 = arith.constant 5 : index
    %c0_30 = arith.constant 0 : index
    %c0_31 = arith.constant 0 : index
    %45 = vector.load %arg4[%c5_29, %c0_30, %c0_31] : memref<9x4x8xf32, #tpu.memory_space<vmem>>, vector<1x4x8xf32>
    %46 = vector.shape_cast %45 : vector<1x4x8xf32> to vector<4x8xf32>
    %47 = arith.truncf %46 : vector<4x8xf32> to vector<4x8xbf16>
    %cst_32 = arith.constant dense<0.000000e+00> : vector<324x8xf32>
    %48 = tpu.matmul %44, %47, %cst_32 {dimension_numbers = #tpu.dot_dimension_numbers<[1], [0], [0], [1], [0, 0, 1, 1], [], []>} : vector<324x4xbf16>, vector<4x8xbf16>, vector<324x8xf32> -> vector<324x8xf32>
    %49 = arith.addf %41, %48 : vector<324x8xf32>
    %c0_33 = arith.constant 0 : index
    %c41 = arith.constant 41 : index
    %c0_34 = arith.constant 0 : index
    %50 = vector.load %arg1[%c0_33, %c41, %c0_34] : memref<1x372x4xf32, #tpu.memory_space<vmem>>, vector<1x324x4xf32>
    %51 = vector.shape_cast %50 : vector<1x324x4xf32> to vector<324x4xf32>
    %52 = arith.truncf %51 : vector<324x4xf32> to vector<324x4xbf16>
    %c6_35 = arith.constant 6 : index
    %c0_36 = arith.constant 0 : index
    %c0_37 = arith.constant 0 : index
    %53 = vector.load %arg4[%c6_35, %c0_36, %c0_37] : memref<9x4x8xf32, #tpu.memory_space<vmem>>, vector<1x4x8xf32>
    %54 = vector.shape_cast %53 : vector<1x4x8xf32> to vector<4x8xf32>
    %55 = arith.truncf %54 : vector<4x8xf32> to vector<4x8xbf16>
    %cst_38 = arith.constant dense<0.000000e+00> : vector<324x8xf32>
    %56 = tpu.matmul %52, %55, %cst_38 {dimension_numbers = #tpu.dot_dimension_numbers<[1], [0], [0], [1], [0, 0, 1, 1], [], []>} : vector<324x4xbf16>, vector<4x8xbf16>, vector<324x8xf32> -> vector<324x8xf32>
    %57 = arith.addf %49, %56 : vector<324x8xf32>
    %c0_39 = arith.constant 0 : index
    %c42 = arith.constant 42 : index
    %c0_40 = arith.constant 0 : index
    %58 = vector.load %arg1[%c0_39, %c42, %c0_40] : memref<1x372x4xf32, #tpu.memory_space<vmem>>, vector<1x324x4xf32>
    %59 = vector.shape_cast %58 : vector<1x324x4xf32> to vector<324x4xf32>
    %60 = arith.truncf %59 : vector<324x4xf32> to vector<324x4xbf16>
    %c7_41 = arith.constant 7 : index
    %c0_42 = arith.constant 0 : index
    %c0_43 = arith.constant 0 : index
    %61 = vector.load %arg4[%c7_41, %c0_42, %c0_43] : memref<9x4x8xf32, #tpu.memory_space<vmem>>, vector<1x4x8xf32>
    %62 = vector.shape_cast %61 : vector<1x4x8xf32> to vector<4x8xf32>
    %63 = arith.truncf %62 : vector<4x8xf32> to vector<4x8xbf16>
    %cst_44 = arith.constant dense<0.000000e+00> : vector<324x8xf32>
    %64 = tpu.matmul %60, %63, %cst_44 {dimension_numbers = #tpu.dot_dimension_numbers<[1], [0], [0], [1], [0, 0, 1, 1], [], []>} : vector<324x4xbf16>, vector<4x8xbf16>, vector<324x8xf32> -> vector<324x8xf32>
    %65 = arith.addf %57, %64 : vector<324x8xf32>
    %c0_45 = arith.constant 0 : index
    %c43 = arith.constant 43 : index
    %c0_46 = arith.constant 0 : index
    %66 = vector.load %arg1[%c0_45, %c43, %c0_46] : memref<1x372x4xf32, #tpu.memory_space<vmem>>, vector<1x324x4xf32>
    %67 = vector.shape_cast %66 : vector<1x324x4xf32> to vector<324x4xf32>
    %68 = arith.truncf %67 : vector<324x4xf32> to vector<324x4xbf16>
    %c8 = arith.constant 8 : index
    %c0_47 = arith.constant 0 : index
    %c0_48 = arith.constant 0 : index
    %69 = vector.load %arg4[%c8, %c0_47, %c0_48] : memref<9x4x8xf32, #tpu.memory_space<vmem>>, vector<1x4x8xf32>
    %70 = vector.shape_cast %69 : vector<1x4x8xf32> to vector<4x8xf32>
    %71 = arith.truncf %70 : vector<4x8xf32> to vector<4x8xbf16>
    %cst_49 = arith.constant dense<0.000000e+00> : vector<324x8xf32>
    %72 = tpu.matmul %68, %71, %cst_49 {dimension_numbers = #tpu.dot_dimension_numbers<[1], [0], [0], [1], [0, 0, 1, 1], [], []>} : vector<324x4xbf16>, vector<4x8xbf16>, vector<324x8xf32> -> vector<324x8xf32>
    %73 = arith.addf %65, %72 : vector<324x8xf32>
    %c0_50 = arith.constant 0 : index
    %c0_51 = arith.constant 0 : index
    %74 = vector.load %arg5[%c0_50, %c0_51] : memref<1x8xf32, #tpu.memory_space<vmem>>, vector<1x8xf32>
    %75 = vector.broadcast %74 : vector<1x8xf32> to vector<324x8xf32>
    %76 = arith.addf %73, %75 : vector<324x8xf32>
    %cst_52 = arith.constant 0.000000e+00 : f32
    %77 = vector.broadcast %cst_52 : f32 to vector<324x8xf32>
    %78 = arith.maximumf %76, %77 : vector<324x8xf32>
    %79 = vector.broadcast %0 : vector<324x1xf32> to vector<324x8xf32>
    %80 = arith.mulf %78, %79 : vector<324x8xf32>
    %cst_53 = arith.constant 0.000000e+00 : f32
    %81 = vector.broadcast %cst_53 : f32 to vector<24x8xf32>
    %c0_54 = arith.constant 0 : index
    %c0_55 = arith.constant 0 : index
    %82 = vector.load %arg15[%c0_54, %c0_55] : memref<372x8xf32, #tpu.memory_space<vmem>>, vector<24x8xf32>
    tpu.vector_store %arg15[%c0_54, %c0_55], %81 {strides = array<i32>} : memref<372x8xf32, #tpu.memory_space<vmem>>, vector<24x8xf32>,
    %cst_56 = arith.constant 0.000000e+00 : f32
    %83 = vector.broadcast %cst_56 : f32 to vector<24x8xf32>
    %c348 = arith.constant 348 : index
    %c0_57 = arith.constant 0 : index
    %84 = vector.load %arg15[%c348, %c0_57] : memref<372x8xf32, #tpu.memory_space<vmem>>, vector<24x8xf32>
    tpu.vector_store %arg15[%c348, %c0_57], %83 {strides = array<i32>} : memref<372x8xf32, #tpu.memory_space<vmem>>, vector<24x8xf32>,
    %c24_58 = arith.constant 24 : index
    %c0_59 = arith.constant 0 : index
    %85 = vector.load %arg15[%c24_58, %c0_59] : memref<372x8xf32, #tpu.memory_space<vmem>>, vector<324x8xf32>
    tpu.vector_store %arg15[%c24_58, %c0_59], %80 {strides = array<i32>} : memref<372x8xf32, #tpu.memory_space<vmem>>, vector<324x8xf32>,
    %cst_60 = arith.constant 0.000000e+00 : f32
    %86 = vector.broadcast %cst_60 : f32 to vector<324x16xf32>
    %c5_61 = arith.constant 5 : index
    %c0_62 = arith.constant 0 : index
    %87 = vector.load %arg15[%c5_61, %c0_62] : memref<372x8xf32, #tpu.memory_space<vmem>>, vector<324x8xf32>
    %88 = arith.truncf %87 : vector<324x8xf32> to vector<324x8xbf16>
    %c0_63 = arith.constant 0 : index
    %c0_64 = arith.constant 0 : index
    %c0_65 = arith.constant 0 : index
    %89 = vector.load %arg6[%c0_63, %c0_64, %c0_65] : memref<9x8x16xf32, #tpu.memory_space<vmem>>, vector<1x8x16xf32>
    %90 = vector.shape_cast %89 : vector<1x8x16xf32> to vector<8x16xf32>
    %91 = arith.truncf %90 : vector<8x16xf32> to vector<8x16xbf16>
    %cst_66 = arith.constant dense<0.000000e+00> : vector<324x16xf32>
    %92 = tpu.matmul %88, %91, %cst_66 {dimension_numbers = #tpu.dot_dimension_numbers<[1], [0], [0], [1], [0, 0, 1, 1], [], []>} : vector<324x8xbf16>, vector<8x16xbf16>, vector<324x16xf32> -> vector<324x16xf32>
    %93 = arith.addf %86, %92 : vector<324x16xf32>
    %c6_67 = arith.constant 6 : index
    %c0_68 = arith.constant 0 : index
    %94 = vector.load %arg15[%c6_67, %c0_68] : memref<372x8xf32, #tpu.memory_space<vmem>>, vector<324x8xf32>
    %95 = arith.truncf %94 : vector<324x8xf32> to vector<324x8xbf16>
    %c1_69 = arith.constant 1 : index
    %c0_70 = arith.constant 0 : index
    %c0_71 = arith.constant 0 : index
    %96 = vector.load %arg6[%c1_69, %c0_70, %c0_71] : memref<9x8x16xf32, #tpu.memory_space<vmem>>, vector<1x8x16xf32>
    %97 = vector.shape_cast %96 : vector<1x8x16xf32> to vector<8x16xf32>
    %98 = arith.truncf %97 : vector<8x16xf32> to vector<8x16xbf16>
    %cst_72 = arith.constant dense<0.000000e+00> : vector<324x16xf32>
    %99 = tpu.matmul %95, %98, %cst_72 {dimension_numbers = #tpu.dot_dimension_numbers<[1], [0], [0], [1], [0, 0, 1, 1], [], []>} : vector<324x8xbf16>, vector<8x16xbf16>, vector<324x16xf32> -> vector<324x16xf32>
    %100 = arith.addf %93, %99 : vector<324x16xf32>
    %c7_73 = arith.constant 7 : index
    %c0_74 = arith.constant 0 : index
    %101 = vector.load %arg15[%c7_73, %c0_74] : memref<372x8xf32, #tpu.memory_space<vmem>>, vector<324x8xf32>
    %102 = arith.truncf %101 : vector<324x8xf32> to vector<324x8xbf16>
    %c2_75 = arith.constant 2 : index
    %c0_76 = arith.constant 0 : index
    %c0_77 = arith.constant 0 : index
    %103 = vector.load %arg6[%c2_75, %c0_76, %c0_77] : memref<9x8x16xf32, #tpu.memory_space<vmem>>, vector<1x8x16xf32>
    %104 = vector.shape_cast %103 : vector<1x8x16xf32> to vector<8x16xf32>
    %105 = arith.truncf %104 : vector<8x16xf32> to vector<8x16xbf16>
    %cst_78 = arith.constant dense<0.000000e+00> : vector<324x16xf32>
    %106 = tpu.matmul %102, %105, %cst_78 {dimension_numbers = #tpu.dot_dimension_numbers<[1], [0], [0], [1], [0, 0, 1, 1], [], []>} : vector<324x8xbf16>, vector<8x16xbf16>, vector<324x16xf32> -> vector<324x16xf32>
    %107 = arith.addf %100, %106 : vector<324x16xf32>
    %c23_79 = arith.constant 23 : index
    %c0_80 = arith.constant 0 : index
    %108 = vector.load %arg15[%c23_79, %c0_80] : memref<372x8xf32, #tpu.memory_space<vmem>>, vector<324x8xf32>
    %109 = arith.truncf %108 : vector<324x8xf32> to vector<324x8xbf16>
    %c3_81 = arith.constant 3 : index
    %c0_82 = arith.constant 0 : index
    %c0_83 = arith.constant 0 : index
    %110 = vector.load %arg6[%c3_81, %c0_82, %c0_83] : memref<9x8x16xf32, #tpu.memory_space<vmem>>, vector<1x8x16xf32>
    %111 = vector.shape_cast %110 : vector<1x8x16xf32> to vector<8x16xf32>
    %112 = arith.truncf %111 : vector<8x16xf32> to vector<8x16xbf16>
    %cst_84 = arith.constant dense<0.000000e+00> : vector<324x16xf32>
    %113 = tpu.matmul %109, %112, %cst_84 {dimension_numbers = #tpu.dot_dimension_numbers<[1], [0], [0], [1], [0, 0, 1, 1], [], []>} : vector<324x8xbf16>, vector<8x16xbf16>, vector<324x16xf32> -> vector<324x16xf32>
    %114 = arith.addf %107, %113 : vector<324x16xf32>
    %c24_85 = arith.constant 24 : index
    %c0_86 = arith.constant 0 : index
    %115 = vector.load %arg15[%c24_85, %c0_86] : memref<372x8xf32, #tpu.memory_space<vmem>>, vector<324x8xf32>
    %116 = arith.truncf %115 : vector<324x8xf32> to vector<324x8xbf16>
    %c4_87 = arith.constant 4 : index
    %c0_88 = arith.constant 0 : index
    %c0_89 = arith.constant 0 : index
    %117 = vector.load %arg6[%c4_87, %c0_88, %c0_89] : memref<9x8x16xf32, #tpu.memory_space<vmem>>, vector<1x8x16xf32>
    %118 = vector.shape_cast %117 : vector<1x8x16xf32> to vector<8x16xf32>
    %119 = arith.truncf %118 : vector<8x16xf32> to vector<8x16xbf16>
    %cst_90 = arith.constant dense<0.000000e+00> : vector<324x16xf32>
    %120 = tpu.matmul %116, %119, %cst_90 {dimension_numbers = #tpu.dot_dimension_numbers<[1], [0], [0], [1], [0, 0, 1, 1], [], []>} : vector<324x8xbf16>, vector<8x16xbf16>, vector<324x16xf32> -> vector<324x16xf32>
    %121 = arith.addf %114, %120 : vector<324x16xf32>
    %c25_91 = arith.constant 25 : index
    %c0_92 = arith.constant 0 : index
    %122 = vector.load %arg15[%c25_91, %c0_92] : memref<372x8xf32, #tpu.memory_space<vmem>>, vector<324x8xf32>
    %123 = arith.truncf %122 : vector<324x8xf32> to vector<324x8xbf16>
    %c5_93 = arith.constant 5 : index
    %c0_94 = arith.constant 0 : index
    %c0_95 = arith.constant 0 : index
    %124 = vector.load %arg6[%c5_93, %c0_94, %c0_95] : memref<9x8x16xf32, #tpu.memory_space<vmem>>, vector<1x8x16xf32>
    %125 = vector.shape_cast %124 : vector<1x8x16xf32> to vector<8x16xf32>
    %126 = arith.truncf %125 : vector<8x16xf32> to vector<8x16xbf16>
    %cst_96 = arith.constant dense<0.000000e+00> : vector<324x16xf32>
    %127 = tpu.matmul %123, %126, %cst_96 {dimension_numbers = #tpu.dot_dimension_numbers<[1], [0], [0], [1], [0, 0, 1, 1], [], []>} : vector<324x8xbf16>, vector<8x16xbf16>, vector<324x16xf32> -> vector<324x16xf32>
    %128 = arith.addf %121, %127 : vector<324x16xf32>
    %c41_97 = arith.constant 41 : index
    %c0_98 = arith.constant 0 : index
    %129 = vector.load %arg15[%c41_97, %c0_98] : memref<372x8xf32, #tpu.memory_space<vmem>>, vector<324x8xf32>
    %130 = arith.truncf %129 : vector<324x8xf32> to vector<324x8xbf16>
    %c6_99 = arith.constant 6 : index
    %c0_100 = arith.constant 0 : index
    %c0_101 = arith.constant 0 : index
    %131 = vector.load %arg6[%c6_99, %c0_100, %c0_101] : memref<9x8x16xf32, #tpu.memory_space<vmem>>, vector<1x8x16xf32>
    %132 = vector.shape_cast %131 : vector<1x8x16xf32> to vector<8x16xf32>
    %133 = arith.truncf %132 : vector<8x16xf32> to vector<8x16xbf16>
    %cst_102 = arith.constant dense<0.000000e+00> : vector<324x16xf32>
    %134 = tpu.matmul %130, %133, %cst_102 {dimension_numbers = #tpu.dot_dimension_numbers<[1], [0], [0], [1], [0, 0, 1, 1], [], []>} : vector<324x8xbf16>, vector<8x16xbf16>, vector<324x16xf32> -> vector<324x16xf32>
    %135 = arith.addf %128, %134 : vector<324x16xf32>
    %c42_103 = arith.constant 42 : index
    %c0_104 = arith.constant 0 : index
    %136 = vector.load %arg15[%c42_103, %c0_104] : memref<372x8xf32, #tpu.memory_space<vmem>>, vector<324x8xf32>
    %137 = arith.truncf %136 : vector<324x8xf32> to vector<324x8xbf16>
    %c7_105 = arith.constant 7 : index
    %c0_106 = arith.constant 0 : index
    %c0_107 = arith.constant 0 : index
    %138 = vector.load %arg6[%c7_105, %c0_106, %c0_107] : memref<9x8x16xf32, #tpu.memory_space<vmem>>, vector<1x8x16xf32>
    %139 = vector.shape_cast %138 : vector<1x8x16xf32> to vector<8x16xf32>
    %140 = arith.truncf %139 : vector<8x16xf32> to vector<8x16xbf16>
    %cst_108 = arith.constant dense<0.000000e+00> : vector<324x16xf32>
    %141 = tpu.matmul %137, %140, %cst_108 {dimension_numbers = #tpu.dot_dimension_numbers<[1], [0], [0], [1], [0, 0, 1, 1], [], []>} : vector<324x8xbf16>, vector<8x16xbf16>, vector<324x16xf32> -> vector<324x16xf32>
    %142 = arith.addf %135, %141 : vector<324x16xf32>
    %c43_109 = arith.constant 43 : index
    %c0_110 = arith.constant 0 : index
    %143 = vector.load %arg15[%c43_109, %c0_110] : memref<372x8xf32, #tpu.memory_space<vmem>>, vector<324x8xf32>
    %144 = arith.truncf %143 : vector<324x8xf32> to vector<324x8xbf16>
    %c8_111 = arith.constant 8 : index
    %c0_112 = arith.constant 0 : index
    %c0_113 = arith.constant 0 : index
    %145 = vector.load %arg6[%c8_111, %c0_112, %c0_113] : memref<9x8x16xf32, #tpu.memory_space<vmem>>, vector<1x8x16xf32>
    %146 = vector.shape_cast %145 : vector<1x8x16xf32> to vector<8x16xf32>
    %147 = arith.truncf %146 : vector<8x16xf32> to vector<8x16xbf16>
    %cst_114 = arith.constant dense<0.000000e+00> : vector<324x16xf32>
    %148 = tpu.matmul %144, %147, %cst_114 {dimension_numbers = #tpu.dot_dimension_numbers<[1], [0], [0], [1], [0, 0, 1, 1], [], []>} : vector<324x8xbf16>, vector<8x16xbf16>, vector<324x16xf32> -> vector<324x16xf32>
    %149 = arith.addf %142, %148 : vector<324x16xf32>
    %c0_115 = arith.constant 0 : index
    %c0_116 = arith.constant 0 : index
    %150 = vector.load %arg7[%c0_115, %c0_116] : memref<1x16xf32, #tpu.memory_space<vmem>>, vector<1x16xf32>
    %151 = vector.broadcast %150 : vector<1x16xf32> to vector<324x16xf32>
    %152 = arith.addf %149, %151 : vector<324x16xf32>
    %cst_117 = arith.constant 0.000000e+00 : f32
    %153 = vector.broadcast %cst_117 : f32 to vector<324x16xf32>
    %154 = arith.maximumf %152, %153 : vector<324x16xf32>
    %155 = arith.truncf %154 : vector<324x16xf32> to vector<324x16xbf16>
    %c0_118 = arith.constant 0 : index
    %c0_119 = arith.constant 0 : index
    %156 = vector.load %arg8[%c0_118, %c0_119] : memref<16x16xf32, #tpu.memory_space<vmem>>, vector<16x16xf32>
    %157 = arith.truncf %156 : vector<16x16xf32> to vector<16x16xbf16>
    %cst_120 = arith.constant dense<0.000000e+00> : vector<324x16xf32>
    %158 = tpu.matmul %155, %157, %cst_120 {dimension_numbers = #tpu.dot_dimension_numbers<[1], [0], [0], [1], [0, 0, 1, 1], [], []>} : vector<324x16xbf16>, vector<16x16xbf16>, vector<324x16xf32> -> vector<324x16xf32>
    %c0_121 = arith.constant 0 : index
    %c0_122 = arith.constant 0 : index
    %159 = vector.load %arg9[%c0_121, %c0_122] : memref<1x16xf32, #tpu.memory_space<vmem>>, vector<1x16xf32>
    %160 = vector.broadcast %159 : vector<1x16xf32> to vector<324x16xf32>
    %161 = arith.addf %158, %160 : vector<324x16xf32>
    %cst_123 = arith.constant 0.000000e+00 : f32
    %162 = vector.broadcast %cst_123 : f32 to vector<324x16xf32>
    %163 = arith.maximumf %161, %162 : vector<324x16xf32>
    %164 = arith.truncf %163 : vector<324x16xf32> to vector<324x16xbf16>
    %c0_124 = arith.constant 0 : index
    %c0_125 = arith.constant 0 : index
    %165 = vector.load %arg10[%c0_124, %c0_125] : memref<16x8xf32, #tpu.memory_space<vmem>>, vector<16x8xf32>
    %166 = arith.truncf %165 : vector<16x8xf32> to vector<16x8xbf16>
    %cst_126 = arith.constant dense<0.000000e+00> : vector<324x8xf32>
    %167 = tpu.matmul %164, %166, %cst_126 {dimension_numbers = #tpu.dot_dimension_numbers<[1], [0], [0], [1], [0, 0, 1, 1], [], []>} : vector<324x16xbf16>, vector<16x8xbf16>, vector<324x8xf32> -> vector<324x8xf32>
    %c0_127 = arith.constant 0 : index
    %c0_128 = arith.constant 0 : index
    %168 = vector.load %arg11[%c0_127, %c0_128] : memref<1x8xf32, #tpu.memory_space<vmem>>, vector<1x8xf32>
    %169 = vector.broadcast %168 : vector<1x8xf32> to vector<324x8xf32>
    %170 = arith.addf %167, %169 : vector<324x8xf32>
    %c0_129 = arith.constant 0 : index
    %c0_130 = arith.constant 0 : index
    %c0_131 = arith.constant 0 : index
    %171 = vector.load %arg12[%c0_129, %c0_130, %c0_131] : memref<1x324x8xf32, #tpu.memory_space<vmem>>, vector<1x324x8xf32>
    %172 = vector.shape_cast %171 : vector<1x324x8xf32> to vector<324x8xf32>
    %173 = vector.shape_cast %170 : vector<324x8xf32> to vector<1x324x8xf32>
    tpu.vector_store %arg12[%c0_129, %c0_130, %c0_131], %173 {strides = array<i32>} : memref<1x324x8xf32, #tpu.memory_space<vmem>>, vector<1x324x8xf32>,
    %c0_132 = arith.constant 0 : index
    %c0_133 = arith.constant 0 : index
    %c0_134 = arith.constant 0 : index
    %174 = vector.load %arg2[%c0_132, %c0_133, %c0_134] : memref<1x324x8xf32, #tpu.memory_space<vmem>>, vector<1x324x8xf32>
    %175 = vector.shape_cast %174 : vector<1x324x8xf32> to vector<324x8xf32>
    %176 = arith.subf %170, %175 : vector<324x8xf32>
    %177 = arith.mulf %176, %176 : vector<324x8xf32>
    %178 = vector.broadcast %0 : vector<324x1xf32> to vector<324x8xf32>
    %179 = arith.mulf %177, %178 : vector<324x8xf32>
    %180 = tpu.iota {dimensions = array<i32: 1>} : vector<1x8xi32>
    %c4_i32 = arith.constant 4 : i32
    %181 = vector.broadcast %c4_i32 : i32 to vector<1x8xi32>
    %182 = arith.cmpi slt, %180, %181 : vector<1x8xi32>
    %183 = arith.extui %182 : vector<1x8xi1> to vector<1x8xi32>
    %184 = arith.sitofp %183 : vector<1x8xi32> to vector<1x8xf32>
    %185 = vector.broadcast %184 : vector<1x8xf32> to vector<324x8xf32>
    %186 = arith.mulf %179, %185 : vector<324x8xf32>
    %187 = vector.shape_cast %186 : vector<324x8xf32> to vector<1x324x8xf32>
    %cst_135 = arith.constant dense<0.000000e+00> : vector<1xf32>
    %188 = vector.multi_reduction <add>, %187, %cst_135 [1, 2] : vector<1x324x8xf32> to vector<1xf32>
    %189 = vector.shape_cast %188 : vector<1xf32> to vector<1x1x1xf32>
    %190 = vector.extract %189[0, 0, 0] : f32 from vector<1x1x1xf32>
    %191 = vector.broadcast %190 : f32 to vector<1x1xf32>
    %c0_136 = arith.constant 0 : index
    %c0_137 = arith.constant 0 : index
    %c0_138 = arith.constant 0 : index
    %192 = vector.load %arg13[%c0_136, %c0_137, %c0_138] : memref<1x1x1xf32, #tpu.memory_space<vmem>>, vector<1x1x1xf32>
    %193 = vector.shape_cast %192 : vector<1x1x1xf32> to vector<1x1xf32>
    %194 = vector.shape_cast %191 : vector<1x1xf32> to vector<1x1x1xf32>
    tpu.vector_store %arg13[%c0_136, %c0_137, %c0_138], %194 {strides = array<i32>} : memref<1x1x1xf32, #tpu.memory_space<vmem>>, vector<1x1x1xf32>,
    %cst_139 = arith.constant 1.000000e+00 : f32
    %195 = vector.broadcast %cst_139 : f32 to vector<1x8xf32>
    %196 = arith.subf %195, %184 : vector<1x8xf32>
    %197 = vector.broadcast %196 : vector<1x8xf32> to vector<324x8xf32>
    %198 = arith.mulf %179, %197 : vector<324x8xf32>
    %199 = vector.shape_cast %198 : vector<324x8xf32> to vector<1x324x8xf32>
    %cst_140 = arith.constant dense<0.000000e+00> : vector<1xf32>
    %200 = vector.multi_reduction <add>, %199, %cst_140 [1, 2] : vector<1x324x8xf32> to vector<1xf32>
    %201 = vector.shape_cast %200 : vector<1xf32> to vector<1x1x1xf32>
    %202 = vector.extract %201[0, 0, 0] : f32 from vector<1x1x1xf32>
    %203 = vector.broadcast %202 : f32 to vector<1x1xf32>
    %c0_141 = arith.constant 0 : index
    %c0_142 = arith.constant 0 : index
    %c0_143 = arith.constant 0 : index
    %204 = vector.load %arg14[%c0_141, %c0_142, %c0_143] : memref<1x1x1xf32, #tpu.memory_space<vmem>>, vector<1x1x1xf32>
    %205 = vector.shape_cast %204 : vector<1x1x1xf32> to vector<1x1xf32>
    %206 = vector.shape_cast %203 : vector<1x1xf32> to vector<1x1x1xf32>
    tpu.vector_store %arg14[%c0_141, %c0_142, %c0_143], %206 {strides = array<i32>} : memref<1x1x1xf32, #tpu.memory_space<vmem>>, vector<1x1x1xf32>,
    return
  }
  func.func @transform_0(%arg0: i32) -> (i32, i32, i32) {
    %c0_i32 = arith.constant 0 : i32
    %c0_i32_0 = arith.constant 0 : i32
    %c0_i32_1 = arith.constant 0 : i32
    return %arg0, %c0_i32, %c0_i32_0 : i32, i32, i32
  }
  func.func @transform_1(%arg0: i32) -> (i32, i32, i32) {
    %c0_i32 = arith.constant 0 : i32
    %c0_i32_0 = arith.constant 0 : i32
    %c0_i32_1 = arith.constant 0 : i32
    return %arg0, %c0_i32, %c0_i32_0 : i32, i32, i32
  }
  func.func @transform_2(%arg0: i32) -> (i32, i32) {
    %c0_i32 = arith.constant 0 : i32
    %c0_i32_0 = arith.constant 0 : i32
    %c0_i32_1 = arith.constant 0 : i32
    return %c0_i32, %c0_i32_0 : i32, i32
  }
  func.func @transform_3(%arg0: i32) -> (i32, i32, i32) {
    %c0_i32 = arith.constant 0 : i32
    %c0_i32_0 = arith.constant 0 : i32
    %c0_i32_1 = arith.constant 0 : i32
    %c0_i32_2 = arith.constant 0 : i32
    return %c0_i32, %c0_i32_0, %c0_i32_1 : i32, i32, i32
  }
  func.func @transform_4(%arg0: i32) -> (i32, i32) {
    %c0_i32 = arith.constant 0 : i32
    %c0_i32_0 = arith.constant 0 : i32
    %c0_i32_1 = arith.constant 0 : i32
    return %c0_i32, %c0_i32_0 : i32, i32
  }
  func.func @transform_5(%arg0: i32) -> (i32, i32, i32) {
    %c0_i32 = arith.constant 0 : i32
    %c0_i32_0 = arith.constant 0 : i32
    %c0_i32_1 = arith.constant 0 : i32
    %c0_i32_2 = arith.constant 0 : i32
    return %c0_i32, %c0_i32_0, %c0_i32_1 : i32, i32, i32
  }
  func.func @transform_6(%arg0: i32) -> (i32, i32) {
    %c0_i32 = arith.constant 0 : i32
    %c0_i32_0 = arith.constant 0 : i32
    %c0_i32_1 = arith.constant 0 : i32
    return %c0_i32, %c0_i32_0 : i32, i32
  }
  func.func @transform_7(%arg0: i32) -> (i32, i32) {
    %c0_i32 = arith.constant 0 : i32
    %c0_i32_0 = arith.constant 0 : i32
    %c0_i32_1 = arith.constant 0 : i32
    return %c0_i32, %c0_i32_0 : i32, i32
  }
  func.func @transform_8(%arg0: i32) -> (i32, i32) {
    %c0_i32 = arith.constant 0 : i32
    %c0_i32_0 = arith.constant 0 : i32
    %c0_i32_1 = arith.constant 0 : i32
    return %c0_i32, %c0_i32_0 : i32, i32
  }
  func.func @transform_9(%arg0: i32) -> (i32, i32) {
    %c0_i32 = arith.constant 0 : i32
    %c0_i32_0 = arith.constant 0 : i32
    %c0_i32_1 = arith.constant 0 : i32
    return %c0_i32, %c0_i32_0 : i32, i32
  }
  func.func @transform_10(%arg0: i32) -> (i32, i32) {
    %c0_i32 = arith.constant 0 : i32
    %c0_i32_0 = arith.constant 0 : i32
    %c0_i32_1 = arith.constant 0 : i32
    return %c0_i32, %c0_i32_0 : i32, i32
  }
  func.func @transform_11(%arg0: i32) -> (i32, i32, i32) {
    %c0_i32 = arith.constant 0 : i32
    %c0_i32_0 = arith.constant 0 : i32
    %c0_i32_1 = arith.constant 0 : i32
    return %arg0, %c0_i32, %c0_i32_0 : i32, i32, i32
  }
  func.func @transform_12(%arg0: i32) -> (i32, i32, i32) {
    %c0_i32 = arith.constant 0 : i32
    %c0_i32_0 = arith.constant 0 : i32
    %c0_i32_1 = arith.constant 0 : i32
    return %arg0, %c0_i32, %c0_i32_0 : i32, i32, i32
  }
  func.func @transform_13(%arg0: i32) -> (i32, i32, i32) {
    %c0_i32 = arith.constant 0 : i32
    %c0_i32_0 = arith.constant 0 : i32
    %c0_i32_1 = arith.constant 0 : i32
    return %arg0, %c0_i32, %c0_i32_0 : i32, i32, i32
  }
}

</mosaic_0001>

<bundles_post_ra>
// kernel: _forward_impl.1
= control target key start
LH: loop header
LB: loop body
LE: loop exit
PB: predicated region body
PF: predicated region fallthrough
CT: control target
= control target key end

     0   :  { %s7552_s25 = smov 0   ;;  %s10210_s0 = inlined_call_operand.vmem [shape: f32[2,372,4], index: 0, kind: input, shape index: {}]   ;;  %s10211_s1 = inlined_call_operand.vmem [shape: f32[2,324,8], index: 1, kind: input, shape index: {}]   ;;  %s10212_s2 = inlined_call_operand.vmem [shape: f32[324,1], index: 2, kind: input, shape index: {}]   ;;  %s10213_s3 = inlined_call_operand.vmem [shape: f32[9,4,8], index: 3, kind: input, shape index: {}]   ;;  %s10214_s4 = inlined_call_operand.vmem [shape: f32[1,8], index: 4, kind: input, shape index: {}]   ;;  %s10215_s5 = inlined_call_operand.vmem [shape: f32[9,8,16], index: 5, kind: input, shape index: {}]   ;;  %s10216_s6 = inlined_call_operand.vmem [shape: f32[1,16], index: 6, kind: input, shape index: {}]   ;;  %s10217_s7 = inlined_call_operand.vmem [shape: f32[16,16], index: 7, kind: input, shape index: {}]   ;;  %s10218_s8 = inlined_call_operand.vmem [shape: f32[1,16], index: 8, kind: input, shape index: {}]   ;;  %s10219_s9 = inlined_call_operand.vmem [shape: f32[16,8], index: 9, kind: input, shape index: {}]   ;;  %s10220_s10 = inlined_call_operand.vmem [shape: f32[1,8], index: 10, kind: input, shape index: {}]   ;;  %s10221_s11 = inlined_call_operand.vmem [shape: f32[2,324,8], index: 11, kind: output, shape index: {0}]   ;;  %s10222_s12 = inlined_call_operand.vmem [shape: f32[2,1,1], index: 12, kind: output, shape index: {1}]   ;;  %s10223_s13 = inlined_call_operand.vmem [shape: f32[2,1,1], index: 13, kind: output, shape index: {2}]  }
   0x1 LB: > { %s6999_s26 = sadd.s32 4294967295, %s7478_s25   ;;  %p7003_p0 = scmp.ge.s32.totalorder %s7478_s25, 1  ;;  %s7478_s25 = sphi %s7552_s25, %s24_s25  }
   0x2   : > { %p402_p1 = scmp.lt.s32.totalorder %s7478_s25, 3 }
   0x4   : > { %p403_p2 = pnand %p7003_p0, %p402_p1 }
   0x6   : > { %406 = sbr.rel (%p403_p2) target bundleno = 2435 (0x983), region = 64 }
   0xb   : > { %v7007_v0 = vld [vmem:[%s10213_s3 + $0x4] sm:$0xf]  ;;  %vm713_vm0 = vcmask 1041408   ;;  %v582_v1 = vld [vmem:[%s10213_s3] sm:$0xf]  ;;  %p457_p3 = scmp.lt.s32.totalorder %s6999_s26, 1 }
   0xc   : > { %v648_v2 = vpack.c.bf16 %v7007_v0, %v7007_v0  ;;  %v583_v3 = vpack.c.bf16 %v582_v1, %v582_v1  ;;  %v7050_v4 = vld [vmem:[%s10213_s3 + $0x8] sm:$0xf]  ;;  %v7072_v5 = vld [vmem:[%s10213_s3 + $0xc] sm:$0xf]  ;;  %v7094_v8 = vld [vmem:[%s10213_s3 + $0x10] sm:$0xf] }
   0xd   : > { %v1073_v6 = vpack.c.bf16 %v7050_v4, %v7050_v4  ;;  %v1358_v7 = vpack.c.bf16 %v7072_v5, %v7072_v5  ;;  %s10436_s26 = smov (!%p457_p3, %s6999_s26), 1  ;;  %v1643_v11 = vpack.c.bf16 %v7094_v8, %v7094_v8  ;;  %vm649_vm1 = vcmask 31744  }
   0xe   : > { %v715_v9 = vsel %vm713_vm0, %v648_v2, 0  ;;  %v894_v10 = vsel %vm713_vm0, %v583_v3, 0  ;;  %s7446_s20 = smul.u32 376, %s10436_s26  ;;  %vm3577_vm2 = vcmask 1043456   ;;  %vm3336_vm3 = vcmask 64512   ;;  %s477_s24 = scalar_lea.vmem %s10223_s13, %s10436_s26 }
   0xf   : > { %724 = vmatpush.bf16.msra.mxu0 %v715_v9  ;;  %903 = vmatpush.bf16.msra.mxu1 %v894_v10  ;;  %v1138_v12 = vsel %vm713_vm0, %v1073_v6, 0  ;;  %v1423_v13 = vsel %vm713_vm0, %v1358_v7, 0  ;;  %v1708_v14 = vsel %vm713_vm0, %v1643_v11, 0  ;;  %vm3383_vm4 = vcmask 60416   ;;  %s7447_s19 = smul.u32 328, %s10436_s26 }
  0x10   : > { %1147 = vmatpush.bf16.msra.mxu2 %v1138_v12  ;;  %1432 = vmatpush.bf16.msra.mxu3 %v1423_v13  ;;  %s7586_s23 = scalar_lea.vmem %s10210_s0, %s7446_s20  ;;  %vm5982_vm5 = vcmask 130048   ;;  %vm6746_vm7 = vcmask 0  }
  0x11   : > { %v584_v15 = vld [vmem:[%s7586_s23 + $0x6] sm:$0xff]  ;;  %v585_v16 = vld [vmem:[%s7586_s23 + $0xe] sm:$0xff]  ;;  %v1294_v24 = vld [vmem:[%s7586_s23 + $0x17] sm:$0xff]  ;;  %s9748_s22 = scalar_lea.vmem %s10211_s1, %s7447_s19  ;;  %s9759_s30 = scalar_lea.vmem %s10221_s11, %s7447_s19 }
  0x12   : > { %v520_v17 = vld [vmem:[%s7586_s23 + $0x5] sm:$0xff]  ;;  %v625_v18 = vpack.c.bf16 %v585_v16, %v584_v15  ;;  %v521_v19 = vld [vmem:[%s7586_s23 + $0xd] sm:$0xff]  ;;  %v586_v27 = vld [vmem:[%s7586_s23 + $0x16] sm:$0xff]  ;;  %s474_s19 = scalar_lea.vmem %s10222_s12, %s10436_s26 }
  0x13   : > { %1717 = vmatpush.bf16.msrb.mxu0 %v1708_v14  ;;  %v1009_v20 = vld [vmem:[%s7586_s23 + $0x7] sm:$0xff]  ;;  %v1010_v21 = vld [vmem:[%s7586_s23 + $0xf] sm:$0xff]  ;;  %v561_v22 = vpack.c.bf16 %v521_v19, %v520_v17  ;;  %v1295_v25 = vld [vmem:[%s7586_s23 + $0x1f] sm:$0xff] }
  0x14   : > { %v1050_v23 = vpack.c.bf16 %v1010_v21, %v1009_v20  ;;  %7008 = vmatmul.msk.bf16.vlgmr.msra.gmra.mxu0 %vm649_vm1, %v625_v18  ;;  %v1335_v26 = vpack.c.bf16 %v1295_v25, %v1294_v24  ;;  %v587_v28 = vld [vmem:[%s7586_s23 + $0x1e] sm:$0xff]  ;;  %v522_v29 = vld [vmem:[%s7586_s23 + $0x15] sm:$0xff]  ;;  %v1296_v31 = vld [vmem:[%s7586_s23 + $0x27] sm:$0xff] }
  0x15   : > { %7029 = vmatmul.msk.bf16.vlgmr.msra.gmra.mxu1 %vm649_vm1, %v561_v22  ;;  %v523_v30 = vld [vmem:[%s7586_s23 + $0x1d] sm:$0xff]  ;;  %v1297_v32 = vld [vmem:[%s7586_s23 + $0x2f] sm:$0xff]  ;;  %v626_v33 = vpack.c.bf16 %v587_v28, %v586_v27  ;;  %v588_v36 = vld [vmem:[%s7586_s23 + $0x26] sm:$0xff] }
  0x16   : > { %7051 = vmatmul.msk.bf16.vlgmr.msra.gmra.mxu2 %vm649_vm1, %v1050_v23  ;;  %7073 = vmatmul.msk.bf16.vlgmr.msra.gmra.mxu3 %vm649_vm1, %v1335_v26  ;;  %v562_v34 = vpack.c.bf16 %v523_v30, %v522_v29  ;;  %v1336_v35 = vpack.c.bf16 %v1297_v32, %v1296_v31  ;;  %v589_v37 = vld [vmem:[%s7586_s23 + $0x2e] sm:$0xff]  ;;  %v524_v38 = vld [vmem:[%s7586_s23 + $0x25] sm:$0xff]  ;;  %v1298_v40 = vld [vmem:[%s7586_s23 + $0x37] sm:$0xff] }
  0x17   : > { %v525_v39 = vld [vmem:[%s7586_s23 + $0x2d] sm:$0xff]  ;;  %v1299_v41 = vld [vmem:[%s7586_s23 + $0x3f] sm:$0xff]  ;;  %v627_v42 = vpack.c.bf16 %v589_v37, %v588_v36  ;;  %v590_v45 = vld [vmem:[%s7586_s23 + $0x36] sm:$0xff] }
  0x18   : > { %v563_v43 = vpack.c.bf16 %v525_v39, %v524_v38  ;;  %v1337_v44 = vpack.c.bf16 %v1299_v41, %v1298_v40  ;;  %v591_v46 = vld [vmem:[%s7586_s23 + $0x3e] sm:$0xff]  ;;  %v526_v47 = vld [vmem:[%s7586_s23 + $0x35] sm:$0xff]  ;;  %v1300_v49 = vld [vmem:[%s7586_s23 + $0x47] sm:$0xff] }
  0x19   : > { %v527_v48 = vld [vmem:[%s7586_s23 + $0x3d] sm:$0xff]  ;;  %v1301_v50 = vld [vmem:[%s7586_s23 + $0x4f] sm:$0xff]  ;;  %v628_v51 = vpack.c.bf16 %v591_v46, %v590_v45  ;;  %v592_v54 = vld [vmem:[%s7586_s23 + $0x46] sm:$0xff] }
  0x1a   : > { %v564_v52 = vpack.c.bf16 %v527_v48, %v526_v47  ;;  %v1338_v53 = vpack.c.bf16 %v1301_v50, %v1300_v49  ;;  %v593_v55 = vld [vmem:[%s7586_s23 + $0x4e] sm:$0xff]  ;;  %v528_v56 = vld [vmem:[%s7586_s23 + $0x45] sm:$0xff]  ;;  %v1302_v58 = vld [vmem:[%s7586_s23 + $0x57] sm:$0xff] }
  0x1b   : > { %v529_v57 = vld [vmem:[%s7586_s23 + $0x4d] sm:$0xff]  ;;  %v1303_v59 = vld [vmem:[%s7586_s23 + $0x5f] sm:$0xff]  ;;  %v629_v60 = vpack.c.bf16 %v593_v55, %v592_v54  ;;  %v594_v63 = vld [vmem:[%s7586_s23 + $0x56] sm:$0xff] }
  0x1c   : > { %v565_v61 = vpack.c.bf16 %v529_v57, %v528_v56  ;;  %v1339_v62 = vpack.c.bf16 %v1303_v59, %v1302_v58  ;;  %v595_v0 = vld [vmem:[%s7586_s23 + $0x5e] sm:$0xff]  ;;  %v530_v1 = vld [vmem:[%s7586_s23 + $0x55] sm:$0xff]  ;;  %v1304_v3 = vld [vmem:[%s7586_s23 + $0x67] sm:$0xff] }
  0x1d   : > { %v531_v2 = vld [vmem:[%s7586_s23 + $0x5d] sm:$0xff]  ;;  %v1305_v4 = vld [vmem:[%s7586_s23 + $0x6f] sm:$0xff]  ;;  %v630_v5 = vpack.c.bf16 %v595_v0, %v594_v63  ;;  %v596_v8 = vld [vmem:[%s7586_s23 + $0x66] sm:$0xff] }
  0x1e   : > { %v566_v6 = vpack.c.bf16 %v531_v2, %v530_v1  ;;  %v1340_v7 = vpack.c.bf16 %v1305_v4, %v1304_v3  ;;  %v597_v9 = vld [vmem:[%s7586_s23 + $0x6e] sm:$0xff]  ;;  %v532_v10 = vld [vmem:[%s7586_s23 + $0x65] sm:$0xff]  ;;  %v1306_v12 = vld [vmem:[%s7586_s23 + $0x77] sm:$0xff] }
  0x1f   : > { %v533_v11 = vld [vmem:[%s7586_s23 + $0x6d] sm:$0xff]  ;;  %v1307_v13 = vld [vmem:[%s7586_s23 + $0x7f] sm:$0xff]  ;;  %v631_v14 = vpack.c.bf16 %v597_v9, %v596_v8  ;;  %v598_v19 = vld [vmem:[%s7586_s23 + $0x76] sm:$0xff] }
  0x20   : > { %v567_v15 = vpack.c.bf16 %v533_v11, %v532_v10  ;;  %v1341_v16 = vpack.c.bf16 %v1307_v13, %v1306_v12  ;;  %v7116_v17 = vld [vmem:[%s10213_s3 + $0x14] sm:$0xf]  ;;  %v599_v20 = vld [vmem:[%s7586_s23 + $0x7e] sm:$0xff]  ;;  %v1308_v24 = vld [vmem:[%s7586_s23 + $0x87] sm:$0xff] }
  0x21   : > { %v1928_v18 = vpack.c.bf16 %v7116_v17, %v7116_v17  ;;  %v534_v21 = vld [vmem:[%s7586_s23 + $0x75] sm:$0xff]  ;;  %v535_v22 = vld [vmem:[%s7586_s23 + $0x7d] sm:$0xff]  ;;  %v600_v29 = vld [vmem:[%s7586_s23 + $0x86] sm:$0xff] }
  0x22   : > { %v1309_v25 = vld [vmem:[%s7586_s23 + $0x8f] sm:$0xff]  ;;  %v568_v27 = vpack.c.bf16 %v535_v22, %v534_v21  ;;  %v536_v31 = vld [vmem:[%s7586_s23 + $0x85] sm:$0xff]  ;;  %v1314_v11 = vld [vmem:[%s7586_s23 + $0xb7] sm:$0xff] }
  0x23   : > { %v1993_v23 = vsel %vm713_vm0, %v1928_v18, 0  ;;  %v1342_v28 = vpack.c.bf16 %v1309_v25, %v1308_v24  ;;  %v601_v30 = vld [vmem:[%s7586_s23 + $0x8e] sm:$0xff]  ;;  %v602_v48 = vld [vmem:[%s7586_s23 + $0x96] sm:$0xff]  ;;  %v603_v49 = vld [vmem:[%s7586_s23 + $0x9e] sm:$0xff] }
  0x24   : > { %7009 = vmatmul.msk.bf16.gmra.mxu0 %vm649_vm1, %v626_v33  ;;  %2002 = vmatpush.bf16.msrb.mxu1 %v1993_v23  ;;  %v537_v32 = vld [vmem:[%s7586_s23 + $0x8d] sm:$0xff]  ;;  %v1310_v33 = vld [vmem:[%s7586_s23 + $0x97] sm:$0xff]  ;;  %v634_v55 = vpack.c.bf16 %v603_v49, %v602_v48  ;;  %v540_v9 = vld [vmem:[%s7586_s23 + $0xa5] sm:$0xff] }
  0x25   : > { %7030 = vmatmul.msk.bf16.gmra.mxu1 %vm649_vm1, %v562_v34  ;;  %v1311_v34 = vld [vmem:[%s7586_s23 + $0x9f] sm:$0xff]  ;;  %v569_v37 = vpack.c.bf16 %v537_v32, %v536_v31  ;;  %v538_v50 = vld [vmem:[%s7586_s23 + $0x95] sm:$0xff]  ;;  %v541_v10 = vld [vmem:[%s7586_s23 + $0xad] sm:$0xff] }
  0x26   : > { %7052 = vmatmul.msk.bf16.gmra.mxu2 %vm649_vm1, %v1335_v26  ;;  %7074 = vmatmul.msk.bf16.gmra.mxu3 %vm649_vm1, %v1336_v35  ;;  %v632_v26 = vpack.c.bf16 %v599_v20, %v598_v19  ;;  %v1343_v39 = vpack.c.bf16 %v1311_v34, %v1310_v33  ;;  %v605_v8 = vld [vmem:[%s7586_s23 + $0xae] sm:$0xff]  ;;  %v1315_v12 = vld [vmem:[%s7586_s23 + $0xbf] sm:$0xff]  ;;  %v571_v18 = vpack.c.bf16 %v541_v10, %v540_v9 }
  0x27   : > { %v1345_v20 = vpack.c.bf16 %v1315_v12, %v1314_v11  ;;  %v607_v31 = vld [vmem:[%s7586_s23 + $0xbe] sm:$0xff]  ;;  %v542_v32 = vld [vmem:[%s7586_s23 + $0xb5] sm:$0xff]  ;;  %v1316_v34 = vld [vmem:[%s7586_s23 + $0xc7] sm:$0xff] }
  0x28   : > { %v543_v33 = vld [vmem:[%s7586_s23 + $0xbd] sm:$0xff] }
  0x34   : > { %7010 = vmatmul.msk.bf16.gmra.mxu0 %vm649_vm1, %v627_v42 }
  0x35   : > { %7031 = vmatmul.msk.bf16.gmra.mxu1 %vm649_vm1, %v563_v43 }
  0x36   : > { %7053 = vmatmul.msk.bf16.gmra.mxu2 %vm649_vm1, %v1336_v35  ;;  %7075 = vmatmul.msk.bf16.gmra.mxu3 %vm649_vm1, %v1337_v44  ;;  %v633_v35 = vpack.c.bf16 %v601_v30, %v600_v29  ;;  %v606_v30 = vld [vmem:[%s7586_s23 + $0xb6] sm:$0xff] }
  0x44   : > { %7011 = vmatmul.msk.bf16.gmra.mxu0 %vm649_vm1, %v628_v51  ;;  %v539_v51 = vld [vmem:[%s7586_s23 + $0x9d] sm:$0xff] }
  0x45   : > { %7032 = vmatmul.msk.bf16.gmra.mxu1 %vm649_vm1, %v564_v52  ;;  %v1312_v52 = vld [vmem:[%s7586_s23 + $0xa7] sm:$0xff]  ;;  %v570_v59 = vpack.c.bf16 %v539_v51, %v538_v50 }
  0x46   : > { %7054 = vmatmul.msk.bf16.gmra.mxu2 %vm649_vm1, %v1337_v44  ;;  %7076 = vmatmul.msk.bf16.gmra.mxu3 %vm649_vm1, %v1338_v53 }
  0x54   : > { %7012 = vmatmul.msk.bf16.gmra.mxu0 %vm649_vm1, %v629_v60 }
  0x55   : > { %7033 = vmatmul.msk.bf16.gmra.mxu1 %vm649_vm1, %v565_v61 }
  0x56   : > { %7055 = vmatmul.msk.bf16.gmra.mxu2 %vm649_vm1, %v1338_v53  ;;  %7077 = vmatmul.msk.bf16.gmra.mxu3 %vm649_vm1, %v1339_v62  ;;  %v1313_v53 = vld [vmem:[%s7586_s23 + $0xaf] sm:$0xff] }
  0x57   : > { %v1344_v61 = vpack.c.bf16 %v1313_v53, %v1312_v52 }
  0x64   : > { %7013 = vmatmul.msk.bf16.gmra.mxu0 %vm649_vm1, %v630_v5 }
  0x65   : > { %7034 = vmatmul.msk.bf16.gmra.mxu1 %vm649_vm1, %v566_v6 }
  0x66   : > { %7056 = vmatmul.msk.bf16.gmra.mxu2 %vm649_vm1, %v1339_v62  ;;  %7078 = vmatmul.msk.bf16.gmra.mxu3 %vm649_vm1, %v1340_v7 }
  0x74   : > { %7014 = vmatmul.msk.bf16.gmra.mxu0 %vm649_vm1, %v631_v14 }
  0x75   : > { %7035 = vmatmul.msk.bf16.gmra.mxu1 %vm649_vm1, %v567_v15 }
  0x76   : > { %7057 = vmatmul.msk.bf16.gmra.mxu2 %vm649_vm1, %v1340_v7  ;;  %7079 = vmatmul.msk.bf16.gmra.mxu3 %vm649_vm1, %v1341_v16  ;;  %v604_v7 = vld [vmem:[%s7586_s23 + $0xa6] sm:$0xff] }
  0x77   : > { %v635_v14 = vpack.c.bf16 %v605_v8, %v604_v7 }
  0x84   : > { %7015 = vmatmul.msk.bf16.gmra.mxu0 %vm649_vm1, %v632_v26 }
  0x85   : > { %7036 = vmatmul.msk.bf16.gmra.mxu1 %vm649_vm1, %v568_v27 }
  0x86   : > { %7058 = vmatmul.msk.bf16.gmra.mxu2 %vm649_vm1, %v1341_v16  ;;  %7080 = vmatmul.msk.bf16.gmra.mxu3 %vm649_vm1, %v1342_v28 }
  0x91   : > { %v726_v36 = vpop.f32.mrf.mxu0 }
  0x92   : > { %v905_v38 = vpop.f32.mrf.mxu1 }
  0x93   : > { %v906_v40 = vadd.f32 %v905_v38, %v726_v36 }
  0x94   : > { %7016 = vmatmul.msk.bf16.gmra.mxu0 %vm649_vm1, %v633_v35  ;;  %v1317_v35 = vld [vmem:[%s7586_s23 + $0xcf] sm:$0xff] }
  0x95   : > { %7037 = vmatmul.msk.bf16.gmra.mxu1 %vm649_vm1, %v569_v37  ;;  %v636_v37 = vpack.c.bf16 %v607_v31, %v606_v30 }
  0x96   : > { %7059 = vmatmul.msk.bf16.gmra.mxu2 %vm649_vm1, %v1342_v28  ;;  %7081 = vmatmul.msk.bf16.gmra.mxu3 %vm649_vm1, %v1343_v39 }
  0x99   : > { %v1149_v41 = vpop.f32.mrf.mxu2  ;;  %v728_v43 = vpop.f32.mrf.mxu0 }
  0x9a   : > { %v1253_v42 = vadd.f32 %v1149_v41, %v906_v40  ;;  %v1434_v44 = vpop.f32.mrf.mxu3  ;;  %v907_v45 = vpop.f32.mrf.mxu1  ;;  %v572_v41 = vpack.c.bf16 %v543_v33, %v542_v32 }
  0x9b   : > { %v908_v46 = vadd.f32 %v907_v45, %v728_v43  ;;  %v1346_v43 = vpack.c.bf16 %v1317_v35, %v1316_v34 }
  0x9c   : > { %v7684_v47 = vadd.f32 %v1434_v44, %v1253_v42 }
  0xa1   : > { %v1151_v54 = vpop.f32.mrf.mxu2  ;;  %v731_v57 = vpop.f32.mrf.mxu0 }
  0xa2   : > { %v1254_v56 = vadd.f32 %v1151_v54, %v908_v46  ;;  %v1436_v58 = vpop.f32.mrf.mxu3  ;;  %v910_v60 = vpop.f32.mrf.mxu1  ;;  %v608_v54 = vld [vmem:[%s7586_s23 + $0xc6] sm:$0xff] }
  0xa3   : > { %v911_v62 = vadd.f32 %v910_v60, %v731_v57  ;;  %v545_v57 = vld [vmem:[%s7586_s23 + $0xcd] sm:$0xff] }
  0xa4   : > { %v7692_v63 = vadd.f32 %v1436_v58, %v1254_v56  ;;  %7017 = vmatmul.msk.bf16.gmra.mxu0 %vm649_vm1, %v634_v55  ;;  %v609_v55 = vld [vmem:[%s7586_s23 + $0xce] sm:$0xff]  ;;  %v544_v56 = vld [vmem:[%s7586_s23 + $0xc5] sm:$0xff]  ;;  %v1318_v58 = vld [vmem:[%s7586_s23 + $0xd7] sm:$0xff] }
  0xa5   : > { %7038 = vmatmul.msk.bf16.gmra.mxu1 %vm649_vm1, %v570_v59  ;;  %v1319_v59 = vld [vmem:[%s7586_s23 + $0xdf] sm:$0xff] }
  0xa6   : > { %7060 = vmatmul.msk.bf16.gmra.mxu2 %vm649_vm1, %v1343_v39  ;;  %7082 = vmatmul.msk.bf16.gmra.mxu3 %vm649_vm1, %v1344_v61 }
  0xa9   : > { %v1154_v0 = vpop.f32.mrf.mxu2  ;;  %v733_v2 = vpop.f32.mrf.mxu0 }
  0xaa   : > { %v1255_v1 = vadd.f32 %v1154_v0, %v911_v62  ;;  %v1439_v3 = vpop.f32.mrf.mxu3  ;;  %v912_v4 = vpop.f32.mrf.mxu1 }
  0xab   : > { %v913_v5 = vadd.f32 %v912_v4, %v733_v2  ;;  %v573_v2 = vpack.c.bf16 %v545_v57, %v544_v56  ;;  %v1347_v4 = vpack.c.bf16 %v1319_v59, %v1318_v58 }
  0xac   : > { %v7698_v6 = vadd.f32 %v1439_v3, %v1255_v1 }
  0xb1   : > { %v1156_v13 = vpop.f32.mrf.mxu2  ;;  %v736_v16 = vpop.f32.mrf.mxu0 }
  0xb2   : > { %v1256_v15 = vadd.f32 %v1156_v13, %v913_v5  ;;  %v1441_v17 = vpop.f32.mrf.mxu3  ;;  %v915_v19 = vpop.f32.mrf.mxu1 }
  0xb3   : > { %v916_v21 = vadd.f32 %v915_v19, %v736_v16  ;;  %v611_v16 = vld [vmem:[%s7586_s23 + $0xde] sm:$0xff]  ;;  %v1320_v19 = vld [vmem:[%s7586_s23 + $0xe7] sm:$0xff] }
  0xb4   : > { %v7706_v22 = vadd.f32 %v1441_v17, %v1256_v15  ;;  %7018 = vmatmul.msk.bf16.gmra.mxu0 %vm649_vm1, %v635_v14  ;;  %v610_v15 = vld [vmem:[%s7586_s23 + $0xd6] sm:$0xff] }
  0xb5   : > { %7039 = vmatmul.msk.bf16.gmra.mxu1 %vm649_vm1, %v571_v18  ;;  %v546_v17 = vld [vmem:[%s7586_s23 + $0xd5] sm:$0xff]  ;;  %v547_v18 = vld [vmem:[%s7586_s23 + $0xdd] sm:$0xff] }
  0xb6   : > { %7061 = vmatmul.msk.bf16.gmra.mxu2 %vm649_vm1, %v1344_v61  ;;  %7083 = vmatmul.msk.bf16.gmra.mxu3 %vm649_vm1, %v1345_v20  ;;  %v637_v61 = vpack.c.bf16 %v609_v55, %v608_v54 }
  0xb9   : > { %v1159_v23 = vpop.f32.mrf.mxu2  ;;  %v738_v25 = vpop.f32.mrf.mxu0 }
  0xba   : > { %v1257_v24 = vadd.f32 %v1159_v23, %v916_v21  ;;  %v1444_v26 = vpop.f32.mrf.mxu3  ;;  %v917_v27 = vpop.f32.mrf.mxu1  ;;  %v638_v23 = vpack.c.bf16 %v611_v16, %v610_v15 }
  0xbb   : > { %v918_v28 = vadd.f32 %v917_v27, %v738_v25  ;;  %v574_v27 = vpack.c.bf16 %v547_v18, %v546_v17 }
  0xbc   : > { %v7712_v29 = vadd.f32 %v1444_v26, %v1257_v24 }
  0xc1   : > { %v1161_v36 = vpop.f32.mrf.mxu2  ;;  %v741_v39 = vpop.f32.mrf.mxu0 }
  0xc2   : > { %v1258_v38 = vadd.f32 %v1161_v36, %v918_v28  ;;  %v1446_v40 = vpop.f32.mrf.mxu3  ;;  %v920_v42 = vpop.f32.mrf.mxu1 }
  0xc3   : > { %v921_v44 = vadd.f32 %v920_v42, %v741_v39  ;;  %v548_v42 = vld [vmem:[%s7586_s23 + $0xe5] sm:$0xff] }
  0xc4   : > { %v7720_v45 = vadd.f32 %v1446_v40, %v1258_v38  ;;  %7019 = vmatmul.msk.bf16.gmra.mxu0 %vm649_vm1, %v636_v37  ;;  %v612_v40 = vld [vmem:[%s7586_s23 + $0xe6] sm:$0xff] }
  0xc5   : > { %7040 = vmatmul.msk.bf16.gmra.mxu1 %vm649_vm1, %v572_v41  ;;  %v613_v41 = vld [vmem:[%s7586_s23 + $0xee] sm:$0xff] }
  0xc6   : > { %7062 = vmatmul.msk.bf16.gmra.mxu2 %vm649_vm1, %v1345_v20  ;;  %7084 = vmatmul.msk.bf16.gmra.mxu3 %vm649_vm1, %v1346_v43  ;;  %v1321_v20 = vld [vmem:[%s7586_s23 + $0xef] sm:$0xff] }
  0xc7   : > { %v1348_v30 = vpack.c.bf16 %v1321_v20, %v1320_v19 }
  0xc9   : > { %v1164_v46 = vpop.f32.mrf.mxu2  ;;  %v743_v49 = vpop.f32.mrf.mxu0 }
  0xca   : > { %v1259_v48 = vadd.f32 %v1164_v46, %v921_v44  ;;  %v1449_v50 = vpop.f32.mrf.mxu3  ;;  %v922_v51 = vpop.f32.mrf.mxu1  ;;  %v1322_v44 = vld [vmem:[%s7586_s23 + $0xf7] sm:$0xff]  ;;  %v1323_v46 = vld [vmem:[%s7586_s23 + $0xff] sm:$0xff] }
  0xcb   : > { %v923_v52 = vadd.f32 %v922_v51, %v743_v49  ;;  %v639_v49 = vpack.c.bf16 %v613_v41, %v612_v40  ;;  %v1349_v56 = vpack.c.bf16 %v1323_v46, %v1322_v44  ;;  %v1326_v40 = vld [vmem:[%s7586_s23 + $0x117] sm:$0xff]  ;;  %v1327_v41 = vld [vmem:[%s7586_s23 + $0x11f] sm:$0xff] }
  0xcc   : > { %v7726_v53 = vadd.f32 %v1449_v50, %v1259_v48 }
  0xd1   : > { %v1166_v60 = vpop.f32.mrf.mxu2  ;;  %v746_v0 = vpop.f32.mrf.mxu0 }
  0xd2   : > { %v1260_v62 = vadd.f32 %v1166_v60, %v923_v52  ;;  %v1451_v1 = vpop.f32.mrf.mxu3  ;;  %v925_v3 = vpop.f32.mrf.mxu1 }
  0xd3   : > { %v926_v5 = vadd.f32 %v925_v3, %v746_v0  ;;  %v614_v3 = vld [vmem:[%s7586_s23 + $0xf6] sm:$0xff] }
  0xd4   : > { %v7734_v7 = vadd.f32 %v1451_v1, %v1260_v62  ;;  %7020 = vmatmul.msk.bf16.gmra.mxu0 %vm649_vm1, %v637_v61 }
  0xd5   : > { %7041 = vmatmul.msk.bf16.gmra.mxu1 %vm649_vm1, %v573_v2 }
  0xd6   : > { %7063 = vmatmul.msk.bf16.gmra.mxu2 %vm649_vm1, %v1346_v43  ;;  %7085 = vmatmul.msk.bf16.gmra.mxu3 %vm649_vm1, %v1347_v4  ;;  %v549_v43 = vld [vmem:[%s7586_s23 + $0xed] sm:$0xff] }
  0xd7   : > { %v575_v54 = vpack.c.bf16 %v549_v43, %v548_v42 }
  0xd9   : > { %v1169_v8 = vpop.f32.mrf.mxu2  ;;  %v748_v10 = vpop.f32.mrf.mxu0 }
  0xda   : > { %v1261_v9 = vadd.f32 %v1169_v8, %v926_v5  ;;  %v1454_v11 = vpop.f32.mrf.mxu3  ;;  %v927_v12 = vpop.f32.mrf.mxu1  ;;  %v550_v5 = vld [vmem:[%s7586_s23 + $0xf5] sm:$0xff]  ;;  %v551_v8 = vld [vmem:[%s7586_s23 + $0xfd] sm:$0xff] }
  0xdb   : > { %v928_v13 = vadd.f32 %v927_v12, %v748_v10  ;;  %v1325_v10 = vld [vmem:[%s7586_s23 + $0x10f] sm:$0xff]  ;;  %v576_v17 = vpack.c.bf16 %v551_v8, %v550_v5  ;;  %v1328_v5 = vld [vmem:[%s7586_s23 + $0x127] sm:$0xff] }
  0xdc   : > { %v7740_v14 = vadd.f32 %v1454_v11, %v1261_v9  ;;  %v1324_v9 = vld [vmem:[%s7586_s23 + $0x107] sm:$0xff]  ;;  %v1329_v8 = vld [vmem:[%s7586_s23 + $0x12f] sm:$0xff] }
  0xdd   : > { %v1350_v19 = vpack.c.bf16 %v1325_v10, %v1324_v9 }
  0xe1   : > { %v1171_v21 = vpop.f32.mrf.mxu2  ;;  %v751_v25 = vpop.f32.mrf.mxu0 }
  0xe2   : > { %v1262_v24 = vadd.f32 %v1171_v21, %v928_v13  ;;  %v1456_v26 = vpop.f32.mrf.mxu3  ;;  %v930_v28 = vpop.f32.mrf.mxu1 }
  0xe3   : > { %v931_v31 = vadd.f32 %v930_v28, %v751_v25 }
  0xe4   : > { %v7748_v32 = vadd.f32 %v1456_v26, %v1262_v24  ;;  %7021 = vmatmul.msk.bf16.gmra.mxu0 %vm649_vm1, %v638_v23 }
  0xe5   : > { %7042 = vmatmul.msk.bf16.gmra.mxu1 %vm649_vm1, %v574_v27 }
  0xe6   : > { %7064 = vmatmul.msk.bf16.gmra.mxu2 %vm649_vm1, %v1347_v4  ;;  %7086 = vmatmul.msk.bf16.gmra.mxu3 %vm649_vm1, %v1348_v30  ;;  %v615_v4 = vld [vmem:[%s7586_s23 + $0xfe] sm:$0xff] }
  0xe7   : > { %v640_v12 = vpack.c.bf16 %v615_v4, %v614_v3  ;;  %v554_v3 = vld [vmem:[%s7586_s23 + $0x115] sm:$0xff]  ;;  %v555_v4 = vld [vmem:[%s7586_s23 + $0x11d] sm:$0xff] }
  0xe9   : > { %v1174_v33 = vpop.f32.mrf.mxu2  ;;  %v753_v35 = vpop.f32.mrf.mxu0 }
  0xea   : > { %v1263_v34 = vadd.f32 %v1174_v33, %v931_v31  ;;  %v1459_v36 = vpop.f32.mrf.mxu3  ;;  %v932_v37 = vpop.f32.mrf.mxu1  ;;  %v7138_v31 = vld [vmem:[%s10213_s3 + $0x18] sm:$0xf] }
  0xeb   : > { %v933_v38 = vadd.f32 %v932_v37, %v753_v35  ;;  %v2213_v33 = vpack.c.bf16 %v7138_v31, %v7138_v31  ;;  %v617_v35 = vld [vmem:[%s7586_s23 + $0x10e] sm:$0xff]  ;;  %v620_v31 = vld [vmem:[%s7586_s23 + $0x126] sm:$0xff] }
  0xec   : > { %v7754_v39 = vadd.f32 %v1459_v36, %v1263_v34  ;;  %v616_v34 = vld [vmem:[%s7586_s23 + $0x106] sm:$0xff] }
  0xed   : > { %v552_v36 = vld [vmem:[%s7586_s23 + $0x105] sm:$0xff]  ;;  %v553_v37 = vld [vmem:[%s7586_s23 + $0x10d] sm:$0xff]  ;;  %v641_v43 = vpack.c.bf16 %v617_v35, %v616_v34 }
  0xee   : > { %v556_v34 = vld [vmem:[%s7586_s23 + $0x125] sm:$0xff]  ;;  %v557_v35 = vld [vmem:[%s7586_s23 + $0x12d] sm:$0xff] }
  0xf1   : > { %v1176_v48 = vpop.f32.mrf.mxu2  ;;  %v756_v51 = vpop.f32.mrf.mxu0 }
  0xf2   : > { %v1264_v50 = vadd.f32 %v1176_v48, %v933_v38  ;;  %v1461_v52 = vpop.f32.mrf.mxu3  ;;  %v935_v55 = vpop.f32.mrf.mxu1  ;;  %v2278_v38 = vsel %vm713_vm0, %v2213_v33, 0  ;;  %v621_v33 = vld [vmem:[%s7586_s23 + $0x12e] sm:$0xff] }
  0xf3   : > { %v936_v57 = vadd.f32 %v935_v55, %v756_v51  ;;  %2287 = vmatpush.bf16.msrb.mxu2 %v2278_v38  ;;  %v1351_v51 = vpack.c.bf16 %v1327_v41, %v1326_v40  ;;  %v643_v40 = vpack.c.bf16 %v621_v33, %v620_v31 }
  0xf4   : > { %v7762_v58 = vadd.f32 %v1461_v52, %v1264_v50  ;;  %7022 = vmatmul.msk.bf16.gmra.mxu0 %vm649_vm1, %v639_v49  ;;  %v577_v49 = vpack.c.bf16 %v553_v37, %v552_v36  ;;  %v1330_v36 = vld [vmem:[%s7586_s23 + $0x137] sm:$0xff]  ;;  %v1331_v37 = vld [vmem:[%s7586_s23 + $0x13f] sm:$0xff] }
  0xf5   : > { %7043 = vmatmul.msk.bf16.gmra.mxu1 %vm649_vm1, %v575_v54 }
  0xf6   : > { %7065 = vmatmul.msk.bf16.gmra.mxu2 %vm649_vm1, %v1348_v30  ;;  %7087 = vmatmul.msk.bf16.gmra.mxu3 %vm649_vm1, %v1349_v56 }
  0xf9   : > { %v1179_v59 = vpop.f32.mrf.mxu2  ;;  %v758_v61 = vpop.f32.mrf.mxu0 }
  0xfa   : > { %v1265_v60 = vadd.f32 %v1179_v59, %v936_v57  ;;  %v1464_v62 = vpop.f32.mrf.mxu3  ;;  %v937_v0 = vpop.f32.mrf.mxu1 }
  0xfb   : > { %v938_v1 = vadd.f32 %v937_v0, %v758_v61  ;;  %v618_v0 = vld [vmem:[%s7586_s23 + $0x116] sm:$0xff] }
  0xfc   : > { %v7768_v2 = vadd.f32 %v1464_v62, %v1265_v60 }
 0x101   : > { %v1181_v11 = vpop.f32.mrf.mxu2  ;;  %v761_v15 = vpop.f32.mrf.mxu0 }
 0x102   : > { %v1266_v13 = vadd.f32 %v1181_v11, %v938_v1  ;;  %v1466_v16 = vpop.f32.mrf.mxu3  ;;  %v940_v18 = vpop.f32.mrf.mxu1  ;;  %v619_v1 = vld [vmem:[%s7586_s23 + $0x11e] sm:$0xff] }
 0x103   : > { %v941_v20 = vadd.f32 %v940_v18, %v761_v15  ;;  %v642_v10 = vpack.c.bf16 %v619_v1, %v618_v0  ;;  %v578_v15 = vpack.c.bf16 %v555_v4, %v554_v3  ;;  %v622_v1 = vld [vmem:[%s7586_s23 + $0x136] sm:$0xff]  ;;  %v623_v3 = vld [vmem:[%s7586_s23 + $0x13e] sm:$0xff] }
 0x104   : > { %v7776_v21 = vadd.f32 %v1466_v16, %v1266_v13  ;;  %7023 = vmatmul.msk.bf16.gmra.mxu0 %vm649_vm1, %v640_v12  ;;  %v558_v4 = vld [vmem:[%s7586_s23 + $0x135] sm:$0xff] }
 0x105   : > { %7044 = vmatmul.msk.bf16.gmra.mxu1 %vm649_vm1, %v576_v17  ;;  %v1352_v17 = vpack.c.bf16 %v1329_v8, %v1328_v5  ;;  %v559_v5 = vld [vmem:[%s7586_s23 + $0x13d] sm:$0xff] }
 0x106   : > { %7066 = vmatmul.msk.bf16.gmra.mxu2 %vm649_vm1, %v1349_v56  ;;  %7088 = vmatmul.msk.bf16.gmra.mxu3 %vm649_vm1, %v1350_v19 }
 0x109   : > { %v1184_v23 = vpop.f32.mrf.mxu2  ;;  %v763_v25 = vpop.f32.mrf.mxu0 }
 0x10a   : > { %v1267_v24 = vadd.f32 %v1184_v23, %v941_v20  ;;  %v1469_v26 = vpop.f32.mrf.mxu3  ;;  %v942_v27 = vpop.f32.mrf.mxu1 }
 0x10b   : > { %v943_v28 = vadd.f32 %v942_v27, %v763_v25 }
 0x10c   : > { %v7782_v30 = vadd.f32 %v1469_v26, %v1267_v24 }
 0x111   : > { %v1186_v42 = vpop.f32.mrf.mxu2  ;;  %v766_v46 = vpop.f32.mrf.mxu0 }
 0x112   : > { %v1268_v44 = vadd.f32 %v1186_v42, %v943_v28  ;;  %v1471_v48 = vpop.f32.mrf.mxu3  ;;  %v945_v50 = vpop.f32.mrf.mxu1 }
 0x113   : > { %v946_v52 = vadd.f32 %v945_v50, %v766_v46 }
 0x114   : > { %v7794_v54 = vadd.f32 %v1471_v48, %v1268_v44  ;;  %7024 = vmatmul.msk.bf16.gmra.mxu0 %vm649_vm1, %v641_v43  ;;  %v579_v44 = vpack.c.bf16 %v557_v35, %v556_v34  ;;  %v1353_v48 = vpack.c.bf16 %v1331_v37, %v1330_v36 }
 0x115   : > { %7045 = vmatmul.msk.bf16.gmra.mxu1 %vm649_vm1, %v577_v49 }
 0x116   : > { %7067 = vmatmul.msk.bf16.gmra.mxu2 %vm649_vm1, %v1350_v19  ;;  %7089 = vmatmul.msk.bf16.gmra.mxu3 %vm649_vm1, %v1351_v51 }
 0x119   : > { %v1189_v55 = vpop.f32.mrf.mxu2  ;;  %v768_v57 = vpop.f32.mrf.mxu0 }
 0x11a   : > { %v1269_v56 = vadd.f32 %v1189_v55, %v946_v52  ;;  %v1474_v59 = vpop.f32.mrf.mxu3  ;;  %v947_v60 = vpop.f32.mrf.mxu1 }
 0x11b   : > { %v948_v61 = vadd.f32 %v947_v60, %v768_v57 }
 0x11c   : > { %v7800_v62 = vadd.f32 %v1474_v59, %v1269_v56 }
 0x121   : > { %v1191_v9 = vpop.f32.mrf.mxu2  ;;  %v771_v12 = vpop.f32.mrf.mxu0 }
 0x122   : > { %v1270_v11 = vadd.f32 %v1191_v9, %v948_v61  ;;  %v1476_v13 = vpop.f32.mrf.mxu3  ;;  %v950_v16 = vpop.f32.mrf.mxu1  ;;  %v7160_v61 = vld [vmem:[%s10213_s3 + $0x1c] sm:$0xf]  ;;  %v1332_v9 = vld [vmem:[%s7586_s23 + $0x147] sm:$0xff] }
 0x123   : > { %v951_v18 = vadd.f32 %v950_v16, %v771_v12  ;;  %v2498_v0 = vpack.c.bf16 %v7160_v61, %v7160_v61  ;;  %v644_v12 = vpack.c.bf16 %v623_v3, %v622_v1 }
 0x124   : > { %v7808_v19 = vadd.f32 %v1476_v13, %v1270_v11  ;;  %7025 = vmatmul.msk.bf16.gmra.mxu0 %vm649_vm1, %v642_v10  ;;  %v1333_v10 = vld [vmem:[%s7586_s23 + $0x14f] sm:$0xff] }
 0x125   : > { %7046 = vmatmul.msk.bf16.gmra.mxu1 %vm649_vm1, %v578_v15  ;;  %v2563_v8 = vsel %vm713_vm0, %v2498_v0, 0 }
 0x126   : > { %7068 = vmatmul.msk.bf16.gmra.mxu2 %vm649_vm1, %v1351_v51  ;;  %7090 = vmatmul.msk.bf16.gmra.mxu3 %vm649_vm1, %v1352_v17 }
 0x127   : > { %2572 = vmatpush.bf16.msrb.mxu3 %v2563_v8 }
 0x129   : > { %v1194_v20 = vpop.f32.mrf.mxu2  ;;  %v773_v24 = vpop.f32.mrf.mxu0 }
 0x12a   : > { %v1271_v23 = vadd.f32 %v1194_v20, %v951_v18  ;;  %v1479_v25 = vpop.f32.mrf.mxu3  ;;  %v952_v26 = vpop.f32.mrf.mxu1  ;;  %v1354_v20 = vpack.c.bf16 %v1333_v10, %v1332_v9  ;;  %v1579_v10 = vld [vmem:[%s7586_s23 + $0x18] sm:$0xff] }
 0x12b   : > { %v953_v27 = vadd.f32 %v952_v26, %v773_v24 }
 0x12c   : > { %v7814_v28 = vadd.f32 %v1479_v25, %v1271_v23  ;;  %v7182_v25 = vld [vmem:[%s10213_s3 + $0x20] sm:$0xf] }
 0x12d   : > { %v2783_v26 = vpack.c.bf16 %v7182_v25, %v7182_v25 }
 0x12f   : > { %v2848_v31 = vsel %vm713_vm0, %v2783_v26, 0 }
 0x130   : > { %2857 = vmatpush.bf16.msra.mxu0 %v2848_v31 }
 0x131   : > { %v1196_v38 = vpop.f32.mrf.mxu2  ;;  %v776_v42 = vpop.f32.mrf.mxu0 }
 0x132   : > { %v1272_v41 = vadd.f32 %v1196_v38, %v953_v27  ;;  %v1481_v43 = vpop.f32.mrf.mxu3  ;;  %v955_v46 = vpop.f32.mrf.mxu1 }
 0x133   : > { %v956_v49 = vadd.f32 %v955_v46, %v776_v42  ;;  %v1049_v42 = vld [vmem:[%s7586_s23 + $0x147] sm:$0xf] }
 0x134   : > { %v7822_v50 = vadd.f32 %v1481_v43, %v1272_v41  ;;  %7026 = vmatmul.msk.bf16.gmra.mxu0 %vm649_vm1, %v643_v40  ;;  %v624_v40 = vld [vmem:[%s7586_s23 + $0x146] sm:$0xf]  ;;  %v1334_v43 = vld [vmem:[%s7586_s23 + $0x157] sm:$0xf] }
 0x135   : > { %7047 = vmatmul.msk.bf16.gmra.mxu1 %vm649_vm1, %v579_v44  ;;  %v560_v41 = vld [vmem:[%s7586_s23 + $0x145] sm:$0xf]  ;;  %v645_v46 = vpack.c.bf16 %v624_v40, %v624_v40 }
 0x136   : > { %7069 = vmatmul.msk.bf16.gmra.mxu2 %vm649_vm1, %v1352_v17  ;;  %7091 = vmatmul.msk.bf16.gmra.mxu3 %vm649_vm1, %v1353_v48  ;;  %v580_v17 = vpack.c.bf16 %v559_v5, %v558_v4 }
 0x139   : > { %v1199_v51 = vpop.f32.mrf.mxu2  ;;  %v778_v55 = vpop.f32.mrf.mxu0 }
 0x13a   : > { %v1273_v52 = vadd.f32 %v1199_v51, %v956_v49  ;;  %v1484_v56 = vpop.f32.mrf.mxu3  ;;  %v957_v57 = vpop.f32.mrf.mxu1 }
 0x13b   : > { %v958_v59 = vadd.f32 %v957_v57, %v778_v55  ;;  %v1070_v55 = vpack.c.bf16 %v1049_v42, %v1049_v42  ;;  %v1355_v57 = vpack.c.bf16 %v1334_v43, %v1334_v43 }
 0x13c   : > { %v7828_v60 = vadd.f32 %v1484_v56, %v1273_v52  ;;  %v581_v52 = vpack.c.bf16 %v560_v41, %v560_v41 }
 0x141   : > { %v1201_v11 = vpop.f32.mrf.mxu2  ;;  %v781_v15 = vpop.f32.mrf.mxu0 }
 0x142   : > { %v1274_v13 = vadd.f32 %v1201_v11, %v958_v59  ;;  %v1486_v16 = vpop.f32.mrf.mxu3  ;;  %v960_v18 = vpop.f32.mrf.mxu1  ;;  %v1580_v11 = vld [vmem:[%s7586_s23 + $0x20] sm:$0xff] }
 0x143   : > { %v961_v23 = vadd.f32 %v960_v18, %v781_v15  ;;  %v1864_v15 = vld [vmem:[%s7586_s23 + $0x19] sm:$0xff] }
 0x144   : > { %v7840_v24 = vadd.f32 %v1486_v16, %v1274_v13  ;;  %7027 = vmatmul.msk.bf16.gmra.mxu0 %vm649_vm1, %v644_v12  ;;  %v2149_v12 = vld [vmem:[%s7586_s23 + $0x29] sm:$0xff]  ;;  %v2150_v13 = vld [vmem:[%s7586_s23 + $0x31] sm:$0xff]  ;;  %v1865_v16 = vld [vmem:[%s7586_s23 + $0x21] sm:$0xff] }
 0x145   : > { %7048 = vmatmul.msk.bf16.gmra.mxu1 %vm649_vm1, %v580_v17  ;;  %v2434_v17 = vld [vmem:[%s7586_s23 + $0x2a] sm:$0xff]  ;;  %v2435_v18 = vld [vmem:[%s7586_s23 + $0x32] sm:$0xff]  ;;  %v2190_v31 = vpack.c.bf16 %v2150_v13, %v2149_v12 }
 0x146   : > { %7070 = vmatmul.msk.bf16.gmra.mxu2 %vm649_vm1, %v1353_v48  ;;  %7092 = vmatmul.msk.bf16.gmra.mxu3 %vm649_vm1, %v1354_v20 }
 0x149   : > { %v1204_v27 = vpop.f32.mrf.mxu2  ;;  %v783_v34 = vpop.f32.mrf.mxu0 }
 0x14a   : > { %v1275_v33 = vadd.f32 %v1204_v27, %v961_v23  ;;  %v1489_v35 = vpop.f32.mrf.mxu3  ;;  %v962_v36 = vpop.f32.mrf.mxu1  ;;  %v1620_v23 = vpack.c.bf16 %v1580_v11, %v1579_v10 }
 0x14b   : > { %v963_v37 = vadd.f32 %v962_v36, %v783_v34 }
 0x14c   : > { %v7850_v38 = vadd.f32 %v1489_v35, %v1275_v33  ;;  %v1905_v33 = vpack.c.bf16 %v1865_v16, %v1864_v15  ;;  %v2475_v35 = vpack.c.bf16 %v2435_v18, %v2434_v17 }
 0x151   : > { %v1206_v44 = vpop.f32.mrf.mxu2  ;;  %v786_v49 = vpop.f32.mrf.mxu0 }
 0x152   : > { %v1276_v48 = vadd.f32 %v1206_v44, %v963_v37  ;;  %v1491_v51 = vpop.f32.mrf.mxu3  ;;  %v965_v56 = vpop.f32.mrf.mxu1 }
 0x153   : > { %v966_v59 = vadd.f32 %v965_v56, %v786_v49  ;;  %v1581_v49 = vld [vmem:[%s7586_s23 + $0x28] sm:$0xff]  ;;  %v2436_v56 = vld [vmem:[%s7586_s23 + $0x3a] sm:$0xff] }
 0x154   : > { %v7856_v61 = vadd.f32 %v1491_v51, %v1276_v48  ;;  %7028 = vmatmul.msk.bf16.gmra.mxu0 %vm649_vm1, %v645_v46  ;;  %v1582_v51 = vld [vmem:[%s7586_s23 + $0x30] sm:$0xff] }
 0x155   : > { %7049 = vmatmul.msk.bf16.gmra.mxu1 %vm649_vm1, %v581_v52  ;;  %v2151_v52 = vld [vmem:[%s7586_s23 + $0x39] sm:$0xff] }
 0x156   : > { %7071 = vmatmul.msk.bf16.gmra.mxu2 %vm649_vm1, %v1070_v55  ;;  %7093 = vmatmul.msk.bf16.gmra.mxu3 %vm649_vm1, %v1355_v57  ;;  %v2152_v55 = vld [vmem:[%s7586_s23 + $0x41] sm:$0xff] }
 0x157   : > { %v2437_v57 = vld [vmem:[%s7586_s23 + $0x42] sm:$0xff] }
 0x158   : > { %v2476_v10 = vpack.c.bf16 %v2437_v57, %v2436_v56 }
 0x159   : > { %v1209_v0 = vpop.f32.mrf.mxu2  ;;  %v788_v3 = vpop.f32.mrf.mxu0 }
 0x15a   : > { %v1277_v1 = vadd.f32 %v1209_v0, %v966_v59  ;;  %v1494_v4 = vpop.f32.mrf.mxu3  ;;  %v967_v5 = vpop.f32.mrf.mxu1  ;;  %v1621_v0 = vpack.c.bf16 %v1582_v51, %v1581_v49 }
 0x15b   : > { %v968_v8 = vadd.f32 %v967_v5, %v788_v3  ;;  %v2191_v5 = vpack.c.bf16 %v2152_v55, %v2151_v52 }
 0x15c   : > { %v7862_v9 = vadd.f32 %v1494_v4, %v1277_v1 }
 0x161   : > { %v1211_v20 = vpop.f32.mrf.mxu2  ;;  %v791_v26 = vpop.f32.mrf.mxu0 }
 0x162   : > { %v1278_v25 = vadd.f32 %v1211_v20, %v968_v8  ;;  %v1496_v27 = vpop.f32.mrf.mxu3  ;;  %v970_v34 = vpop.f32.mrf.mxu1 }
 0x163   : > { %v971_v36 = vadd.f32 %v970_v34, %v791_v26  ;;  %v1584_v26 = vld [vmem:[%s7586_s23 + $0x40] sm:$0xff]  ;;  %v2438_v34 = vld [vmem:[%s7586_s23 + $0x4a] sm:$0xff] }
 0x164   : > { %v7872_v37 = vadd.f32 %v1496_v27, %v1278_v25  ;;  %7095 = vmatmul.msk.bf16.vlgmr.msrb.gmra.mxu0 %vm649_vm1, %v1620_v23  ;;  %v1583_v25 = vld [vmem:[%s7586_s23 + $0x38] sm:$0xff]  ;;  %v2153_v27 = vld [vmem:[%s7586_s23 + $0x49] sm:$0xff] }
 0x165   : > { %7117 = vmatmul.msk.bf16.vlgmr.msrb.gmra.mxu1 %vm649_vm1, %v1905_v33  ;;  %v2154_v33 = vld [vmem:[%s7586_s23 + $0x51] sm:$0xff] }
 0x166   : > { %7139 = vmatmul.msk.bf16.vlgmr.msrb.gmra.mxu2 %vm649_vm1, %v2190_v31  ;;  %7161 = vmatmul.msk.bf16.vlgmr.msrb.gmra.mxu3 %vm649_vm1, %v2475_v35  ;;  %v2439_v35 = vld [vmem:[%s7586_s23 + $0x52] sm:$0xff] }
 0x169   : > { %v1214_v40 = vpop.f32.mrf.mxu2  ;;  %v793_v42 = vpop.f32.mrf.mxu0 }
 0x16a   : > { %v1279_v41 = vadd.f32 %v1214_v40, %v971_v36  ;;  %v1499_v43 = vpop.f32.mrf.mxu3  ;;  %v972_v44 = vpop.f32.mrf.mxu1  ;;  %v1622_v40 = vpack.c.bf16 %v1584_v26, %v1583_v25 }
 0x16b   : > { %v973_v46 = vadd.f32 %v972_v44, %v793_v42 }
 0x16c   : > { %v7878_v48 = vadd.f32 %v1499_v43, %v1279_v41  ;;  %v2192_v43 = vpack.c.bf16 %v2154_v33, %v2153_v27 }
 0x171   : > { %v1216_v59 = vpop.f32.mrf.mxu2  ;;  %v796_v3 = vpop.f32.mrf.mxu0 }
 0x172   : > { %v1280_v1 = vadd.f32 %v1216_v59, %v973_v46  ;;  %v1501_v4 = vpop.f32.mrf.mxu3  ;;  %v975_v8 = vpop.f32.mrf.mxu1  ;;  %v2477_v46 = vpack.c.bf16 %v2439_v35, %v2438_v34 }
 0x173   : > { %v976_v11 = vadd.f32 %v975_v8, %v796_v3  ;;  %v1585_v3 = vld [vmem:[%s7586_s23 + $0x48] sm:$0xff]  ;;  %v2155_v8 = vld [vmem:[%s7586_s23 + $0x59] sm:$0xff] }
 0x174   : > { %v7886_v12 = vadd.f32 %v1501_v4, %v1280_v1  ;;  %7096 = vmatmul.msk.bf16.gmra.mxu0 %vm649_vm1, %v1621_v0  ;;  %v1586_v4 = vld [vmem:[%s7586_s23 + $0x50] sm:$0xff] }
 0x175   : > { %7118 = vmatmul.msk.bf16.gmra.mxu1 %vm649_vm1, %v2190_v31 }
 0x176   : > { %7140 = vmatmul.msk.bf16.gmra.mxu2 %vm649_vm1, %v2191_v5  ;;  %7162 = vmatmul.msk.bf16.gmra.mxu3 %vm649_vm1, %v2476_v10  ;;  %v2156_v10 = vld [vmem:[%s7586_s23 + $0x61] sm:$0xff] }
 0x179   : > { %v1219_v13 = vpop.f32.mrf.mxu2  ;;  %v798_v16 = vpop.f32.mrf.mxu0 }
 0x17a   : > { %v1281_v15 = vadd.f32 %v1219_v13, %v976_v11  ;;  %v1504_v17 = vpop.f32.mrf.mxu3  ;;  %v977_v18 = vpop.f32.mrf.mxu1  ;;  %v2440_v11 = vld [vmem:[%s7586_s23 + $0x5a] sm:$0xff]  ;;  %v2441_v13 = vld [vmem:[%s7586_s23 + $0x62] sm:$0xff] }
 0x17b   : > { %v978_v20 = vadd.f32 %v977_v18, %v798_v16  ;;  %v1623_v16 = vpack.c.bf16 %v1586_v4, %v1585_v3  ;;  %v2478_v26 = vpack.c.bf16 %v2441_v13, %v2440_v11 }
 0x17c   : > { %v7892_v23 = vadd.f32 %v1504_v17, %v1281_v15 }
 0x181   : > { %v1221_v36 = vpop.f32.mrf.mxu2  ;;  %v801_v31 = vpop.f32.mrf.mxu0 }
 0x182   : > { %v1282_v41 = vadd.f32 %v1221_v36, %v978_v20  ;;  %v1506_v42 = vpop.f32.mrf.mxu3  ;;  %v980_v44 = vpop.f32.mrf.mxu1  ;;  %v2193_v20 = vpack.c.bf16 %v2156_v10, %v2155_v8 }
 0x183   : > { %v981_v49 = vadd.f32 %v980_v44, %v801_v31  ;;  %v1587_v44 = vld [vmem:[%s7586_s23 + $0x58] sm:$0xff] }
 0x184   : > { %v7900_v51 = vadd.f32 %v1506_v42, %v1282_v41  ;;  %7097 = vmatmul.msk.bf16.gmra.mxu0 %vm649_vm1, %v1622_v40 }
 0x185   : > { %7119 = vmatmul.msk.bf16.gmra.mxu1 %vm649_vm1, %v2191_v5 }
 0x186   : > { %7141 = vmatmul.msk.bf16.gmra.mxu2 %vm649_vm1, %v2192_v43  ;;  %7163 = vmatmul.msk.bf16.gmra.mxu3 %vm649_vm1, %v2477_v46  ;;  %v1588_v46 = vld [vmem:[%s7586_s23 + $0x60] sm:$0xff] }
 0x189   : > { %v1224_v52 = vpop.f32.mrf.mxu2  ;;  %v803_v56 = vpop.f32.mrf.mxu0 }
 0x18a   : > { %v1283_v55 = vadd.f32 %v1224_v52, %v981_v49  ;;  %v1509_v57 = vpop.f32.mrf.mxu3  ;;  %v982_v59 = vpop.f32.mrf.mxu1  ;;  %v2157_v49 = vld [vmem:[%s7586_s23 + $0x69] sm:$0xff]  ;;  %v2158_v52 = vld [vmem:[%s7586_s23 + $0x71] sm:$0xff] }
 0x18b   : > { %v983_v0 = vadd.f32 %v982_v59, %v803_v56  ;;  %v2443_v56 = vld [vmem:[%s7586_s23 + $0x72] sm:$0xff]  ;;  %v1624_v59 = vpack.c.bf16 %v1588_v46, %v1587_v44  ;;  %v2194_v4 = vpack.c.bf16 %v2158_v52, %v2157_v49 }
 0x18c   : > { %v7906_v1 = vadd.f32 %v1509_v57, %v1283_v55  ;;  %v2442_v55 = vld [vmem:[%s7586_s23 + $0x6a] sm:$0xff] }
 0x18d   : > { %v2479_v10 = vpack.c.bf16 %v2443_v56, %v2442_v55 }
 0x191   : > { %v1226_v15 = vpop.f32.mrf.mxu2  ;;  %v806_v5 = vpop.f32.mrf.mxu0 }
 0x192   : > { %v1284_v17 = vadd.f32 %v1226_v15, %v983_v0  ;;  %v1511_v18 = vpop.f32.mrf.mxu3  ;;  %v985_v25 = vpop.f32.mrf.mxu1 }
 0x193   : > { %v986_v27 = vadd.f32 %v985_v25, %v806_v5 }
 0x194   : > { %v7914_v33 = vadd.f32 %v1511_v18, %v1284_v17  ;;  %7098 = vmatmul.msk.bf16.gmra.mxu0 %vm649_vm1, %v1623_v16 }
 0x195   : > { %7120 = vmatmul.msk.bf16.gmra.mxu1 %vm649_vm1, %v2192_v43 }
 0x196   : > { %7142 = vmatmul.msk.bf16.gmra.mxu2 %vm649_vm1, %v2193_v20  ;;  %7164 = vmatmul.msk.bf16.gmra.mxu3 %vm649_vm1, %v2478_v26 }
 0x199   : > { %v1229_v34 = vpop.f32.mrf.mxu2  ;;  %v808_v36 = vpop.f32.mrf.mxu0 }
 0x19a   : > { %v1285_v35 = vadd.f32 %v1229_v34, %v986_v27  ;;  %v1514_v40 = vpop.f32.mrf.mxu3  ;;  %v987_v41 = vpop.f32.mrf.mxu1  ;;  %v1589_v27 = vld [vmem:[%s7586_s23 + $0x68] sm:$0xff]  ;;  %v1590_v34 = vld [vmem:[%s7586_s23 + $0x70] sm:$0xff] }
 0x19b   : > { %v988_v31 = vadd.f32 %v987_v41, %v808_v36  ;;  %v2160_v36 = vld [vmem:[%s7586_s23 + $0x81] sm:$0xff]  ;;  %v1625_v44 = vpack.c.bf16 %v1590_v34, %v1589_v27  ;;  %v2447_v27 = vld [vmem:[%s7586_s23 + $0x92] sm:$0xff] }
 0x19c   : > { %v7920_v42 = vadd.f32 %v1514_v40, %v1285_v35  ;;  %v2159_v35 = vld [vmem:[%s7586_s23 + $0x79] sm:$0xff]  ;;  %v2445_v41 = vld [vmem:[%s7586_s23 + $0x82] sm:$0xff] }
 0x19d   : > { %v2444_v40 = vld [vmem:[%s7586_s23 + $0x7a] sm:$0xff]  ;;  %v2195_v52 = vpack.c.bf16 %v2160_v36, %v2159_v35 }
 0x19e   : > { %v2480_v56 = vpack.c.bf16 %v2445_v41, %v2444_v40 }
 0x1a1   : > { %v1231_v57 = vpop.f32.mrf.mxu2  ;;  %v811_v43 = vpop.f32.mrf.mxu0 }
 0x1a2   : > { %v1286_v0 = vadd.f32 %v1231_v57, %v988_v31  ;;  %v1516_v3 = vpop.f32.mrf.mxu3  ;;  %v990_v8 = vpop.f32.mrf.mxu1 }
 0x1a3   : > { %v991_v11 = vadd.f32 %v990_v8, %v811_v43 }
 0x1a4   : > { %v7928_v13 = vadd.f32 %v1516_v3, %v1286_v0  ;;  %7099 = vmatmul.msk.bf16.gmra.mxu0 %vm649_vm1, %v1624_v59 }
 0x1a5   : > { %7121 = vmatmul.msk.bf16.gmra.mxu1 %vm649_vm1, %v2193_v20 }
 0x1a6   : > { %7143 = vmatmul.msk.bf16.gmra.mxu2 %vm649_vm1, %v2194_v4  ;;  %7165 = vmatmul.msk.bf16.gmra.mxu3 %vm649_vm1, %v2479_v10 }
 0x1a9   : > { %v1234_v15 = vpop.f32.mrf.mxu2  ;;  %v813_v17 = vpop.f32.mrf.mxu0 }
 0x1aa   : > { %v1287_v16 = vadd.f32 %v1234_v15, %v991_v11  ;;  %v1519_v5 = vpop.f32.mrf.mxu3  ;;  %v992_v18 = vpop.f32.mrf.mxu1 }
 0x1ab   : > { %v993_v25 = vadd.f32 %v992_v18, %v813_v17  ;;  %v1592_v17 = vld [vmem:[%s7586_s23 + $0x80] sm:$0xff]  ;;  %v2162_v18 = vld [vmem:[%s7586_s23 + $0x91] sm:$0xff] }
 0x1ac   : > { %v7934_v26 = vadd.f32 %v1519_v5, %v1287_v16  ;;  %v1591_v16 = vld [vmem:[%s7586_s23 + $0x78] sm:$0xff]  ;;  %v2161_v5 = vld [vmem:[%s7586_s23 + $0x89] sm:$0xff] }
 0x1ad   : > { %v1626_v35 = vpack.c.bf16 %v1592_v17, %v1591_v16  ;;  %v2196_v41 = vpack.c.bf16 %v2162_v18, %v2161_v5  ;;  %v2164_v17 = vld [vmem:[%s7586_s23 + $0xa1] sm:$0xff] }
 0x1ae   : > { %v2448_v5 = vld [vmem:[%s7586_s23 + $0x9a] sm:$0xff]  ;;  %v2449_v18 = vld [vmem:[%s7586_s23 + $0xa2] sm:$0xff] }
 0x1b1   : > { %v1236_v31 = vpop.f32.mrf.mxu2  ;;  %v816_v20 = vpop.f32.mrf.mxu0 }
 0x1b2   : > { %v1288_v46 = vadd.f32 %v1236_v31, %v993_v25  ;;  %v1521_v49 = vpop.f32.mrf.mxu3  ;;  %v995_v55 = vpop.f32.mrf.mxu1  ;;  %v2446_v25 = vld [vmem:[%s7586_s23 + $0x8a] sm:$0xff] }
 0x1b3   : > { %v996_v57 = vadd.f32 %v995_v55, %v816_v20 }
 0x1b4   : > { %v7942_v59 = vadd.f32 %v1521_v49, %v1288_v46  ;;  %7100 = vmatmul.msk.bf16.gmra.mxu0 %vm649_vm1, %v1625_v44  ;;  %v2481_v44 = vpack.c.bf16 %v2447_v27, %v2446_v25 }
 0x1b5   : > { %7122 = vmatmul.msk.bf16.gmra.mxu1 %vm649_vm1, %v2194_v4 }
 0x1b6   : > { %7144 = vmatmul.msk.bf16.gmra.mxu2 %vm649_vm1, %v2195_v52  ;;  %7166 = vmatmul.msk.bf16.gmra.mxu3 %vm649_vm1, %v2480_v56 }
 0x1b9   : > { %v1239_v0 = vpop.f32.mrf.mxu2  ;;  %v818_v3 = vpop.f32.mrf.mxu0 }
 0x1ba   : > { %v1289_v43 = vadd.f32 %v1239_v0, %v996_v57  ;;  %v1524_v8 = vpop.f32.mrf.mxu3  ;;  %v997_v10 = vpop.f32.mrf.mxu1 }
 0x1bb   : > { %v998_v11 = vadd.f32 %v997_v10, %v818_v3  ;;  %v1593_v10 = vld [vmem:[%s7586_s23 + $0x88] sm:$0xff] }
 0x1bc   : > { %v7948_v15 = vadd.f32 %v1524_v8, %v1289_v43  ;;  %v7204_v8 = vld [vmem:[%s10215_s5 + $0x8] sm:$0xff] }
 0x1bd   : > { %v3513_v16 = vpack.c.bf16 %v7204_v8, %v7204_v8 }
 0x1bf   : > { %v3579_v25 = vsel %vm3577_vm2, %v3513_v16, 0  ;;  %v2165_v16 = vld [vmem:[%s7586_s23 + $0xa9] sm:$0xff] }
 0x1c0   : > { %3588 = vmatpush.bf16.msra.mxu1 %v3579_v25 }
 0x1c1   : > { %v1241_v34 = vpop.f32.mrf.mxu2  ;;  %v821_v4 = vpop.f32.mrf.mxu0 }
 0x1c2   : > { %v1290_v36 = vadd.f32 %v1241_v34, %v998_v11  ;;  %v1526_v40 = vpop.f32.mrf.mxu3  ;;  %v1000_v31 = vpop.f32.mrf.mxu1  ;;  %v1594_v11 = vld [vmem:[%s7586_s23 + $0x90] sm:$0xff] }
 0x1c3   : > { %v1001_v46 = vadd.f32 %v1000_v31, %v821_v4  ;;  %v1627_v34 = vpack.c.bf16 %v1594_v11, %v1593_v10  ;;  %v1595_v10 = vld [vmem:[%s7586_s23 + $0x98] sm:$0xff]  ;;  %v1596_v11 = vld [vmem:[%s7586_s23 + $0xa0] sm:$0xff] }
 0x1c4   : > { %v7956_v20 = vadd.f32 %v1526_v40, %v1290_v36  ;;  %7101 = vmatmul.msk.bf16.gmra.mxu0 %vm649_vm1, %v1626_v35  ;;  %v1628_v25 = vpack.c.bf16 %v1596_v11, %v1595_v10  ;;  %v1597_v10 = vld [vmem:[%s7586_s23 + $0xa8] sm:$0xff]  ;;  %v1598_v11 = vld [vmem:[%s7586_s23 + $0xb0] sm:$0xff] }
 0x1c5   : > { %7123 = vmatmul.msk.bf16.gmra.mxu1 %vm649_vm1, %v2195_v52  ;;  %v2163_v52 = vld [vmem:[%s7586_s23 + $0x99] sm:$0xff] }
 0x1c6   : > { %7145 = vmatmul.msk.bf16.gmra.mxu2 %vm649_vm1, %v2196_v41  ;;  %7167 = vmatmul.msk.bf16.gmra.mxu3 %vm649_vm1, %v2481_v44  ;;  %v2197_v40 = vpack.c.bf16 %v2164_v17, %v2163_v52  ;;  %v2482_v44 = vpack.c.bf16 %v2449_v18, %v2448_v5  ;;  %v2166_v52 = vld [vmem:[%s7586_s23 + $0xb1] sm:$0xff] }
 0x1c7   : > { %v2450_v17 = vld [vmem:[%s7586_s23 + $0xaa] sm:$0xff]  ;;  %v2451_v5 = vld [vmem:[%s7586_s23 + $0xb2] sm:$0xff] }
 0x1c9   : > { %v1244_v49 = vpop.f32.mrf.mxu2  ;;  %v823_v56 = vpop.f32.mrf.mxu0 }
 0x1ca   : > { %v1291_v55 = vadd.f32 %v1244_v49, %v1001_v46  ;;  %v1529_v57 = vpop.f32.mrf.mxu3  ;;  %v1002_v0 = vpop.f32.mrf.mxu1 }
 0x1cb   : > { %v1003_v43 = vadd.f32 %v1002_v0, %v823_v56 }
 0x1cc   : > { %v7962_v3 = vadd.f32 %v1529_v57, %v1291_v55 }
 0x1d1   : > { %v1246_v27 = vpop.f32.mrf.mxu2  ;;  %v826_v36 = vpop.f32.mrf.mxu0 }
 0x1d2   : > { %v1292_v35 = vadd.f32 %v1246_v27, %v1003_v43  ;;  %v1531_v4 = vpop.f32.mrf.mxu3  ;;  %v1005_v31 = vpop.f32.mrf.mxu1 }
 0x1d3   : > { %v1006_v46 = vadd.f32 %v1005_v31, %v826_v36 }
 0x1d4   : > { %v7974_v49 = vadd.f32 %v1531_v4, %v1292_v35  ;;  %7102 = vmatmul.msk.bf16.gmra.mxu0 %vm649_vm1, %v1627_v34  ;;  %v2483_v4 = vpack.c.bf16 %v2451_v5, %v2450_v17  ;;  %v2452_v17 = vld [vmem:[%s7586_s23 + $0xba] sm:$0xff]  ;;  %v2453_v5 = vld [vmem:[%s7586_s23 + $0xc2] sm:$0xff] }
 0x1d5   : > { %7124 = vmatmul.msk.bf16.gmra.mxu1 %vm649_vm1, %v2196_v41  ;;  %v2198_v41 = vpack.c.bf16 %v2166_v52, %v2165_v16  ;;  %v2167_v16 = vld [vmem:[%s7586_s23 + $0xb9] sm:$0xff]  ;;  %v2168_v52 = vld [vmem:[%s7586_s23 + $0xc1] sm:$0xff] }
 0x1d6   : > { %7146 = vmatmul.msk.bf16.gmra.mxu2 %vm649_vm1, %v2197_v40  ;;  %7168 = vmatmul.msk.bf16.gmra.mxu3 %vm649_vm1, %v2482_v44 }
 0x1d9   : > { %v1249_v55 = vpop.f32.mrf.mxu2  ;;  %v828_v57 = vpop.f32.mrf.mxu0 }
 0x1da   : > { %v1293_v56 = vadd.f32 %v1249_v55, %v1006_v46  ;;  %v1534_v0 = vpop.f32.mrf.mxu3  ;;  %v1007_v43 = vpop.f32.mrf.mxu1 }
 0x1dc   : > { %v7980_v8 = vadd.f32 %v1534_v0, %v1293_v56 }
 0x1e1   : > { %v1251_v18 = vpop.f32.mrf.mxu2  ;;  %v1719_v34 = vpop.f32.mrf.mxu0 }
 0x1e2   : > { %v1536_v27 = vpop.f32.mrf.mxu3  ;;  %v1823_v35 = vadd.f32 %v1719_v34, %v7684_v47  ;;  %v2004_v36 = vpop.f32.mrf.mxu1 }
 0x1e4   : > { %v2108_v31 = vadd.f32 %v2004_v36, %v1823_v35  ;;  %7103 = vmatmul.msk.bf16.gmra.mxu0 %vm649_vm1, %v1628_v25  ;;  %v2199_v35 = vpack.c.bf16 %v2168_v52, %v2167_v16  ;;  %v1600_v16 = vld [vmem:[%s7586_s23 + $0xc0] sm:$0xff]  ;;  %v2169_v52 = vld [vmem:[%s7586_s23 + $0xc9] sm:$0xff] }
 0x1e5   : > { %7125 = vmatmul.msk.bf16.gmra.mxu1 %vm649_vm1, %v2197_v40  ;;  %v1629_v40 = vpack.c.bf16 %v1598_v11, %v1597_v10  ;;  %v1599_v11 = vld [vmem:[%s7586_s23 + $0xb8] sm:$0xff] }
 0x1e6   : > { %7147 = vmatmul.msk.bf16.gmra.mxu2 %vm649_vm1, %v2198_v41  ;;  %7169 = vmatmul.msk.bf16.gmra.mxu3 %vm649_vm1, %v2483_v4 }
 0x1e9   : > { %v2289_v44 = vpop.f32.mrf.mxu2  ;;  %v1721_v47 = vpop.f32.mrf.mxu0 }
 0x1ea   : > { %v2393_v46 = vadd.f32 %v2289_v44, %v2108_v31  ;;  %v2574_v55 = vpop.f32.mrf.mxu3  ;;  %v1824_v56 = vadd.f32 %v1721_v47, %v7692_v63  ;;  %v2006_v57 = vpop.f32.mrf.mxu1  ;;  %v2484_v63 = vpack.c.bf16 %v2453_v5, %v2452_v17  ;;  %v2170_v17 = vld [vmem:[%s7586_s23 + $0xd1] sm:$0xff] }
 0x1eb   : > { %v2454_v5 = vld [vmem:[%s7586_s23 + $0xca] sm:$0xff] }
 0x1ec   : > { %v7994_v0 = vadd.f32 %v2574_v55, %v2393_v46  ;;  %v2109_v43 = vadd.f32 %v2006_v57, %v1824_v56 }
 0x1f1   : > { %v2291_v18 = vpop.f32.mrf.mxu2  ;;  %v1724_v27 = vpop.f32.mrf.mxu0 }
 0x1f2   : > { %v2394_v25 = vadd.f32 %v2291_v18, %v2109_v43  ;;  %v2576_v34 = vpop.f32.mrf.mxu3  ;;  %v1825_v36 = vadd.f32 %v1724_v27, %v7698_v6  ;;  %v2009_v4 = vpop.f32.mrf.mxu1  ;;  %v2455_v18 = vld [vmem:[%s7586_s23 + $0xd2] sm:$0xff] }
 0x1f4   : > { %v8003_v31 = vadd.f32 %v2576_v34, %v2394_v25  ;;  %v2110_v44 = vadd.f32 %v2009_v4, %v1825_v36  ;;  %7104 = vmatmul.msk.bf16.gmra.mxu0 %vm649_vm1, %v1629_v40  ;;  %v2200_v36 = vpack.c.bf16 %v2170_v17, %v2169_v52  ;;  %v1602_v52 = vld [vmem:[%s7586_s23 + $0xd0] sm:$0xff]  ;;  %v2171_v17 = vld [vmem:[%s7586_s23 + $0xd9] sm:$0xff] }
 0x1f5   : > { %7126 = vmatmul.msk.bf16.gmra.mxu1 %vm649_vm1, %v2198_v41  ;;  %v1630_v41 = vpack.c.bf16 %v1600_v16, %v1599_v11  ;;  %v1601_v16 = vld [vmem:[%s7586_s23 + $0xc8] sm:$0xff] }
 0x1f6   : > { %7148 = vmatmul.msk.bf16.gmra.mxu2 %vm649_vm1, %v2199_v35  ;;  %7170 = vmatmul.msk.bf16.gmra.mxu3 %vm649_vm1, %v2484_v63 }
 0x1f9   : > { %v2294_v6 = vpop.f32.mrf.mxu2  ;;  %v1726_v47 = vpop.f32.mrf.mxu0 }
 0x1fa   : > { %v2395_v46 = vadd.f32 %v2294_v6, %v2110_v44  ;;  %v2579_v55 = vpop.f32.mrf.mxu3  ;;  %v1826_v56 = vadd.f32 %v1726_v47, %v7706_v22  ;;  %v2011_v57 = vpop.f32.mrf.mxu1  ;;  %v2485_v22 = vpack.c.bf16 %v2455_v18, %v2454_v5  ;;  %v2172_v5 = vld [vmem:[%s7586_s23 + $0xe1] sm:$0xff] }
 0x1fb   : > { %v2456_v18 = vld [vmem:[%s7586_s23 + $0xda] sm:$0xff] }
 0x1fc   : > { %v8010_v43 = vadd.f32 %v2579_v55, %v2395_v46  ;;  %v2111_v10 = vadd.f32 %v2011_v57, %v1826_v56 }
 0x201   : > { %v2296_v40 = vpop.f32.mrf.mxu2  ;;  %v1729_v27 = vpop.f32.mrf.mxu0 }
 0x202   : > { %v2396_v25 = vadd.f32 %v2296_v40, %v2111_v10  ;;  %v2581_v34 = vpop.f32.mrf.mxu3  ;;  %v1827_v4 = vadd.f32 %v1729_v27, %v7712_v29  ;;  %v2014_v63 = vpop.f32.mrf.mxu1  ;;  %v2457_v40 = vld [vmem:[%s7586_s23 + $0xe2] sm:$0xff] }
 0x204   : > { %v8019_v44 = vadd.f32 %v2581_v34, %v2396_v25  ;;  %v2112_v6 = vadd.f32 %v2014_v63, %v1827_v4  ;;  %7105 = vmatmul.msk.bf16.gmra.mxu0 %vm649_vm1, %v1630_v41  ;;  %v2201_v4 = vpack.c.bf16 %v2172_v5, %v2171_v17  ;;  %v1604_v17 = vld [vmem:[%s7586_s23 + $0xe0] sm:$0xff]  ;;  %v2173_v5 = vld [vmem:[%s7586_s23 + $0xe9] sm:$0xff] }
 0x205   : > { %7127 = vmatmul.msk.bf16.gmra.mxu1 %vm649_vm1, %v2199_v35  ;;  %v1631_v35 = vpack.c.bf16 %v1602_v52, %v1601_v16  ;;  %v1603_v52 = vld [vmem:[%s7586_s23 + $0xd8] sm:$0xff] }
 0x206   : > { %7149 = vmatmul.msk.bf16.gmra.mxu2 %vm649_vm1, %v2200_v36  ;;  %7171 = vmatmul.msk.bf16.gmra.mxu3 %vm649_vm1, %v2485_v22 }
 0x209   : > { %v2299_v29 = vpop.f32.mrf.mxu2  ;;  %v1731_v47 = vpop.f32.mrf.mxu0 }
 0x20a   : > { %v2397_v46 = vadd.f32 %v2299_v29, %v2112_v6  ;;  %v2584_v55 = vpop.f32.mrf.mxu3  ;;  %v1828_v56 = vadd.f32 %v1731_v47, %v7720_v45  ;;  %v2016_v57 = vpop.f32.mrf.mxu1  ;;  %v2486_v45 = vpack.c.bf16 %v2457_v40, %v2456_v18  ;;  %v2174_v18 = vld [vmem:[%s7586_s23 + $0xf1] sm:$0xff] }
 0x20b   : > { %v2458_v40 = vld [vmem:[%s7586_s23 + $0xea] sm:$0xff] }
 0x20c   : > { %v8026_v10 = vadd.f32 %v2584_v55, %v2397_v46  ;;  %v2113_v11 = vadd.f32 %v2016_v57, %v1828_v56 }
 0x211   : > { %v2301_v41 = vpop.f32.mrf.mxu2  ;;  %v1734_v27 = vpop.f32.mrf.mxu0 }
 0x212   : > { %v2398_v25 = vadd.f32 %v2301_v41, %v2113_v11  ;;  %v2586_v34 = vpop.f32.mrf.mxu3  ;;  %v1829_v63 = vadd.f32 %v1734_v27, %v7726_v53  ;;  %v2019_v22 = vpop.f32.mrf.mxu1  ;;  %v2459_v41 = vld [vmem:[%s7586_s23 + $0xf2] sm:$0xff] }
 0x214   : > { %v8035_v6 = vadd.f32 %v2586_v34, %v2398_v25  ;;  %v2114_v29 = vadd.f32 %v2019_v22, %v1829_v63  ;;  %7106 = vmatmul.msk.bf16.gmra.mxu0 %vm649_vm1, %v1631_v35  ;;  %v2202_v63 = vpack.c.bf16 %v2174_v18, %v2173_v5  ;;  %v1606_v5 = vld [vmem:[%s7586_s23 + $0xf0] sm:$0xff]  ;;  %v2175_v18 = vld [vmem:[%s7586_s23 + $0xf9] sm:$0xff] }
 0x215   : > { %7128 = vmatmul.msk.bf16.gmra.mxu1 %vm649_vm1, %v2200_v36  ;;  %v1632_v36 = vpack.c.bf16 %v1604_v17, %v1603_v52  ;;  %v1605_v17 = vld [vmem:[%s7586_s23 + $0xe8] sm:$0xff] }
 0x216   : > { %7150 = vmatmul.msk.bf16.gmra.mxu2 %vm649_vm1, %v2201_v4  ;;  %7172 = vmatmul.msk.bf16.gmra.mxu3 %vm649_vm1, %v2486_v45 }
 0x219   : > { %v2304_v53 = vpop.f32.mrf.mxu2  ;;  %v1736_v47 = vpop.f32.mrf.mxu0 }
 0x21a   : > { %v2399_v46 = vadd.f32 %v2304_v53, %v2114_v29  ;;  %v2589_v55 = vpop.f32.mrf.mxu3  ;;  %v1830_v56 = vadd.f32 %v1736_v47, %v7734_v7  ;;  %v2021_v57 = vpop.f32.mrf.mxu1  ;;  %v2487_v7 = vpack.c.bf16 %v2459_v41, %v2458_v40  ;;  %v2176_v40 = vld [vmem:[%s7586_s23 + $0x101] sm:$0xff] }
 0x21b   : > { %v2460_v41 = vld [vmem:[%s7586_s23 + $0xfa] sm:$0xff] }
 0x21c   : > { %v8042_v11 = vadd.f32 %v2589_v55, %v2399_v46  ;;  %v2115_v16 = vadd.f32 %v2021_v57, %v1830_v56 }
 0x221   : > { %v2306_v35 = vpop.f32.mrf.mxu2  ;;  %v1739_v27 = vpop.f32.mrf.mxu0 }
 0x222   : > { %v2400_v25 = vadd.f32 %v2306_v35, %v2115_v16  ;;  %v2591_v34 = vpop.f32.mrf.mxu3  ;;  %v1831_v22 = vadd.f32 %v1739_v27, %v7740_v14  ;;  %v2024_v45 = vpop.f32.mrf.mxu1  ;;  %v2461_v35 = vld [vmem:[%s7586_s23 + $0x102] sm:$0xff] }
 0x224   : > { %v8051_v29 = vadd.f32 %v2591_v34, %v2400_v25  ;;  %v2116_v53 = vadd.f32 %v2024_v45, %v1831_v22  ;;  %7107 = vmatmul.msk.bf16.gmra.mxu0 %vm649_vm1, %v1632_v36  ;;  %v2203_v22 = vpack.c.bf16 %v2176_v40, %v2175_v18  ;;  %v1608_v18 = vld [vmem:[%s7586_s23 + $0x100] sm:$0xff]  ;;  %v7480_v40 = vmov 0  }
 0x225   : > { %7129 = vmatmul.msk.bf16.gmra.mxu1 %vm649_vm1, %v2201_v4  ;;  %v1633_v4 = vpack.c.bf16 %v1606_v5, %v1605_v17  ;;  %v1607_v5 = vld [vmem:[%s7586_s23 + $0xf8] sm:$0xff]  ;;  %7462 = vset.pattern.permute.xlu0 %v7480_v40 }
 0x226   : > { %7151 = vmatmul.msk.bf16.gmra.mxu2 %vm649_vm1, %v2202_v63  ;;  %7173 = vmatmul.msk.bf16.gmra.mxu3 %vm649_vm1, %v2487_v7 }
 0x227   : > { %7463 = vset.pattern.permute.xlu1 %v7480_v40  ;;  %7464 = vset.pattern.permute.xlu2 %v7480_v40  ;;  %v481_v40 = vld [vmem:[%s10212_s2 + $0x10] sm:$0xff] }
 0x228   : > { %3102 = vperm.xlu1 %7463, %v481_v40  }
 0x229   : > { %v2309_v14 = vpop.f32.mrf.mxu2  ;;  %v1741_v47 = vpop.f32.mrf.mxu0 }
 0x22a   : > { %v2401_v46 = vadd.f32 %v2309_v14, %v2116_v53  ;;  %v2594_v55 = vpop.f32.mrf.mxu3  ;;  %v1832_v56 = vadd.f32 %v1741_v47, %v7748_v32  ;;  %v2026_v57 = vpop.f32.mrf.mxu1  ;;  %v2488_v32 = vpack.c.bf16 %v2461_v35, %v2460_v41  ;;  %v2177_v41 = vld [vmem:[%s7586_s23 + $0x109] sm:$0xff]  ;;  %v2178_v35 = vld [vmem:[%s7586_s23 + $0x111] sm:$0xff] }
 0x22c   : > { %v8058_v16 = vadd.f32 %v2594_v55, %v2401_v46  ;;  %v2117_v52 = vadd.f32 %v2026_v57, %v1832_v56 }
 0x231   : > { %v2311_v36 = vpop.f32.mrf.mxu2  ;;  %v1744_v27 = vpop.f32.mrf.mxu0 }
 0x232   : > { %v2402_v25 = vadd.f32 %v2311_v36, %v2117_v52  ;;  %v2596_v34 = vpop.f32.mrf.mxu3  ;;  %v1833_v45 = vadd.f32 %v1744_v27, %v7754_v39  ;;  %v2029_v7 = vpop.f32.mrf.mxu1  ;;  %v2462_v36 = vld [vmem:[%s7586_s23 + $0x10a] sm:$0xff] }
 0x234   : > { %v8067_v53 = vadd.f32 %v2596_v34, %v2402_v25  ;;  %v2118_v14 = vadd.f32 %v2029_v7, %v1833_v45  ;;  %7108 = vmatmul.msk.bf16.gmra.mxu0 %vm649_vm1, %v1633_v4  ;;  %v2463_v4 = vld [vmem:[%s7586_s23 + $0x112] sm:$0xff]  ;;  %v1634_v25 = vpack.c.bf16 %v1608_v18, %v1607_v5  ;;  %v2204_v7 = vpack.c.bf16 %v2178_v35, %v2177_v41  ;;  %v1609_v35 = vld [vmem:[%s7586_s23 + $0x108] sm:$0xff] }
 0x235   : > { %7130 = vmatmul.msk.bf16.gmra.mxu1 %vm649_vm1, %v2202_v63  ;;  %v479_v63 = vld [vmem:[%s10212_s2] sm:$0xff]  ;;  %v485_v41 = vld [vmem:[%s10212_s2 + $0x30] sm:$0xff] }
 0x236   : > { %7152 = vmatmul.msk.bf16.gmra.mxu2 %vm649_vm1, %v2203_v22  ;;  %7174 = vmatmul.msk.bf16.gmra.mxu3 %vm649_vm1, %v2488_v32 }
 0x237   : > { %3092 = vperm.xlu0 %7462, %v479_v63  }
 0x239   : > { %v2314_v46 = vpop.f32.mrf.mxu2  ;;  %v1746_v39 = vpop.f32.mrf.mxu0 }
 0x23a   : > { %v2403_v47 = vadd.f32 %v2314_v46, %v2118_v14  ;;  %v2599_v55 = vpop.f32.mrf.mxu3  ;;  %v1834_v56 = vadd.f32 %v1746_v39, %v7762_v58  ;;  %v2031_v57 = vpop.f32.mrf.mxu1  ;;  %v2489_v46 = vpack.c.bf16 %v2463_v4, %v2462_v36  ;;  %v1610_v36 = vld [vmem:[%s7586_s23 + $0x110] sm:$0xff]  ;;  %v2179_v4 = vld [vmem:[%s7586_s23 + $0x119] sm:$0xff] }
 0x23c   : > { %v8074_v52 = vadd.f32 %v2599_v55, %v2403_v47  ;;  %v2119_v17 = vadd.f32 %v2031_v57, %v1834_v56  ;;  %v480_v55 = vld [vmem:[%s10212_s2 + $0x8] sm:$0xff] }
 0x23f   : > { %3097 = vperm.xlu0 %7462, %v480_v55  }
 0x241   : > { %v2316_v58 = vpop.f32.mrf.mxu2  ;;  %v1749_v34 = vpop.f32.mrf.mxu0 }
 0x242   : > { %v2404_v27 = vadd.f32 %v2316_v58, %v2119_v17  ;;  %v2601_v45 = vpop.f32.mrf.mxu3  ;;  %v1835_v32 = vadd.f32 %v1749_v34, %v7768_v2  ;;  %v2034_v14 = vpop.f32.mrf.mxu1  ;;  %v2180_v58 = vld [vmem:[%s7586_s23 + $0x121] sm:$0xff]  ;;  %v1635_v34 = vpack.c.bf16 %v1610_v36, %v1609_v35 }
 0x243   : > { %v3447_v36 = vld [vmem:[%s10215_s5] sm:$0xff] }
 0x244   : > { %v8086_v47 = vadd.f32 %v2601_v45, %v2404_v27  ;;  %v2120_v39 = vadd.f32 %v2034_v14, %v1835_v32  ;;  %7109 = vmatmul.msk.bf16.gmra.mxu0 %vm649_vm1, %v1634_v25  ;;  %v2464_v25 = vld [vmem:[%s7586_s23 + $0x11a] sm:$0xff] }
 0x245   : > { %7131 = vmatmul.msk.bf16.gmra.mxu1 %vm649_vm1, %v2203_v22 }
 0x246   : > { %7153 = vmatmul.msk.bf16.gmra.mxu2 %vm649_vm1, %v2204_v7  ;;  %7175 = vmatmul.msk.bf16.gmra.mxu3 %vm649_vm1, %v2489_v46  ;;  %v2205_v46 = vpack.c.bf16 %v2180_v58, %v2179_v4  ;;  %v3448_v58 = vpack.c.bf16 %v3447_v36, %v3447_v36  ;;  %v489_v36 = vld [vmem:[%s10212_s2 + $0x50] sm:$0xff] }
 0x247   : > { %3122 = vperm.xlu0 %7462, %v485_v41  }
 0x249   : > { %v2319_v2 = vpop.f32.mrf.mxu2  ;;  %v1751_v57 = vpop.f32.mrf.mxu0 }
 0x24a   : > { %v2405_v56 = vadd.f32 %v2319_v2, %v2120_v39  ;;  %v2604_v17 = vpop.f32.mrf.mxu3  ;;  %v1836_v63 = vadd.f32 %v1751_v57, %v7776_v21  ;;  %v2036_v5 = vpop.f32.mrf.mxu1  ;;  %v2465_v21 = vld [vmem:[%s7586_s23 + $0x122] sm:$0xff] }
 0x24b   : > { %v2490_v2 = vpack.c.bf16 %v2465_v21, %v2464_v25  ;;  %v486_v25 = vld [vmem:[%s10212_s2 + $0x38] sm:$0xff]  ;;  %v491_v21 = vld [vmem:[%s10212_s2 + $0x60] sm:$0xff] }
 0x24c   : > { %v8096_v18 = vadd.f32 %v2604_v17, %v2405_v56  ;;  %v2121_v22 = vadd.f32 %v2036_v5, %v1836_v63  ;;  %v482_v17 = vld [vmem:[%s10212_s2 + $0x18] sm:$0xff]  ;;  %v488_v63 = vld [vmem:[%s10212_s2 + $0x48] sm:$0xff] }
 0x24d   : > { %3107 = vperm.xlu1 %7463, %v482_v17  }
 0x24f   : > { %3137 = vperm.xlu0 %7462, %v488_v63  }
 0x251   : > { %v2321_v27 = vpop.f32.mrf.mxu2  ;;  %v1754_v32 = vpop.f32.mrf.mxu0 }
 0x252   : > { %v2406_v45 = vadd.f32 %v2321_v27, %v2121_v22  ;;  %v2606_v14 = vpop.f32.mrf.mxu3  ;;  %v1837_v39 = vadd.f32 %v1754_v32, %v7782_v30  ;;  %v2039_v55 = vpop.f32.mrf.mxu1  ;;  %v1611_v27 = vld [vmem:[%s7586_s23 + $0x118] sm:$0xff]  ;;  %v3758_v32 = vsel %vm3577_vm2, %v3448_v58, 0 }
 0x253   : > { %3767 = vmatpush.bf16.msra.mxu2 %v3758_v32  ;;  %v497_v32 = vld [vmem:[%s10212_s2 + $0x90] sm:$0xff] }
 0x254   : > { %v8111_v56 = vadd.f32 %v2606_v14, %v2406_v45  ;;  %v2122_v57 = vadd.f32 %v2039_v55, %v1837_v39  ;;  %7110 = vmatmul.msk.bf16.gmra.mxu0 %vm649_vm1, %v1635_v34  ;;  %v1612_v34 = vld [vmem:[%s7586_s23 + $0x120] sm:$0xff]  ;;  %v2182_v45 = vld [vmem:[%s7586_s23 + $0x131] sm:$0xff] }
 0x255   : > { %7132 = vmatmul.msk.bf16.gmra.mxu1 %vm649_vm1, %v2204_v7  ;;  %3127 = vperm.xlu1 %7463, %v486_v25   ;;  %v2466_v14 = vld [vmem:[%s7586_s23 + $0x12a] sm:$0xff]  ;;  %v2467_v39 = vld [vmem:[%s7586_s23 + $0x132] sm:$0xff] }
 0x256   : > { %7154 = vmatmul.msk.bf16.gmra.mxu2 %vm649_vm1, %v2205_v46  ;;  %7176 = vmatmul.msk.bf16.gmra.mxu3 %vm649_vm1, %v2490_v2  ;;  %v1636_v2 = vpack.c.bf16 %v1612_v34, %v1611_v27 }
 0x257   : > { %3152 = vperm.xlu0 %7462, %v491_v21  }
 0x259   : > { %v2324_v30 = vpop.f32.mrf.mxu2  ;;  %v1756_v22 = vpop.f32.mrf.mxu0 }
 0x25a   : > { %v2407_v5 = vadd.f32 %v2324_v30, %v2122_v57  ;;  %v2609_v7 = vpop.f32.mrf.mxu3  ;;  %v1838_v40 = vadd.f32 %v1756_v22, %v7794_v54  ;;  %v2041_v41 = vpop.f32.mrf.mxu1  ;;  %v2181_v54 = vld [vmem:[%s7586_s23 + $0x129] sm:$0xff] }
 0x25b   : > { %v2206_v30 = vpack.c.bf16 %v2182_v45, %v2181_v54  ;;  %v492_v45 = vld [vmem:[%s10212_s2 + $0x68] sm:$0xff] }
 0x25c   : > { %v8124_v35 = vadd.f32 %v2609_v7, %v2407_v5  ;;  %v2123_v4 = vadd.f32 %v2041_v41, %v1838_v40  ;;  %v2491_v7 = vpack.c.bf16 %v2467_v39, %v2466_v14  ;;  %v1613_v14 = vld [vmem:[%s7586_s23 + $0x128] sm:$0xff]  ;;  %v1614_v39 = vld [vmem:[%s7586_s23 + $0x130] sm:$0xff] }
 0x25d   : > { %3142 = vperm.xlu1 %7463, %v489_v36  }
 0x261   : > { %v2326_v55 = vpop.f32.mrf.mxu2  ;;  %v1759_v17 = vpop.f32.mrf.mxu0 }
 0x262   : > { %v2408_v57 = vadd.f32 %v2326_v55, %v2123_v4  ;;  %v2611_v63 = vpop.f32.mrf.mxu3  ;;  %v1839_v5 = vadd.f32 %v1759_v17, %v7800_v62  ;;  %v2044_v22 = vpop.f32.mrf.mxu1  ;;  %v494_v62 = vld [vmem:[%s10212_s2 + $0x78] sm:$0xff]  ;;  %v2469_v17 = vld [vmem:[%s7586_s23 + $0x142] sm:$0xff] }
 0x263   : > { %3167 = vperm.xlu0 %7462, %v494_v62   ;;  %v2183_v55 = vld [vmem:[%s7586_s23 + $0x139] sm:$0xff] }
 0x264   : > { %v8143_v40 = vadd.f32 %v2611_v63, %v2408_v57  ;;  %v2124_v41 = vadd.f32 %v2044_v22, %v1839_v5  ;;  %7111 = vmatmul.msk.bf16.gmra.mxu0 %vm649_vm1, %v1636_v2  ;;  %v2184_v2 = vld [vmem:[%s7586_s23 + $0x141] sm:$0xff]  ;;  %v1637_v63 = vpack.c.bf16 %v1614_v39, %v1613_v14 }
 0x265   : > { %7133 = vmatmul.msk.bf16.gmra.mxu1 %vm649_vm1, %v2205_v46  ;;  %3157 = vperm.xlu1 %7463, %v492_v45   ;;  %v2468_v57 = vld [vmem:[%s7586_s23 + $0x13a] sm:$0xff] }
 0x266   : > { %7155 = vmatmul.msk.bf16.gmra.mxu2 %vm649_vm1, %v2206_v30  ;;  %7177 = vmatmul.msk.bf16.gmra.mxu3 %vm649_vm1, %v2491_v7  ;;  %v483_v39 = vld [vmem:[%s10212_s2 + $0x20] sm:$0xff] }
 0x267   : > { %3112 = vperm.xlu2 %7464, %v483_v39  }
 0x269   : > { %v2329_v4 = vpop.f32.mrf.mxu2  ;;  %v1761_v58 = vpop.f32.mrf.mxu0 }
 0x26a   : > { %v2409_v46 = vadd.f32 %v2329_v4, %v2124_v41  ;;  %v2614_v25 = vpop.f32.mrf.mxu3  ;;  %v1840_v21 = vadd.f32 %v1761_v58, %v7808_v19  ;;  %v2046_v27 = vpop.f32.mrf.mxu1  ;;  %v2207_v41 = vpack.c.bf16 %v2184_v2, %v2183_v55  ;;  %v2492_v4 = vpack.c.bf16 %v2469_v17, %v2468_v57  ;;  %v498_v55 = vld [vmem:[%s10212_s2 + $0x98] sm:$0xff]  ;;  %v503_v2 = vld [vmem:[%s10212_s2 + $0xc0] sm:$0xff] }
 0x26b   : > { %3182 = vperm.xlu0 %7462, %v497_v32   ;;  %v1615_v57 = vld [vmem:[%s7586_s23 + $0x138] sm:$0xff]  ;;  %v1616_v17 = vld [vmem:[%s7586_s23 + $0x140] sm:$0xff] }
 0x26c   : > { %v8156_v34 = vadd.f32 %v2614_v25, %v2409_v46  ;;  %v2125_v54 = vadd.f32 %v2046_v27, %v1840_v21  ;;  %v495_v25 = vld [vmem:[%s10212_s2 + $0x80] sm:$0xff] }
 0x26d   : > { %3172 = vperm.xlu1 %7463, %v495_v25  }
 0x271   : > { %v2331_v19 = vpop.f32.mrf.mxu2  ;;  %v1764_v22 = vpop.f32.mrf.mxu0 }
 0x272   : > { %v2410_v5 = vadd.f32 %v2331_v19, %v2125_v54  ;;  %v2616_v7 = vpop.f32.mrf.mxu3  ;;  %v1841_v36 = vadd.f32 %v1764_v22, %v7814_v28  ;;  %v2049_v62 = vpop.f32.mrf.mxu1  ;;  %v500_v28 = vld [vmem:[%s10212_s2 + $0xa8] sm:$0xff]  ;;  %v2186_v19 = vld [vmem:[%s7586_s23 + $0x151] sm:$0xff] }
 0x273   : > { %3197 = vperm.xlu0 %7462, %v500_v28  }
 0x274   : > { %v8171_v46 = vadd.f32 %v2616_v7, %v2410_v5  ;;  %v2126_v58 = vadd.f32 %v2049_v62, %v1841_v36  ;;  %7112 = vmatmul.msk.bf16.gmra.mxu0 %vm649_vm1, %v1637_v63  ;;  %v2470_v63 = vld [vmem:[%s7586_s23 + $0x14a] sm:$0xff]  ;;  %v2471_v5 = vld [vmem:[%s7586_s23 + $0x152] sm:$0xff]  ;;  %v1638_v7 = vpack.c.bf16 %v1616_v17, %v1615_v57 }
 0x275   : > { %7134 = vmatmul.msk.bf16.gmra.mxu1 %vm649_vm1, %v2206_v30  ;;  %3187 = vperm.xlu1 %7463, %v498_v55   ;;  %v2493_v28 = vpack.c.bf16 %v2471_v5, %v2470_v63  ;;  %v509_v63 = vld [vmem:[%s10212_s2 + $0xf0] sm:$0xff]  ;;  %v1617_v5 = vld [vmem:[%s7586_s23 + $0x148] sm:$0xff] }
 0x276   : > { %7156 = vmatmul.msk.bf16.gmra.mxu2 %vm649_vm1, %v2207_v41  ;;  %7178 = vmatmul.msk.bf16.gmra.mxu3 %vm649_vm1, %v2492_v4 }
 0x279   : > { %v2334_v21 = vpop.f32.mrf.mxu2  ;;  %v1766_v30 = vpop.f32.mrf.mxu0 }
 0x27a   : > { %v2411_v27 = vadd.f32 %v2334_v21, %v2126_v58  ;;  %v2619_v54 = vpop.f32.mrf.mxu3  ;;  %v8184_v45 = vadd.f32 %v1766_v30, %v7822_v50  ;;  %v8186_v32 = vpop.f32.mrf.mxu1  ;;  %v2185_v50 = vld [vmem:[%s7586_s23 + $0x149] sm:$0xff] }
 0x27b   : > { %3212 = vperm.xlu0 %7462, %v503_v2   ;;  %v2208_v4 = vpack.c.bf16 %v2186_v19, %v2185_v50  ;;  %v501_v30 = vld [vmem:[%s10212_s2 + $0xb0] sm:$0xff]  ;;  %v487_v50 = vld [vmem:[%s10212_s2 + $0x40] sm:$0xff]  ;;  %v504_v19 = vld [vmem:[%s10212_s2 + $0xc8] sm:$0xff] }
 0x27c   : > { %v8188_v14 = vadd.f32 %v2619_v54, %v2411_v27  ;;  %v484_v27 = vld [vmem:[%s10212_s2 + $0x28] sm:$0xff] }
 0x27d   : > { %3117 = vperm.xlu2 %7464, %v484_v27   ;;  %3202 = vperm.xlu1 %7463, %v501_v30  }
 0x281   : > { %v8205_v22 = vpop.f32.mrf.mxu2  ;;  %v1769_v36 = vpop.f32.mrf.mxu0 }
 0x282   : > { %v8207_v62 = vpop.f32.mrf.mxu3  ;;  %v1843_v58 = vadd.f32 %v1769_v36, %v7828_v60  ;;  %v2054_v25 = vpop.f32.mrf.mxu1  ;;  %v506_v60 = vld [vmem:[%s10212_s2 + $0xd8] sm:$0xff]  ;;  %v2188_v36 = vld [vmem:[%s7586_s23 + $0x161] sm:$0xff] }
 0x283   : > { %3227 = vperm.xlu0 %7462, %v506_v60  }
 0x284   : > { %v2128_v21 = vadd.f32 %v2054_v25, %v1843_v58  ;;  %7113 = vmatmul.msk.bf16.gmra.mxu0 %vm649_vm1, %v1638_v7  ;;  %v1618_v7 = vld [vmem:[%s7586_s23 + $0x150] sm:$0xff]  ;;  %v2472_v58 = vld [vmem:[%s7586_s23 + $0x15a] sm:$0xff]  ;;  %v2473_v25 = vld [vmem:[%s7586_s23 + $0x162] sm:$0xff] }
 0x285   : > { %7135 = vmatmul.msk.bf16.gmra.mxu1 %vm649_vm1, %v2207_v41  ;;  %3132 = vperm.xlu2 %7464, %v487_v50   ;;  %v490_v50 = vld [vmem:[%s10212_s2 + $0x58] sm:$0xff] }
 0x286   : > { %7157 = vmatmul.msk.bf16.gmra.mxu2 %vm649_vm1, %v2208_v4  ;;  %7179 = vmatmul.msk.bf16.gmra.mxu3 %vm649_vm1, %v2493_v28 }
 0x287   : > { %3217 = vperm.xlu1 %7463, %v504_v19   ;;  %v507_v19 = vld [vmem:[%s10212_s2 + $0xe0] sm:$0xff] }
 0x289   : > { %v2339_v41 = vpop.f32.mrf.mxu2  ;;  %v1771_v39 = vpop.f32.mrf.mxu0 }
 0x28a   : > { %v2413_v54 = vadd.f32 %v2339_v41, %v2128_v21  ;;  %v2624_v55 = vpop.f32.mrf.mxu3  ;;  %v8224_v2 = vadd.f32 %v1771_v39, %v7840_v24  ;;  %v8226_v57 = vpop.f32.mrf.mxu1  ;;  %v2187_v24 = vld [vmem:[%s7586_s23 + $0x159] sm:$0xff]  ;;  %v1639_v21 = vpack.c.bf16 %v1618_v7, %v1617_v5  ;;  %v2494_v39 = vpack.c.bf16 %v2473_v25, %v2472_v58 }
 0x28b   : > { %3242 = vperm.xlu0 %7462, %v509_v63   ;;  %v2209_v60 = vpack.c.bf16 %v2188_v36, %v2187_v24  ;;  %v512_v63 = vld [vmem:[%s10212_s2 + $0x108] sm:$0xff] }
 0x28c   : > { %v8228_v17 = vadd.f32 %v2624_v55, %v2413_v54 }
 0x28d   : > { %3147 = vperm.xlu2 %7464, %v490_v50  }
 0x28f   : > { %3232 = vperm.xlu1 %7463, %v507_v19  }
 0x291   : > { %v8245_v28 = vpop.f32.mrf.mxu2  ;;  %v1774_v27 = vpop.f32.mrf.mxu0 }
 0x292   : > { %v8247_v30 = vpop.f32.mrf.mxu3  ;;  %v1845_v41 = vadd.f32 %v1774_v27, %v7850_v38  ;;  %v2059_v54 = vpop.f32.mrf.mxu1  ;;  %v515_v27 = vld [vmem:[%s10212_s2 + $0x120] sm:$0xff] }
 0x293   : > { %3257 = vperm.xlu0 %7462, %v512_v63  }
 0x294   : > { %v2130_v55 = vadd.f32 %v2059_v54, %v1845_v41  ;;  %7114 = vmatmul.msk.bf16.gmra.mxu0 %vm649_vm1, %v1639_v21  ;;  %v510_v21 = vld [vmem:[%s10212_s2 + $0xf8] sm:$0xff]  ;;  %v2189_v41 = vld [vmem:[%s7586_s23 + $0x169] sm:$0xf] }
 0x295   : > { %7136 = vmatmul.msk.bf16.gmra.mxu1 %vm649_vm1, %v2208_v4  ;;  %v493_v4 = vld [vmem:[%s10212_s2 + $0x70] sm:$0xff]  ;;  %v2474_v54 = vld [vmem:[%s7586_s23 + $0x16a] sm:$0xf]  ;;  %v2210_v63 = vpack.c.bf16 %v2189_v41, %v2189_v41 }
 0x296   : > { %7158 = vmatmul.msk.bf16.gmra.mxu2 %vm649_vm1, %v2209_v60  ;;  %7180 = vmatmul.msk.bf16.gmra.mxu3 %vm649_vm1, %v2494_v39  ;;  %v1619_v60 = vld [vmem:[%s7586_s23 + $0x158] sm:$0xf] }
 0x297   : > { %3162 = vperm.xlu2 %7464, %v493_v4   ;;  %3247 = vperm.xlu1 %7463, %v510_v21   ;;  %v496_v4 = vld [vmem:[%s10212_s2 + $0x88] sm:$0xff]  ;;  %v513_v21 = vld [vmem:[%s10212_s2 + $0x110] sm:$0xff] }
 0x299   : > { %v2344_v38 = vpop.f32.mrf.mxu2  ;;  %v1776_v7 = vpop.f32.mrf.mxu0 }
 0x29a   : > { %v2415_v5 = vadd.f32 %v2344_v38, %v2130_v55  ;;  %v2629_v24 = vpop.f32.mrf.mxu3  ;;  %v8264_v36 = vadd.f32 %v1776_v7, %v7856_v61  ;;  %v8266_v58 = vpop.f32.mrf.mxu1  ;;  %v1904_v61 = vld [vmem:[%s7586_s23 + $0x159] sm:$0xf]  ;;  %v1640_v55 = vpack.c.bf16 %v1619_v60, %v1619_v60 }
 0x29b   : > { %3272 = vperm.xlu0 %7462, %v515_v27   ;;  %v1925_v38 = vpack.c.bf16 %v1904_v61, %v1904_v61  ;;  %v518_v27 = vld [vmem:[%s10212_s2 + $0x138] sm:$0xff] }
 0x29c   : > { %v8268_v25 = vadd.f32 %v2629_v24, %v2415_v5  ;;  %v2495_v24 = vpack.c.bf16 %v2474_v54, %v2474_v54 }
 0x29e   : > { %10266 = vst [vmem:[#allocation3_spill] sm:$0xff] %v8268_v25 }
 0x29f   : > { %3177 = vperm.xlu2 %7464, %v496_v4   ;;  %3262 = vperm.xlu1 %7463, %v513_v21  }
 0x2a1   : > { %v8283_v39 = vpop.f32.mrf.mxu2  ;;  %v1779_v50 = vpop.f32.mrf.mxu0 }
 0x2a2   : > { %v8285_v19 = vpop.f32.mrf.mxu3  ;;  %v1847_v5 = vadd.f32 %v1779_v50, %v7862_v9  ;;  %v2064_v7 = vpop.f32.mrf.mxu1 }
 0x2a3   : > { %3287 = vperm.xlu0 %7462, %v518_v27  }
 0x2a4   : > { %v2132_v25 = vadd.f32 %v2064_v7, %v1847_v5  ;;  %7115 = vmatmul.msk.bf16.gmra.mxu0 %vm649_vm1, %v1640_v55  ;;  %v2719_v5 = vld [vmem:[%s7586_s23 + $0x2b] sm:$0xff]  ;;  %v2720_v7 = vld [vmem:[%s7586_s23 + $0x33] sm:$0xff] }
 0x2a5   : > { %7137 = vmatmul.msk.bf16.gmra.mxu1 %vm649_vm1, %v1925_v38  ;;  %v516_v38 = vld [vmem:[%s10212_s2 + $0x128] sm:$0xff] }
 0x2a6   : > { %7159 = vmatmul.msk.bf16.gmra.mxu2 %vm649_vm1, %v2210_v63  ;;  %7181 = vmatmul.msk.bf16.gmra.mxu3 %vm649_vm1, %v2495_v24  ;;  %v499_v63 = vld [vmem:[%s10212_s2 + $0xa0] sm:$0xff] }
 0x2a7   : > { %3192 = vperm.xlu2 %7464, %v499_v63   ;;  %3277 = vperm.xlu1 %7463, %v516_v38  }
 0x2a9   : > { %v2349_v9 = vpop.f32.mrf.mxu2  ;;  %v1781_v41 = vpop.f32.mrf.mxu0 }
 0x2aa   : > { %v2417_v60 = vadd.f32 %v2349_v9, %v2132_v25  ;;  %v2634_v61 = vpop.f32.mrf.mxu3  ;;  %v8302_v54 = vadd.f32 %v1781_v41, %v7872_v37  ;;  %v8304_v55 = vpop.f32.mrf.mxu1  ;;  %v2760_v37 = vpack.c.bf16 %v2720_v7, %v2719_v5  ;;  %v519_v41 = vld [vmem:[%s10212_s2 + $0x140] sm:$0xf] }
 0x2ac   : > { %v8306_v50 = vadd.f32 %v2634_v61, %v2417_v60  ;;  %v502_v60 = vld [vmem:[%s10212_s2 + $0xb8] sm:$0xff] }
 0x2af   : > { %3207 = vperm.xlu2 %7464, %v502_v60   ;;  %3292 = vperm.xlu1 %7463, %v519_v41  }
 0x2b1   : > { %v8316_v25 = vpop.f32.mrf.mxu2  ;;  %v1784_v24 = vpop.f32.mrf.mxu0 }
 0x2b2   : > { %v8318_v4 = vpop.f32.mrf.mxu3  ;;  %v1849_v21 = vadd.f32 %v1784_v24, %v7878_v48  ;;  %v2069_v27 = vpop.f32.mrf.mxu1  ;;  %v505_v24 = vld [vmem:[%s10212_s2 + $0xd0] sm:$0xff] }
 0x2b4   : > { %v2134_v9 = vadd.f32 %v2069_v27, %v1849_v21  ;;  %7183 = vmatmul.msk.bf16.vlgmr.msra.gmra.mxu0 %vm649_vm1, %v2760_v37  ;;  %v2721_v21 = vld [vmem:[%s7586_s23 + $0x3b] sm:$0xff]  ;;  %v2722_v27 = vld [vmem:[%s7586_s23 + $0x43] sm:$0xff] }
 0x2b5   : > { %v2761_v41 = vpack.c.bf16 %v2722_v27, %v2721_v21 }
 0x2b7   : > { %3222 = vperm.xlu2 %7464, %v505_v24  }
 0x2b9   : > { %v2354_v61 = vpop.f32.mrf.mxu2  ;;  %v1786_v38 = vpop.f32.mrf.mxu0 }
 0x2ba   : > { %v2419_v63 = vadd.f32 %v2354_v61, %v2134_v9  ;;  %v2639_v48 = vpop.f32.mrf.mxu3  ;;  %v8329_v5 = vadd.f32 %v1786_v38, %v7886_v12  ;;  %v8331_v7 = vpop.f32.mrf.mxu1 }
 0x2bb   : > { %10267 = vst [vmem:[#allocation4_spill] sm:$0xff] %v8331_v7 }
 0x2bc   : > { %v8333_v37 = vadd.f32 %v2639_v48, %v2419_v63  ;;  %v508_v48 = vld [vmem:[%s10212_s2 + $0xe8] sm:$0xff] }
 0x2be   : > { %10268 = vst [vmem:[#allocation5_spill] sm:$0xff] %v8333_v37 }
 0x2bf   : > { %3237 = vperm.xlu2 %7464, %v508_v48  }
 0x2c1   : > { %v8340_v60 = vpop.f32.mrf.mxu2  ;;  %v1789_v9 = vpop.f32.mrf.mxu0 }
 0x2c2   : > { %10269 = vst [vmem:[#allocation6_spill] sm:$0xff] %v8340_v60  ;;  %v8342_v61 = vpop.f32.mrf.mxu3  ;;  %v1851_v12 = vadd.f32 %v1789_v9, %v7892_v23  ;;  %v2074_v38 = vpop.f32.mrf.mxu1  ;;  %v511_v23 = vld [vmem:[%s10212_s2 + $0x100] sm:$0xff]  ;;  %v2724_v9 = vld [vmem:[%s7586_s23 + $0x53] sm:$0xff] }
 0x2c3   : > { %10270 = vst [vmem:[#allocation7_spill] sm:$0xff] %v8342_v61 }
 0x2c4   : > { %v2136_v63 = vadd.f32 %v2074_v38, %v1851_v12  ;;  %7184 = vmatmul.msk.bf16.gmra.mxu0 %vm649_vm1, %v2761_v41  ;;  %v2723_v41 = vld [vmem:[%s7586_s23 + $0x4b] sm:$0xff] }
 0x2c5   : > { %v2762_v38 = vpack.c.bf16 %v2724_v9, %v2723_v41 }
 0x2c7   : > { %3252 = vperm.xlu2 %7464, %v511_v23  }
 0x2c9   : > { %v2359_v24 = vpop.f32.mrf.mxu2  ;;  %v1791_v60 = vpop.f32.mrf.mxu0 }
 0x2ca   : > { %v2421_v37 = vadd.f32 %v2359_v24, %v2136_v63  ;;  %v2644_v21 = vpop.f32.mrf.mxu3  ;;  %v8350_v27 = vadd.f32 %v1791_v60, %v7900_v51  ;;  %v8352_v61 = vpop.f32.mrf.mxu1  ;;  %v514_v24 = vld [vmem:[%s10212_s2 + $0x118] sm:$0xff] }
 0x2cc   : > { %v8354_v7 = vadd.f32 %v2644_v21, %v2421_v37 }
 0x2ce   : > { %10271 = vst [vmem:[#allocation8_spill] sm:$0xff] %v8354_v7 }
 0x2cf   : > { %3267 = vperm.xlu2 %7464, %v514_v24  }
 0x2d1   : > { %v8361_v12 = vpop.f32.mrf.mxu2  ;;  %v1794_v63 = vpop.f32.mrf.mxu0 }
 0x2d2   : > { %10272 = vst [vmem:[#allocation9_spill] sm:$0xff] %v8361_v12  ;;  %v8363_v48 = vpop.f32.mrf.mxu3  ;;  %v1853_v51 = vadd.f32 %v1794_v63, %v7906_v1  ;;  %v2079_v60 = vpop.f32.mrf.mxu1  ;;  %v517_v1 = vld [vmem:[%s10212_s2 + $0x130] sm:$0xff]  ;;  %v2726_v63 = vld [vmem:[%s7586_s23 + $0x63] sm:$0xff] }
 0x2d3   : > { %10273 = vst [vmem:[#allocation10_spill] sm:$0xff] %v8363_v48 }
 0x2d4   : > { %v2138_v37 = vadd.f32 %v2079_v60, %v1853_v51  ;;  %7185 = vmatmul.msk.bf16.gmra.mxu0 %vm649_vm1, %v2762_v38  ;;  %v2725_v38 = vld [vmem:[%s7586_s23 + $0x5b] sm:$0xff] }
 0x2d5   : > { %v2763_v60 = vpack.c.bf16 %v2726_v63, %v2725_v38  ;;  %v7247_v63 = vld [vmem:[%s10215_s5 + $0x10] sm:$0xff] }
 0x2d7   : > { %3282 = vperm.xlu2 %7464, %v517_v1  }
 0x2d9   : > { %v2364_v21 = vpop.f32.mrf.mxu2  ;;  %v1796_v12 = vpop.f32.mrf.mxu0 }
 0x2da   : > { %v2423_v23 = vadd.f32 %v2364_v21, %v2138_v37  ;;  %v2649_v41 = vpop.f32.mrf.mxu3  ;;  %v8371_v9 = vadd.f32 %v1796_v12, %v7914_v33  ;;  %v8373_v48 = vpop.f32.mrf.mxu1 }
 0x2db   : > { %10274 = vst [vmem:[#allocation11_spill] sm:$0xff] %v8373_v48 }
 0x2dc   : > { %v8375_v7 = vadd.f32 %v2649_v41, %v2423_v23 }
 0x2de   : > { %10275 = vst [vmem:[#allocation12_spill] sm:$0xff] %v8375_v7 }
 0x2e1   : > { %v8382_v51 = vpop.f32.mrf.mxu2  ;;  %v1799_v37 = vpop.f32.mrf.mxu0 }
 0x2e2   : > { %10276 = vst [vmem:[#allocation13_spill] sm:$0xff] %v8382_v51  ;;  %v8384_v24 = vpop.f32.mrf.mxu3  ;;  %v1855_v33 = vadd.f32 %v1799_v37, %v7920_v42  ;;  %v2084_v12 = vpop.f32.mrf.mxu1  ;;  %v2727_v42 = vld [vmem:[%s7586_s23 + $0x6b] sm:$0xff]  ;;  %v2728_v37 = vld [vmem:[%s7586_s23 + $0x73] sm:$0xff] }
 0x2e4   : > { %v2140_v21 = vadd.f32 %v2084_v12, %v1855_v33  ;;  %7186 = vmatmul.msk.bf16.gmra.mxu0 %vm649_vm1, %v2763_v60  ;;  %v3937_v33 = vpack.c.bf16 %v7247_v63, %v7247_v63 }
 0x2e6   : > { %v4002_v60 = vsel %vm3577_vm2, %v3937_v33, 0 }
 0x2e7   : > { %4011 = vmatpush.bf16.msra.mxu3 %v4002_v60  ;;  %v2730_v60 = vld [vmem:[%s7586_s23 + $0x83] sm:$0xff] }
 0x2e9   : > { %v2369_v23 = vpop.f32.mrf.mxu2  ;;  %v1801_v7 = vpop.f32.mrf.mxu0 }
 0x2ea   : > { %v2425_v41 = vadd.f32 %v2369_v23, %v2140_v21  ;;  %v2654_v48 = vpop.f32.mrf.mxu3  ;;  %v8389_v1 = vadd.f32 %v1801_v7, %v7928_v13  ;;  %v8391_v51 = vpop.f32.mrf.mxu1  ;;  %v2764_v21 = vpack.c.bf16 %v2728_v37, %v2727_v42  ;;  %v2729_v37 = vld [vmem:[%s7586_s23 + $0x7b] sm:$0xff] }
 0x2eb   : > { %10278 = vst [vmem:[#allocation15_spill] sm:$0xff] %v8391_v51 }
 0x2ec   : > { %10277 = vst [vmem:[#allocation14_spill] sm:$0xff] %v8389_v1  ;;  %v8393_v38 = vadd.f32 %v2654_v48, %v2425_v41 }
 0x2ee   : > { %10279 = vst [vmem:[#allocation16_spill] sm:$0xff] %v8393_v38 }
 0x2f1   : > { %v8401_v12 = vpop.f32.mrf.mxu2  ;;  %v1804_v13 = vpop.f32.mrf.mxu0 }
 0x2f2   : > { %10280 = vst [vmem:[#allocation17_spill] sm:$0xff] %v8401_v12  ;;  %v8403_v7 = vpop.f32.mrf.mxu3  ;;  %v1857_v48 = vadd.f32 %v1804_v13, %v7934_v26  ;;  %v2089_v23 = vpop.f32.mrf.mxu1  ;;  %v2765_v26 = vpack.c.bf16 %v2730_v60, %v2729_v37 }
 0x2f3   : > { %10281 = vst [vmem:[#allocation18_spill] sm:$0xff] %v8403_v7 }
 0x2f4   : > { %v2142_v41 = vadd.f32 %v2089_v23, %v1857_v48  ;;  %7187 = vmatmul.msk.bf16.gmra.mxu0 %vm649_vm1, %v2764_v21 }
 0x2f9   : > { %v2374_v38 = vpop.f32.mrf.mxu2  ;;  %v1806_v63 = vpop.f32.mrf.mxu0 }
 0x2fa   : > { %v2427_v51 = vadd.f32 %v2374_v38, %v2142_v41  ;;  %v2659_v1 = vpop.f32.mrf.mxu3  ;;  %v8408_v33 = vadd.f32 %v1806_v63, %v7942_v59  ;;  %v8410_v12 = vpop.f32.mrf.mxu1  ;;  %v10224_v59 = vmov 0.0  }
 0x2fb   : > { %10282 = vst [vmem:[#allocation19_spill] sm:$0xff] %v8410_v12 }
 0x2fc   : > { %v8412_v42 = vadd.f32 %v2659_v1, %v2427_v51  ;;  %3337 = vst.msk [vmem:[#allocation2] sm:$0xff] %vm3336_vm3, %v10224_v59 }
 0x2fd   : > { %3338 = vst.msk [vmem:[#allocation2 + $0x8] sm:$0xff] %vm3336_vm3, %v10224_v59 }
 0x2fe   : > { %10283 = vst [vmem:[#allocation20_spill] sm:$0xff] %v8412_v42 }
 0x2ff   : > { %3339 = vst.msk [vmem:[#allocation2 + $0x10] sm:$0xff] %vm3336_vm3, %v10224_v59 }
 0x300   : > { %3340 = vst.msk [vmem:[#allocation2 + $0x15c] sm:$0xff] %vm3336_vm3, %v10224_v59 }
 0x301   : > { %v8416_v7 = vpop.f32.mrf.mxu2  ;;  %v1809_v13 = vpop.f32.mrf.mxu0  ;;  %3341 = vst.msk [vmem:[#allocation2 + $0x164] sm:$0xff] %vm3336_vm3, %v10224_v59 }
 0x302   : > { %10284 = vst [vmem:[#allocation21_spill] sm:$0xff] %v8416_v7  ;;  %v8418_v48 = vpop.f32.mrf.mxu3  ;;  %v1859_v21 = vadd.f32 %v1809_v13, %v7948_v15  ;;  %v2094_v38 = vpop.f32.mrf.mxu1  ;;  %v2732_v13 = vld [vmem:[%s7586_s23 + $0x93] sm:$0xff] }
 0x303   : > { %10285 = vst [vmem:[#allocation22_spill] sm:$0xff] %v8418_v48 }
 0x304   : > { %v2144_v23 = vadd.f32 %v2094_v38, %v1859_v21  ;;  %7188 = vmatmul.msk.bf16.gmra.mxu0 %vm649_vm1, %v2765_v26  ;;  %3342 = vst.msk [vmem:[#allocation2 + $0x16c] sm:$0xff] %vm3336_vm3, %v10224_v59  ;;  %v2731_v26 = vld [vmem:[%s7586_s23 + $0x8b] sm:$0xff] }
 0x305   : > { %v3385_v21 = vld [vmem:[#allocation2 + $0x5] sm:$0xff]  ;;  %v2766_v12 = vpack.c.bf16 %v2732_v13, %v2731_v26 }
 0x306   : > { %v3873_v38 = vld [vmem:[#allocation2 + $0x7] sm:$0xff] }
 0x307   : > { %v3449_v59 = vld [vmem:[#allocation2 + $0x6] sm:$0xff] }
 0x309   : > { %v2379_v51 = vpop.f32.mrf.mxu2  ;;  %v1811_v1 = vpop.f32.mrf.mxu0 }
 0x30a   : > { %v2429_v15 = vadd.f32 %v2379_v51, %v2144_v23  ;;  %v2664_v41 = vpop.f32.mrf.mxu3  ;;  %v8433_v63 = vadd.f32 %v1811_v1, %v7956_v20  ;;  %v8435_v37 = vpop.f32.mrf.mxu1  ;;  %v3386_v23 = vld [vmem:[#allocation2 + $0xd] sm:$0xff] }
 0x30b   : > { %10286 = vst [vmem:[#allocation23_spill] sm:$0xff] %v8435_v37  ;;  %v3874_v51 = vld [vmem:[#allocation2 + $0xf] sm:$0xff]  ;;  %v3426_v48 = vpack.c.bf16 %v3386_v23, %v3385_v21 }
 0x30c   : > { %v8439_v60 = vadd.f32 %v2664_v41, %v2429_v15  ;;  %v3914_v7 = vpack.c.bf16 %v3874_v51, %v3873_v38  ;;  %v2733_v51 = vld [vmem:[%s7586_s23 + $0x9b] sm:$0xff] }
 0x30d   : > { %7226 = vmatmul.msk.bf16.vlgmr.msra.gmra.mxu2 %vm3336_vm3, %v3426_v48 }
 0x30e   : > { %10287 = vst [vmem:[#allocation24_spill] sm:$0xff] %v8439_v60  ;;  %7248 = vmatmul.msk.bf16.vlgmr.msra.gmra.mxu3 %vm3336_vm3, %v3914_v7  ;;  %v3450_v60 = vld [vmem:[#allocation2 + $0xe] sm:$0xff] }
 0x30f   : > { %v3490_v21 = vpack.c.bf16 %v3450_v60, %v3449_v59 }
 0x311   : > { %v8443_v42 = vpop.f32.mrf.mxu2  ;;  %v1814_v20 = vpop.f32.mrf.mxu0  ;;  %7205 = vmatmul.msk.bf16.vlgmr.msra.gmra.mxu1 %vm3336_vm3, %v3490_v21 }
 0x312   : > { %v8445_v1 = vpop.f32.mrf.mxu3  ;;  %v1861_v15 = vadd.f32 %v1814_v20, %v7962_v3  ;;  %v2099_v41 = vpop.f32.mrf.mxu1  ;;  %v2734_v20 = vld [vmem:[%s7586_s23 + $0xa3] sm:$0xff] }
 0x313   : > { %10288 = vst [vmem:[#allocation25_spill] sm:$0xff] %v8445_v1 }
 0x314   : > { %v2146_v37 = vadd.f32 %v2099_v41, %v1861_v15  ;;  %7189 = vmatmul.msk.bf16.gmra.mxu0 %vm649_vm1, %v2766_v12  ;;  %v2767_v15 = vpack.c.bf16 %v2734_v20, %v2733_v51  ;;  %v7291_v41 = vld [vmem:[%s10215_s5 + $0x20] sm:$0xff] }
 0x319   : > { %v2384_v26 = vpop.f32.mrf.mxu2  ;;  %v1816_v38 = vpop.f32.mrf.mxu0 }
 0x31a   : > { %v2431_v13 = vadd.f32 %v2384_v26, %v2146_v37  ;;  %v2669_v23 = vpop.f32.mrf.mxu3  ;;  %v8453_v48 = vadd.f32 %v1816_v38, %v7974_v49  ;;  %v8455_v7 = vpop.f32.mrf.mxu1  ;;  %v7269_v49 = vld [vmem:[%s10215_s5 + $0x18] sm:$0xff]  ;;  %v4507_v26 = vpack.c.bf16 %v7291_v41, %v7291_v41 }
 0x31b   : > { %10289 = vst [vmem:[#allocation26_spill] sm:$0xff] %v8455_v7  ;;  %v4222_v21 = vpack.c.bf16 %v7269_v49, %v7269_v49  ;;  %v2736_v7 = vld [vmem:[%s7586_s23 + $0xb3] sm:$0xff] }
 0x31c   : > { %v8457_v3 = vadd.f32 %v2669_v23, %v2431_v13 }
 0x31d   : > { %v4287_v38 = vsel %vm3577_vm2, %v4222_v21, 0 }
 0x31e   : > { %10290 = vst [vmem:[#allocation27_spill] sm:$0xff] %v8457_v3  ;;  %4296 = vmatpush.bf16.msrb.mxu0 %v4287_v38  ;;  %v2735_v3 = vld [vmem:[%s7586_s23 + $0xab] sm:$0xff] }
 0x321   : > { %v8461_v1 = vpop.f32.mrf.mxu2  ;;  %v1819_v12 = vpop.f32.mrf.mxu0 }
 0x322   : > { %10291 = vst [vmem:[#allocation28_spill] sm:$0xff] %v8461_v1  ;;  %v8463_v59 = vpop.f32.mrf.mxu3  ;;  %v1863_v60 = vadd.f32 %v1819_v12, %v7980_v8  ;;  %v2104_v37 = vpop.f32.mrf.mxu1  ;;  %v4572_v8 = vsel %vm3577_vm2, %v4507_v26, 0 }
 0x323   : > { %10292 = vst [vmem:[#allocation29_spill] sm:$0xff] %v8463_v59  ;;  %4581 = vmatpush.bf16.msrb.mxu1 %v4572_v8 }
 0x324   : > { %v2148_v13 = vadd.f32 %v2104_v37, %v1863_v60  ;;  %7190 = vmatmul.msk.bf16.gmra.mxu0 %vm649_vm1, %v2767_v15  ;;  %v8482_v15 = vld [vmem:[%s10214_s4] ss:$0 sm:$0xff]  ;;  %v2768_v60 = vpack.c.bf16 %v2736_v7, %v2735_v3 }
 0x325   : > { %v2737_v3 = vld [vmem:[%s7586_s23 + $0xbb] sm:$0xff] }
 0x329   : > { %v2389_v23 = vpop.f32.mrf.mxu2  ;;  %v1821_v20 = vpop.f32.mrf.mxu0 }
 0x32a   : > { %v2433_v51 = vadd.f32 %v2389_v23, %v2148_v13  ;;  %v2674_v12 = vpop.f32.mrf.mxu3  ;;  %v2106_v59 = vpop.f32.mrf.mxu1 }
 0x32b   : > { %v8487_v59 = vpop.permute.xlu0 %3092 }
 0x32c   : > { %v8475_v1 = vadd.f32 %v2674_v12, %v2433_v51  ;;  %10293 = vst [vmem:[#allocation30_spill] sm:$0xff] %v8487_v59  ;;  %v2738_v51 = vld [vmem:[%s7586_s23 + $0xc3] sm:$0xff] }
 0x331   : > { %v2391_v37 = vpop.f32.mrf.mxu2  ;;  %v2859_v49 = vpop.f32.mrf.mxu0 }
 0x332   : > { %v2676_v41 = vpop.f32.mrf.mxu3  ;;  %v2963_v21 = vadd.f32 %v2859_v49, %v7994_v0 }
 0x333   : > { %v8495_v0 = vpop.permute.xlu0 %3097 }
 0x334   : > { %v3008_v26 = vadd.f32 %v8482_v15, %v2963_v21  ;;  %7191 = vmatmul.msk.bf16.gmra.mxu0 %vm649_vm1, %v2768_v60  ;;  %10294 = vst [vmem:[#allocation31_spill] sm:$0xff] %v8495_v0  ;;  %v2769_v60 = vpack.c.bf16 %v2738_v51, %v2737_v3 }
 0x336   : > { %v3049_v13 = vmax.f32 %v3008_v26, 0.0 }
 0x338   : > { %v3295_v38 = vmul.f32 %v8487_v59, %v3049_v13 }
 0x339   : > { %v2861_v8 = vpop.f32.mrf.mxu0 }
 0x33a   : > { %3343 = vst.msk [vmem:[#allocation2 + $0x18] sm:$0xff] %vm3336_vm3, %v3295_v38  ;;  %v2964_v23 = vadd.f32 %v2861_v8, %v8003_v31  ;;  %v8502_v31 = vpop.permute.xlu1 %3102 }
 0x33b   : > { %10295 = vst [vmem:[#allocation32_spill] sm:$0xff] %v8502_v31 }
 0x33c   : > { %v3009_v7 = vadd.f32 %v8482_v15, %v2964_v23 }
 0x33e   : > { %v3050_v20 = vmax.f32 %v3009_v7, 0.0 }
 0x340   : > { %v3296_v12 = vmul.f32 %v8495_v0, %v3050_v20 }
 0x341   : > { %v2864_v37 = vpop.f32.mrf.mxu0  ;;  %v3451_v13 = vld [vmem:[#allocation2 + $0x16] sm:$0xff] }
 0x342   : > { %3344 = vst.msk [vmem:[#allocation2 + $0x20] sm:$0xff] %vm3336_vm3, %v3296_v12  ;;  %v2965_v49 = vadd.f32 %v2864_v37, %v8010_v43  ;;  %v3387_v38 = vld [vmem:[#allocation2 + $0x15] sm:$0xff] }
 0x343   : > { %v3875_v8 = vld [vmem:[#allocation2 + $0x17] sm:$0xff] }
 0x344   : > { %v3010_v41 = vadd.f32 %v8482_v15, %v2965_v49  ;;  %7192 = vmatmul.msk.bf16.gmra.mxu0 %vm649_vm1, %v2769_v60  ;;  %v2739_v49 = vld [vmem:[%s7586_s23 + $0xcb] sm:$0xff] }
 0x346   : > { %v3051_v21 = vmax.f32 %v3010_v41, 0.0  ;;  %v2740_v41 = vld [vmem:[%s7586_s23 + $0xd3] sm:$0xff] }
 0x348   : > { %v3297_v26 = vmul.f32 %v8502_v31, %v3051_v21  ;;  %v8516_v31 = vpop.permute.xlu1 %3107 }
 0x349   : > { %v2866_v23 = vpop.f32.mrf.mxu0  ;;  %v3452_v7 = vld [vmem:[#allocation2 + $0x1e] sm:$0xff]  ;;  %10296 = vst [vmem:[#allocation33_spill] sm:$0xff] %v8516_v31 }
 0x34a   : > { %v3388_v3 = vld [vmem:[#allocation2 + $0x1d] sm:$0xff]  ;;  %3345 = vst.msk [vmem:[#allocation2 + $0x28] sm:$0xff] %vm3336_vm3, %v3297_v26  ;;  %v2966_v43 = vadd.f32 %v2866_v23, %v8019_v44  ;;  %v3491_v20 = vpack.c.bf16 %v3452_v7, %v3451_v13  ;;  %v2770_v26 = vpack.c.bf16 %v2740_v41, %v2739_v49  ;;  %v8523_v23 = vpop.permute.xlu2 %3112 }
 0x34b   : > { %v3876_v51 = vld [vmem:[#allocation2 + $0x1f] sm:$0xff]  ;;  %v3427_v12 = vpack.c.bf16 %v3388_v3, %v3387_v38  ;;  %10297 = vst [vmem:[#allocation34_spill] sm:$0xff] %v8523_v23 }
 0x34c   : > { %v8507_v60 = vpack.c.bf16 %v3876_v51, %v3875_v8  ;;  %v3011_v37 = vadd.f32 %v8482_v15, %v2966_v43  ;;  %7206 = vmatmul.msk.bf16.gmra.mxu1 %vm3336_vm3, %v3491_v20 }
 0x34d   : > { %7227 = vmatmul.msk.bf16.gmra.mxu2 %vm3336_vm3, %v3427_v12 }
 0x34e   : > { %7249 = vmatmul.msk.bf16.gmra.mxu3 %vm3336_vm3, %v8507_v60  ;;  %v3052_v21 = vmax.f32 %v3011_v37, 0.0 }
 0x350   : > { %v3298_v44 = vmul.f32 %v8516_v31, %v3052_v21 }
 0x351   : > { %v2869_v13 = vpop.f32.mrf.mxu0  ;;  %v3453_v51 = vld [vmem:[#allocation2 + $0x26] sm:$0xff] }
 0x352   : > { %3346 = vst.msk [vmem:[#allocation2 + $0x30] sm:$0xff] %vm3336_vm3, %v3298_v44  ;;  %v2967_v38 = vadd.f32 %v2869_v13, %v8026_v10  ;;  %v3389_v43 = vld [vmem:[#allocation2 + $0x25] sm:$0xff] }
 0x353   : > { %v3877_v20 = vld [vmem:[#allocation2 + $0x27] sm:$0xff] }
 0x354   : > { %v3012_v8 = vadd.f32 %v8482_v15, %v2967_v38  ;;  %7193 = vmatmul.msk.bf16.gmra.mxu0 %vm649_vm1, %v2770_v26  ;;  %v2741_v38 = vld [vmem:[%s7586_s23 + $0xdb] sm:$0xff] }
 0x356   : > { %v3053_v7 = vmax.f32 %v3012_v8, 0.0  ;;  %v2742_v8 = vld [vmem:[%s7586_s23 + $0xe3] sm:$0xff] }
 0x358   : > { %v3299_v3 = vmul.f32 %v8523_v23, %v3053_v7  ;;  %v8537_v23 = vpop.permute.xlu2 %3117 }
 0x359   : > { %v2871_v12 = vpop.f32.mrf.mxu0  ;;  %v3454_v37 = vld [vmem:[#allocation2 + $0x2e] sm:$0xff]  ;;  %10298 = vst [vmem:[#allocation35_spill] sm:$0xff] %v8537_v23 }
 0x35a   : > { %v3390_v49 = vld [vmem:[#allocation2 + $0x2d] sm:$0xff]  ;;  %3347 = vst.msk [vmem:[#allocation2 + $0x38] sm:$0xff] %vm3336_vm3, %v3299_v3  ;;  %v2968_v10 = vadd.f32 %v2871_v12, %v8035_v6  ;;  %v3492_v21 = vpack.c.bf16 %v3454_v37, %v3453_v51  ;;  %v2771_v3 = vpack.c.bf16 %v2742_v8, %v2741_v38  ;;  %v8544_v37 = vpop.permute.xlu0 %3122 }
 0x35b   : > { %v3878_v41 = vld [vmem:[#allocation2 + $0x2f] sm:$0xff]  ;;  %v3428_v44 = vpack.c.bf16 %v3390_v49, %v3389_v43  ;;  %10299 = vst [vmem:[#allocation36_spill] sm:$0xff] %v8544_v37 }
 0x35c   : > { %v8528_v26 = vpack.c.bf16 %v3878_v41, %v3877_v20  ;;  %v3013_v13 = vadd.f32 %v8482_v15, %v2968_v10  ;;  %7207 = vmatmul.msk.bf16.gmra.mxu1 %vm3336_vm3, %v3492_v21 }
 0x35d   : > { %7228 = vmatmul.msk.bf16.gmra.mxu2 %vm3336_vm3, %v3428_v44 }
 0x35e   : > { %7250 = vmatmul.msk.bf16.gmra.mxu3 %vm3336_vm3, %v8528_v26  ;;  %v3054_v7 = vmax.f32 %v3013_v13, 0.0 }
 0x360   : > { %v3300_v6 = vmul.f32 %v8537_v23, %v3054_v7 }
 0x361   : > { %v2874_v51 = vpop.f32.mrf.mxu0  ;;  %v3455_v41 = vld [vmem:[#allocation2 + $0x36] sm:$0xff] }
 0x362   : > { %3348 = vst.msk [vmem:[#allocation2 + $0x40] sm:$0xff] %vm3336_vm3, %v3300_v6  ;;  %v2969_v43 = vadd.f32 %v2874_v51, %v8042_v11  ;;  %v3391_v10 = vld [vmem:[#allocation2 + $0x35] sm:$0xff] }
 0x363   : > { %v3879_v21 = vld [vmem:[#allocation2 + $0x37] sm:$0xff] }
 0x364   : > { %v3014_v20 = vadd.f32 %v8482_v15, %v2969_v43  ;;  %7194 = vmatmul.msk.bf16.gmra.mxu0 %vm649_vm1, %v2771_v3  ;;  %v2743_v43 = vld [vmem:[%s7586_s23 + $0xeb] sm:$0xff] }
 0x366   : > { %v3055_v12 = vmax.f32 %v3014_v20, 0.0  ;;  %v2744_v20 = vld [vmem:[%s7586_s23 + $0xf3] sm:$0xff] }
 0x368   : > { %v3301_v49 = vmul.f32 %v8544_v37, %v3055_v12  ;;  %v8558_v37 = vpop.permute.xlu1 %3127 }
 0x369   : > { %v2876_v44 = vpop.f32.mrf.mxu0  ;;  %v3456_v13 = vld [vmem:[#allocation2 + $0x3e] sm:$0xff]  ;;  %10300 = vst [vmem:[#allocation37_spill] sm:$0xff] %v8558_v37 }
 0x36a   : > { %v3392_v38 = vld [vmem:[#allocation2 + $0x3d] sm:$0xff]  ;;  %3349 = vst.msk [vmem:[#allocation2 + $0x48] sm:$0xff] %vm3336_vm3, %v3301_v49  ;;  %v2970_v11 = vadd.f32 %v2876_v44, %v8051_v29  ;;  %v3493_v7 = vpack.c.bf16 %v3456_v13, %v3455_v41  ;;  %v2772_v49 = vpack.c.bf16 %v2744_v20, %v2743_v43  ;;  %v8565_v13 = vpop.permute.xlu2 %3132 }
 0x36b   : > { %v3880_v8 = vld [vmem:[#allocation2 + $0x3f] sm:$0xff]  ;;  %v3429_v6 = vpack.c.bf16 %v3392_v38, %v3391_v10  ;;  %10301 = vst [vmem:[#allocation38_spill] sm:$0xff] %v8565_v13 }
 0x36c   : > { %v8549_v3 = vpack.c.bf16 %v3880_v8, %v3879_v21  ;;  %v3015_v51 = vadd.f32 %v8482_v15, %v2970_v11  ;;  %7208 = vmatmul.msk.bf16.gmra.mxu1 %vm3336_vm3, %v3493_v7 }
 0x36d   : > { %7229 = vmatmul.msk.bf16.gmra.mxu2 %vm3336_vm3, %v3429_v6 }
 0x36e   : > { %7251 = vmatmul.msk.bf16.gmra.mxu3 %vm3336_vm3, %v8549_v3  ;;  %v3056_v12 = vmax.f32 %v3015_v51, 0.0 }
 0x370   : > { %v3302_v29 = vmul.f32 %v8558_v37, %v3056_v12 }
 0x371   : > { %v2879_v41 = vpop.f32.mrf.mxu0  ;;  %v3457_v8 = vld [vmem:[#allocation2 + $0x46] sm:$0xff] }
 0x372   : > { %3350 = vst.msk [vmem:[#allocation2 + $0x50] sm:$0xff] %vm3336_vm3, %v3302_v29  ;;  %v2971_v10 = vadd.f32 %v2879_v41, %v8058_v16  ;;  %v3393_v11 = vld [vmem:[#allocation2 + $0x45] sm:$0xff] }
 0x373   : > { %v3881_v7 = vld [vmem:[#allocation2 + $0x47] sm:$0xff] }
 0x374   : > { %v3016_v21 = vadd.f32 %v8482_v15, %v2971_v10  ;;  %7195 = vmatmul.msk.bf16.gmra.mxu0 %vm649_vm1, %v2772_v49  ;;  %v2745_v10 = vld [vmem:[%s7586_s23 + $0xfb] sm:$0xff] }
 0x376   : > { %v3057_v44 = vmax.f32 %v3016_v21, 0.0  ;;  %v2746_v21 = vld [vmem:[%s7586_s23 + $0x103] sm:$0xff] }
 0x378   : > { %v3303_v38 = vmul.f32 %v8565_v13, %v3057_v44  ;;  %v8579_v13 = vpop.permute.xlu0 %3137 }
 0x379   : > { %v2881_v6 = vpop.f32.mrf.mxu0  ;;  %v3458_v51 = vld [vmem:[#allocation2 + $0x4e] sm:$0xff]  ;;  %10302 = vst [vmem:[#allocation39_spill] sm:$0xff] %v8579_v13 }
 0x37a   : > { %v3394_v43 = vld [vmem:[#allocation2 + $0x4d] sm:$0xff]  ;;  %3351 = vst.msk [vmem:[#allocation2 + $0x58] sm:$0xff] %vm3336_vm3, %v3303_v38  ;;  %v2972_v16 = vadd.f32 %v2881_v6, %v8067_v53  ;;  %v3494_v12 = vpack.c.bf16 %v3458_v51, %v3457_v8  ;;  %v2773_v38 = vpack.c.bf16 %v2746_v21, %v2745_v10  ;;  %v8586_v51 = vpop.permute.xlu1 %3142 }
 0x37b   : > { %v3882_v20 = vld [vmem:[#allocation2 + $0x4f] sm:$0xff]  ;;  %v3430_v29 = vpack.c.bf16 %v3394_v43, %v3393_v11  ;;  %10303 = vst [vmem:[#allocation40_spill] sm:$0xff] %v8586_v51 }
 0x37c   : > { %v8570_v49 = vpack.c.bf16 %v3882_v20, %v3881_v7  ;;  %v3017_v41 = vadd.f32 %v8482_v15, %v2972_v16  ;;  %7209 = vmatmul.msk.bf16.gmra.mxu1 %vm3336_vm3, %v3494_v12 }
 0x37d   : > { %7230 = vmatmul.msk.bf16.gmra.mxu2 %vm3336_vm3, %v3430_v29 }
 0x37e   : > { %7252 = vmatmul.msk.bf16.gmra.mxu3 %vm3336_vm3, %v8570_v49  ;;  %v3058_v44 = vmax.f32 %v3017_v41, 0.0 }
 0x380   : > { %v3304_v53 = vmul.f32 %v8579_v13, %v3058_v44 }
 0x381   : > { %v2884_v8 = vpop.f32.mrf.mxu0  ;;  %v3459_v20 = vld [vmem:[#allocation2 + $0x56] sm:$0xff] }
 0x382   : > { %3352 = vst.msk [vmem:[#allocation2 + $0x60] sm:$0xff] %vm3336_vm3, %v3304_v53  ;;  %v2973_v11 = vadd.f32 %v2884_v8, %v8074_v52  ;;  %v3395_v16 = vld [vmem:[#allocation2 + $0x55] sm:$0xff] }
 0x383   : > { %v3883_v12 = vld [vmem:[#allocation2 + $0x57] sm:$0xff] }
 0x384   : > { %v3018_v7 = vadd.f32 %v8482_v15, %v2973_v11  ;;  %7196 = vmatmul.msk.bf16.gmra.mxu0 %vm649_vm1, %v2773_v38  ;;  %v2747_v11 = vld [vmem:[%s7586_s23 + $0x10b] sm:$0xff] }
 0x386   : > { %v3059_v6 = vmax.f32 %v3018_v7, 0.0  ;;  %v2748_v7 = vld [vmem:[%s7586_s23 + $0x113] sm:$0xff] }
 0x388   : > { %v3305_v43 = vmul.f32 %v8586_v51, %v3059_v6  ;;  %v8600_v51 = vpop.permute.xlu2 %3147 }
 0x389   : > { %v2886_v29 = vpop.f32.mrf.mxu0  ;;  %v3460_v41 = vld [vmem:[#allocation2 + $0x5e] sm:$0xff]  ;;  %10304 = vst [vmem:[#allocation41_spill] sm:$0xff] %v8600_v51 }
 0x38a   : > { %v3396_v10 = vld [vmem:[#allocation2 + $0x5d] sm:$0xff]  ;;  %3353 = vst.msk [vmem:[#allocation2 + $0x68] sm:$0xff] %vm3336_vm3, %v3305_v43  ;;  %v2974_v52 = vadd.f32 %v2886_v29, %v8086_v47  ;;  %v3495_v44 = vpack.c.bf16 %v3460_v41, %v3459_v20  ;;  %v2774_v43 = vpack.c.bf16 %v2748_v7, %v2747_v11  ;;  %v8607_v41 = vpop.permute.xlu0 %3152 }
 0x38b   : > { %v3884_v21 = vld [vmem:[#allocation2 + $0x5f] sm:$0xff]  ;;  %v3431_v53 = vpack.c.bf16 %v3396_v10, %v3395_v16  ;;  %10305 = vst [vmem:[#allocation42_spill] sm:$0xff] %v8607_v41 }
 0x38c   : > { %v8591_v38 = vpack.c.bf16 %v3884_v21, %v3883_v12  ;;  %v3019_v8 = vadd.f32 %v8482_v15, %v2974_v52  ;;  %7210 = vmatmul.msk.bf16.gmra.mxu1 %vm3336_vm3, %v3495_v44 }
 0x38d   : > { %7231 = vmatmul.msk.bf16.gmra.mxu2 %vm3336_vm3, %v3431_v53 }
 0x38e   : > { %7253 = vmatmul.msk.bf16.gmra.mxu3 %vm3336_vm3, %v8591_v38  ;;  %v3060_v6 = vmax.f32 %v3019_v8, 0.0 }
 0x390   : > { %v3306_v47 = vmul.f32 %v8600_v51, %v3060_v6  ;;  %v2750_v51 = vld [vmem:[%s7586_s23 + $0x123] sm:$0xff] }
 0x391   : > { %v2889_v20 = vpop.f32.mrf.mxu0  ;;  %v3461_v21 = vld [vmem:[#allocation2 + $0x66] sm:$0xff] }
 0x392   : > { %3354 = vst.msk [vmem:[#allocation2 + $0x70] sm:$0xff] %vm3336_vm3, %v3306_v47  ;;  %v2975_v16 = vadd.f32 %v2889_v20, %v8096_v18  ;;  %v3397_v52 = vld [vmem:[#allocation2 + $0x65] sm:$0xff]  ;;  %v3590_v20 = vpop.f32.mrf.mxu1 }
 0x393   : > { %v3885_v44 = vld [vmem:[#allocation2 + $0x67] sm:$0xff] }
 0x394   : > { %v3020_v12 = vadd.f32 %v8482_v15, %v2975_v16  ;;  %7197 = vmatmul.msk.bf16.gmra.mxu0 %vm649_vm1, %v2774_v43  ;;  %v3769_v16 = vpop.f32.mrf.mxu2 }
 0x396   : > { %v3061_v29 = vmax.f32 %v3020_v12, 0.0  ;;  %v3770_v12 = vadd.f32 %v3769_v16, %v3590_v20 }
 0x398   : > { %v3307_v10 = vmul.f32 %v8607_v41, %v3061_v29  ;;  %v4013_v41 = vpop.f32.mrf.mxu3 }
 0x399   : > { %v2891_v53 = vpop.f32.mrf.mxu0  ;;  %v3462_v8 = vld [vmem:[#allocation2 + $0x6e] sm:$0xff] }
 0x39a   : > { %v3398_v11 = vld [vmem:[#allocation2 + $0x6d] sm:$0xff]  ;;  %3355 = vst.msk [vmem:[#allocation2 + $0x78] sm:$0xff] %vm3336_vm3, %v3307_v10  ;;  %v2976_v18 = vadd.f32 %v2891_v53, %v8111_v56  ;;  %v3496_v6 = vpack.c.bf16 %v3462_v8, %v3461_v21  ;;  %v2749_v10 = vld [vmem:[%s7586_s23 + $0x11b] sm:$0xff]  ;;  %v8621_v56 = vadd.f32 %v4013_v41, %v3770_v12 }
 0x39b   : > { %v3886_v7 = vld [vmem:[#allocation2 + $0x6f] sm:$0xff]  ;;  %v3432_v47 = vpack.c.bf16 %v3398_v11, %v3397_v52  ;;  %v8623_v52 = vpop.permute.xlu1 %3157  ;;  %v2775_v53 = vpack.c.bf16 %v2750_v51, %v2749_v10 }
 0x39c   : > { %v8612_v43 = vpack.c.bf16 %v3886_v7, %v3885_v44  ;;  %v3021_v29 = vadd.f32 %v8482_v15, %v2976_v18  ;;  %7211 = vmatmul.msk.bf16.gmra.mxu1 %vm3336_vm3, %v3496_v6  ;;  %10306 = vst [vmem:[#allocation43_spill] sm:$0xff] %v8623_v52  ;;  %v8630_v6 = vpop.permute.xlu2 %3162 }
 0x39d   : > { %7232 = vmatmul.msk.bf16.gmra.mxu2 %vm3336_vm3, %v3432_v47  ;;  %10307 = vst [vmem:[#allocation44_spill] sm:$0xff] %v8630_v6 }
 0x39e   : > { %7254 = vmatmul.msk.bf16.gmra.mxu3 %vm3336_vm3, %v8612_v43  ;;  %v3062_v21 = vmax.f32 %v3021_v29, 0.0 }
 0x3a0   : > { %v3308_v44 = vmul.f32 %v8623_v52, %v3062_v21 }
 0x3a1   : > { %v2894_v8 = vpop.f32.mrf.mxu0  ;;  %v3463_v47 = vld [vmem:[#allocation2 + $0x76] sm:$0xff] }
 0x3a2   : > { %3356 = vst.msk [vmem:[#allocation2 + $0x80] sm:$0xff] %vm3336_vm3, %v3308_v44  ;;  %v2977_v11 = vadd.f32 %v2894_v8, %v8124_v35  ;;  %v3399_v20 = vld [vmem:[#allocation2 + $0x75] sm:$0xff] }
 0x3a3   : > { %v3887_v16 = vld [vmem:[#allocation2 + $0x77] sm:$0xff] }
 0x3a4   : > { %v3022_v7 = vadd.f32 %v8482_v15, %v2977_v11  ;;  %7198 = vmatmul.msk.bf16.gmra.mxu0 %vm649_vm1, %v2775_v53  ;;  %v2751_v11 = vld [vmem:[%s7586_s23 + $0x12b] sm:$0xff] }
 0x3a6   : > { %v3063_v18 = vmax.f32 %v3022_v7, 0.0  ;;  %v2752_v7 = vld [vmem:[%s7586_s23 + $0x133] sm:$0xff] }
 0x3a8   : > { %v3309_v41 = vmul.f32 %v8630_v6, %v3063_v18  ;;  %v8644_v6 = vpop.permute.xlu0 %3167 }
 0x3a9   : > { %v2896_v51 = vpop.f32.mrf.mxu0  ;;  %v3464_v12 = vld [vmem:[#allocation2 + $0x7e] sm:$0xff]  ;;  %10308 = vst [vmem:[#allocation45_spill] sm:$0xff] %v8644_v6 }
 0x3aa   : > { %v3400_v29 = vld [vmem:[#allocation2 + $0x7d] sm:$0xff]  ;;  %3357 = vst.msk [vmem:[#allocation2 + $0x88] sm:$0xff] %vm3336_vm3, %v3309_v41  ;;  %v2978_v35 = vadd.f32 %v2896_v51, %v8143_v40  ;;  %v3497_v21 = vpack.c.bf16 %v3464_v12, %v3463_v47  ;;  %v2776_v41 = vpack.c.bf16 %v2752_v7, %v2751_v11 }
 0x3ab   : > { %v3888_v10 = vld [vmem:[#allocation2 + $0x7f] sm:$0xff]  ;;  %v3433_v44 = vpack.c.bf16 %v3400_v29, %v3399_v20 }
 0x3ac   : > { %v8635_v53 = vpack.c.bf16 %v3888_v10, %v3887_v16  ;;  %v3023_v8 = vadd.f32 %v8482_v15, %v2978_v35  ;;  %7212 = vmatmul.msk.bf16.gmra.mxu1 %vm3336_vm3, %v3497_v21  ;;  %v7313_v16 = vld [vmem:[%s10215_s5 + $0x28] sm:$0xff]  ;;  %v8655_v35 = vpop.permute.xlu1 %3172 }
 0x3ad   : > { %7233 = vmatmul.msk.bf16.gmra.mxu2 %vm3336_vm3, %v3433_v44  ;;  %v4792_v51 = vpack.c.bf16 %v7313_v16, %v7313_v16  ;;  %10309 = vst [vmem:[#allocation46_spill] sm:$0xff] %v8655_v35 }
 0x3ae   : > { %7255 = vmatmul.msk.bf16.gmra.mxu3 %vm3336_vm3, %v8635_v53  ;;  %v3064_v18 = vmax.f32 %v3023_v8, 0.0 }
 0x3af   : > { %v4857_v29 = vsel %vm3577_vm2, %v4792_v51, 0 }
 0x3b0   : > { %v3310_v40 = vmul.f32 %v8644_v6, %v3064_v18  ;;  %4866 = vmatpush.bf16.msrb.mxu2 %v4857_v29  ;;  %v2754_v29 = vld [vmem:[%s7586_s23 + $0x143] sm:$0xff] }
 0x3b1   : > { %v2899_v47 = vpop.f32.mrf.mxu0  ;;  %v3465_v44 = vld [vmem:[#allocation2 + $0x86] sm:$0xff] }
 0x3b2   : > { %3358 = vst.msk [vmem:[#allocation2 + $0x90] sm:$0xff] %vm3336_vm3, %v3310_v40  ;;  %v2979_v20 = vadd.f32 %v2899_v47, %v8156_v34  ;;  %v3401_v34 = vld [vmem:[#allocation2 + $0x85] sm:$0xff] }
 0x3b3   : > { %v3889_v8 = vld [vmem:[#allocation2 + $0x87] sm:$0xff] }
 0x3b4   : > { %v3024_v12 = vadd.f32 %v8482_v15, %v2979_v20  ;;  %7199 = vmatmul.msk.bf16.gmra.mxu0 %vm649_vm1, %v2776_v41 }
 0x3b6   : > { %v3065_v10 = vmax.f32 %v3024_v12, 0.0  ;;  %v2753_v12 = vld [vmem:[%s7586_s23 + $0x13b] sm:$0xff] }
 0x3b8   : > { %v3311_v21 = vmul.f32 %v8655_v35, %v3065_v10  ;;  %v8669_v35 = vpop.permute.xlu2 %3177 }
 0x3b9   : > { %v2901_v11 = vpop.f32.mrf.mxu0  ;;  %v3466_v7 = vld [vmem:[#allocation2 + $0x8e] sm:$0xff]  ;;  %10310 = vst [vmem:[#allocation47_spill] sm:$0xff] %v8669_v35 }
 0x3ba   : > { %v3402_v18 = vld [vmem:[#allocation2 + $0x8d] sm:$0xff]  ;;  %3359 = vst.msk [vmem:[#allocation2 + $0x98] sm:$0xff] %vm3336_vm3, %v3311_v21  ;;  %v2980_v41 = vadd.f32 %v2901_v11, %v8171_v46  ;;  %v3498_v47 = vpack.c.bf16 %v3466_v7, %v3465_v44  ;;  %v2777_v21 = vpack.c.bf16 %v2754_v29, %v2753_v12  ;;  %v8672_v44 = vpop.f32.mrf.mxu1 }
 0x3bb   : > { %v3890_v40 = vld [vmem:[#allocation2 + $0x8f] sm:$0xff]  ;;  %v3434_v20 = vpack.c.bf16 %v3402_v18, %v3401_v34 }
 0x3bc   : > { %v8660_v16 = vpack.c.bf16 %v3890_v40, %v3889_v8  ;;  %v3025_v51 = vadd.f32 %v8482_v15, %v2980_v41  ;;  %7213 = vmatmul.msk.bf16.gmra.mxu1 %vm3336_vm3, %v3498_v47  ;;  %v2127_v8 = vadd.f32 %v8186_v32, %v8184_v45  ;;  %v8681_v41 = vpop.permute.xlu0 %3182  ;;  %v8683_v47 = vpop.f32.mrf.mxu2 }
 0x3bd   : > { %7234 = vmatmul.msk.bf16.gmra.mxu2 %vm3336_vm3, %v3434_v20  ;;  %10311 = vst [vmem:[#allocation48_spill] sm:$0xff] %v8681_v41 }
 0x3be   : > { %7256 = vmatmul.msk.bf16.gmra.mxu3 %vm3336_vm3, %v8660_v16  ;;  %v3066_v10 = vmax.f32 %v3025_v51, 0.0  ;;  %v2412_v7 = vadd.f32 %v8205_v22, %v2127_v8  ;;  %v8686_v51 = vpop.f32.mrf.mxu3 }
 0x3c0   : > { %v3312_v46 = vmul.f32 %v8669_v35, %v3066_v10  ;;  %v2697_v20 = vadd.f32 %v8207_v62, %v2412_v7  ;;  %v8699_v35 = vpop.permute.xlu1 %3187 }
 0x3c1   : > { %v2904_v34 = vpop.f32.mrf.mxu0  ;;  %v3467_v32 = vld [vmem:[#allocation2 + $0x96] sm:$0xff]  ;;  %10312 = vst [vmem:[#allocation49_spill] sm:$0xff] %v8699_v35 }
 0x3c2   : > { %3360 = vst.msk [vmem:[#allocation2 + $0xa0] sm:$0xff] %vm3336_vm3, %v3312_v46  ;;  %v2981_v11 = vadd.f32 %v2904_v34, %v8188_v14  ;;  %v3403_v12 = vld [vmem:[#allocation2 + $0x95] sm:$0xff] }
 0x3c3   : > { %v3891_v14 = vld [vmem:[#allocation2 + $0x97] sm:$0xff] }
 0x3c4   : > { %v3026_v18 = vadd.f32 %v8482_v15, %v2981_v11  ;;  %7200 = vmatmul.msk.bf16.gmra.mxu0 %vm649_vm1, %v2777_v21 }
 0x3c6   : > { %v3067_v40 = vmax.f32 %v3026_v18, 0.0  ;;  %v2755_v18 = vld [vmem:[%s7586_s23 + $0x14b] sm:$0xff] }
 0x3c8   : > { %v3313_v45 = vmul.f32 %v8681_v41, %v3067_v40  ;;  %v2756_v40 = vld [vmem:[%s7586_s23 + $0x153] sm:$0xff] }
 0x3c9   : > { %v2906_v22 = vpop.f32.mrf.mxu0  ;;  %v3595_v29 = vpop.f32.mrf.mxu1  ;;  %v3468_v10 = vld [vmem:[#allocation2 + $0x9e] sm:$0xff] }
 0x3ca   : > { %v3404_v46 = vld [vmem:[#allocation2 + $0x9d] sm:$0xff]  ;;  %3361 = vst.msk [vmem:[#allocation2 + $0xa8] sm:$0xff] %vm3336_vm3, %v3313_v45  ;;  %v2982_v34 = vadd.f32 %v2906_v22, %v2697_v20  ;;  %v3499_v8 = vpack.c.bf16 %v3468_v10, %v3467_v32 }
 0x3cb   : > { %v3892_v21 = vld [vmem:[#allocation2 + $0x9f] sm:$0xff]  ;;  %v3435_v11 = vpack.c.bf16 %v3404_v46, %v3403_v12  ;;  %v2129_v46 = vadd.f32 %v8226_v57, %v8224_v2 }
 0x3cc   : > { %v8690_v62 = vpack.c.bf16 %v3892_v21, %v3891_v14  ;;  %v3027_v7 = vadd.f32 %v8482_v15, %v2982_v34  ;;  %7214 = vmatmul.msk.bf16.gmra.mxu1 %vm3336_vm3, %v3499_v8  ;;  %v2778_v14 = vpack.c.bf16 %v2756_v40, %v2755_v18 }
 0x3cd   : > { %7235 = vmatmul.msk.bf16.gmra.mxu2 %vm3336_vm3, %v3435_v11  ;;  %v2414_v8 = vadd.f32 %v8245_v28, %v2129_v46 }
 0x3ce   : > { %7257 = vmatmul.msk.bf16.gmra.mxu3 %vm3336_vm3, %v8690_v62  ;;  %v3068_v41 = vmax.f32 %v3027_v7, 0.0 }
 0x3cf   : > { %v2699_v18 = vadd.f32 %v8247_v30, %v2414_v8 }
 0x3d0   : > { %v3774_v45 = vpop.f32.mrf.mxu2  ;;  %v3314_v20 = vmul.f32 %v8699_v35, %v3068_v41 }
 0x3d1   : > { %v3775_v32 = vadd.f32 %v3774_v45, %v3595_v29  ;;  %v4018_v12 = vpop.f32.mrf.mxu3  ;;  %v2909_v22 = vpop.f32.mrf.mxu0  ;;  %v3469_v45 = vld [vmem:[#allocation2 + $0xa6] sm:$0xff] }
 0x3d2   : > { %v3597_v10 = vpop.f32.mrf.mxu1  ;;  %3362 = vst.msk [vmem:[#allocation2 + $0xb0] sm:$0xff] %vm3336_vm3, %v3314_v20  ;;  %v2983_v34 = vadd.f32 %v2909_v22, %v8228_v17  ;;  %v8711_v29 = vpop.permute.xlu2 %3192  ;;  %v3405_v20 = vld [vmem:[#allocation2 + $0xa5] sm:$0xff] }
 0x3d3   : > { %v8705_v21 = vadd.f32 %v4018_v12, %v3775_v32  ;;  %10313 = vst [vmem:[#allocation50_spill] sm:$0xff] %v8711_v29  ;;  %v3893_v8 = vld [vmem:[#allocation2 + $0xa7] sm:$0xff] }
 0x3d4   : > { %v3028_v11 = vadd.f32 %v8482_v15, %v2983_v34  ;;  %7201 = vmatmul.msk.bf16.gmra.mxu0 %vm649_vm1, %v2778_v14 }
 0x3d6   : > { %v3069_v41 = vmax.f32 %v3028_v11, 0.0 }
 0x3d8   : > { %v3776_v7 = vpop.f32.mrf.mxu2  ;;  %v3315_v2 = vmul.f32 %v8711_v29, %v3069_v41  ;;  %v2757_v41 = vld [vmem:[%s7586_s23 + $0x15b] sm:$0xff] }
 0x3d9   : > { %v3777_v57 = vadd.f32 %v3776_v7, %v3597_v10  ;;  %v4020_v40 = vpop.f32.mrf.mxu3  ;;  %v2911_v32 = vpop.f32.mrf.mxu0  ;;  %v3470_v28 = vld [vmem:[#allocation2 + $0xae] sm:$0xff]  ;;  %v2758_v7 = vld [vmem:[%s7586_s23 + $0x163] sm:$0xff] }
 0x3da   : > { %v3600_v17 = vpop.f32.mrf.mxu1  ;;  %v3406_v12 = vld [vmem:[#allocation2 + $0xad] sm:$0xff]  ;;  %3363 = vst.msk [vmem:[#allocation2 + $0xb8] sm:$0xff] %vm3336_vm3, %v3315_v2  ;;  %v2984_v46 = vadd.f32 %v2911_v32, %v2699_v18  ;;  %v3500_v34 = vpack.c.bf16 %v3470_v28, %v3469_v45  ;;  %v2779_v32 = vpack.c.bf16 %v2758_v7, %v2757_v41 }
 0x3db   : > { %v3894_v22 = vld [vmem:[#allocation2 + $0xaf] sm:$0xff]  ;;  %v8716_v14 = vadd.f32 %v4020_v40, %v3777_v57  ;;  %v3436_v30 = vpack.c.bf16 %v3406_v12, %v3405_v20  ;;  %v8727_v57 = vpop.permute.xlu0 %3197 }
 0x3dc   : > { %v8718_v11 = vpack.c.bf16 %v3894_v22, %v3893_v8  ;;  %v3029_v10 = vadd.f32 %v8482_v15, %v2984_v46  ;;  %7215 = vmatmul.msk.bf16.gmra.mxu1 %vm3336_vm3, %v3500_v34  ;;  %10314 = vst [vmem:[#allocation51_spill] sm:$0xff] %v8727_v57  ;;  %v2131_v22 = vadd.f32 %v8266_v58, %v8264_v36  ;;  %v10315_v34 = vld [vmem:[#allocation3_spill] sm:$0xff] }
 0x3dd   : > { %7236 = vmatmul.msk.bf16.gmra.mxu2 %vm3336_vm3, %v3436_v30 }
 0x3de   : > { %7258 = vmatmul.msk.bf16.gmra.mxu3 %vm3336_vm3, %v8718_v11  ;;  %v3070_v2 = vmax.f32 %v3029_v10, 0.0  ;;  %v2416_v8 = vadd.f32 %v8283_v39, %v2131_v22 }
 0x3e0   : > { %v3779_v18 = vpop.f32.mrf.mxu2  ;;  %v3316_v40 = vmul.f32 %v8727_v57, %v3070_v2  ;;  %v8739_v2 = vpop.permute.xlu1 %3202  ;;  %v2701_v7 = vadd.f32 %v8285_v19, %v2416_v8 }
 0x3e1   : > { %v3780_v45 = vadd.f32 %v3779_v18, %v3600_v17  ;;  %v4023_v20 = vpop.f32.mrf.mxu3  ;;  %v2914_v28 = vpop.f32.mrf.mxu0  ;;  %10316 = vst [vmem:[#allocation3_spill] sm:$0xff] %v8739_v2  ;;  %v3895_v19 = vld [vmem:[#allocation2 + $0xb7] sm:$0xff] }
 0x3e2   : > { %v3602_v12 = vpop.f32.mrf.mxu1  ;;  %3364 = vst.msk [vmem:[#allocation2 + $0xc0] sm:$0xff] %vm3336_vm3, %v3316_v40  ;;  %v2985_v30 = vadd.f32 %v2914_v28, %v10315_v34  ;;  %v3471_v40 = vld [vmem:[#allocation2 + $0xb6] sm:$0xff] }
 0x3e3   : > { %v8733_v46 = vadd.f32 %v4023_v20, %v3780_v45  ;;  %v3407_v45 = vld [vmem:[#allocation2 + $0xb5] sm:$0xff] }
 0x3e4   : > { %v3030_v10 = vadd.f32 %v8482_v15, %v2985_v30  ;;  %7202 = vmatmul.msk.bf16.gmra.mxu0 %vm649_vm1, %v2779_v32 }
 0x3e6   : > { %v3071_v17 = vmax.f32 %v3030_v10, 0.0 }
 0x3e8   : > { %v3781_v41 = vpop.f32.mrf.mxu2  ;;  %v3317_v36 = vmul.f32 %v8739_v2, %v3071_v17  ;;  %v2759_v17 = vld [vmem:[%s7586_s23 + $0x16b] sm:$0xf] }
 0x3e9   : > { %v3782_v58 = vadd.f32 %v3781_v41, %v3602_v12  ;;  %v4025_v18 = vpop.f32.mrf.mxu3  ;;  %v2916_v20 = vpop.f32.mrf.mxu0  ;;  %v3472_v39 = vld [vmem:[#allocation2 + $0xbe] sm:$0xff] }
 0x3ea   : > { %v3605_v28 = vpop.f32.mrf.mxu1  ;;  %v3408_v22 = vld [vmem:[#allocation2 + $0xbd] sm:$0xff]  ;;  %3365 = vst.msk [vmem:[#allocation2 + $0xc8] sm:$0xff] %vm3336_vm3, %v3317_v36  ;;  %v2986_v30 = vadd.f32 %v2916_v20, %v2701_v7  ;;  %v3501_v10 = vpack.c.bf16 %v3472_v39, %v3471_v40  ;;  %v8754_v36 = vpop.permute.xlu2 %3207 }
 0x3eb   : > { %v3896_v34 = vld [vmem:[#allocation2 + $0xbf] sm:$0xff]  ;;  %v8744_v32 = vadd.f32 %v4025_v18, %v3782_v58  ;;  %v3437_v57 = vpack.c.bf16 %v3408_v22, %v3407_v45  ;;  %10317 = vst [vmem:[#allocation52_spill] sm:$0xff] %v8754_v36  ;;  %v2780_v45 = vpack.c.bf16 %v2759_v17, %v2759_v17  ;;  %v2133_v22 = vadd.f32 %v8304_v55, %v8302_v54 }
 0x3ec   : > { %v8746_v8 = vpack.c.bf16 %v3896_v34, %v3895_v19  ;;  %v3031_v12 = vadd.f32 %v8482_v15, %v2986_v30  ;;  %7216 = vmatmul.msk.bf16.gmra.mxu1 %vm3336_vm3, %v3501_v10  ;;  %v8766_v19 = vpop.permute.xlu0 %3212 }
 0x3ed   : > { %7237 = vmatmul.msk.bf16.gmra.mxu2 %vm3336_vm3, %v3437_v57  ;;  %v2418_v30 = vadd.f32 %v8316_v25, %v2133_v22  ;;  %10318 = vst [vmem:[#allocation53_spill] sm:$0xff] %v8766_v19 }
 0x3ee   : > { %7259 = vmatmul.msk.bf16.gmra.mxu3 %vm3336_vm3, %v8746_v8  ;;  %v3072_v41 = vmax.f32 %v3031_v12, 0.0 }
 0x3ef   : > { %v2703_v17 = vadd.f32 %v8318_v4, %v2418_v30 }
 0x3f0   : > { %v3784_v58 = vpop.f32.mrf.mxu2  ;;  %v3318_v7 = vmul.f32 %v8754_v36, %v3072_v41 }
 0x3f1   : > { %v3785_v18 = vadd.f32 %v3784_v58, %v3605_v28  ;;  %v4028_v40 = vpop.f32.mrf.mxu3  ;;  %v2919_v20 = vpop.f32.mrf.mxu0  ;;  %v3473_v58 = vld [vmem:[#allocation2 + $0xc6] sm:$0xff] }
 0x3f2   : > { %v3607_v39 = vpop.f32.mrf.mxu1  ;;  %3366 = vst.msk [vmem:[#allocation2 + $0xd0] sm:$0xff] %vm3336_vm3, %v3318_v7  ;;  %v2987_v34 = vadd.f32 %v2919_v20, %v8306_v50  ;;  %v3409_v7 = vld [vmem:[#allocation2 + $0xc5] sm:$0xff] }
 0x3f3   : > { %v8760_v57 = vadd.f32 %v4028_v40, %v3785_v18  ;;  %v3897_v36 = vld [vmem:[#allocation2 + $0xc7] sm:$0xff] }
 0x3f4   : > { %v3032_v10 = vadd.f32 %v8482_v15, %v2987_v34  ;;  %7203 = vmatmul.msk.bf16.gmra.mxu0 %vm649_vm1, %v2780_v45 }
 0x3f6   : > { %v3073_v28 = vmax.f32 %v3032_v10, 0.0 }
 0x3f8   : > { %v3786_v12 = vpop.f32.mrf.mxu2  ;;  %v3319_v54 = vmul.f32 %v8766_v19, %v3073_v28  ;;  %v8780_v28 = vpop.permute.xlu1 %3217 }
 0x3f9   : > { %v3787_v55 = vadd.f32 %v3786_v12, %v3607_v39  ;;  %v4030_v41 = vpop.f32.mrf.mxu3  ;;  %v2921_v18 = vpop.f32.mrf.mxu0  ;;  %v3474_v40 = vld [vmem:[#allocation2 + $0xce] sm:$0xff]  ;;  %10319 = vst [vmem:[#allocation54_spill] sm:$0xff] %v8780_v28 }
 0x3fa   : > { %v3610_v50 = vpop.f32.mrf.mxu1  ;;  %v3410_v25 = vld [vmem:[#allocation2 + $0xcd] sm:$0xff]  ;;  %3367 = vst.msk [vmem:[#allocation2 + $0xd8] sm:$0xff] %vm3336_vm3, %v3319_v54  ;;  %v2988_v22 = vadd.f32 %v2921_v18, %v2703_v17  ;;  %v3502_v34 = vpack.c.bf16 %v3474_v40, %v3473_v58  ;;  %v10320_v58 = vld [vmem:[#allocation4_spill] sm:$0xff] }
 0x3fb   : > { %v3898_v20 = vld [vmem:[#allocation2 + $0xcf] sm:$0xff]  ;;  %v8771_v45 = vadd.f32 %v4030_v41, %v3787_v55  ;;  %v3438_v10 = vpack.c.bf16 %v3410_v25, %v3409_v7  ;;  %v2135_v7 = vadd.f32 %v10320_v58, %v8329_v5 }
 0x3fc   : > { %v8773_v4 = vpack.c.bf16 %v3898_v20, %v3897_v36  ;;  %v3033_v39 = vadd.f32 %v8482_v15, %v2988_v22  ;;  %7217 = vmatmul.msk.bf16.gmra.mxu1 %vm3336_vm3, %v3502_v34  ;;  %v10321_v40 = vld [vmem:[#allocation5_spill] sm:$0xff]  ;;  %v10322_v20 = vld [vmem:[#allocation6_spill] sm:$0xff] }
 0x3fd   : > { %7238 = vmatmul.msk.bf16.gmra.mxu2 %vm3336_vm3, %v3438_v10  ;;  %v2420_v22 = vadd.f32 %v10322_v20, %v2135_v7  ;;  %v8793_v10 = vpop.permute.xlu2 %3222 }
 0x3fe   : > { %7260 = vmatmul.msk.bf16.gmra.mxu3 %vm3336_vm3, %v8773_v4  ;;  %v3074_v30 = vmax.f32 %v3033_v39, 0.0  ;;  %10323 = vst [vmem:[#allocation4_spill] sm:$0xff] %v8793_v10 }
 0x400   : > { %v3789_v12 = vpop.f32.mrf.mxu2  ;;  %v3320_v17 = vmul.f32 %v8780_v28, %v3074_v30  ;;  %v10324_v30 = vld [vmem:[#allocation7_spill] sm:$0xff] }
 0x401   : > { %v3790_v54 = vadd.f32 %v3789_v12, %v3610_v50  ;;  %v4033_v55 = vpop.f32.mrf.mxu3  ;;  %v2924_v41 = vpop.f32.mrf.mxu0  ;;  %v2705_v12 = vadd.f32 %v10324_v30, %v2420_v22  ;;  %v3411_v58 = vld [vmem:[#allocation2 + $0xd5] sm:$0xff] }
 0x402   : > { %v3612_v36 = vpop.f32.mrf.mxu1  ;;  %3368 = vst.msk [vmem:[#allocation2 + $0xe0] sm:$0xff] %vm3336_vm3, %v3320_v17  ;;  %v2989_v25 = vadd.f32 %v2924_v41, %v10321_v40  ;;  %v3899_v2 = vld [vmem:[#allocation2 + $0xd7] sm:$0xff] }
 0x403   : > { %v8786_v18 = vadd.f32 %v4033_v55, %v3790_v54  ;;  %v3475_v55 = vld [vmem:[#allocation2 + $0xd6] sm:$0xff] }
 0x404   : > { %v3034_v34 = vadd.f32 %v8482_v15, %v2989_v25  ;;  %7270 = vmatmul.msk.bf16.vlgmr.msrb.gmra.mxu0 %vm3336_vm3, %v8507_v60 }
 0x406   : > { %v3075_v50 = vmax.f32 %v3034_v34, 0.0 }
 0x408   : > { %v3791_v39 = vpop.f32.mrf.mxu2  ;;  %v3321_v5 = vmul.f32 %v8793_v10, %v3075_v50 }
 0x409   : > { %v3792_v17 = vadd.f32 %v3791_v39, %v3612_v36  ;;  %v4035_v54 = vpop.f32.mrf.mxu3  ;;  %v2926_v41 = vpop.f32.mrf.mxu0  ;;  %v3476_v7 = vld [vmem:[#allocation2 + $0xde] sm:$0xff] }
 0x40a   : > { %v3615_v40 = vpop.f32.mrf.mxu1  ;;  %v3412_v20 = vld [vmem:[#allocation2 + $0xdd] sm:$0xff]  ;;  %3369 = vst.msk [vmem:[#allocation2 + $0xe8] sm:$0xff] %vm3336_vm3, %v3321_v5  ;;  %v2990_v34 = vadd.f32 %v2926_v41, %v2705_v12  ;;  %v3503_v28 = vpack.c.bf16 %v3476_v7, %v3475_v55  ;;  %v8807_v39 = vpop.permute.xlu0 %3227  ;;  %v2137_v55 = vadd.f32 %v8352_v61, %v8350_v27  ;;  %v10327_v41 = vld [vmem:[#allocation9_spill] sm:$0xff] }
 0x40b   : > { %v3900_v25 = vld [vmem:[#allocation2 + $0xdf] sm:$0xff]  ;;  %v8798_v60 = vadd.f32 %v4035_v54, %v3792_v17  ;;  %v3439_v19 = vpack.c.bf16 %v3412_v20, %v3411_v58  ;;  %10325 = vst [vmem:[#allocation5_spill] sm:$0xff] %v8807_v39 }
 0x40c   : > { %v8800_v22 = vpack.c.bf16 %v3900_v25, %v3899_v2  ;;  %v3035_v36 = vadd.f32 %v8482_v15, %v2990_v34  ;;  %7218 = vmatmul.msk.bf16.gmra.mxu1 %vm3336_vm3, %v3503_v28  ;;  %v2422_v7 = vadd.f32 %v10327_v41, %v2137_v55  ;;  %v8820_v25 = vpop.permute.xlu1 %3232 }
 0x40d   : > { %7239 = vmatmul.msk.bf16.gmra.mxu2 %vm3336_vm3, %v3439_v19  ;;  %v10326_v19 = vld [vmem:[#allocation8_spill] sm:$0xff]  ;;  %10328 = vst [vmem:[#allocation6_spill] sm:$0xff] %v8820_v25 }
 0x40e   : > { %7261 = vmatmul.msk.bf16.gmra.mxu3 %vm3336_vm3, %v8800_v22  ;;  %v3076_v50 = vmax.f32 %v3035_v36, 0.0  ;;  %v10329_v36 = vld [vmem:[#allocation10_spill] sm:$0xff] }
 0x410   : > { %v3794_v30 = vpop.f32.mrf.mxu2  ;;  %v3322_v12 = vmul.f32 %v8807_v39, %v3076_v50  ;;  %v2707_v50 = vadd.f32 %v10329_v36, %v2422_v7 }
 0x411   : > { %v3795_v5 = vadd.f32 %v3794_v30, %v3615_v40  ;;  %v4038_v17 = vpop.f32.mrf.mxu3  ;;  %v2929_v54 = vpop.f32.mrf.mxu0  ;;  %v3901_v10 = vld [vmem:[#allocation2 + $0xe7] sm:$0xff] }
 0x412   : > { %v3617_v2 = vpop.f32.mrf.mxu1  ;;  %3370 = vst.msk [vmem:[#allocation2 + $0xf0] sm:$0xff] %vm3336_vm3, %v3322_v12  ;;  %v2991_v58 = vadd.f32 %v2929_v54, %v10326_v19  ;;  %v3477_v12 = vld [vmem:[#allocation2 + $0xe6] sm:$0xff] }
 0x413   : > { %v8813_v28 = vadd.f32 %v4038_v17, %v3795_v5  ;;  %v3413_v5 = vld [vmem:[#allocation2 + $0xe5] sm:$0xff] }
 0x414   : > { %v3036_v20 = vadd.f32 %v8482_v15, %v2991_v58  ;;  %7271 = vmatmul.msk.bf16.gmra.mxu0 %vm3336_vm3, %v8528_v26 }
 0x416   : > { %v3077_v40 = vmax.f32 %v3036_v20, 0.0 }
 0x418   : > { %v3796_v34 = vpop.f32.mrf.mxu2  ;;  %v3323_v61 = vmul.f32 %v8820_v25, %v3077_v40 }
 0x419   : > { %v3797_v27 = vadd.f32 %v3796_v34, %v3617_v2  ;;  %v4040_v30 = vpop.f32.mrf.mxu3  ;;  %v2931_v17 = vpop.f32.mrf.mxu0  ;;  %v3478_v55 = vld [vmem:[#allocation2 + $0xee] sm:$0xff] }
 0x41a   : > { %v3620_v54 = vpop.f32.mrf.mxu1  ;;  %v3414_v19 = vld [vmem:[#allocation2 + $0xed] sm:$0xff]  ;;  %3371 = vst.msk [vmem:[#allocation2 + $0xf8] sm:$0xff] %vm3336_vm3, %v3323_v61  ;;  %v2992_v41 = vadd.f32 %v2931_v17, %v2707_v50  ;;  %v3504_v20 = vpack.c.bf16 %v3478_v55, %v3477_v12  ;;  %v8834_v34 = vpop.permute.xlu2 %3237  ;;  %v10331_v12 = vld [vmem:[#allocation11_spill] sm:$0xff] }
 0x41b   : > { %v3902_v58 = vld [vmem:[#allocation2 + $0xef] sm:$0xff]  ;;  %v8825_v26 = vadd.f32 %v4040_v30, %v3797_v27  ;;  %v3440_v39 = vpack.c.bf16 %v3414_v19, %v3413_v5  ;;  %10330 = vst [vmem:[#allocation7_spill] sm:$0xff] %v8834_v34 }
 0x41c   : > { %v8827_v7 = vpack.c.bf16 %v3902_v58, %v3901_v10  ;;  %v3037_v2 = vadd.f32 %v8482_v15, %v2992_v41  ;;  %7219 = vmatmul.msk.bf16.gmra.mxu1 %vm3336_vm3, %v3504_v20  ;;  %v2139_v15 = vadd.f32 %v10331_v12, %v8371_v9  ;;  %v10333_v55 = vld [vmem:[#allocation13_spill] sm:$0xff]  ;;  %v8847_v58 = vld [vmem:[%s10214_s4] ss:$0 sm:$0xff]  ;;  %v8852_v9 = vpop.permute.xlu0 %3242 }
 0x41d   : > { %7240 = vmatmul.msk.bf16.gmra.mxu2 %vm3336_vm3, %v3440_v39  ;;  %v10332_v39 = vld [vmem:[#allocation12_spill] sm:$0xff]  ;;  %10334 = vst [vmem:[#allocation8_spill] sm:$0xff] %v8852_v9 }
 0x41e   : > { %7262 = vmatmul.msk.bf16.gmra.mxu3 %vm3336_vm3, %v8827_v7  ;;  %v3078_v40 = vmax.f32 %v3037_v2, 0.0  ;;  %v2424_v19 = vadd.f32 %v10333_v55, %v2139_v15 }
 0x420   : > { %v3799_v36 = vpop.f32.mrf.mxu2  ;;  %v3324_v50 = vmul.f32 %v8834_v34, %v3078_v40  ;;  %v2709_v2 = vadd.f32 %v8384_v24, %v2424_v19 }
 0x421   : > { %v3800_v61 = vadd.f32 %v3799_v36, %v3620_v54  ;;  %v4043_v27 = vpop.f32.mrf.mxu3  ;;  %v2934_v30 = vpop.f32.mrf.mxu0  ;;  %v3903_v25 = vld [vmem:[#allocation2 + $0xf7] sm:$0xff] }
 0x422   : > { %v3622_v10 = vpop.f32.mrf.mxu1  ;;  %3372 = vst.msk [vmem:[#allocation2 + $0x100] sm:$0xff] %vm3336_vm3, %v3324_v50  ;;  %v2993_v17 = vadd.f32 %v2934_v30, %v10332_v39 }
 0x423   : > { %v8840_v5 = vadd.f32 %v4043_v27, %v3800_v61  ;;  %v3479_v61 = vld [vmem:[#allocation2 + $0xf6] sm:$0xff] }
 0x424   : > { %v3038_v54 = vadd.f32 %v8847_v58, %v2993_v17  ;;  %7272 = vmatmul.msk.bf16.gmra.mxu0 %vm3336_vm3, %v8549_v3  ;;  %v3415_v27 = vld [vmem:[#allocation2 + $0xf5] sm:$0xff] }
 0x426   : > { %v3079_v41 = vmax.f32 %v3038_v54, 0.0 }
 0x428   : > { %v3801_v20 = vpop.f32.mrf.mxu2  ;;  %v3325_v40 = vmul.f32 %v8852_v9, %v3079_v41  ;;  %v8866_v41 = vpop.permute.xlu1 %3247 }
 0x429   : > { %v3802_v36 = vadd.f32 %v3801_v20, %v3622_v10  ;;  %v4045_v50 = vpop.f32.mrf.mxu3  ;;  %v2936_v30 = vpop.f32.mrf.mxu0  ;;  %v3480_v15 = vld [vmem:[#allocation2 + $0xfe] sm:$0xff]  ;;  %10335 = vst [vmem:[#allocation9_spill] sm:$0xff] %v8866_v41 }
 0x42a   : > { %v3625_v12 = vpop.f32.mrf.mxu1  ;;  %v3416_v39 = vld [vmem:[#allocation2 + $0xfd] sm:$0xff]  ;;  %3373 = vst.msk [vmem:[#allocation2 + $0x108] sm:$0xff] %vm3336_vm3, %v3325_v40  ;;  %v2994_v55 = vadd.f32 %v2936_v30, %v2709_v2  ;;  %v3505_v54 = vpack.c.bf16 %v3480_v15, %v3479_v61  ;;  %v10336_v61 = vld [vmem:[#allocation14_spill] sm:$0xff] }
 0x42b   : > { %v3904_v17 = vld [vmem:[#allocation2 + $0xff] sm:$0xff]  ;;  %v8857_v3 = vadd.f32 %v4045_v50, %v3802_v36  ;;  %v3441_v34 = vpack.c.bf16 %v3416_v39, %v3415_v27 }
 0x42c   : > { %v8859_v24 = vpack.c.bf16 %v3904_v17, %v3903_v25  ;;  %v3039_v10 = vadd.f32 %v8847_v58, %v2994_v55  ;;  %7220 = vmatmul.msk.bf16.gmra.mxu1 %vm3336_vm3, %v3505_v54  ;;  %v10337_v27 = vld [vmem:[#allocation15_spill] sm:$0xff]  ;;  %v10339_v17 = vld [vmem:[#allocation17_spill] sm:$0xff] }
 0x42d   : > { %7241 = vmatmul.msk.bf16.gmra.mxu2 %vm3336_vm3, %v3441_v34  ;;  %v2141_v30 = vadd.f32 %v10337_v27, %v10336_v61  ;;  %v10338_v34 = vld [vmem:[#allocation16_spill] sm:$0xff] }
 0x42e   : > { %7263 = vmatmul.msk.bf16.gmra.mxu3 %vm3336_vm3, %v8859_v24  ;;  %v3080_v19 = vmax.f32 %v3039_v10, 0.0  ;;  %v8879_v10 = vpop.permute.xlu2 %3252 }
 0x42f   : > { %v2426_v55 = vadd.f32 %v10339_v17, %v2141_v30  ;;  %10340 = vst [vmem:[#allocation10_spill] sm:$0xff] %v8879_v10 }
 0x430   : > { %v3804_v20 = vpop.f32.mrf.mxu2  ;;  %v3326_v2 = vmul.f32 %v8866_v41, %v3080_v19 }
 0x431   : > { %v3805_v40 = vadd.f32 %v3804_v20, %v3625_v12  ;;  %v4048_v36 = vpop.f32.mrf.mxu3  ;;  %v2939_v50 = vpop.f32.mrf.mxu0  ;;  %v10341_v20 = vld [vmem:[#allocation18_spill] sm:$0xff]  ;;  %v3417_v27 = vld [vmem:[#allocation2 + $0x105] sm:$0xff] }
 0x432   : > { %v3627_v25 = vpop.f32.mrf.mxu1  ;;  %3374 = vst.msk [vmem:[#allocation2 + $0x110] sm:$0xff] %vm3336_vm3, %v3326_v2  ;;  %v2995_v39 = vadd.f32 %v2939_v50, %v10338_v34  ;;  %v2711_v41 = vadd.f32 %v10341_v20, %v2426_v55  ;;  %v3905_v35 = vld [vmem:[#allocation2 + $0x107] sm:$0xff] }
 0x433   : > { %v8872_v15 = vadd.f32 %v4048_v36, %v3805_v40  ;;  %v3481_v36 = vld [vmem:[#allocation2 + $0x106] sm:$0xff] }
 0x434   : > { %v3040_v54 = vadd.f32 %v8847_v58, %v2995_v39  ;;  %7273 = vmatmul.msk.bf16.gmra.mxu0 %vm3336_vm3, %v8570_v49 }
 0x436   : > { %v3081_v12 = vmax.f32 %v3040_v54, 0.0 }
 0x438   : > { %v3806_v19 = vpop.f32.mrf.mxu2  ;;  %v3327_v61 = vmul.f32 %v8879_v10, %v3081_v12 }
 0x439   : > { %v3807_v2 = vadd.f32 %v3806_v19, %v3627_v25  ;;  %v4050_v40 = vpop.f32.mrf.mxu3  ;;  %v2941_v50 = vpop.f32.mrf.mxu0  ;;  %v3482_v30 = vld [vmem:[#allocation2 + $0x10e] sm:$0xff] }
 0x43a   : > { %v3630_v34 = vpop.f32.mrf.mxu1  ;;  %v3418_v17 = vld [vmem:[#allocation2 + $0x10d] sm:$0xff]  ;;  %3375 = vst.msk [vmem:[#allocation2 + $0x118] sm:$0xff] %vm3336_vm3, %v3327_v61  ;;  %v2996_v54 = vadd.f32 %v2941_v50, %v2711_v41  ;;  %v3506_v9 = vpack.c.bf16 %v3482_v30, %v3481_v36  ;;  %v8893_v19 = vpop.permute.xlu0 %3257  ;;  %v10343_v36 = vld [vmem:[#allocation19_spill] sm:$0xff] }
 0x43b   : > { %v3906_v39 = vld [vmem:[#allocation2 + $0x10f] sm:$0xff]  ;;  %v8884_v49 = vadd.f32 %v4050_v40, %v3807_v2  ;;  %v3442_v29 = vpack.c.bf16 %v3418_v17, %v3417_v27  ;;  %10342 = vst [vmem:[#allocation11_spill] sm:$0xff] %v8893_v19  ;;  %v2143_v27 = vadd.f32 %v10343_v36, %v8408_v33 }
 0x43c   : > { %v8886_v55 = vpack.c.bf16 %v3906_v39, %v3905_v35  ;;  %v3041_v25 = vadd.f32 %v8847_v58, %v2996_v54  ;;  %7221 = vmatmul.msk.bf16.gmra.mxu1 %vm3336_vm3, %v3506_v9  ;;  %v7335_v30 = vld [vmem:[%s10215_s5 + $0x30] sm:$0xff]  ;;  %v10345_v39 = vld [vmem:[#allocation21_spill] sm:$0xff] }
 0x43d   : > { %7242 = vmatmul.msk.bf16.gmra.mxu2 %vm3336_vm3, %v3442_v29  ;;  %v10344_v29 = vld [vmem:[#allocation20_spill] sm:$0xff]  ;;  %v5077_v17 = vpack.c.bf16 %v7335_v30, %v7335_v30  ;;  %v2428_v54 = vadd.f32 %v10345_v39, %v2143_v27 }
 0x43e   : > { %7264 = vmatmul.msk.bf16.gmra.mxu3 %vm3336_vm3, %v8886_v55  ;;  %v3082_v12 = vmax.f32 %v3041_v25, 0.0 }
 0x43f   : > { %v5142_v33 = vsel %vm3577_vm2, %v5077_v17, 0 }
 0x440   : > { %v3809_v20 = vpop.f32.mrf.mxu2  ;;  %v3328_v41 = vmul.f32 %v8893_v19, %v3082_v12  ;;  %5151 = vmatpush.bf16.msrb.mxu3 %v5142_v33  ;;  %v8910_v12 = vpop.permute.xlu1 %3262 }
 0x441   : > { %v3810_v61 = vadd.f32 %v3809_v20, %v3630_v34  ;;  %v4053_v2 = vpop.f32.mrf.mxu3  ;;  %v2944_v40 = vpop.f32.mrf.mxu0  ;;  %10346 = vst [vmem:[#allocation12_spill] sm:$0xff] %v8910_v12  ;;  %v3419_v27 = vld [vmem:[#allocation2 + $0x115] sm:$0xff] }
 0x442   : > { %v3632_v35 = vpop.f32.mrf.mxu1  ;;  %3376 = vst.msk [vmem:[#allocation2 + $0x120] sm:$0xff] %vm3336_vm3, %v3328_v41  ;;  %v2997_v50 = vadd.f32 %v2944_v40, %v10344_v29  ;;  %v10347_v41 = vld [vmem:[#allocation22_spill] sm:$0xff] }
 0x443   : > { %v8899_v9 = vadd.f32 %v4053_v2, %v3810_v61  ;;  %v2713_v61 = vadd.f32 %v10347_v41, %v2428_v54  ;;  %v3483_v29 = vld [vmem:[#allocation2 + $0x116] sm:$0xff] }
 0x444   : > { %v3042_v34 = vadd.f32 %v8847_v58, %v2997_v50  ;;  %7274 = vmatmul.msk.bf16.gmra.mxu0 %vm3336_vm3, %v8591_v38  ;;  %v3907_v6 = vld [vmem:[#allocation2 + $0x117] sm:$0xff] }
 0x446   : > { %v3083_v25 = vmax.f32 %v3042_v34, 0.0 }
 0x448   : > { %v3811_v20 = vpop.f32.mrf.mxu2  ;;  %v3329_v2 = vmul.f32 %v8910_v12, %v3083_v25 }
 0x449   : > { %v3812_v40 = vadd.f32 %v3811_v20, %v3632_v35  ;;  %v4055_v36 = vpop.f32.mrf.mxu3  ;;  %v2946_v30 = vpop.f32.mrf.mxu0  ;;  %v3484_v39 = vld [vmem:[#allocation2 + $0x11e] sm:$0xff] }
 0x44a   : > { %v3635_v50 = vpop.f32.mrf.mxu1  ;;  %v3420_v19 = vld [vmem:[#allocation2 + $0x11d] sm:$0xff]  ;;  %3377 = vst.msk [vmem:[#allocation2 + $0x128] sm:$0xff] %vm3336_vm3, %v3329_v2  ;;  %v2998_v34 = vadd.f32 %v2946_v30, %v2713_v61  ;;  %v3507_v33 = vpack.c.bf16 %v3484_v39, %v3483_v29  ;;  %v8924_v20 = vpop.permute.xlu2 %3267 }
 0x44b   : > { %v3908_v38 = vld [vmem:[#allocation2 + $0x11f] sm:$0xff]  ;;  %v8915_v17 = vadd.f32 %v4055_v36, %v3812_v40  ;;  %v3443_v10 = vpack.c.bf16 %v3420_v19, %v3419_v27  ;;  %10348 = vst [vmem:[#allocation13_spill] sm:$0xff] %v8924_v20 }
 0x44c   : > { %v8917_v54 = vpack.c.bf16 %v3908_v38, %v3907_v6  ;;  %v3043_v35 = vadd.f32 %v8847_v58, %v2998_v34  ;;  %7222 = vmatmul.msk.bf16.gmra.mxu1 %vm3336_vm3, %v3507_v33  ;;  %v10349_v36 = vld [vmem:[#allocation23_spill] sm:$0xff]  ;;  %v8937_v34 = vpop.permute.xlu0 %3272 }
 0x44d   : > { %7243 = vmatmul.msk.bf16.gmra.mxu2 %vm3336_vm3, %v3443_v10  ;;  %v2145_v29 = vadd.f32 %v10349_v36, %v8433_v63  ;;  %v10350_v10 = vld [vmem:[#allocation24_spill] sm:$0xff]  ;;  %10351 = vst [vmem:[#allocation14_spill] sm:$0xff] %v8937_v34 }
 0x44e   : > { %7265 = vmatmul.msk.bf16.gmra.mxu3 %vm3336_vm3, %v8917_v54  ;;  %v3084_v25 = vmax.f32 %v3043_v35, 0.0  ;;  %v10352_v35 = vld [vmem:[#allocation25_spill] sm:$0xff] }
 0x44f   : > { %v2430_v39 = vadd.f32 %v8443_v42, %v2145_v29 }
 0x450   : > { %v3814_v41 = vpop.f32.mrf.mxu2  ;;  %v3330_v61 = vmul.f32 %v8924_v20, %v3084_v25 }
 0x451   : > { %v3815_v2 = vadd.f32 %v3814_v41, %v3635_v50  ;;  %v4058_v19 = vpop.f32.mrf.mxu3  ;;  %v2949_v40 = vpop.f32.mrf.mxu0  ;;  %v2715_v25 = vadd.f32 %v10352_v35, %v2430_v39  ;;  %v3909_v12 = vld [vmem:[#allocation2 + $0x127] sm:$0xff] }
 0x452   : > { %v3637_v6 = vpop.f32.mrf.mxu1  ;;  %3378 = vst.msk [vmem:[#allocation2 + $0x130] sm:$0xff] %vm3336_vm3, %v3330_v61  ;;  %v2999_v30 = vadd.f32 %v2949_v40, %v10350_v10 }
 0x453   : > { %v8930_v27 = vadd.f32 %v4058_v19, %v3815_v2  ;;  %v3485_v2 = vld [vmem:[#allocation2 + $0x126] sm:$0xff] }
 0x454   : > { %v3044_v38 = vadd.f32 %v8847_v58, %v2999_v30  ;;  %7275 = vmatmul.msk.bf16.gmra.mxu0 %vm3336_vm3, %v8612_v43  ;;  %v3421_v19 = vld [vmem:[#allocation2 + $0x125] sm:$0xff] }
 0x456   : > { %v3085_v50 = vmax.f32 %v3044_v38, 0.0 }
 0x458   : > { %v3816_v33 = vpop.f32.mrf.mxu2  ;;  %v3331_v63 = vmul.f32 %v8937_v34, %v3085_v50 }
 0x459   : > { %v3817_v41 = vadd.f32 %v3816_v33, %v3637_v6  ;;  %v4060_v61 = vpop.f32.mrf.mxu3  ;;  %v2951_v40 = vpop.f32.mrf.mxu0  ;;  %v3486_v42 = vld [vmem:[#allocation2 + $0x12e] sm:$0xff] }
 0x45a   : > { %v3640_v36 = vpop.f32.mrf.mxu1  ;;  %v3422_v29 = vld [vmem:[#allocation2 + $0x12d] sm:$0xff]  ;;  %3379 = vst.msk [vmem:[#allocation2 + $0x138] sm:$0xff] %vm3336_vm3, %v3331_v63  ;;  %v3000_v30 = vadd.f32 %v2951_v40, %v2715_v25  ;;  %v3508_v38 = vpack.c.bf16 %v3486_v42, %v3485_v2  ;;  %v8951_v33 = vpop.permute.xlu1 %3277 }
 0x45b   : > { %v3910_v10 = vld [vmem:[#allocation2 + $0x12f] sm:$0xff]  ;;  %v8942_v43 = vadd.f32 %v4060_v61, %v3817_v41  ;;  %v3444_v20 = vpack.c.bf16 %v3422_v29, %v3421_v19  ;;  %10353 = vst [vmem:[#allocation15_spill] sm:$0xff] %v8951_v33  ;;  %v10356_v29 = vld [vmem:[#allocation28_spill] sm:$0xff] }
 0x45c   : > { %v8944_v39 = vpack.c.bf16 %v3910_v10, %v3909_v12  ;;  %v3045_v6 = vadd.f32 %v8847_v58, %v3000_v30  ;;  %7223 = vmatmul.msk.bf16.gmra.mxu1 %vm3336_vm3, %v3508_v38  ;;  %v10354_v2 = vld [vmem:[#allocation26_spill] sm:$0xff]  ;;  %v8964_v38 = vpop.permute.xlu2 %3282 }
 0x45d   : > { %7244 = vmatmul.msk.bf16.gmra.mxu2 %vm3336_vm3, %v3444_v20  ;;  %v2147_v19 = vadd.f32 %v10354_v2, %v8453_v48  ;;  %v10355_v20 = vld [vmem:[#allocation27_spill] sm:$0xff]  ;;  %10357 = vst [vmem:[#allocation16_spill] sm:$0xff] %v8964_v38 }
 0x45e   : > { %7266 = vmatmul.msk.bf16.gmra.mxu3 %vm3336_vm3, %v8944_v39  ;;  %v3086_v50 = vmax.f32 %v3045_v6, 0.0 }
 0x45f   : > { %v2432_v10 = vadd.f32 %v10356_v29, %v2147_v19 }
 0x460   : > { %v3819_v35 = vpop.f32.mrf.mxu2  ;;  %v3332_v25 = vmul.f32 %v8951_v33, %v3086_v50  ;;  %v10358_v50 = vld [vmem:[#allocation29_spill] sm:$0xff] }
 0x461   : > { %v3820_v63 = vadd.f32 %v3819_v35, %v3640_v36  ;;  %v4063_v41 = vpop.f32.mrf.mxu3  ;;  %v2954_v61 = vpop.f32.mrf.mxu0  ;;  %v2717_v35 = vadd.f32 %v10358_v50, %v2432_v10  ;;  %v3423_v2 = vld [vmem:[#allocation2 + $0x135] sm:$0xff] }
 0x462   : > { %v3642_v12 = vpop.f32.mrf.mxu1  ;;  %3380 = vst.msk [vmem:[#allocation2 + $0x140] sm:$0xff] %vm3336_vm3, %v3332_v25  ;;  %v3001_v42 = vadd.f32 %v2954_v61, %v10355_v20  ;;  %v3911_v52 = vld [vmem:[#allocation2 + $0x137] sm:$0xff] }
 0x463   : > { %v8957_v40 = vadd.f32 %v4063_v41, %v3820_v63  ;;  %v3487_v41 = vld [vmem:[#allocation2 + $0x136] sm:$0xff] }
 0x464   : > { %v3046_v30 = vadd.f32 %v8847_v58, %v3001_v42  ;;  %7276 = vmatmul.msk.bf16.gmra.mxu0 %vm3336_vm3, %v8635_v53 }
 0x466   : > { %v3087_v36 = vmax.f32 %v3046_v30, 0.0 }
 0x468   : > { %v3821_v6 = vpop.f32.mrf.mxu2  ;;  %v3333_v48 = vmul.f32 %v8964_v38, %v3087_v36 }
 0x469   : > { %v3822_v25 = vadd.f32 %v3821_v6, %v3642_v12  ;;  %v4065_v63 = vpop.f32.mrf.mxu3  ;;  %v2956_v61 = vpop.f32.mrf.mxu0  ;;  %v3488_v19 = vld [vmem:[#allocation2 + $0x13e] sm:$0xff] }
 0x46a   : > { %v3645_v20 = vpop.f32.mrf.mxu1  ;;  %v3424_v29 = vld [vmem:[#allocation2 + $0x13d] sm:$0xff]  ;;  %3381 = vst.msk [vmem:[#allocation2 + $0x148] sm:$0xff] %vm3336_vm3, %v3333_v48  ;;  %v3002_v30 = vadd.f32 %v2956_v61, %v2717_v35  ;;  %v3509_v33 = vpack.c.bf16 %v3488_v19, %v3487_v41 }
 0x46b   : > { %v3912_v42 = vld [vmem:[#allocation2 + $0x13f] sm:$0xff]  ;;  %v8969_v53 = vadd.f32 %v4065_v63, %v3822_v25  ;;  %v3445_v34 = vpack.c.bf16 %v3424_v29, %v3423_v2  ;;  %v8985_v25 = vpop.permute.xlu0 %3287 }
 0x46c   : > { %v7357_v12 = vld [vmem:[%s10215_s5 + $0x38] sm:$0xff]  ;;  %v8974_v10 = vpack.c.bf16 %v3912_v42, %v3911_v52  ;;  %v3047_v6 = vadd.f32 %v8847_v58, %v3002_v30  ;;  %7224 = vmatmul.msk.bf16.gmra.mxu1 %vm3336_vm3, %v3509_v33  ;;  %v7379_v35 = vld [vmem:[%s10215_s5 + $0x40] sm:$0xff]  ;;  %10359 = vst [vmem:[#allocation17_spill] sm:$0xff] %v8985_v25 }
 0x46d   : > { %v5362_v36 = vpack.c.bf16 %v7357_v12, %v7357_v12  ;;  %7245 = vmatmul.msk.bf16.gmra.mxu2 %vm3336_vm3, %v3445_v34  ;;  %v5647_v52 = vpack.c.bf16 %v7379_v35, %v7379_v35 }
 0x46e   : > { %7267 = vmatmul.msk.bf16.gmra.mxu3 %vm3336_vm3, %v8974_v10  ;;  %v3088_v48 = vmax.f32 %v3047_v6, 0.0 }
 0x46f   : > { %v5427_v50 = vsel %vm3577_vm2, %v5362_v36, 0  ;;  %v5712_v34 = vsel %vm3577_vm2, %v5647_v52, 0  ;;  %v8996_v36 = vpop.permute.xlu1 %3292 }
 0x470   : > { %5436 = vmatpush.bf16.msra.mxu0 %v5427_v50  ;;  %v3824_v63 = vpop.f32.mrf.mxu2  ;;  %v3334_v41 = vmul.f32 %v8985_v25, %v3088_v48  ;;  %5721 = vmatpush.bf16.msra.mxu1 %v5712_v34  ;;  %10360 = vst [vmem:[#allocation18_spill] sm:$0xff] %v8996_v36 }
 0x471   : > { %v3825_v33 = vadd.f32 %v3824_v63, %v3645_v20  ;;  %v4068_v2 = vpop.f32.mrf.mxu3  ;;  %v2959_v61 = vpop.f32.mrf.mxu0  ;;  %v3489_v6 = vld [vmem:[#allocation2 + $0x146] sm:$0xf] }
 0x472   : > { %v3647_v19 = vpop.f32.mrf.mxu1  ;;  %3382 = vst.msk [vmem:[#allocation2 + $0x150] sm:$0xff] %vm3336_vm3, %v3334_v41  ;;  %v3003_v42 = vadd.f32 %v2959_v61, %v8475_v1  ;;  %v3425_v50 = vld [vmem:[#allocation2 + $0x145] sm:$0xf] }
 0x473   : > { %v8990_v29 = vadd.f32 %v4068_v2, %v3825_v33  ;;  %v3913_v63 = vld [vmem:[#allocation2 + $0x147] sm:$0xf] }
 0x474   : > { %v3048_v30 = vadd.f32 %v8847_v58, %v3003_v42  ;;  %7277 = vmatmul.msk.bf16.gmra.mxu0 %vm3336_vm3, %v8660_v16  ;;  %v3510_v58 = vpack.c.bf16 %v3489_v6, %v3489_v6  ;;  %v3446_v16 = vpack.c.bf16 %v3425_v50, %v3425_v50  ;;  %v3934_v2 = vpack.c.bf16 %v3913_v63, %v3913_v63  ;;  %v4444_v50 = vld [vmem:[#allocation2 + $0x20] sm:$0xff]  ;;  %v5014_v63 = vld [vmem:[#allocation2 + $0x31] sm:$0xff] }
 0x476   : > { %v3089_v12 = vmax.f32 %v3048_v30, 0.0 }
 0x478   : > { %v3826_v20 = vpop.f32.mrf.mxu2  ;;  %v3335_v35 = vmul.f32 %v8996_v36, %v3089_v12 }
 0x479   : > { %v3827_v48 = vadd.f32 %v3826_v20, %v3647_v19  ;;  %v4070_v52 = vpop.f32.mrf.mxu3  ;;  %v2961_v41 = vpop.f32.mrf.mxu0 }
 0x47a   : > { %v3650_v33 = vpop.f32.mrf.mxu1  ;;  %3384 = vst.msk [vmem:[#allocation2 + $0x158] sm:$0xf] %vm3383_vm4, %v3335_v35  ;;  %v4729_v35 = vld [vmem:[#allocation2 + $0x21] sm:$0xff] }
 0x47b   : > { %v9000_v1 = vadd.f32 %v4070_v52, %v3827_v48 }
 0x47c   : > { %7225 = vmatmul.msk.bf16.gmra.mxu1 %vm3336_vm3, %v3510_v58 }
 0x47d   : > { %7246 = vmatmul.msk.bf16.gmra.mxu2 %vm3336_vm3, %v3446_v16  ;;  %v4728_v16 = vld [vmem:[#allocation2 + $0x19] sm:$0xff] }
 0x47e   : > { %7268 = vmatmul.msk.bf16.gmra.mxu3 %vm3336_vm3, %v3934_v2 }
 0x480   : > { %v3829_v34 = vpop.f32.mrf.mxu2 }
 0x481   : > { %v3830_v61 = vadd.f32 %v3829_v34, %v3650_v33  ;;  %v4073_v19 = vpop.f32.mrf.mxu3  ;;  %v4298_v30 = vpop.f32.mrf.mxu0  ;;  %v4443_v33 = vld [vmem:[#allocation2 + $0x18] sm:$0xff] }
 0x482   : > { %v3652_v42 = vpop.f32.mrf.mxu1  ;;  %v9008_v20 = vadd.f32 %v4298_v30, %v8621_v56  ;;  %v4484_v34 = vpack.c.bf16 %v4444_v50, %v4443_v33  ;;  %v5013_v56 = vld [vmem:[#allocation2 + $0x29] sm:$0xff]  ;;  %v5016_v33 = vld [vmem:[#allocation2 + $0x41] sm:$0xff] }
 0x483   : > { %v9005_v12 = vadd.f32 %v4073_v19, %v3830_v61  ;;  %v4769_v61 = vpack.c.bf16 %v4729_v35, %v4728_v16  ;;  %v5054_v19 = vpack.c.bf16 %v5014_v63, %v5013_v56  ;;  %v4446_v35 = vld [vmem:[#allocation2 + $0x30] sm:$0xff] }
 0x484   : > { %7278 = vmatmul.msk.bf16.gmra.mxu0 %vm3336_vm3, %v8690_v62 }
 0x488   : > { %v3831_v6 = vpop.f32.mrf.mxu2 }
 0x489   : > { %v3832_v48 = vadd.f32 %v3831_v6, %v3652_v42  ;;  %v4075_v52 = vpop.f32.mrf.mxu3  ;;  %v9012_v58 = vpop.f32.mrf.mxu0 }
 0x48a   : > { %v3655_v41 = vpop.f32.mrf.mxu1 }
 0x48b   : > { %v9014_v2 = vadd.f32 %v4075_v52, %v3832_v48 }
 0x48c   : > { %7292 = vmatmul.msk.bf16.vlgmr.msrb.gmra.mxu1 %vm3336_vm3, %v4484_v34 }
 0x48d   : > { %7314 = vmatmul.msk.bf16.vlgmr.msrb.gmra.mxu2 %vm3336_vm3, %v4769_v61  ;;  %v4445_v61 = vld [vmem:[#allocation2 + $0x28] sm:$0xff] }
 0x48e   : > { %7336 = vmatmul.msk.bf16.vlgmr.msrb.gmra.mxu3 %vm3336_vm3, %v5054_v19 }
 0x490   : > { %v3834_v62 = vpop.f32.mrf.mxu2 }
 0x491   : > { %v3835_v42 = vadd.f32 %v3834_v62, %v3655_v41  ;;  %v4078_v30 = vpop.f32.mrf.mxu3  ;;  %v4303_v36 = vpop.f32.mrf.mxu0  ;;  %v4485_v62 = vpack.c.bf16 %v4446_v35, %v4445_v61  ;;  %v4448_v35 = vld [vmem:[#allocation2 + $0x40] sm:$0xff] }
 0x492   : > { %v3657_v6 = vpop.f32.mrf.mxu1  ;;  %v9022_v48 = vadd.f32 %v4303_v36, %v8705_v21 }
 0x493   : > { %v9019_v25 = vadd.f32 %v4078_v30, %v3835_v42  ;;  %v5015_v42 = vld [vmem:[#allocation2 + $0x39] sm:$0xff] }
 0x494   : > { %7279 = vmatmul.msk.bf16.gmra.mxu0 %vm3336_vm3, %v8718_v11  ;;  %v5055_v21 = vpack.c.bf16 %v5016_v33, %v5015_v42 }
 0x498   : > { %v3836_v50 = vpop.f32.mrf.mxu2 }
 0x499   : > { %v3837_v52 = vadd.f32 %v3836_v50, %v3657_v6  ;;  %v4080_v63 = vpop.f32.mrf.mxu3  ;;  %v4305_v34 = vpop.f32.mrf.mxu0 }
 0x49a   : > { %v3660_v16 = vpop.f32.mrf.mxu1  ;;  %v9029_v56 = vadd.f32 %v4305_v34, %v8716_v14 }
 0x49b   : > { %v9026_v41 = vadd.f32 %v4080_v63, %v3837_v52 }
 0x49c   : > { %7293 = vmatmul.msk.bf16.gmra.mxu1 %vm3336_vm3, %v4485_v62  ;;  %v4447_v62 = vld [vmem:[#allocation2 + $0x38] sm:$0xff] }
 0x49d   : > { %7315 = vmatmul.msk.bf16.gmra.mxu2 %vm3336_vm3, %v5054_v19  ;;  %v5018_v19 = vld [vmem:[#allocation2 + $0x51] sm:$0xff] }
 0x49e   : > { %7337 = vmatmul.msk.bf16.gmra.mxu3 %vm3336_vm3, %v5055_v21 }
 0x4a0   : > { %v3839_v11 = vpop.f32.mrf.mxu2 }
 0x4a1   : > { %v3840_v36 = vadd.f32 %v3839_v11, %v3660_v16  ;;  %v4083_v30 = vpop.f32.mrf.mxu3  ;;  %v4308_v50 = vpop.f32.mrf.mxu0  ;;  %v4486_v11 = vpack.c.bf16 %v4448_v35, %v4447_v62  ;;  %v4450_v35 = vld [vmem:[#allocation2 + $0x50] sm:$0xff] }
 0x4a2   : > { %v3662_v6 = vpop.f32.mrf.mxu1  ;;  %v9037_v52 = vadd.f32 %v4308_v50, %v8733_v46 }
 0x4a3   : > { %v9034_v38 = vadd.f32 %v4083_v30, %v3840_v36  ;;  %v5017_v36 = vld [vmem:[#allocation2 + $0x49] sm:$0xff] }
 0x4a4   : > { %7280 = vmatmul.msk.bf16.gmra.mxu0 %vm3336_vm3, %v8746_v8  ;;  %v5056_v46 = vpack.c.bf16 %v5018_v19, %v5017_v36 }
 0x4a8   : > { %v3841_v14 = vpop.f32.mrf.mxu2 }
 0x4a9   : > { %v3842_v63 = vadd.f32 %v3841_v14, %v3662_v6  ;;  %v4085_v33 = vpop.f32.mrf.mxu3  ;;  %v4310_v61 = vpop.f32.mrf.mxu0 }
 0x4aa   : > { %v3665_v34 = vpop.f32.mrf.mxu1  ;;  %v9044_v42 = vadd.f32 %v4310_v61, %v8744_v32 }
 0x4ab   : > { %v9041_v16 = vadd.f32 %v4085_v33, %v3842_v63 }
 0x4ac   : > { %7294 = vmatmul.msk.bf16.gmra.mxu1 %vm3336_vm3, %v4486_v11  ;;  %v4449_v11 = vld [vmem:[#allocation2 + $0x48] sm:$0xff] }
 0x4ad   : > { %7316 = vmatmul.msk.bf16.gmra.mxu2 %vm3336_vm3, %v5055_v21  ;;  %v5020_v21 = vld [vmem:[#allocation2 + $0x61] sm:$0xff] }
 0x4ae   : > { %7338 = vmatmul.msk.bf16.gmra.mxu3 %vm3336_vm3, %v5056_v46 }
 0x4b0   : > { %v3844_v8 = vpop.f32.mrf.mxu2 }
 0x4b1   : > { %v3845_v30 = vadd.f32 %v3844_v8, %v3665_v34  ;;  %v4088_v6 = vpop.f32.mrf.mxu3  ;;  %v4313_v14 = vpop.f32.mrf.mxu0  ;;  %v4487_v8 = vpack.c.bf16 %v4450_v35, %v4449_v11  ;;  %v4452_v35 = vld [vmem:[#allocation2 + $0x60] sm:$0xff] }
 0x4b2   : > { %v3667_v50 = vpop.f32.mrf.mxu1  ;;  %v9052_v63 = vadd.f32 %v4313_v14, %v8760_v57 }
 0x4b3   : > { %v9049_v13 = vadd.f32 %v4088_v6, %v3845_v30  ;;  %v5019_v30 = vld [vmem:[#allocation2 + $0x59] sm:$0xff] }
 0x4b4   : > { %7281 = vmatmul.msk.bf16.gmra.mxu0 %vm3336_vm3, %v8773_v4  ;;  %v5057_v57 = vpack.c.bf16 %v5020_v21, %v5019_v30 }
 0x4b8   : > { %v3846_v32 = vpop.f32.mrf.mxu2 }
 0x4b9   : > { %v3847_v33 = vadd.f32 %v3846_v32, %v3667_v50  ;;  %v4090_v19 = vpop.f32.mrf.mxu3  ;;  %v4315_v62 = vpop.f32.mrf.mxu0 }
 0x4ba   : > { %v3670_v61 = vpop.f32.mrf.mxu1  ;;  %v9059_v36 = vadd.f32 %v4315_v62, %v8771_v45 }
 0x4bb   : > { %v9056_v34 = vadd.f32 %v4090_v19, %v3847_v33 }
 0x4bc   : > { %7295 = vmatmul.msk.bf16.gmra.mxu1 %vm3336_vm3, %v4487_v8  ;;  %v4451_v8 = vld [vmem:[#allocation2 + $0x58] sm:$0xff] }
 0x4bd   : > { %7317 = vmatmul.msk.bf16.gmra.mxu2 %vm3336_vm3, %v5056_v46  ;;  %v5022_v46 = vld [vmem:[#allocation2 + $0x71] sm:$0xff] }
 0x4be   : > { %7339 = vmatmul.msk.bf16.gmra.mxu3 %vm3336_vm3, %v5057_v57 }
 0x4c0   : > { %v3849_v4 = vpop.f32.mrf.mxu2 }
 0x4c1   : > { %v3850_v6 = vadd.f32 %v3849_v4, %v3670_v61  ;;  %v4093_v50 = vpop.f32.mrf.mxu3  ;;  %v4318_v32 = vpop.f32.mrf.mxu0  ;;  %v4488_v4 = vpack.c.bf16 %v4452_v35, %v4451_v8  ;;  %v4454_v35 = vld [vmem:[#allocation2 + $0x70] sm:$0xff] }
 0x4c2   : > { %v3672_v14 = vpop.f32.mrf.mxu1  ;;  %v9067_v33 = vadd.f32 %v4318_v32, %v8786_v18 }
 0x4c3   : > { %v9064_v37 = vadd.f32 %v4093_v50, %v3850_v6  ;;  %v5021_v6 = vld [vmem:[#allocation2 + $0x69] sm:$0xff] }
 0x4c4   : > { %7282 = vmatmul.msk.bf16.gmra.mxu0 %vm3336_vm3, %v8800_v22  ;;  %v5058_v18 = vpack.c.bf16 %v5022_v46, %v5021_v6 }
 0x4c8   : > { %v3851_v45 = vpop.f32.mrf.mxu2 }
 0x4c9   : > { %v3852_v19 = vadd.f32 %v3851_v45, %v3672_v14  ;;  %v4095_v21 = vpop.f32.mrf.mxu3  ;;  %v4320_v11 = vpop.f32.mrf.mxu0 }
 0x4ca   : > { %v3675_v62 = vpop.f32.mrf.mxu1  ;;  %v9074_v30 = vadd.f32 %v4320_v11, %v8798_v60 }
 0x4cb   : > { %v9071_v61 = vadd.f32 %v4095_v21, %v3852_v19 }
 0x4cc   : > { %7296 = vmatmul.msk.bf16.gmra.mxu1 %vm3336_vm3, %v4488_v4  ;;  %v4453_v4 = vld [vmem:[#allocation2 + $0x68] sm:$0xff] }
 0x4cd   : > { %7318 = vmatmul.msk.bf16.gmra.mxu2 %vm3336_vm3, %v5057_v57  ;;  %v5024_v57 = vld [vmem:[#allocation2 + $0x81] sm:$0xff] }
 0x4ce   : > { %7340 = vmatmul.msk.bf16.gmra.mxu3 %vm3336_vm3, %v5058_v18 }
 0x4d0   : > { %v3854_v22 = vpop.f32.mrf.mxu2 }
 0x4d1   : > { %v3855_v50 = vadd.f32 %v3854_v22, %v3675_v62  ;;  %v4098_v14 = vpop.f32.mrf.mxu3  ;;  %v4323_v45 = vpop.f32.mrf.mxu0  ;;  %v4489_v22 = vpack.c.bf16 %v4454_v35, %v4453_v4  ;;  %v4456_v35 = vld [vmem:[#allocation2 + $0x80] sm:$0xff] }
 0x4d2   : > { %v3677_v32 = vpop.f32.mrf.mxu1  ;;  %v9082_v19 = vadd.f32 %v4323_v45, %v8813_v28 }
 0x4d3   : > { %v9079_v23 = vadd.f32 %v4098_v14, %v3855_v50  ;;  %v5023_v50 = vld [vmem:[#allocation2 + $0x79] sm:$0xff] }
 0x4d4   : > { %7283 = vmatmul.msk.bf16.gmra.mxu0 %vm3336_vm3, %v8827_v7  ;;  %v5059_v28 = vpack.c.bf16 %v5024_v57, %v5023_v50 }
 0x4d8   : > { %v3856_v60 = vpop.f32.mrf.mxu2 }
 0x4d9   : > { %v3857_v21 = vadd.f32 %v3856_v60, %v3677_v32  ;;  %v4100_v46 = vpop.f32.mrf.mxu3  ;;  %v4325_v8 = vpop.f32.mrf.mxu0 }
 0x4da   : > { %v3680_v11 = vpop.f32.mrf.mxu1  ;;  %v9089_v6 = vadd.f32 %v4325_v8, %v8825_v26 }
 0x4db   : > { %v9086_v62 = vadd.f32 %v4100_v46, %v3857_v21 }
 0x4dc   : > { %7297 = vmatmul.msk.bf16.gmra.mxu1 %vm3336_vm3, %v4489_v22  ;;  %v4455_v22 = vld [vmem:[#allocation2 + $0x78] sm:$0xff] }
 0x4dd   : > { %7319 = vmatmul.msk.bf16.gmra.mxu2 %vm3336_vm3, %v5058_v18  ;;  %v5026_v18 = vld [vmem:[#allocation2 + $0x91] sm:$0xff] }
 0x4de   : > { %7341 = vmatmul.msk.bf16.gmra.mxu3 %vm3336_vm3, %v5059_v28 }
 0x4e0   : > { %v3859_v7 = vpop.f32.mrf.mxu2 }
 0x4e1   : > { %v3860_v14 = vadd.f32 %v3859_v7, %v3680_v11  ;;  %v4103_v32 = vpop.f32.mrf.mxu3  ;;  %v4328_v60 = vpop.f32.mrf.mxu0  ;;  %v4490_v7 = vpack.c.bf16 %v4456_v35, %v4455_v22  ;;  %v4458_v35 = vld [vmem:[#allocation2 + $0x90] sm:$0xff] }
 0x4e2   : > { %v3682_v45 = vpop.f32.mrf.mxu1  ;;  %v9097_v21 = vadd.f32 %v4328_v60, %v8840_v5 }
 0x4e3   : > { %v9094_v31 = vadd.f32 %v4103_v32, %v3860_v14  ;;  %v5025_v14 = vld [vmem:[#allocation2 + $0x89] sm:$0xff] }
 0x4e4   : > { %7284 = vmatmul.msk.bf16.gmra.mxu0 %vm3336_vm3, %v8859_v24  ;;  %v5060_v5 = vpack.c.bf16 %v5026_v18, %v5025_v14 }
 0x4e8   : > { %v3861_v26 = vpop.f32.mrf.mxu2 }
 0x4e9   : > { %v3862_v46 = vadd.f32 %v3861_v26, %v3682_v45  ;;  %v4105_v57 = vpop.f32.mrf.mxu3  ;;  %v4330_v4 = vpop.f32.mrf.mxu0 }
 0x4ea   : > { %v3685_v8 = vpop.f32.mrf.mxu1  ;;  %v9104_v50 = vadd.f32 %v4330_v4, %v8857_v3 }
 0x4eb   : > { %v9101_v11 = vadd.f32 %v4105_v57, %v3862_v46 }
 0x4ec   : > { %7298 = vmatmul.msk.bf16.gmra.mxu1 %vm3336_vm3, %v4490_v7  ;;  %v4457_v7 = vld [vmem:[#allocation2 + $0x88] sm:$0xff] }
 0x4ed   : > { %7320 = vmatmul.msk.bf16.gmra.mxu2 %vm3336_vm3, %v5059_v28  ;;  %v5028_v28 = vld [vmem:[#allocation2 + $0xa1] sm:$0xff] }
 0x4ee   : > { %7342 = vmatmul.msk.bf16.gmra.mxu3 %vm3336_vm3, %v5060_v5 }
 0x4f0   : > { %v3864_v24 = vpop.f32.mrf.mxu2 }
 0x4f1   : > { %v3865_v32 = vadd.f32 %v3864_v24, %v3685_v8  ;;  %v4108_v45 = vpop.f32.mrf.mxu3  ;;  %v4333_v26 = vpop.f32.mrf.mxu0  ;;  %v4491_v24 = vpack.c.bf16 %v4458_v35, %v4457_v7  ;;  %v4460_v7 = vld [vmem:[#allocation2 + $0xa0] sm:$0xff] }
 0x4f2   : > { %v3687_v60 = vpop.f32.mrf.mxu1  ;;  %v9112_v46 = vadd.f32 %v4333_v26, %v8872_v15  ;;  %v5975_v15 = vld [vmem:[%s10217_s7] sm:$0xff] }
 0x4f3   : > { %v9109_v0 = vadd.f32 %v4108_v45, %v3865_v32  ;;  %v5027_v32 = vld [vmem:[#allocation2 + $0x99] sm:$0xff] }
 0x4f4   : > { %7285 = vmatmul.msk.bf16.gmra.mxu0 %vm3336_vm3, %v8886_v55  ;;  %v5976_v55 = vld [vmem:[%s10217_s7 + $0x8] sm:$0xff]  ;;  %v5061_v45 = vpack.c.bf16 %v5028_v28, %v5027_v32 }
 0x4f8   : > { %v3866_v3 = vpop.f32.mrf.mxu2 }
 0x4f9   : > { %v3867_v57 = vadd.f32 %v3866_v3, %v3687_v60  ;;  %v4110_v18 = vpop.f32.mrf.mxu3  ;;  %v4335_v22 = vpop.f32.mrf.mxu0  ;;  %v5977_v60 = vpack.c.bf16 %v5976_v55, %v5975_v15  ;;  %v4459_v55 = vld [vmem:[#allocation2 + $0x98] sm:$0xff] }
 0x4fa   : > { %v3690_v4 = vpop.f32.mrf.mxu1  ;;  %v9119_v14 = vadd.f32 %v4335_v22, %v8884_v49 }
 0x4fb   : > { %v9116_v8 = vadd.f32 %v4110_v18, %v3867_v57  ;;  %6053 = vmatpush.bf16.msra.mxu2 %v5977_v60 }
 0x4fc   : > { %7299 = vmatmul.msk.bf16.gmra.mxu1 %vm3336_vm3, %v4491_v24 }
 0x4fd   : > { %7321 = vmatmul.msk.bf16.gmra.mxu2 %vm3336_vm3, %v5060_v5  ;;  %v5030_v5 = vld [vmem:[#allocation2 + $0xb1] sm:$0xff] }
 0x4fe   : > { %7343 = vmatmul.msk.bf16.gmra.mxu3 %vm3336_vm3, %v5061_v45 }
 0x500   : > { %v3869_v49 = vpop.f32.mrf.mxu2 }
 0x501   : > { %v3870_v26 = vadd.f32 %v3869_v49, %v3690_v4  ;;  %v4113_v3 = vpop.f32.mrf.mxu3  ;;  %v4338_v57 = vpop.f32.mrf.mxu0  ;;  %v3772_v4 = vadd.f32 %v8683_v47, %v8672_v44 }
 0x502   : > { %v3692_v35 = vpop.f32.mrf.mxu1  ;;  %v9133_v22 = vadd.f32 %v4338_v57, %v8899_v9  ;;  %v4492_v9 = vpack.c.bf16 %v4460_v7, %v4459_v55 }
 0x503   : > { %v9130_v18 = vadd.f32 %v4113_v3, %v3870_v26  ;;  %v5029_v26 = vld [vmem:[#allocation2 + $0xa9] sm:$0xff] }
 0x504   : > { %7286 = vmatmul.msk.bf16.gmra.mxu0 %vm3336_vm3, %v8917_v54  ;;  %v5062_v3 = vpack.c.bf16 %v5030_v5, %v5029_v26  ;;  %v4118_v54 = vadd.f32 %v8686_v51, %v3772_v4  ;;  %v4462_v5 = vld [vmem:[#allocation2 + $0xb0] sm:$0xff]  ;;  %v4461_v4 = vld [vmem:[#allocation2 + $0xa8] sm:$0xff] }
 0x505   : > { %v4493_v26 = vpack.c.bf16 %v4462_v5, %v4461_v4 }
 0x506   : > { %v4403_v57 = vadd.f32 %v9012_v58, %v4118_v54  ;;  %v5031_v54 = vld [vmem:[#allocation2 + $0xb9] sm:$0xff] }
 0x508   : > { %v3871_v28 = vpop.f32.mrf.mxu2 }
 0x509   : > { %v4115_v24 = vpop.f32.mrf.mxu3  ;;  %v4340_v32 = vpop.f32.mrf.mxu0 }
 0x50a   : > { %v4583_v15 = vpop.f32.mrf.mxu1  ;;  %v9140_v60 = vadd.f32 %v4340_v32, %v8915_v17 }
 0x50b   : > { %v4687_v49 = vadd.f32 %v4583_v15, %v9008_v20  ;;  %v5032_v15 = vld [vmem:[#allocation2 + $0xc1] sm:$0xff] }
 0x50c   : > { %7300 = vmatmul.msk.bf16.gmra.mxu1 %vm3336_vm3, %v4492_v9 }
 0x50d   : > { %7322 = vmatmul.msk.bf16.gmra.mxu2 %vm3336_vm3, %v5061_v45 }
 0x50e   : > { %7344 = vmatmul.msk.bf16.gmra.mxu3 %vm3336_vm3, %v5062_v3 }
 0x510   : > { %v4868_v35 = vpop.f32.mrf.mxu2 }
 0x511   : > { %v4972_v44 = vadd.f32 %v4868_v35, %v4687_v49  ;;  %v5153_v47 = vpop.f32.mrf.mxu3  ;;  %v4343_v17 = vpop.f32.mrf.mxu0  ;;  %v5063_v35 = vpack.c.bf16 %v5032_v15, %v5031_v54  ;;  %v4197_v54 = vld [vmem:[#allocation2 + $0x14f] sm:$0xff] }
 0x512   : > { %v4585_v28 = vpop.f32.mrf.mxu1  ;;  %v9151_v20 = vadd.f32 %v4343_v17, %v8930_v27 }
 0x513   : > { %v9148_v24 = vadd.f32 %v5153_v47, %v4972_v44  ;;  %v4688_v7 = vadd.f32 %v4585_v28, %v4403_v57 }
 0x514   : > { %7287 = vmatmul.msk.bf16.gmra.mxu0 %vm3336_vm3, %v8944_v39 }
 0x518   : > { %v4870_v45 = vpop.f32.mrf.mxu2 }
 0x519   : > { %v4973_v32 = vadd.f32 %v4870_v45, %v4688_v7  ;;  %v5155_v51 = vpop.f32.mrf.mxu3  ;;  %v4345_v55 = vpop.f32.mrf.mxu0  ;;  %v4464_v45 = vld [vmem:[#allocation2 + $0xc0] sm:$0xff] }
 0x51a   : > { %v4588_v58 = vpop.f32.mrf.mxu1  ;;  %v9158_v9 = vadd.f32 %v4345_v55, %v8942_v43  ;;  %v4463_v55 = vld [vmem:[#allocation2 + $0xb8] sm:$0xff] }
 0x51b   : > { %v9155_v49 = vadd.f32 %v5155_v51, %v4973_v32  ;;  %v4689_v27 = vadd.f32 %v4588_v58, %v9022_v48  ;;  %v5034_v32 = vld [vmem:[#allocation2 + $0xd1] sm:$0xff] }
 0x51c   : > { %7301 = vmatmul.msk.bf16.gmra.mxu1 %vm3336_vm3, %v4493_v26 }
 0x51d   : > { %7323 = vmatmul.msk.bf16.gmra.mxu2 %vm3336_vm3, %v5062_v3 }
 0x51e   : > { %7345 = vmatmul.msk.bf16.gmra.mxu3 %vm3336_vm3, %v5063_v35 }
 0x520   : > { %v4873_v39 = vpop.f32.mrf.mxu2 }
 0x521   : > { %v4974_v57 = vadd.f32 %v4873_v39, %v4689_v27  ;;  %v5158_v44 = vpop.f32.mrf.mxu3  ;;  %v4348_v47 = vpop.f32.mrf.mxu0  ;;  %v4494_v27 = vpack.c.bf16 %v4464_v45, %v4463_v55  ;;  %v4466_v45 = vld [vmem:[#allocation2 + $0xd0] sm:$0xff]  ;;  %v4465_v55 = vld [vmem:[#allocation2 + $0xc8] sm:$0xff] }
 0x522   : > { %v4590_v17 = vpop.f32.mrf.mxu1  ;;  %v9167_v43 = vadd.f32 %v4348_v47, %v8957_v40 }
 0x523   : > { %v9164_v28 = vadd.f32 %v5158_v44, %v4974_v57  ;;  %v4690_v48 = vadd.f32 %v4590_v17, %v9029_v56  ;;  %v5033_v56 = vld [vmem:[#allocation2 + $0xc9] sm:$0xff] }
 0x524   : > { %7288 = vmatmul.msk.bf16.gmra.mxu0 %vm3336_vm3, %v8974_v10  ;;  %v5064_v26 = vpack.c.bf16 %v5034_v32, %v5033_v56  ;;  %v4196_v17 = vld [vmem:[#allocation2 + $0x147] sm:$0xff]  ;;  %v4495_v56 = vpack.c.bf16 %v4466_v45, %v4465_v55 }
 0x525   : > { %v5036_v32 = vld [vmem:[#allocation2 + $0xe1] sm:$0xff] }
 0x528   : > { %v4875_v7 = vpop.f32.mrf.mxu2 }
 0x529   : > { %v4975_v3 = vadd.f32 %v4875_v7, %v4690_v48  ;;  %v5160_v5 = vpop.f32.mrf.mxu3  ;;  %v4350_v51 = vpop.f32.mrf.mxu0  ;;  %v4218_v7 = vpack.c.bf16 %v4197_v54, %v4196_v17 }
 0x52a   : > { %v4593_v15 = vpop.f32.mrf.mxu1  ;;  %v9175_v4 = vadd.f32 %v4350_v51, %v8969_v53 }
 0x52b   : > { %v9172_v58 = vadd.f32 %v5160_v5, %v4975_v3  ;;  %v4691_v40 = vadd.f32 %v4593_v15, %v9037_v52 }
 0x52c   : > { %7302 = vmatmul.msk.bf16.gmra.mxu1 %vm3336_vm3, %v4494_v27 }
 0x52d   : > { %7324 = vmatmul.msk.bf16.gmra.mxu2 %vm3336_vm3, %v5063_v35 }
 0x52e   : > { %7346 = vmatmul.msk.bf16.gmra.mxu3 %vm3336_vm3, %v5064_v26 }
 0x530   : > { %v4878_v10 = vpop.f32.mrf.mxu2 }
 0x531   : > { %v4976_v39 = vadd.f32 %v4878_v10, %v4691_v40  ;;  %v5163_v57 = vpop.f32.mrf.mxu3  ;;  %v4353_v44 = vpop.f32.mrf.mxu0 }
 0x532   : > { %v4595_v47 = vpop.f32.mrf.mxu1  ;;  %v9184_v52 = vadd.f32 %v4353_v44, %v8990_v29 }
 0x533   : > { %v9181_v53 = vadd.f32 %v5163_v57, %v4976_v39  ;;  %v4692_v48 = vadd.f32 %v4595_v47, %v9044_v42  ;;  %v5035_v42 = vld [vmem:[#allocation2 + $0xd9] sm:$0xff] }
 0x534   : > { %7289 = vmatmul.msk.bf16.gmra.mxu0 %vm3336_vm3, %v4218_v7  ;;  %v5065_v10 = vpack.c.bf16 %v5036_v32, %v5035_v42  ;;  %v4198_v39 = vld [vmem:[#allocation2 + $0x157] sm:$0xf] }
 0x535   : > { %v4219_v7 = vpack.c.bf16 %v4198_v39, %v4198_v39  ;;  %v5299_v39 = vld [vmem:[#allocation2 + $0x32] sm:$0xff] }
 0x538   : > { %v4880_v35 = vpop.f32.mrf.mxu2 }
 0x539   : > { %v4977_v3 = vadd.f32 %v4880_v35, %v4692_v48  ;;  %v5165_v5 = vpop.f32.mrf.mxu3  ;;  %v4355_v51 = vpop.f32.mrf.mxu0 }
 0x53a   : > { %v4598_v15 = vpop.f32.mrf.mxu1  ;;  %v9191_v27 = vadd.f32 %v4355_v51, %v9000_v1 }
 0x53b   : > { %v9188_v40 = vadd.f32 %v5165_v5, %v4977_v3  ;;  %v4693_v29 = vadd.f32 %v4598_v15, %v9052_v63  ;;  %v5038_v5 = vld [vmem:[#allocation2 + $0xf1] sm:$0xff] }
 0x53c   : > { %7303 = vmatmul.msk.bf16.gmra.mxu1 %vm3336_vm3, %v4495_v56  ;;  %v4467_v15 = vld [vmem:[#allocation2 + $0xd8] sm:$0xff] }
 0x53d   : > { %7325 = vmatmul.msk.bf16.gmra.mxu2 %vm3336_vm3, %v5064_v26  ;;  %v4468_v26 = vld [vmem:[#allocation2 + $0xe0] sm:$0xff] }
 0x53e   : > { %7347 = vmatmul.msk.bf16.gmra.mxu3 %vm3336_vm3, %v5065_v10  ;;  %v4496_v56 = vpack.c.bf16 %v4468_v26, %v4467_v15  ;;  %v4470_v26 = vld [vmem:[#allocation2 + $0xf0] sm:$0xff]  ;;  %v4469_v15 = vld [vmem:[#allocation2 + $0xe8] sm:$0xff] }
 0x540   : > { %v4883_v54 = vpop.f32.mrf.mxu2 }
 0x541   : > { %v4978_v57 = vadd.f32 %v4883_v54, %v4693_v29  ;;  %v5168_v44 = vpop.f32.mrf.mxu3  ;;  %v4358_v47 = vpop.f32.mrf.mxu0 }
 0x542   : > { %v4600_v17 = vpop.f32.mrf.mxu1  ;;  %v9200_v1 = vadd.f32 %v4358_v47, %v9005_v12 }
 0x543   : > { %v9197_v48 = vadd.f32 %v5168_v44, %v4978_v57  ;;  %v4694_v63 = vadd.f32 %v4600_v17, %v9059_v36  ;;  %v5037_v36 = vld [vmem:[#allocation2 + $0xe9] sm:$0xff] }
 0x544   : > { %7290 = vmatmul.msk.bf16.gmra.mxu0 %vm3336_vm3, %v4219_v7  ;;  %v5066_v42 = vpack.c.bf16 %v5038_v5, %v5037_v36  ;;  %v5040_v5 = vld [vmem:[#allocation2 + $0x101] sm:$0xff]  ;;  %v4497_v36 = vpack.c.bf16 %v4470_v26, %v4469_v15  ;;  %v4471_v15 = vld [vmem:[#allocation2 + $0xf8] sm:$0xff] }
 0x545   : > { %v4472_v26 = vld [vmem:[#allocation2 + $0x100] sm:$0xff] }
 0x548   : > { %v4885_v35 = vpop.f32.mrf.mxu2 }
 0x549   : > { %v4979_v45 = vadd.f32 %v4885_v35, %v4694_v63  ;;  %v5170_v3 = vpop.f32.mrf.mxu3  ;;  %v4360_v32 = vpop.f32.mrf.mxu0  ;;  %v5298_v63 = vld [vmem:[#allocation2 + $0x2a] sm:$0xff] }
 0x54a   : > { %v4603_v51 = vpop.f32.mrf.mxu1  ;;  %v9207_v29 = vadd.f32 %v4360_v32, %v9014_v2  ;;  %v5339_v35 = vpack.c.bf16 %v5299_v39, %v5298_v63 }
 0x54b   : > { %v9204_v55 = vadd.f32 %v5170_v3, %v4979_v45  ;;  %v4695_v12 = vadd.f32 %v4603_v51, %v9067_v33 }
 0x54c   : > { %7304 = vmatmul.msk.bf16.gmra.mxu1 %vm3336_vm3, %v4496_v56 }
 0x54d   : > { %7326 = vmatmul.msk.bf16.gmra.mxu2 %vm3336_vm3, %v5065_v10 }
 0x54e   : > { %7348 = vmatmul.msk.bf16.gmra.mxu3 %vm3336_vm3, %v5066_v42 }
 0x550   : > { %v4888_v54 = vpop.f32.mrf.mxu2 }
 0x551   : > { %v4980_v57 = vadd.f32 %v4888_v54, %v4695_v12  ;;  %v5173_v44 = vpop.f32.mrf.mxu3  ;;  %v4363_v47 = vpop.f32.mrf.mxu0 }
 0x552   : > { %v4605_v17 = vpop.f32.mrf.mxu1  ;;  %v9216_v33 = vadd.f32 %v4363_v47, %v9019_v25 }
 0x553   : > { %v9213_v2 = vadd.f32 %v5173_v44, %v4980_v57  ;;  %v4696_v7 = vadd.f32 %v4605_v17, %v9074_v30  ;;  %v5039_v30 = vld [vmem:[#allocation2 + $0xf9] sm:$0xff]  ;;  %v5301_v57 = vld [vmem:[#allocation2 + $0x42] sm:$0xff] }
 0x554   : > { %7358 = vmatmul.msk.bf16.vlgmr.msra.gmra.mxu0 %vm3336_vm3, %v5339_v35  ;;  %v5067_v54 = vpack.c.bf16 %v5040_v5, %v5039_v30  ;;  %v5042_v5 = vld [vmem:[#allocation2 + $0x111] sm:$0xff]  ;;  %v4498_v30 = vpack.c.bf16 %v4472_v26, %v4471_v15  ;;  %v4473_v15 = vld [vmem:[#allocation2 + $0x108] sm:$0xff] }
 0x555   : > { %v4474_v26 = vld [vmem:[#allocation2 + $0x110] sm:$0xff] }
 0x558   : > { %v4890_v10 = vpop.f32.mrf.mxu2 }
 0x559   : > { %v4981_v45 = vadd.f32 %v4890_v10, %v4696_v7  ;;  %v5175_v3 = vpop.f32.mrf.mxu3  ;;  %v4365_v32 = vpop.f32.mrf.mxu0  ;;  %v5300_v7 = vld [vmem:[#allocation2 + $0x3a] sm:$0xff] }
 0x55a   : > { %v4608_v51 = vpop.f32.mrf.mxu1  ;;  %v9223_v56 = vadd.f32 %v4365_v32, %v9026_v41  ;;  %v5340_v10 = vpack.c.bf16 %v5301_v57, %v5300_v7 }
 0x55b   : > { %v9220_v12 = vadd.f32 %v5175_v3, %v4981_v45  ;;  %v4697_v25 = vadd.f32 %v4608_v51, %v9082_v19 }
 0x55c   : > { %7305 = vmatmul.msk.bf16.gmra.mxu1 %vm3336_vm3, %v4497_v36 }
 0x55d   : > { %7327 = vmatmul.msk.bf16.gmra.mxu2 %vm3336_vm3, %v5066_v42 }
 0x55e   : > { %7349 = vmatmul.msk.bf16.gmra.mxu3 %vm3336_vm3, %v5067_v54 }
 0x560   : > { %v4893_v39 = vpop.f32.mrf.mxu2 }
 0x561   : > { %v4982_v44 = vadd.f32 %v4893_v39, %v4697_v25  ;;  %v5178_v47 = vpop.f32.mrf.mxu3  ;;  %v4368_v17 = vpop.f32.mrf.mxu0 }
 0x562   : > { %v4610_v63 = vpop.f32.mrf.mxu1  ;;  %v9232_v19 = vadd.f32 %v4368_v17, %v9034_v38 }
 0x563   : > { %v9229_v41 = vadd.f32 %v5178_v47, %v4982_v44  ;;  %v4698_v35 = vadd.f32 %v4610_v63, %v9089_v6  ;;  %v5041_v6 = vld [vmem:[#allocation2 + $0x109] sm:$0xff]  ;;  %v5303_v44 = vld [vmem:[#allocation2 + $0x52] sm:$0xff] }
 0x564   : > { %7359 = vmatmul.msk.bf16.gmra.mxu0 %vm3336_vm3, %v5340_v10  ;;  %v5068_v39 = vpack.c.bf16 %v5042_v5, %v5041_v6  ;;  %v5044_v5 = vld [vmem:[#allocation2 + $0x121] sm:$0xff]  ;;  %v4499_v6 = vpack.c.bf16 %v4474_v26, %v4473_v15  ;;  %v4475_v15 = vld [vmem:[#allocation2 + $0x118] sm:$0xff] }
 0x565   : > { %v4476_v26 = vld [vmem:[#allocation2 + $0x120] sm:$0xff] }
 0x568   : > { %v4895_v42 = vpop.f32.mrf.mxu2 }
 0x569   : > { %v4983_v45 = vadd.f32 %v4895_v42, %v4698_v35  ;;  %v5180_v3 = vpop.f32.mrf.mxu3  ;;  %v4370_v32 = vpop.f32.mrf.mxu0  ;;  %v5302_v35 = vld [vmem:[#allocation2 + $0x4a] sm:$0xff] }
 0x56a   : > { %v4613_v51 = vpop.f32.mrf.mxu1  ;;  %v9239_v36 = vadd.f32 %v4370_v32, %v9041_v16  ;;  %v5341_v42 = vpack.c.bf16 %v5303_v44, %v5302_v35 }
 0x56b   : > { %v9236_v25 = vadd.f32 %v5180_v3, %v4983_v45  ;;  %v4699_v38 = vadd.f32 %v4613_v51, %v9097_v21 }
 0x56c   : > { %7306 = vmatmul.msk.bf16.gmra.mxu1 %vm3336_vm3, %v4498_v30 }
 0x56d   : > { %7328 = vmatmul.msk.bf16.gmra.mxu2 %vm3336_vm3, %v5067_v54 }
 0x56e   : > { %7350 = vmatmul.msk.bf16.gmra.mxu3 %vm3336_vm3, %v5068_v39 }
 0x570   : > { %v4898_v57 = vpop.f32.mrf.mxu2 }
 0x571   : > { %v4984_v47 = vadd.f32 %v4898_v57, %v4699_v38  ;;  %v5183_v17 = vpop.f32.mrf.mxu3  ;;  %v4373_v63 = vpop.f32.mrf.mxu0 }
 0x572   : > { %v4615_v7 = vpop.f32.mrf.mxu1  ;;  %v9248_v21 = vadd.f32 %v4373_v63, %v9049_v13 }
 0x573   : > { %v9245_v16 = vadd.f32 %v5183_v17, %v4984_v47  ;;  %v4700_v10 = vadd.f32 %v4615_v7, %v9104_v50  ;;  %v5043_v50 = vld [vmem:[#allocation2 + $0x119] sm:$0xff]  ;;  %v5305_v47 = vld [vmem:[#allocation2 + $0x62] sm:$0xff] }
 0x574   : > { %7360 = vmatmul.msk.bf16.gmra.mxu0 %vm3336_vm3, %v5341_v42  ;;  %v5069_v57 = vpack.c.bf16 %v5044_v5, %v5043_v50  ;;  %v5046_v5 = vld [vmem:[#allocation2 + $0x131] sm:$0xff]  ;;  %v4500_v50 = vpack.c.bf16 %v4476_v26, %v4475_v15  ;;  %v5048_v15 = vld [vmem:[#allocation2 + $0x141] sm:$0xff] }
 0x578   : > { %v4900_v54 = vpop.f32.mrf.mxu2 }
 0x579   : > { %v4985_v45 = vadd.f32 %v4900_v54, %v4700_v10  ;;  %v5185_v3 = vpop.f32.mrf.mxu3  ;;  %v4375_v32 = vpop.f32.mrf.mxu0  ;;  %v5304_v10 = vld [vmem:[#allocation2 + $0x5a] sm:$0xff] }
 0x57a   : > { %v4618_v51 = vpop.f32.mrf.mxu1  ;;  %v9255_v30 = vadd.f32 %v4375_v32, %v9056_v34  ;;  %v5342_v54 = vpack.c.bf16 %v5305_v47, %v5304_v10  ;;  %v6221_v47 = vld [vmem:[%s10219_s9] sm:$0xff] }
 0x57b   : > { %v9252_v38 = vadd.f32 %v5185_v3, %v4985_v45  ;;  %v4701_v13 = vadd.f32 %v4618_v51, %v9112_v46 }
 0x57c   : > { %7307 = vmatmul.msk.bf16.gmra.mxu1 %vm3336_vm3, %v4499_v6 }
 0x57d   : > { %7329 = vmatmul.msk.bf16.gmra.mxu2 %vm3336_vm3, %v5068_v39 }
 0x57e   : > { %7351 = vmatmul.msk.bf16.gmra.mxu3 %vm3336_vm3, %v5069_v57 }
 0x580   : > { %v4903_v44 = vpop.f32.mrf.mxu2 }
 0x581   : > { %v4986_v17 = vadd.f32 %v4903_v44, %v4701_v13  ;;  %v5188_v63 = vpop.f32.mrf.mxu3  ;;  %v4378_v7 = vpop.f32.mrf.mxu0 }
 0x582   : > { %v4620_v35 = vpop.f32.mrf.mxu1  ;;  %v9264_v46 = vadd.f32 %v4378_v7, %v9064_v37 }
 0x583   : > { %v9261_v34 = vadd.f32 %v5188_v63, %v4986_v17  ;;  %v4702_v42 = vadd.f32 %v4620_v35, %v9119_v14  ;;  %v5045_v14 = vld [vmem:[#allocation2 + $0x129] sm:$0xff] }
 0x584   : > { %7361 = vmatmul.msk.bf16.gmra.mxu0 %vm3336_vm3, %v5342_v54  ;;  %v5070_v44 = vpack.c.bf16 %v5046_v5, %v5045_v14  ;;  %v5306_v54 = vld [vmem:[#allocation2 + $0x6a] sm:$0xff] }
 0x585   : > { %v4478_v5 = vld [vmem:[#allocation2 + $0x130] sm:$0xff]  ;;  %v4477_v14 = vld [vmem:[#allocation2 + $0x128] sm:$0xff] }
 0x588   : > { %v4905_v39 = vpop.f32.mrf.mxu2 }
 0x589   : > { %v4987_v45 = vadd.f32 %v4905_v39, %v4702_v42  ;;  %v5190_v3 = vpop.f32.mrf.mxu3  ;;  %v4380_v32 = vpop.f32.mrf.mxu0 }
 0x58a   : > { %v4623_v51 = vpop.f32.mrf.mxu1  ;;  %v9271_v6 = vadd.f32 %v4380_v32, %v9071_v61  ;;  %v6222_v61 = vld [vmem:[%s10219_s9 + $0x8] sm:$0xff] }
 0x58b   : > { %v9268_v13 = vadd.f32 %v5190_v3, %v4987_v45  ;;  %v4703_v37 = vadd.f32 %v4623_v51, %v9133_v22  ;;  %v6223_v17 = vpack.c.bf16 %v6222_v61, %v6221_v47  ;;  %v5307_v22 = vld [vmem:[#allocation2 + $0x72] sm:$0xff] }
 0x58c   : > { %7308 = vmatmul.msk.bf16.gmra.mxu1 %vm3336_vm3, %v4500_v50  ;;  %v5343_v45 = vpack.c.bf16 %v5307_v22, %v5306_v54 }
 0x58d   : > { %7330 = vmatmul.msk.bf16.gmra.mxu2 %vm3336_vm3, %v5069_v57  ;;  %6298 = vmatpush.bf16.msra.mxu3 %v6223_v17  ;;  %v4501_v17 = vpack.c.bf16 %v4478_v5, %v4477_v14  ;;  %v4480_v5 = vld [vmem:[#allocation2 + $0x140] sm:$0xff] }
 0x58e   : > { %7352 = vmatmul.msk.bf16.gmra.mxu3 %vm3336_vm3, %v5070_v44 }
 0x590   : > { %v4908_v63 = vpop.f32.mrf.mxu2 }
 0x591   : > { %v4988_v7 = vadd.f32 %v4908_v63, %v4703_v37  ;;  %v5193_v35 = vpop.f32.mrf.mxu3  ;;  %v4383_v10 = vpop.f32.mrf.mxu0 }
 0x592   : > { %v4625_v42 = vpop.f32.mrf.mxu1  ;;  %v9286_v39 = vadd.f32 %v4383_v10, %v9079_v23 }
 0x593   : > { %v9283_v57 = vadd.f32 %v5193_v35, %v4988_v7  ;;  %v4704_v26 = vadd.f32 %v4625_v42, %v9140_v60  ;;  %v5047_v60 = vld [vmem:[#allocation2 + $0x139] sm:$0xff]  ;;  %v5309_v7 = vld [vmem:[#allocation2 + $0x82] sm:$0xff] }
 0x594   : > { %7362 = vmatmul.msk.bf16.gmra.mxu0 %vm3336_vm3, %v5343_v45  ;;  %v5071_v63 = vpack.c.bf16 %v5048_v15, %v5047_v60 }
 0x598   : > { %v4910_v3 = vpop.f32.mrf.mxu2 }
 0x599   : > { %v4989_v32 = vadd.f32 %v4910_v3, %v4704_v26  ;;  %v5195_v51 = vpop.f32.mrf.mxu3  ;;  %v4385_v37 = vpop.f32.mrf.mxu0  ;;  %v5308_v26 = vld [vmem:[#allocation2 + $0x7a] sm:$0xff] }
 0x59a   : > { %v4628_v50 = vpop.f32.mrf.mxu1  ;;  %v9293_v61 = vadd.f32 %v4385_v37, %v9086_v62  ;;  %v5344_v3 = vpack.c.bf16 %v5309_v7, %v5308_v26 }
 0x59b   : > { %v9290_v47 = vadd.f32 %v5195_v51, %v4989_v32  ;;  %v4705_v23 = vadd.f32 %v4628_v50, %v9151_v20  ;;  %v5050_v51 = vld [vmem:[#allocation2 + $0x151] sm:$0xff] }
 0x59c   : > { %7309 = vmatmul.msk.bf16.gmra.mxu1 %vm3336_vm3, %v4501_v17  ;;  %v4479_v50 = vld [vmem:[#allocation2 + $0x138] sm:$0xff] }
 0x59d   : > { %7331 = vmatmul.msk.bf16.gmra.mxu2 %vm3336_vm3, %v5070_v44 }
 0x59e   : > { %7353 = vmatmul.msk.bf16.gmra.mxu3 %vm3336_vm3, %v5071_v63 }
 0x5a0   : > { %v4913_v22 = vpop.f32.mrf.mxu2 }
 0x5a1   : > { %v4990_v35 = vadd.f32 %v4913_v22, %v4705_v23  ;;  %v5198_v10 = vpop.f32.mrf.mxu3  ;;  %v4388_v42 = vpop.f32.mrf.mxu0  ;;  %v4502_v23 = vpack.c.bf16 %v4480_v5, %v4479_v50  ;;  %v5311_v22 = vld [vmem:[#allocation2 + $0x92] sm:$0xff] }
 0x5a2   : > { %v4630_v54 = vpop.f32.mrf.mxu1  ;;  %v9302_v20 = vadd.f32 %v4388_v42, %v9094_v31  ;;  %v4482_v5 = vld [vmem:[#allocation2 + $0x150] sm:$0xff] }
 0x5a3   : > { %v9299_v62 = vadd.f32 %v5198_v10, %v4990_v35  ;;  %v9305_v45 = vadd.f32 %v4630_v54, %v9158_v9  ;;  %v5049_v9 = vld [vmem:[#allocation2 + $0x149] sm:$0xff] }
 0x5a4   : > { %7363 = vmatmul.msk.bf16.gmra.mxu0 %vm3336_vm3, %v5344_v3  ;;  %v5072_v17 = vpack.c.bf16 %v5050_v51, %v5049_v9  ;;  %v5310_v54 = vld [vmem:[#allocation2 + $0x8a] sm:$0xff] }
 0x5a5   : > { %v5345_v3 = vpack.c.bf16 %v5311_v22, %v5310_v54 }
 0x5a8   : > { %v9308_v44 = vpop.f32.mrf.mxu2 }
 0x5a9   : > { %v9310_v32 = vpop.f32.mrf.mxu3  ;;  %v4390_v15 = vpop.f32.mrf.mxu0 }
 0x5aa   : > { %v4633_v37 = vpop.f32.mrf.mxu1  ;;  %v9313_v14 = vadd.f32 %v4390_v15, %v9101_v11  ;;  %v5051_v15 = vld [vmem:[#allocation2 + $0x159] sm:$0xff] }
 0x5ab   : > { %v4707_v31 = vadd.f32 %v4633_v37, %v9167_v43  ;;  %v5052_v37 = vld [vmem:[#allocation2 + $0x161] sm:$0xff] }
 0x5ac   : > { %7310 = vmatmul.msk.bf16.gmra.mxu1 %vm3336_vm3, %v4502_v23  ;;  %v4481_v23 = vld [vmem:[#allocation2 + $0x148] sm:$0xff] }
 0x5ad   : > { %7332 = vmatmul.msk.bf16.gmra.mxu2 %vm3336_vm3, %v5071_v63 }
 0x5ae   : > { %7354 = vmatmul.msk.bf16.gmra.mxu3 %vm3336_vm3, %v5072_v17 }
 0x5b0   : > { %v4918_v60 = vpop.f32.mrf.mxu2 }
 0x5b1   : > { %v4992_v7 = vadd.f32 %v4918_v60, %v4707_v31  ;;  %v5203_v35 = vpop.f32.mrf.mxu3  ;;  %v4393_v10 = vpop.f32.mrf.mxu0  ;;  %v5073_v60 = vpack.c.bf16 %v5052_v37, %v5051_v15  ;;  %v4483_v37 = vld [vmem:[#allocation2 + $0x158] sm:$0xf] }
 0x5b2   : > { %v4635_v42 = vpop.f32.mrf.mxu1  ;;  %v9322_v43 = vadd.f32 %v4393_v10, %v9109_v0 }
 0x5b3   : > { %v9319_v11 = vadd.f32 %v5203_v35, %v4992_v7  ;;  %v9325_v26 = vadd.f32 %v4635_v42, %v9175_v4  ;;  %v4503_v4 = vpack.c.bf16 %v4482_v5, %v4481_v23  ;;  %v5313_v7 = vld [vmem:[#allocation2 + $0xa2] sm:$0xff] }
 0x5b4   : > { %7364 = vmatmul.msk.bf16.gmra.mxu0 %vm3336_vm3, %v5345_v3  ;;  %v5312_v3 = vld [vmem:[#allocation2 + $0x9a] sm:$0xff] }
 0x5b5   : > { %v5346_v5 = vpack.c.bf16 %v5313_v7, %v5312_v3  ;;  %v5315_v7 = vld [vmem:[#allocation2 + $0xb2] sm:$0xff]  ;;  %v5314_v3 = vld [vmem:[#allocation2 + $0xaa] sm:$0xff] }
 0x5b8   : > { %v9328_v63 = vpop.f32.mrf.mxu2 }
 0x5b9   : > { %v9330_v51 = vpop.f32.mrf.mxu3  ;;  %v4395_v50 = vpop.f32.mrf.mxu0 }
 0x5ba   : > { %v4638_v31 = vpop.f32.mrf.mxu1  ;;  %v9333_v9 = vadd.f32 %v4395_v50, %v9116_v8  ;;  %v4768_v50 = vld [vmem:[#allocation2 + $0x159] sm:$0xf] }
 0x5bb   : > { %v4709_v0 = vadd.f32 %v4638_v31, %v9184_v52 }
 0x5bc   : > { %7311 = vmatmul.msk.bf16.gmra.mxu1 %vm3336_vm3, %v4503_v4 }
 0x5bd   : > { %7333 = vmatmul.msk.bf16.gmra.mxu2 %vm3336_vm3, %v5072_v17  ;;  %v5053_v17 = vld [vmem:[#allocation2 + $0x169] sm:$0xf] }
 0x5be   : > { %7355 = vmatmul.msk.bf16.gmra.mxu3 %vm3336_vm3, %v5073_v60  ;;  %v5074_v4 = vpack.c.bf16 %v5053_v17, %v5053_v17 }
 0x5c0   : > { %v4923_v22 = vpop.f32.mrf.mxu2 }
 0x5c1   : > { %v4994_v35 = vadd.f32 %v4923_v22, %v4709_v0  ;;  %v5208_v10 = vpop.f32.mrf.mxu3  ;;  %v4398_v42 = vpop.f32.mrf.mxu0  ;;  %v4789_v22 = vpack.c.bf16 %v4768_v50, %v4768_v50 }
 0x5c2   : > { %v4640_v54 = vpop.f32.mrf.mxu1  ;;  %v9342_v8 = vadd.f32 %v4398_v42, %v9130_v18  ;;  %v4504_v18 = vpack.c.bf16 %v4483_v37, %v4483_v37  ;;  %v5347_v37 = vpack.c.bf16 %v5315_v7, %v5314_v3  ;;  %v5317_v7 = vld [vmem:[#allocation2 + $0xc2] sm:$0xff]  ;;  %v5316_v3 = vld [vmem:[#allocation2 + $0xba] sm:$0xff] }
 0x5c3   : > { %v9339_v59 = vadd.f32 %v5208_v10, %v4994_v35  ;;  %v9345_v52 = vadd.f32 %v4640_v54, %v9191_v27 }
 0x5c4   : > { %7365 = vmatmul.msk.bf16.gmra.mxu0 %vm3336_vm3, %v5346_v5 }
 0x5c8   : > { %v9348_v15 = vpop.f32.mrf.mxu2 }
 0x5c9   : > { %v9350_v31 = vpop.f32.mrf.mxu3  ;;  %v4400_v23 = vpop.f32.mrf.mxu0 }
 0x5ca   : > { %v4643_v0 = vpop.f32.mrf.mxu1  ;;  %v5584_v23 = vld [vmem:[#allocation2 + $0x33] sm:$0xff] }
 0x5cb   : > { %v4711_v60 = vadd.f32 %v4643_v0, %v9200_v1 }
 0x5cc   : > { %7312 = vmatmul.msk.bf16.gmra.mxu1 %vm3336_vm3, %v4504_v18  ;;  %v5583_v18 = vld [vmem:[#allocation2 + $0x2b] sm:$0xff] }
 0x5cd   : > { %7334 = vmatmul.msk.bf16.gmra.mxu2 %vm3336_vm3, %v4789_v22 }
 0x5ce   : > { %7356 = vmatmul.msk.bf16.gmra.mxu3 %vm3336_vm3, %v5074_v4 }
 0x5d0   : > { %v4928_v27 = vpop.f32.mrf.mxu2 }
 0x5d1   : > { %v4996_v35 = vadd.f32 %v4928_v27, %v4711_v60  ;;  %v5213_v10 = vpop.f32.mrf.mxu3  ;;  %v5438_v54 = vpop.f32.mrf.mxu0 }
 0x5d2   : > { %v4645_v42 = vpop.f32.mrf.mxu1  ;;  %v9362_v1 = vadd.f32 %v5438_v54, %v9148_v24 }
 0x5d3   : > { %v9356_v5 = vadd.f32 %v5213_v10, %v4996_v35  ;;  %v9359_v17 = vadd.f32 %v4645_v42, %v9207_v29  ;;  %v5624_v29 = vpack.c.bf16 %v5584_v23, %v5583_v18 }
 0x5d4   : > { %7366 = vmatmul.msk.bf16.gmra.mxu0 %vm3336_vm3, %v5347_v37 }
 0x5d8   : > { %v9365_v50 = vpop.f32.mrf.mxu2 }
 0x5d9   : > { %v9367_v0 = vpop.f32.mrf.mxu3  ;;  %v5440_v60 = vpop.f32.mrf.mxu0 }
 0x5da   : > { %10361 = vst [vmem:[#allocation19_spill] sm:$0xff] %v9367_v0  ;;  %v4648_v4 = vpop.f32.mrf.mxu1  ;;  %v9371_v27 = vadd.f32 %v5440_v60, %v9155_v49  ;;  %v5348_v49 = vpack.c.bf16 %v5317_v7, %v5316_v3  ;;  %v5319_v7 = vld [vmem:[#allocation2 + $0xd2] sm:$0xff] }
 0x5db   : > { %v4713_v22 = vadd.f32 %v4648_v4, %v9216_v33  ;;  %v5586_v4 = vld [vmem:[#allocation2 + $0x43] sm:$0xff] }
 0x5dc   : > { %7380 = vmatmul.msk.bf16.vlgmr.msra.gmra.mxu1 %vm3336_vm3, %v5624_v29  ;;  %v5585_v29 = vld [vmem:[#allocation2 + $0x3b] sm:$0xff] }
 0x5e0   : > { %v4933_v24 = vpop.f32.mrf.mxu2 }
 0x5e1   : > { %v4998_v35 = vadd.f32 %v4933_v24, %v4713_v22  ;;  %v5218_v10 = vpop.f32.mrf.mxu3  ;;  %v5443_v54 = vpop.f32.mrf.mxu0 }
 0x5e2   : > { %v4650_v42 = vpop.f32.mrf.mxu1  ;;  %v9380_v33 = vadd.f32 %v5443_v54, %v9164_v28 }
 0x5e3   : > { %v9374_v37 = vadd.f32 %v5218_v10, %v4998_v35  ;;  %v9377_v0 = vadd.f32 %v4650_v42, %v9223_v56  ;;  %v5625_v56 = vpack.c.bf16 %v5586_v4, %v5585_v29 }
 0x5e4   : > { %7367 = vmatmul.msk.bf16.gmra.mxu0 %vm3336_vm3, %v5348_v49  ;;  %v5318_v49 = vld [vmem:[#allocation2 + $0xca] sm:$0xff] }
 0x5e8   : > { %v9383_v23 = vpop.f32.mrf.mxu2 }
 0x5e9   : > { %10362 = vst [vmem:[#allocation20_spill] sm:$0xff] %v9383_v23  ;;  %v9385_v60 = vpop.f32.mrf.mxu3  ;;  %v5445_v22 = vpop.f32.mrf.mxu0 }
 0x5ea   : > { %10363 = vst [vmem:[#allocation21_spill] sm:$0xff] %v9385_v60  ;;  %v4653_v18 = vpop.f32.mrf.mxu1  ;;  %v9389_v35 = vadd.f32 %v5445_v22, %v9172_v58  ;;  %v5349_v58 = vpack.c.bf16 %v5319_v7, %v5318_v49  ;;  %v5321_v7 = vld [vmem:[#allocation2 + $0xe2] sm:$0xff] }
 0x5eb   : > { %v4715_v24 = vadd.f32 %v4653_v18, %v9232_v19  ;;  %v5588_v18 = vld [vmem:[#allocation2 + $0x53] sm:$0xff] }
 0x5ec   : > { %7381 = vmatmul.msk.bf16.gmra.mxu1 %vm3336_vm3, %v5625_v56  ;;  %v5587_v56 = vld [vmem:[#allocation2 + $0x4b] sm:$0xff] }
 0x5f0   : > { %v4938_v28 = vpop.f32.mrf.mxu2 }
 0x5f1   : > { %v5000_v10 = vadd.f32 %v4938_v28, %v4715_v24  ;;  %v5223_v42 = vpop.f32.mrf.mxu3  ;;  %v5448_v3 = vpop.f32.mrf.mxu0 }
 0x5f2   : > { %v4655_v54 = vpop.f32.mrf.mxu1  ;;  %v9398_v19 = vadd.f32 %v5448_v3, %v9181_v53 }
 0x5f3   : > { %v9392_v23 = vadd.f32 %v5223_v42, %v5000_v10  ;;  %v9395_v60 = vadd.f32 %v4655_v54, %v9239_v36  ;;  %v5626_v36 = vpack.c.bf16 %v5588_v18, %v5587_v56 }
 0x5f4   : > { %7368 = vmatmul.msk.bf16.gmra.mxu0 %vm3336_vm3, %v5349_v58  ;;  %v5320_v58 = vld [vmem:[#allocation2 + $0xda] sm:$0xff] }
 0x5f8   : > { %v9401_v4 = vpop.f32.mrf.mxu2 }
 0x5f9   : > { %10364 = vst [vmem:[#allocation22_spill] sm:$0xff] %v9401_v4  ;;  %v9403_v22 = vpop.f32.mrf.mxu3  ;;  %v5450_v24 = vpop.f32.mrf.mxu0 }
 0x5fa   : > { %10365 = vst [vmem:[#allocation23_spill] sm:$0xff] %v9403_v22  ;;  %v4658_v29 = vpop.f32.mrf.mxu1  ;;  %v9407_v10 = vadd.f32 %v5450_v24, %v9188_v40  ;;  %v5350_v40 = vpack.c.bf16 %v5321_v7, %v5320_v58  ;;  %v5323_v7 = vld [vmem:[#allocation2 + $0xf2] sm:$0xff] }
 0x5fb   : > { %v4717_v28 = vadd.f32 %v4658_v29, %v9248_v21  ;;  %v5590_v29 = vld [vmem:[#allocation2 + $0x63] sm:$0xff] }
 0x5fc   : > { %7382 = vmatmul.msk.bf16.gmra.mxu1 %vm3336_vm3, %v5626_v36  ;;  %v5589_v36 = vld [vmem:[#allocation2 + $0x5b] sm:$0xff] }
 0x600   : > { %v4943_v53 = vpop.f32.mrf.mxu2 }
 0x601   : > { %v5002_v42 = vadd.f32 %v4943_v53, %v4717_v28  ;;  %v5228_v54 = vpop.f32.mrf.mxu3  ;;  %v5453_v49 = vpop.f32.mrf.mxu0 }
 0x602   : > { %v4660_v3 = vpop.f32.mrf.mxu1  ;;  %v9416_v21 = vadd.f32 %v5453_v49, %v9197_v48 }
 0x603   : > { %v9410_v4 = vadd.f32 %v5228_v54, %v5002_v42  ;;  %v9413_v22 = vadd.f32 %v4660_v3, %v9255_v30  ;;  %v5627_v30 = vpack.c.bf16 %v5590_v29, %v5589_v36 }
 0x604   : > { %7369 = vmatmul.msk.bf16.gmra.mxu0 %vm3336_vm3, %v5350_v40  ;;  %v5322_v40 = vld [vmem:[#allocation2 + $0xea] sm:$0xff] }
 0x608   : > { %v9419_v18 = vpop.f32.mrf.mxu2 }
 0x609   : > { %10366 = vst [vmem:[#allocation24_spill] sm:$0xff] %v9419_v18  ;;  %v9421_v24 = vpop.f32.mrf.mxu3  ;;  %v5455_v28 = vpop.f32.mrf.mxu0 }
 0x60a   : > { %10367 = vst [vmem:[#allocation25_spill] sm:$0xff] %v9421_v24  ;;  %v4663_v56 = vpop.f32.mrf.mxu1  ;;  %v9425_v42 = vadd.f32 %v5455_v28, %v9204_v55  ;;  %v5351_v55 = vpack.c.bf16 %v5323_v7, %v5322_v40  ;;  %v5325_v7 = vld [vmem:[#allocation2 + $0x102] sm:$0xff] }
 0x60b   : > { %v4719_v53 = vadd.f32 %v4663_v56, %v9264_v46  ;;  %v5592_v56 = vld [vmem:[#allocation2 + $0x73] sm:$0xff] }
 0x60c   : > { %7383 = vmatmul.msk.bf16.gmra.mxu1 %vm3336_vm3, %v5627_v30  ;;  %v5591_v30 = vld [vmem:[#allocation2 + $0x6b] sm:$0xff] }
 0x610   : > { %v4948_v48 = vpop.f32.mrf.mxu2 }
 0x611   : > { %v5004_v54 = vadd.f32 %v4948_v48, %v4719_v53  ;;  %v5233_v3 = vpop.f32.mrf.mxu3  ;;  %v5458_v58 = vpop.f32.mrf.mxu0 }
 0x612   : > { %v4665_v49 = vpop.f32.mrf.mxu1  ;;  %v9434_v46 = vadd.f32 %v5458_v58, %v9213_v2 }
 0x613   : > { %v9428_v18 = vadd.f32 %v5233_v3, %v5004_v54  ;;  %v9431_v24 = vadd.f32 %v4665_v49, %v9271_v6  ;;  %v5628_v6 = vpack.c.bf16 %v5592_v56, %v5591_v30 }
 0x614   : > { %7370 = vmatmul.msk.bf16.gmra.mxu0 %vm3336_vm3, %v5351_v55  ;;  %v5324_v55 = vld [vmem:[#allocation2 + $0xfa] sm:$0xff] }
 0x618   : > { %v9437_v29 = vpop.f32.mrf.mxu2 }
 0x619   : > { %10368 = vst [vmem:[#allocation26_spill] sm:$0xff] %v9437_v29  ;;  %v9439_v28 = vpop.f32.mrf.mxu3  ;;  %v5460_v53 = vpop.f32.mrf.mxu0 }
 0x61a   : > { %10369 = vst [vmem:[#allocation27_spill] sm:$0xff] %v9439_v28  ;;  %v4668_v36 = vpop.f32.mrf.mxu1  ;;  %v9443_v54 = vadd.f32 %v5460_v53, %v9220_v12  ;;  %v5352_v12 = vpack.c.bf16 %v5325_v7, %v5324_v55  ;;  %v5327_v7 = vld [vmem:[#allocation2 + $0x112] sm:$0xff] }
 0x61b   : > { %v4721_v48 = vadd.f32 %v4668_v36, %v9286_v39  ;;  %v5594_v36 = vld [vmem:[#allocation2 + $0x83] sm:$0xff] }
 0x61c   : > { %7384 = vmatmul.msk.bf16.gmra.mxu1 %vm3336_vm3, %v5628_v6  ;;  %v5593_v6 = vld [vmem:[#allocation2 + $0x7b] sm:$0xff] }
 0x620   : > { %v4953_v2 = vpop.f32.mrf.mxu2 }
 0x621   : > { %v5006_v3 = vadd.f32 %v4953_v2, %v4721_v48  ;;  %v5238_v49 = vpop.f32.mrf.mxu3  ;;  %v5463_v40 = vpop.f32.mrf.mxu0 }
 0x622   : > { %v4670_v58 = vpop.f32.mrf.mxu1  ;;  %v9452_v39 = vadd.f32 %v5463_v40, %v9229_v41 }
 0x623   : > { %v9446_v29 = vadd.f32 %v5238_v49, %v5006_v3  ;;  %v9449_v28 = vadd.f32 %v4670_v58, %v9293_v61  ;;  %v5629_v61 = vpack.c.bf16 %v5594_v36, %v5593_v6 }
 0x624   : > { %7371 = vmatmul.msk.bf16.gmra.mxu0 %vm3336_vm3, %v5352_v12  ;;  %v5326_v12 = vld [vmem:[#allocation2 + $0x10a] sm:$0xff] }
 0x628   : > { %v9455_v56 = vpop.f32.mrf.mxu2 }
 0x629   : > { %10370 = vst [vmem:[#allocation28_spill] sm:$0xff] %v9455_v56  ;;  %v9457_v53 = vpop.f32.mrf.mxu3  ;;  %v5465_v48 = vpop.f32.mrf.mxu0 }
 0x62a   : > { %10371 = vst [vmem:[#allocation29_spill] sm:$0xff] %v9457_v53  ;;  %v4673_v30 = vpop.f32.mrf.mxu1  ;;  %v9461_v3 = vadd.f32 %v5465_v48, %v9236_v25  ;;  %v5353_v25 = vpack.c.bf16 %v5327_v7, %v5326_v12  ;;  %v5329_v7 = vld [vmem:[#allocation2 + $0x122] sm:$0xff] }
 0x62b   : > { %v4723_v2 = vadd.f32 %v4673_v30, %v9302_v20  ;;  %v5596_v30 = vld [vmem:[#allocation2 + $0x93] sm:$0xff] }
 0x62c   : > { %7385 = vmatmul.msk.bf16.gmra.mxu1 %vm3336_vm3, %v5629_v61  ;;  %v5595_v61 = vld [vmem:[#allocation2 + $0x8b] sm:$0xff] }
 0x630   : > { %v4958_v41 = vpop.f32.mrf.mxu2 }
 0x631   : > { %v5008_v49 = vadd.f32 %v4958_v41, %v4723_v2  ;;  %v5243_v58 = vpop.f32.mrf.mxu3  ;;  %v5468_v55 = vpop.f32.mrf.mxu0 }
 0x632   : > { %v4675_v40 = vpop.f32.mrf.mxu1  ;;  %v9470_v20 = vadd.f32 %v5468_v55, %v9245_v16 }
 0x633   : > { %v9464_v56 = vadd.f32 %v5243_v58, %v5008_v49  ;;  %v9467_v53 = vadd.f32 %v4675_v40, %v9313_v14  ;;  %v5630_v14 = vpack.c.bf16 %v5596_v30, %v5595_v61 }
 0x634   : > { %7372 = vmatmul.msk.bf16.gmra.mxu0 %vm3336_vm3, %v5353_v25  ;;  %v5328_v25 = vld [vmem:[#allocation2 + $0x11a] sm:$0xff] }
 0x638   : > { %v9473_v36 = vpop.f32.mrf.mxu2 }
 0x639   : > { %10372 = vst [vmem:[#allocation55_spill] sm:$0xff] %v9473_v36  ;;  %v9475_v48 = vpop.f32.mrf.mxu3  ;;  %v5470_v2 = vpop.f32.mrf.mxu0 }
 0x63a   : > { %10373 = vst [vmem:[#allocation56_spill] sm:$0xff] %v9475_v48  ;;  %v4678_v6 = vpop.f32.mrf.mxu1  ;;  %v9479_v49 = vadd.f32 %v5470_v2, %v9252_v38  ;;  %v5354_v38 = vpack.c.bf16 %v5329_v7, %v5328_v25  ;;  %v5331_v7 = vld [vmem:[#allocation2 + $0x132] sm:$0xff] }
 0x63b   : > { %v4725_v41 = vadd.f32 %v4678_v6, %v9322_v43  ;;  %v5598_v6 = vld [vmem:[#allocation2 + $0xa3] sm:$0xff] }
 0x63c   : > { %7386 = vmatmul.msk.bf16.gmra.mxu1 %vm3336_vm3, %v5630_v14  ;;  %v5597_v14 = vld [vmem:[#allocation2 + $0x9b] sm:$0xff] }
 0x640   : > { %v4963_v16 = vpop.f32.mrf.mxu2 }
 0x641   : > { %v5010_v58 = vadd.f32 %v4963_v16, %v4725_v41  ;;  %v5248_v40 = vpop.f32.mrf.mxu3  ;;  %v5473_v12 = vpop.f32.mrf.mxu0 }
 0x642   : > { %v4680_v55 = vpop.f32.mrf.mxu1  ;;  %v9488_v43 = vadd.f32 %v5473_v12, %v9261_v34 }
 0x643   : > { %v9482_v36 = vadd.f32 %v5248_v40, %v5010_v58  ;;  %v9485_v48 = vadd.f32 %v4680_v55, %v9333_v9  ;;  %v5631_v9 = vpack.c.bf16 %v5598_v6, %v5597_v14  ;;  %v5599_v14 = vld [vmem:[#allocation2 + $0xab] sm:$0xff] }
 0x644   : > { %7373 = vmatmul.msk.bf16.gmra.mxu0 %vm3336_vm3, %v5354_v38  ;;  %v5330_v38 = vld [vmem:[#allocation2 + $0x12a] sm:$0xff] }
 0x645   : > { %10374 = vst [vmem:[#allocation57_spill] sm:$0xff] %v9485_v48  ;;  %v5355_v48 = vpack.c.bf16 %v5331_v7, %v5330_v38 }
 0x648   : > { %v9491_v30 = vpop.f32.mrf.mxu2 }
 0x649   : > { %10375 = vst [vmem:[#allocation58_spill] sm:$0xff] %v9491_v30  ;;  %v9493_v2 = vpop.f32.mrf.mxu3  ;;  %v5475_v41 = vpop.f32.mrf.mxu0 }
 0x64a   : > { %10376 = vst [vmem:[#allocation59_spill] sm:$0xff] %v9493_v2  ;;  %v4683_v61 = vpop.f32.mrf.mxu1  ;;  %v9497_v58 = vadd.f32 %v5475_v41, %v9268_v13 }
 0x64b   : > { %v4727_v16 = vadd.f32 %v4683_v61, %v9342_v8  ;;  %v5600_v8 = vld [vmem:[#allocation2 + $0xb3] sm:$0xff] }
 0x64c   : > { %7387 = vmatmul.msk.bf16.gmra.mxu1 %vm3336_vm3, %v5631_v9  ;;  %v5632_v9 = vpack.c.bf16 %v5600_v8, %v5599_v14 }
 0x650   : > { %v4968_v34 = vpop.f32.mrf.mxu2 }
 0x651   : > { %v5012_v40 = vadd.f32 %v4968_v34, %v4727_v16  ;;  %v5253_v55 = vpop.f32.mrf.mxu3  ;;  %v5478_v25 = vpop.f32.mrf.mxu0 }
 0x652   : > { %v4685_v12 = vpop.f32.mrf.mxu1  ;;  %v9503_v2 = vadd.f32 %v5478_v25, %v9283_v57  ;;  %v9514_v57 = vld [vmem:[%s10216_s6] ss:$0 sm:$0xff] }
 0x653   : > { %v9500_v30 = vadd.f32 %v5253_v55, %v5012_v40  ;;  %v5332_v55 = vld [vmem:[#allocation2 + $0x13a] sm:$0xff] }
 0x654   : > { %7374 = vmatmul.msk.bf16.gmra.mxu0 %vm3336_vm3, %v5355_v48  ;;  %v5333_v48 = vld [vmem:[#allocation2 + $0x142] sm:$0xff] }
 0x655   : > { %v5356_v38 = vpack.c.bf16 %v5333_v48, %v5332_v55  ;;  %v5334_v55 = vld [vmem:[#allocation2 + $0x14a] sm:$0xff] }
 0x658   : > { %v4970_v13 = vpop.f32.mrf.mxu2 }
 0x659   : > { %v5255_v6 = vpop.f32.mrf.mxu3  ;;  %v5480_v61 = vpop.f32.mrf.mxu0 }
 0x65a   : > { %v5723_v41 = vpop.f32.mrf.mxu1  ;;  %v9507_v16 = vadd.f32 %v5480_v61, %v9290_v47  ;;  %v5602_v61 = vld [vmem:[#allocation2 + $0xc3] sm:$0xff] }
 0x65b   : > { %v5827_v34 = vadd.f32 %v5723_v41, %v9362_v1  ;;  %v4991_v1 = vadd.f32 %v9308_v44, %v9305_v45  ;;  %v5335_v44 = vld [vmem:[#allocation2 + $0x152] sm:$0xff] }
 0x65c   : > { %7388 = vmatmul.msk.bf16.gmra.mxu1 %vm3336_vm3, %v5632_v9 }
 0x65d   : > { %v5872_v12 = vadd.f32 %v9514_v57, %v5827_v34  ;;  %v5276_v41 = vadd.f32 %v9310_v32, %v4991_v1  ;;  %v5601_v34 = vld [vmem:[#allocation2 + $0xbb] sm:$0xff]  ;;  %v4993_v1 = vadd.f32 %v9328_v63, %v9325_v26 }
 0x65e   : > { %v5336_v63 = vld [vmem:[#allocation2 + $0x15a] sm:$0xff] }
 0x65f   : > { %v5913_v8 = vmax.f32 %v5872_v12, 0.0 }
 0x661   : > { %v5483_v7 = vpop.f32.mrf.mxu0 }
 0x662   : > { %v5725_v40 = vpop.f32.mrf.mxu1  ;;  %v9518_v25 = vadd.f32 %v5483_v7, %v9299_v62 }
 0x663   : > { %v5828_v47 = vadd.f32 %v5725_v40, %v9371_v27  ;;  %v5633_v27 = vpack.c.bf16 %v5602_v61, %v5601_v34  ;;  %v5278_v61 = vadd.f32 %v9330_v51, %v4993_v1  ;;  %v5337_v34 = vld [vmem:[#allocation2 + $0x162] sm:$0xff] }
 0x664   : > { %7375 = vmatmul.msk.bf16.gmra.mxu0 %vm3336_vm3, %v5356_v38  ;;  %v5357_v38 = vpack.c.bf16 %v5335_v44, %v5334_v55  ;;  %v4995_v55 = vadd.f32 %v9348_v15, %v9345_v52  ;;  %v5338_v52 = vld [vmem:[#allocation2 + $0x16a] sm:$0xf] }
 0x665   : > { %v5873_v13 = vadd.f32 %v9514_v57, %v5828_v47 }
 0x666   : > { %v5280_v1 = vadd.f32 %v9350_v31, %v4995_v55  ;;  %v5607_v55 = vld [vmem:[#allocation2 + $0xeb] sm:$0xff] }
 0x667   : > { %v5914_v6 = vmax.f32 %v5873_v13, 0.0 }
 0x669   : > { %v5954_v14 = vpack.c.bf16 %v5914_v6, %v5913_v8  ;;  %v5485_v9 = vpop.f32.mrf.mxu0  ;;  %v5604_v6 = vld [vmem:[#allocation2 + $0xd3] sm:$0xff] }
 0x66a   : > { %v5728_v62 = vpop.f32.mrf.mxu1  ;;  %v9526_v7 = vadd.f32 %v5485_v9, %v5276_v41 }
 0x66b   : > { %7401 = vmatmul.msk.bf16.vlgmr.msra.gmra.mxu2 %vm5982_vm5, %v5954_v14  ;;  %v5829_v45 = vadd.f32 %v5728_v62, %v9380_v33 }
 0x66c   : > { %7389 = vmatmul.msk.bf16.gmra.mxu1 %vm3336_vm3, %v5633_v27 }
 0x66d   : > { %v5874_v12 = vadd.f32 %v9514_v57, %v5829_v45 }
 0x66f   : > { %v5915_v33 = vmax.f32 %v5874_v12, 0.0 }
 0x671   : > { %v5488_v48 = vpop.f32.mrf.mxu0 }
 0x672   : > { %v5730_v40 = vpop.f32.mrf.mxu1  ;;  %v9533_v32 = vadd.f32 %v5488_v48, %v9319_v11  ;;  %v5603_v11 = vld [vmem:[#allocation2 + $0xcb] sm:$0xff] }
 0x673   : > { %v5830_v47 = vadd.f32 %v5730_v40, %v9389_v35  ;;  %v5634_v35 = vpack.c.bf16 %v5604_v6, %v5603_v11  ;;  %v5358_v40 = vpack.c.bf16 %v5337_v34, %v5336_v63 }
 0x674   : > { %7376 = vmatmul.msk.bf16.gmra.mxu0 %vm3336_vm3, %v5357_v38  ;;  %v5606_v38 = vld [vmem:[#allocation2 + $0xe3] sm:$0xff] }
 0x675   : > { %v5875_v13 = vadd.f32 %v9514_v57, %v5830_v47 }
 0x677   : > { %v5916_v8 = vmax.f32 %v5875_v13, 0.0 }
 0x679   : > { %v5955_v41 = vpack.c.bf16 %v5916_v8, %v5915_v33  ;;  %v5490_v14 = vpop.f32.mrf.mxu0 }
 0x67a   : > { %v5733_v9 = vpop.f32.mrf.mxu1  ;;  %v9541_v62 = vadd.f32 %v5490_v14, %v5278_v61  ;;  %v5359_v61 = vpack.c.bf16 %v5338_v52, %v5338_v52  ;;  %v10379_v52 = vld [vmem:[#allocation21_spill] sm:$0xff] }
 0x67b   : > { %7402 = vmatmul.msk.bf16.gmra.mxu2 %vm5982_vm5, %v5955_v41  ;;  %v5831_v26 = vadd.f32 %v5733_v9, %v9398_v19 }
 0x67c   : > { %7390 = vmatmul.msk.bf16.gmra.mxu1 %vm3336_vm3, %v5634_v35  ;;  %v4997_v35 = vadd.f32 %v9365_v50, %v9359_v17 }
 0x67d   : > { %v5876_v44 = vadd.f32 %v9514_v57, %v5831_v26 }
 0x67f   : > { %v5917_v19 = vmax.f32 %v5876_v44, 0.0 }
 0x681   : > { %v5493_v27 = vpop.f32.mrf.mxu0 }
 0x682   : > { %v5735_v45 = vpop.f32.mrf.mxu1  ;;  %v9548_v51 = vadd.f32 %v5493_v27, %v9339_v59  ;;  %v5605_v59 = vld [vmem:[#allocation2 + $0xdb] sm:$0xff] }
 0x683   : > { %v5832_v48 = vadd.f32 %v5735_v45, %v9407_v10  ;;  %v5635_v10 = vpack.c.bf16 %v5606_v38, %v5605_v59  ;;  %v10377_v27 = vld [vmem:[#allocation19_spill] sm:$0xff] }
 0x684   : > { %7377 = vmatmul.msk.bf16.gmra.mxu0 %vm3336_vm3, %v5358_v40  ;;  %v5282_v45 = vadd.f32 %v10377_v27, %v4997_v35 }
 0x685   : > { %v5877_v12 = vadd.f32 %v9514_v57, %v5832_v48 }
 0x687   : > { %v5918_v47 = vmax.f32 %v5877_v12, 0.0 }
 0x689   : > { %v5956_v13 = vpack.c.bf16 %v5918_v47, %v5917_v19  ;;  %v5495_v33 = vpop.f32.mrf.mxu0 }
 0x68a   : > { %v5738_v8 = vpop.f32.mrf.mxu1  ;;  %v9556_v6 = vadd.f32 %v5495_v33, %v5280_v1  ;;  %v10378_v1 = vld [vmem:[#allocation20_spill] sm:$0xff] }
 0x68b   : > { %7403 = vmatmul.msk.bf16.gmra.mxu2 %vm5982_vm5, %v5956_v13  ;;  %v5833_v15 = vadd.f32 %v5738_v8, %v9416_v21  ;;  %v5608_v21 = vld [vmem:[#allocation2 + $0xf3] sm:$0xff]  ;;  %v4999_v13 = vadd.f32 %v10378_v1, %v9377_v0 }
 0x68c   : > { %7391 = vmatmul.msk.bf16.gmra.mxu1 %vm3336_vm3, %v5635_v10  ;;  %v5610_v10 = vld [vmem:[#allocation2 + $0x103] sm:$0xff] }
 0x68d   : > { %v5878_v9 = vadd.f32 %v9514_v57, %v5833_v15  ;;  %v5284_v15 = vadd.f32 %v10379_v52, %v4999_v13 }
 0x68f   : > { %v5919_v63 = vmax.f32 %v5878_v9, 0.0 }
 0x691   : > { %v5498_v41 = vpop.f32.mrf.mxu0 }
 0x692   : > { %v5740_v14 = vpop.f32.mrf.mxu1  ;;  %v9563_v31 = vadd.f32 %v5498_v41, %v9356_v5 }
 0x693   : > { %v5834_v11 = vadd.f32 %v5740_v14, %v9425_v42  ;;  %v5636_v42 = vpack.c.bf16 %v5608_v21, %v5607_v55  ;;  %v5609_v14 = vld [vmem:[#allocation2 + $0xfb] sm:$0xff] }
 0x694   : > { %7378 = vmatmul.msk.bf16.gmra.mxu0 %vm3336_vm3, %v5359_v61 }
 0x695   : > { %v5879_v26 = vadd.f32 %v9514_v57, %v5834_v11 }
 0x697   : > { %v5920_v34 = vmax.f32 %v5879_v26, 0.0 }
 0x699   : > { %v5957_v44 = vpack.c.bf16 %v5920_v34, %v5919_v63  ;;  %v5500_v48 = vpop.f32.mrf.mxu0  ;;  %v10380_v34 = vld [vmem:[#allocation22_spill] sm:$0xff] }
 0x69a   : > { %v5743_v40 = vpop.f32.mrf.mxu1  ;;  %v9571_v5 = vadd.f32 %v5500_v48, %v5282_v45  ;;  %v5001_v21 = vadd.f32 %v10380_v34, %v9395_v60  ;;  %v5612_v48 = vld [vmem:[#allocation2 + $0x113] sm:$0xff] }
 0x69b   : > { %7404 = vmatmul.msk.bf16.gmra.mxu2 %vm5982_vm5, %v5957_v44  ;;  %v5835_v17 = vadd.f32 %v5743_v40, %v9434_v46  ;;  %v10381_v40 = vld [vmem:[#allocation23_spill] sm:$0xff]  ;;  %v10384_v34 = vld [vmem:[#allocation26_spill] sm:$0xff] }
 0x69c   : > { %7392 = vmatmul.msk.bf16.gmra.mxu1 %vm3336_vm3, %v5636_v42  ;;  %v5286_v55 = vadd.f32 %v10381_v40, %v5001_v21  ;;  %v5005_v21 = vadd.f32 %v10384_v34, %v9431_v24  ;;  %v10385_v40 = vld [vmem:[#allocation27_spill] sm:$0xff] }
 0x69d   : > { %v5880_v19 = vadd.f32 %v9514_v57, %v5835_v17 }
 0x69f   : > { %v5921_v8 = vmax.f32 %v5880_v19, 0.0 }
 0x6a1   : > { %v5503_v50 = vpop.f32.mrf.mxu0 }
 0x6a2   : > { %v5745_v12 = vpop.f32.mrf.mxu1  ;;  %v9578_v47 = vadd.f32 %v5503_v50, %v9374_v37  ;;  %v5637_v37 = vpack.c.bf16 %v5610_v10, %v5609_v14  ;;  %v5611_v50 = vld [vmem:[#allocation2 + $0x10b] sm:$0xff] }
 0x6a3   : > { %v5836_v38 = vadd.f32 %v5745_v12, %v9443_v54 }
 0x6a5   : > { %v5881_v33 = vadd.f32 %v9514_v57, %v5836_v38 }
 0x6a7   : > { %v5922_v59 = vmax.f32 %v5881_v33, 0.0  ;;  %v10382_v33 = vld [vmem:[#allocation24_spill] sm:$0xff] }
 0x6a9   : > { %v5958_v46 = vpack.c.bf16 %v5922_v59, %v5921_v8  ;;  %v5505_v61 = vpop.f32.mrf.mxu0  ;;  %v5003_v8 = vadd.f32 %v10382_v33, %v9413_v22 }
 0x6aa   : > { %v5748_v41 = vpop.f32.mrf.mxu1  ;;  %v9585_v9 = vadd.f32 %v5505_v61, %v5284_v15  ;;  %v5614_v15 = vld [vmem:[#allocation2 + $0x123] sm:$0xff] }
 0x6ab   : > { %7405 = vmatmul.msk.bf16.gmra.mxu2 %vm5982_vm5, %v5958_v46  ;;  %v5837_v0 = vadd.f32 %v5748_v41, %v9452_v39  ;;  %v10383_v46 = vld [vmem:[#allocation25_spill] sm:$0xff] }
 0x6ac   : > { %7393 = vmatmul.msk.bf16.gmra.mxu1 %vm3336_vm3, %v5637_v37  ;;  %v5288_v61 = vadd.f32 %v10383_v46, %v5003_v8  ;;  %v5613_v37 = vld [vmem:[#allocation2 + $0x11b] sm:$0xff] }
 0x6ad   : > { %v5882_v35 = vadd.f32 %v9514_v57, %v5837_v0 }
 0x6af   : > { %v5923_v45 = vmax.f32 %v5882_v35, 0.0 }
 0x6b1   : > { %v5508_v54 = vpop.f32.mrf.mxu0 }
 0x6b2   : > { %v5750_v11 = vpop.f32.mrf.mxu1  ;;  %v9592_v26 = vadd.f32 %v5508_v54, %v9392_v23  ;;  %v5638_v23 = vpack.c.bf16 %v5612_v48, %v5611_v50  ;;  %v5616_v48 = vld [vmem:[#allocation2 + $0x133] sm:$0xff] }
 0x6b3   : > { %v5838_v63 = vadd.f32 %v5750_v11, %v9461_v3 }
 0x6b5   : > { %v5883_v27 = vadd.f32 %v9514_v57, %v5838_v63 }
 0x6b7   : > { %v5924_v44 = vmax.f32 %v5883_v27, 0.0 }
 0x6b9   : > { %v5959_v39 = vpack.c.bf16 %v5924_v44, %v5923_v45  ;;  %v5510_v42 = vpop.f32.mrf.mxu0 }
 0x6ba   : > { %v5753_v17 = vpop.f32.mrf.mxu1  ;;  %v9599_v12 = vadd.f32 %v5510_v42, %v5286_v55  ;;  %v5290_v55 = vadd.f32 %v10385_v40, %v5005_v21  ;;  %v10389_v40 = vld [vmem:[#allocation56_spill] sm:$0xff] }
 0x6bb   : > { %7406 = vmatmul.msk.bf16.gmra.mxu2 %vm5982_vm5, %v5959_v39  ;;  %v5839_v60 = vadd.f32 %v5753_v17, %v9470_v20  ;;  %v5615_v17 = vld [vmem:[#allocation2 + $0x12b] sm:$0xff] }
 0x6bc   : > { %7394 = vmatmul.msk.bf16.gmra.mxu1 %vm3336_vm3, %v5638_v23 }
 0x6bd   : > { %v5884_v38 = vadd.f32 %v9514_v57, %v5839_v60 }
 0x6bf   : > { %v5925_v10 = vmax.f32 %v5884_v38, 0.0  ;;  %v10386_v38 = vld [vmem:[#allocation28_spill] sm:$0xff] }
 0x6c1   : > { %v5513_v3 = vpop.f32.mrf.mxu0 }
 0x6c2   : > { %v5755_v19 = vpop.f32.mrf.mxu1  ;;  %v9606_v1 = vadd.f32 %v5513_v3, %v9410_v4  ;;  %v5639_v4 = vpack.c.bf16 %v5614_v15, %v5613_v37 }
 0x6c3   : > { %v5840_v13 = vadd.f32 %v5755_v19, %v9479_v49 }
 0x6c5   : > { %v5885_v59 = vadd.f32 %v9514_v57, %v5840_v13  ;;  %v5007_v13 = vadd.f32 %v10386_v38, %v9449_v28 }
 0x6c7   : > { %v5926_v52 = vmax.f32 %v5885_v59, 0.0 }
 0x6c9   : > { %v5960_v20 = vpack.c.bf16 %v5926_v52, %v5925_v10  ;;  %v5515_v41 = vpop.f32.mrf.mxu0  ;;  %v5618_v10 = vld [vmem:[#allocation2 + $0x143] sm:$0xff] }
 0x6ca   : > { %v5758_v14 = vpop.f32.mrf.mxu1  ;;  %v9613_v0 = vadd.f32 %v5515_v41, %v5288_v61  ;;  %v10387_v52 = vld [vmem:[#allocation29_spill] sm:$0xff] }
 0x6cb   : > { %7407 = vmatmul.msk.bf16.gmra.mxu2 %vm5982_vm5, %v5960_v20  ;;  %v5841_v22 = vadd.f32 %v5758_v14, %v9488_v43  ;;  %v5292_v15 = vadd.f32 %v10387_v52, %v5007_v13  ;;  %v5617_v20 = vld [vmem:[#allocation2 + $0x13b] sm:$0xff] }
 0x6cc   : > { %7395 = vmatmul.msk.bf16.gmra.mxu1 %vm3336_vm3, %v5639_v4  ;;  %v9649_v14 = vld [vmem:[%s10218_s8] ss:$0 sm:$0xff] }
 0x6cd   : > { %v5886_v11 = vadd.f32 %v9514_v57, %v5841_v22 }
 0x6cf   : > { %v5927_v45 = vmax.f32 %v5886_v11, 0.0  ;;  %v10388_v11 = vld [vmem:[#allocation55_spill] sm:$0xff] }
 0x6d1   : > { %v5518_v49 = vpop.f32.mrf.mxu0 }
 0x6d2   : > { %v5760_v54 = vpop.f32.mrf.mxu1  ;;  %v9620_v35 = vadd.f32 %v5518_v49, %v9428_v18  ;;  %v5640_v18 = vpack.c.bf16 %v5616_v48, %v5615_v17  ;;  %v5620_v48 = vld [vmem:[#allocation2 + $0x153] sm:$0xff]  ;;  %v5619_v17 = vld [vmem:[#allocation2 + $0x14b] sm:$0xff] }
 0x6d3   : > { %v5842_v63 = vadd.f32 %v5760_v54, %v9497_v58 }
 0x6d5   : > { %v5887_v27 = vadd.f32 %v9514_v57, %v5842_v63  ;;  %v5009_v63 = vadd.f32 %v10388_v11, %v9467_v53 }
 0x6d7   : > { %v5928_v44 = vmax.f32 %v5887_v27, 0.0 }
 0x6d9   : > { %v5961_v43 = vpack.c.bf16 %v5928_v44, %v5927_v45  ;;  %v5520_v39 = vpop.f32.mrf.mxu0 }
 0x6da   : > { %v5763_v42 = vpop.f32.mrf.mxu1  ;;  %v9627_v50 = vadd.f32 %v5520_v39, %v5290_v55  ;;  %v5294_v55 = vadd.f32 %v10389_v40, %v5009_v63 }
 0x6db   : > { %7408 = vmatmul.msk.bf16.gmra.mxu2 %vm5982_vm5, %v5961_v43  ;;  %v5843_v24 = vadd.f32 %v5763_v42, %v9503_v2 }
 0x6dc   : > { %7396 = vmatmul.msk.bf16.gmra.mxu1 %vm3336_vm3, %v5640_v18 }
 0x6dd   : > { %v5888_v60 = vadd.f32 %v9514_v57, %v5843_v24  ;;  %v5642_v24 = vpack.c.bf16 %v5620_v48, %v5619_v17 }
 0x6df   : > { %v5929_v8 = vmax.f32 %v5888_v60, 0.0 }
 0x6e1   : > { %v5523_v58 = vpop.f32.mrf.mxu0 }
 0x6e2   : > { %v5765_v23 = vpop.f32.mrf.mxu1  ;;  %v9634_v3 = vadd.f32 %v5523_v58, %v9446_v29  ;;  %v5641_v29 = vpack.c.bf16 %v5618_v10, %v5617_v20  ;;  %v5621_v20 = vld [vmem:[#allocation2 + $0x15b] sm:$0xff] }
 0x6e3   : > { %v5844_v19 = vadd.f32 %v5765_v23, %v9507_v16 }
 0x6e5   : > { %v5889_v33 = vadd.f32 %v9514_v57, %v5844_v19 }
 0x6e7   : > { %v5930_v59 = vmax.f32 %v5889_v33, 0.0 }
 0x6e9   : > { %v5962_v2 = vpack.c.bf16 %v5930_v59, %v5929_v8  ;;  %v5525_v46 = vpop.f32.mrf.mxu0  ;;  %v10390_v8 = vld [vmem:[#allocation57_spill] sm:$0xff]  ;;  %v10391_v59 = vld [vmem:[#allocation58_spill] sm:$0xff] }
 0x6ea   : > { %v5768_v61 = vpop.f32.mrf.mxu1  ;;  %v9641_v41 = vadd.f32 %v5525_v46, %v5292_v15  ;;  %v5011_v10 = vadd.f32 %v10391_v59, %v10390_v8 }
 0x6eb   : > { %7409 = vmatmul.msk.bf16.gmra.mxu2 %vm5982_vm5, %v5962_v2  ;;  %v5845_v28 = vadd.f32 %v5768_v61, %v9518_v25 }
 0x6ec   : > { %7397 = vmatmul.msk.bf16.gmra.mxu1 %vm3336_vm3, %v5641_v29  ;;  %v5622_v29 = vld [vmem:[#allocation2 + $0x163] sm:$0xff] }
 0x6ed   : > { %v5890_v22 = vadd.f32 %v9514_v57, %v5845_v28  ;;  %v5643_v63 = vpack.c.bf16 %v5622_v29, %v5621_v20 }
 0x6ee   : > { %v6055_v16 = vpop.f32.mrf.mxu2 }
 0x6ef   : > { %v6056_v34 = vadd.f32 %v9649_v14, %v6055_v16  ;;  %v5931_v27 = vmax.f32 %v5890_v22, 0.0  ;;  %v10392_v16 = vld [vmem:[#allocation59_spill] sm:$0xff] }
 0x6f0   : > { %v5296_v28 = vadd.f32 %v10392_v16, %v5011_v10 }
 0x6f1   : > { %v5528_v37 = vpop.f32.mrf.mxu0  ;;  %v6159_v43 = vmax.f32 %v6056_v34, 0.0 }
 0x6f2   : > { %v5770_v4 = vpop.f32.mrf.mxu1  ;;  %v9653_v49 = vadd.f32 %v5528_v37, %v9464_v56 }
 0x6f3   : > { %v5846_v54 = vadd.f32 %v5770_v4, %v9526_v7 }
 0x6f5   : > { %v5891_v25 = vadd.f32 %v9514_v57, %v5846_v54 }
 0x6f6   : > { %v6057_v21 = vpop.f32.mrf.mxu2 }
 0x6f7   : > { %v5932_v45 = vmax.f32 %v5891_v25, 0.0  ;;  %v6058_v44 = vadd.f32 %v9649_v14, %v6057_v21 }
 0x6f9   : > { %v5963_v56 = vpack.c.bf16 %v5932_v45, %v5931_v27  ;;  %v6160_v39 = vmax.f32 %v6058_v44, 0.0  ;;  %v5530_v42 = vpop.f32.mrf.mxu0 }
 0x6fa   : > { %v5773_v7 = vpop.f32.mrf.mxu1  ;;  %v9662_v53 = vadd.f32 %v5530_v42, %v5294_v55 }
 0x6fb   : > { %v6200_v18 = vpack.c.bf16 %v6160_v39, %v6159_v43  ;;  %7410 = vmatmul.msk.bf16.gmra.mxu2 %vm5982_vm5, %v5963_v56  ;;  %v5847_v23 = vadd.f32 %v5773_v7, %v9533_v32  ;;  %v5623_v56 = vld [vmem:[#allocation2 + $0x16b] sm:$0xf] }
 0x6fc   : > { %7398 = vmatmul.msk.bf16.gmra.mxu1 %vm3336_vm3, %v5642_v24  ;;  %v5644_v24 = vpack.c.bf16 %v5623_v56, %v5623_v56 }
 0x6fd   : > { %7422 = vmatmul.msk.bf16.vlgmr.msra.gmra.mxu3 %vm5982_vm5, %v6200_v18  ;;  %v5892_v38 = vadd.f32 %v9514_v57, %v5847_v23 }
 0x6fe   : > { %v6060_v58 = vpop.f32.mrf.mxu2 }
 0x6ff   : > { %v6061_v52 = vadd.f32 %v9649_v14, %v6060_v58  ;;  %v5933_v46 = vmax.f32 %v5892_v38, 0.0 }
 0x701   : > { %v5533_v60 = vpop.f32.mrf.mxu0 }
 0x702   : > { %v5775_v19 = vpop.f32.mrf.mxu1  ;;  %v9670_v13 = vadd.f32 %v5533_v60, %v9482_v36  ;;  %v6161_v36 = vmax.f32 %v6061_v52, 0.0 }
 0x703   : > { %v5848_v33 = vadd.f32 %v5775_v19, %v9541_v62 }
 0x705   : > { %v5893_v15 = vadd.f32 %v9514_v57, %v5848_v33 }
 0x706   : > { %v6062_v2 = vpop.f32.mrf.mxu2 }
 0x707   : > { %v5934_v61 = vmax.f32 %v5893_v15, 0.0  ;;  %v6063_v32 = vadd.f32 %v9649_v14, %v6062_v2 }
 0x709   : > { %v5964_v37 = vpack.c.bf16 %v5934_v61, %v5933_v46  ;;  %v6162_v4 = vmax.f32 %v6063_v32, 0.0  ;;  %v5535_v62 = vpop.f32.mrf.mxu0 }
 0x70a   : > { %v5778_v22 = vpop.f32.mrf.mxu1  ;;  %v9679_v11 = vadd.f32 %v5535_v62, %v5296_v28 }
 0x70b   : > { %v6201_v54 = vpack.c.bf16 %v6162_v4, %v6161_v36  ;;  %7411 = vmatmul.msk.bf16.gmra.mxu2 %vm5982_vm5, %v5964_v37  ;;  %v5849_v25 = vadd.f32 %v5778_v22, %v9548_v51 }
 0x70c   : > { %7399 = vmatmul.msk.bf16.gmra.mxu1 %vm3336_vm3, %v5643_v63 }
 0x70d   : > { %7423 = vmatmul.msk.bf16.gmra.mxu3 %vm5982_vm5, %v6201_v54  ;;  %v5894_v45 = vadd.f32 %v9514_v57, %v5849_v25 }
 0x70e   : > { %v6065_v34 = vpop.f32.mrf.mxu2 }
 0x70f   : > { %v6066_v40 = vadd.f32 %v9649_v14, %v6065_v34  ;;  %v5935_v39 = vmax.f32 %v5894_v45, 0.0 }
 0x711   : > { %v5538_v21 = vpop.f32.mrf.mxu0  ;;  %v6163_v51 = vmax.f32 %v6066_v40, 0.0 }
 0x712   : > { %v5780_v27 = vpop.f32.mrf.mxu1  ;;  %v9687_v44 = vadd.f32 %v5538_v21, %v9500_v30 }
 0x713   : > { %v5850_v48 = vadd.f32 %v5780_v27, %v9556_v6 }
 0x715   : > { %v5895_v55 = vadd.f32 %v9514_v57, %v5850_v48 }
 0x716   : > { %v6067_v43 = vpop.f32.mrf.mxu2 }
 0x717   : > { %v5936_v42 = vmax.f32 %v5895_v55, 0.0  ;;  %v6068_v7 = vadd.f32 %v9649_v14, %v6067_v43 }
 0x719   : > { %v5965_v17 = vpack.c.bf16 %v5936_v42, %v5935_v39  ;;  %v6164_v18 = vmax.f32 %v6068_v7, 0.0  ;;  %v5540_v23 = vpop.f32.mrf.mxu0 }
 0x71a   : > { %v5783_v58 = vpop.f32.mrf.mxu1 }
 0x71b   : > { %v6202_v30 = vpack.c.bf16 %v6164_v18, %v6163_v51  ;;  %7412 = vmatmul.msk.bf16.gmra.mxu2 %vm5982_vm5, %v5965_v17  ;;  %v5851_v60 = vadd.f32 %v5783_v58, %v9563_v31 }
 0x71c   : > { %7400 = vmatmul.msk.bf16.gmra.mxu1 %vm3336_vm3, %v5644_v24 }
 0x71d   : > { %7424 = vmatmul.msk.bf16.gmra.mxu3 %vm5982_vm5, %v6202_v30  ;;  %v5896_v38 = vadd.f32 %v9514_v57, %v5851_v60 }
 0x71e   : > { %v6070_v6 = vpop.f32.mrf.mxu2 }
 0x71f   : > { %v6071_v8 = vadd.f32 %v9649_v14, %v6070_v6  ;;  %v5937_v52 = vmax.f32 %v5896_v38, 0.0 }
 0x721   : > { %v6165_v46 = vmax.f32 %v6071_v8, 0.0 }
 0x722   : > { %v5785_v19 = vpop.f32.mrf.mxu1 }
 0x723   : > { %v5852_v33 = vadd.f32 %v5785_v19, %v9571_v5 }
 0x725   : > { %v5897_v59 = vadd.f32 %v9514_v57, %v5852_v33 }
 0x726   : > { %v6072_v10 = vpop.f32.mrf.mxu2 }
 0x727   : > { %v5938_v15 = vmax.f32 %v5897_v59, 0.0  ;;  %v6073_v2 = vadd.f32 %v9649_v14, %v6072_v10 }
 0x729   : > { %v5966_v61 = vpack.c.bf16 %v5938_v15, %v5937_v52  ;;  %v6166_v32 = vmax.f32 %v6073_v2, 0.0 }
 0x72a   : > { %v5788_v20 = vpop.f32.mrf.mxu1 }
 0x72b   : > { %v6203_v29 = vpack.c.bf16 %v6166_v32, %v6165_v46  ;;  %7413 = vmatmul.msk.bf16.gmra.mxu2 %vm5982_vm5, %v5966_v61  ;;  %v5853_v5 = vadd.f32 %v5788_v20, %v9578_v47 }
 0x72d   : > { %7425 = vmatmul.msk.bf16.gmra.mxu3 %vm5982_vm5, %v6203_v29  ;;  %v5898_v28 = vadd.f32 %v9514_v57, %v5853_v5 }
 0x72e   : > { %v6075_v31 = vpop.f32.mrf.mxu2 }
 0x72f   : > { %v6076_v37 = vadd.f32 %v9649_v14, %v6075_v31  ;;  %v5939_v22 = vmax.f32 %v5898_v28, 0.0 }
 0x731   : > { %v6167_v34 = vmax.f32 %v6076_v37, 0.0 }
 0x732   : > { %v5790_v16 = vpop.f32.mrf.mxu1 }
 0x733   : > { %v5854_v36 = vadd.f32 %v5790_v16, %v9585_v9 }
 0x735   : > { %v5899_v4 = vadd.f32 %v9514_v57, %v5854_v36 }
 0x736   : > { %v6077_v62 = vpop.f32.mrf.mxu2 }
 0x737   : > { %v5940_v54 = vmax.f32 %v5899_v4, 0.0  ;;  %v6078_v63 = vadd.f32 %v9649_v14, %v6077_v62 }
 0x739   : > { %v5967_v25 = vpack.c.bf16 %v5940_v54, %v5939_v22  ;;  %v6168_v21 = vmax.f32 %v6078_v63, 0.0 }
 0x73a   : > { %v5793_v27 = vpop.f32.mrf.mxu1 }
 0x73b   : > { %v6204_v45 = vpack.c.bf16 %v6168_v21, %v6167_v34  ;;  %7414 = vmatmul.msk.bf16.gmra.mxu2 %vm5982_vm5, %v5967_v25  ;;  %v5855_v9 = vadd.f32 %v5793_v27, %v9592_v26 }
 0x73d   : > { %7426 = vmatmul.msk.bf16.gmra.mxu3 %vm5982_vm5, %v6204_v45  ;;  %v5900_v40 = vadd.f32 %v9514_v57, %v5855_v9 }
 0x73e   : > { %v6080_v47 = vpop.f32.mrf.mxu2 }
 0x73f   : > { %v6081_v43 = vadd.f32 %v9649_v14, %v6080_v47  ;;  %v5941_v42 = vmax.f32 %v5900_v40, 0.0 }
 0x741   : > { %v6169_v17 = vmax.f32 %v6081_v43, 0.0 }
 0x742   : > { %v5795_v48 = vpop.f32.mrf.mxu1 }
 0x743   : > { %v5856_v55 = vadd.f32 %v5795_v48, %v9599_v12 }
 0x745   : > { %v5901_v56 = vadd.f32 %v9514_v57, %v5856_v55 }
 0x746   : > { %v6082_v39 = vpop.f32.mrf.mxu2 }
 0x747   : > { %v5942_v7 = vmax.f32 %v5901_v56, 0.0  ;;  %v6083_v51 = vadd.f32 %v9649_v14, %v6082_v39 }
 0x749   : > { %v5968_v18 = vpack.c.bf16 %v5942_v7, %v5941_v42  ;;  %v6170_v24 = vmax.f32 %v6083_v51, 0.0  ;;  %v6609_v42 = vlaneseq }
 0x74a   : > { %v5798_v58 = vpop.f32.mrf.mxu1 }
 0x74b   : > { %v6205_v23 = vpack.c.bf16 %v6170_v24, %v6169_v17  ;;  %7415 = vmatmul.msk.bf16.gmra.mxu2 %vm5982_vm5, %v5968_v18  ;;  %v5857_v12 = vadd.f32 %v5798_v58, %v9606_v1  ;;  %v6445_v18 = vld [vmem:[%s9748_s22] sm:$0xff]  ;;  %v6610_v58 = vand.u32 127, %v6609_v42 }
 0x74c   : > { %v10396_v42 = vld [vmem:[#allocation32_spill] sm:$0xff] }
 0x74d   : > { %7427 = vmatmul.msk.bf16.gmra.mxu3 %vm5982_vm5, %v6205_v23  ;;  %v5902_v6 = vadd.f32 %v9514_v57, %v5857_v12  ;;  %vm6611_vm6 = vcmp.lt.s32.totalorder %v6610_v58, 4 }
 0x74e   : > { %v6085_v26 = vpop.f32.mrf.mxu2 }
 0x74f   : > { %v6086_v19 = vadd.f32 %v9649_v14, %v6085_v26  ;;  %v5943_v8 = vmax.f32 %v5902_v6, 0.0 }
 0x751   : > { %v6171_v52 = vmax.f32 %v6086_v19, 0.0 }
 0x752   : > { %v5800_v30 = vpop.f32.mrf.mxu1 }
 0x753   : > { %v5858_v60 = vadd.f32 %v5800_v30, %v9613_v0 }
 0x755   : > { %v5903_v38 = vadd.f32 %v9514_v57, %v5858_v60 }
 0x756   : > { %v6087_v33 = vpop.f32.mrf.mxu2 }
 0x757   : > { %v5944_v59 = vmax.f32 %v5903_v38, 0.0  ;;  %v6088_v10 = vadd.f32 %v9649_v14, %v6087_v33 }
 0x759   : > { %v5969_v15 = vpack.c.bf16 %v5944_v59, %v5943_v8  ;;  %v6172_v2 = vmax.f32 %v6088_v10, 0.0  ;;  %v10393_v10 = vmov 0.0  }
 0x75a   : > { %v5803_v46 = vpop.f32.mrf.mxu1 }
 0x75b   : > { %v6206_v61 = vpack.c.bf16 %v6172_v2, %v6171_v52  ;;  %7416 = vmatmul.msk.bf16.gmra.mxu2 %vm5982_vm5, %v5969_v15  ;;  %v5859_v0 = vadd.f32 %v5803_v46, %v9620_v35  ;;  %v9771_v52 = vsel %vm6611_vm6, 1.0, %v10393_v10 }
 0x75d   : > { %7428 = vmatmul.msk.bf16.gmra.mxu3 %vm5982_vm5, %v6206_v61  ;;  %v5904_v20 = vadd.f32 %v9514_v57, %v5859_v0  ;;  %v10394_v0 = vld [vmem:[#allocation30_spill] sm:$0xff] }
 0x75e   : > { %v6090_v1 = vpop.f32.mrf.mxu2 }
 0x75f   : > { %v6091_v31 = vadd.f32 %v9649_v14, %v6090_v1  ;;  %v5945_v28 = vmax.f32 %v5904_v20, 0.0 }
 0x761   : > { %v6173_v4 = vmax.f32 %v6091_v31, 0.0 }
 0x762   : > { %v5805_v32 = vpop.f32.mrf.mxu1 }
 0x763   : > { %v5860_v29 = vadd.f32 %v5805_v32, %v9627_v50 }
 0x765   : > { %v5905_v5 = vadd.f32 %v9514_v57, %v5860_v29  ;;  %v9778_v29 = vsub.f32 1.0, %v9771_v52 }
 0x766   : > { %v6092_v16 = vpop.f32.mrf.mxu2 }
 0x767   : > { %v5946_v36 = vmax.f32 %v5905_v5, 0.0  ;;  %v6093_v37 = vadd.f32 %v9649_v14, %v6092_v16 }
 0x769   : > { %v5970_v62 = vpack.c.bf16 %v5946_v36, %v5945_v28  ;;  %v6174_v22 = vmax.f32 %v6093_v37, 0.0 }
 0x76a   : > { %v5808_v54 = vpop.f32.mrf.mxu1 }
 0x76b   : > { %v6207_v63 = vpack.c.bf16 %v6174_v22, %v6173_v4  ;;  %7417 = vmatmul.msk.bf16.gmra.mxu2 %vm5982_vm5, %v5970_v62  ;;  %v5861_v50 = vadd.f32 %v5808_v54, %v9634_v3  ;;  %v10395_v4 = vld [vmem:[#allocation31_spill] sm:$0xff]  ;;  %v6447_v54 = vld [vmem:[%s9748_s22 + $0x10] sm:$0xff] }
 0x76d   : > { %7429 = vmatmul.msk.bf16.gmra.mxu3 %vm5982_vm5, %v6207_v63  ;;  %v5906_v25 = vadd.f32 %v9514_v57, %v5861_v50 }
 0x76e   : > { %v6095_v35 = vpop.f32.mrf.mxu2 }
 0x76f   : > { %v6096_v27 = vadd.f32 %v9649_v14, %v6095_v35  ;;  %v5947_v9 = vmax.f32 %v5906_v25, 0.0 }
 0x771   : > { %v6175_v55 = vmax.f32 %v6096_v27, 0.0 }
 0x772   : > { %v5810_v34 = vpop.f32.mrf.mxu1 }
 0x773   : > { %v5862_v21 = vadd.f32 %v5810_v34, %v9641_v41  ;;  %v9753_v41 = vld [vmem:[%s10220_s10] ss:$0 sm:$0xff] }
 0x775   : > { %v5907_v45 = vadd.f32 %v9514_v57, %v5862_v21 }
 0x776   : > { %v6097_v47 = vpop.f32.mrf.mxu2 }
 0x777   : > { %v5948_v48 = vmax.f32 %v5907_v45, 0.0  ;;  %v6098_v40 = vadd.f32 %v9649_v14, %v6097_v47 }
 0x779   : > { %v5971_v43 = vpack.c.bf16 %v5948_v48, %v5947_v9  ;;  %v6176_v56 = vmax.f32 %v6098_v40, 0.0 }
 0x77a   : > { %v5813_v39 = vpop.f32.mrf.mxu1 }
 0x77b   : > { %v6208_v3 = vpack.c.bf16 %v6176_v56, %v6175_v55  ;;  %7418 = vmatmul.msk.bf16.gmra.mxu2 %vm5982_vm5, %v5971_v43  ;;  %v5863_v51 = vadd.f32 %v5813_v39, %v9653_v49 }
 0x77d   : > { %7430 = vmatmul.msk.bf16.gmra.mxu3 %vm5982_vm5, %v6208_v3  ;;  %v5908_v26 = vadd.f32 %v9514_v57, %v5863_v51 }
 0x77e   : > { %v6100_v7 = vpop.f32.mrf.mxu2 }
 0x77f   : > { %v6101_v30 = vadd.f32 %v9649_v14, %v6100_v7  ;;  %v5949_v19 = vmax.f32 %v5908_v26, 0.0 }
 0x780   : > { %v6300_v17 = vpop.f32.mrf.mxu3 }
 0x781   : > { %v6301_v24 = vadd.f32 %v9753_v41, %v6300_v17  ;;  %v6177_v15 = vmax.f32 %v6101_v30, 0.0 }
 0x782   : > { %v5815_v23 = vpop.f32.mrf.mxu1 }
 0x783   : > { %6404 = vst.msk [vmem:[%s9759_s30] sm:$0xff] %vm3336_vm3, %v6301_v24  ;;  %v6486_v12 = vsub.f32 %v6301_v24, %v6445_v18  ;;  %v5864_v49 = vadd.f32 %v5815_v23, %v9662_v53  ;;  %v6446_v53 = vld [vmem:[%s9748_s22 + $0x8] sm:$0xff] }
 0x785   : > { %v5909_v6 = vadd.f32 %v9514_v57, %v5864_v49  ;;  %v6527_v38 = vmul.f32 %v6486_v12, %v6486_v12  ;;  %v6448_v12 = vld [vmem:[%s9748_s22 + $0x18] sm:$0xff] }
 0x786   : > { %v6102_v60 = vpop.f32.mrf.mxu2 }
 0x787   : > { %v5950_v33 = vmax.f32 %v5909_v6, 0.0  ;;  %v6103_v8 = vadd.f32 %v9649_v14, %v6102_v60  ;;  %v6568_v32 = vmul.f32 %v6527_v38, %v10394_v0 }
 0x788   : > { %v6302_v59 = vpop.f32.mrf.mxu3 }
 0x789   : > { %v5972_v2 = vpack.c.bf16 %v5950_v33, %v5949_v19  ;;  %v6178_v46 = vmax.f32 %v6103_v8, 0.0  ;;  %v6303_v61 = vadd.f32 %v9753_v41, %v6302_v59  ;;  %v6614_v28 = vmul.f32 %v9771_v52, %v6568_v32 }
 0x78a   : > { %v5818_v1 = vpop.f32.mrf.mxu1  ;;  %v6749_v37 = vmul.f32 %v9778_v29, %v6568_v32 }
 0x78b   : > { %v6209_v20 = vpack.c.bf16 %v6178_v46, %v6177_v15  ;;  %7419 = vmatmul.msk.bf16.gmra.mxu2 %vm5982_vm5, %v5972_v2  ;;  %6405 = vst.msk [vmem:[%s9759_s30 + $0x8] sm:$0xff] %vm3336_vm3, %v6303_v61  ;;  %v6487_v31 = vsub.f32 %v6303_v61, %v6446_v53  ;;  %v5865_v36 = vadd.f32 %v5818_v1, %v9670_v13  ;;  %v6655_v25 = vsel %vm3336_vm3, %v6614_v28, 0.0  ;;  %v10397_v2 = vld [vmem:[#allocation33_spill] sm:$0xff]  ;;  %v6449_v1 = vld [vmem:[%s9748_s22 + $0x20] sm:$0xff] }
 0x78c   : > { %v6790_v45 = vsel %vm3336_vm3, %v6749_v37, 0.0 }
 0x78d   : > { %7431 = vmatmul.msk.bf16.gmra.mxu3 %vm5982_vm5, %v6209_v20  ;;  %v6528_v5 = vmul.f32 %v6487_v31, %v6487_v31  ;;  %v5910_v21 = vadd.f32 %v9514_v57, %v5865_v36 }
 0x78e   : > { %v6105_v16 = vpop.f32.mrf.mxu2 }
 0x78f   : > { %v6569_v62 = vmul.f32 %v6528_v5, %v10395_v4  ;;  %v6106_v48 = vadd.f32 %v9649_v14, %v6105_v16  ;;  %v5951_v3 = vmax.f32 %v5910_v21, 0.0 }
 0x790   : > { %v6305_v22 = vpop.f32.mrf.mxu3 }
 0x791   : > { %v6306_v63 = vadd.f32 %v9753_v41, %v6305_v22  ;;  %v6615_v35 = vmul.f32 %v9771_v52, %v6569_v62  ;;  %v6750_v50 = vmul.f32 %v9778_v29, %v6569_v62  ;;  %v6179_v17 = vmax.f32 %v6106_v48, 0.0  ;;  %v10398_v22 = vld [vmem:[#allocation34_spill] sm:$0xff] }
 0x792   : > { %v5820_v34 = vpop.f32.mrf.mxu1 }
 0x793   : > { %6406 = vst.msk [vmem:[%s9759_s30 + $0x10] sm:$0xff] %vm3336_vm3, %v6306_v63  ;;  %v6488_v13 = vsub.f32 %v6306_v63, %v6447_v54  ;;  %v5866_v27 = vadd.f32 %v5820_v34, %v9679_v11  ;;  %v6656_v47 = vsel %vm3336_vm3, %v6615_v35, 0.0  ;;  %v6791_v9 = vsel %vm3336_vm3, %v6750_v50, 0.0 }
 0x794   : > { %v6657_v40 = vadd.f32 %v6656_v47, %v6655_v25  ;;  %v6792_v55 = vadd.f32 %v6791_v9, %v6790_v45  ;;  %v6450_v25 = vld [vmem:[%s9748_s22 + $0x28] sm:$0xff] }
 0x795   : > { %v6529_v43 = vmul.f32 %v6488_v13, %v6488_v13  ;;  %v5911_v56 = vadd.f32 %v9514_v57, %v5866_v27 }
 0x796   : > { %v6107_v39 = vpop.f32.mrf.mxu2 }
 0x797   : > { %v6570_v7 = vmul.f32 %v6529_v43, %v10396_v42  ;;  %v5952_v51 = vmax.f32 %v5911_v56, 0.0  ;;  %v6108_v11 = vadd.f32 %v9649_v14, %v6107_v39 }
 0x798   : > { %v6307_v18 = vpop.f32.mrf.mxu3 }
 0x799   : > { %v6616_v24 = vmul.f32 %v9771_v52, %v6570_v7  ;;  %v6751_v58 = vmul.f32 %v9778_v29, %v6570_v7  ;;  %v5973_v23 = vpack.c.bf16 %v5952_v51, %v5951_v3  ;;  %v6180_v26 = vmax.f32 %v6108_v11, 0.0  ;;  %v10399_v3 = vld [vmem:[#allocation35_spill] sm:$0xff]  ;;  %v6451_v51 = vld [vmem:[%s9748_s22 + $0x30] sm:$0xff] }
 0x79a   : > { %v6308_v49 = vadd.f32 %v9753_v41, %v6307_v18  ;;  %v5823_v30 = vpop.f32.mrf.mxu1 }
 0x79b   : > { %v6658_v6 = vsel %vm3336_vm3, %v6616_v24, 0.0  ;;  %v6793_v60 = vsel %vm3336_vm3, %v6751_v58, 0.0  ;;  %v6210_v19 = vpack.c.bf16 %v6180_v26, %v6179_v17  ;;  %7420 = vmatmul.msk.bf16.gmra.mxu2 %vm5982_vm5, %v5973_v23  ;;  %v5867_v59 = vadd.f32 %v5823_v30, %v9687_v44 }
 0x79c   : > { %v6659_v38 = vadd.f32 %v6658_v6, %v6657_v40  ;;  %v6794_v33 = vadd.f32 %v6793_v60, %v6792_v55  ;;  %6407 = vst.msk [vmem:[%s9759_s30 + $0x18] sm:$0xff] %vm3336_vm3, %v6308_v49  ;;  %v6489_v8 = vsub.f32 %v6308_v49, %v6448_v12  ;;  %v10400_v60 = vld [vmem:[#allocation36_spill] sm:$0xff] }
 0x79d   : > { %7432 = vmatmul.msk.bf16.gmra.mxu3 %vm5982_vm5, %v6210_v19  ;;  %v5912_v53 = vadd.f32 %v9514_v57, %v5867_v59  ;;  %v6452_v59 = vld [vmem:[%s9748_s22 + $0x38] sm:$0xff] }
 0x79e   : > { %v6530_v10 = vmul.f32 %v6489_v8, %v6489_v8  ;;  %v6110_v15 = vpop.f32.mrf.mxu2 }
 0x79f   : > { %v5953_v28 = vmax.f32 %v5912_v53, 0.0  ;;  %v6111_v57 = vadd.f32 %v9649_v14, %v6110_v15 }
 0x7a0   : > { %v6571_v46 = vmul.f32 %v6530_v10, %v10397_v2  ;;  %v6310_v61 = vpop.f32.mrf.mxu3 }
 0x7a1   : > { %v6311_v0 = vadd.f32 %v9753_v41, %v6310_v61  ;;  %v5974_v35 = vpack.c.bf16 %v5953_v28, %v5953_v28  ;;  %v6181_v50 = vmax.f32 %v6111_v57, 0.0  ;;  %v6453_v57 = vld [vmem:[%s9748_s22 + $0x40] sm:$0xff] }
 0x7a2   : > { %v6617_v32 = vmul.f32 %v9771_v52, %v6571_v46  ;;  %v6752_v20 = vmul.f32 %v9778_v29, %v6571_v46  ;;  %v5825_v31 = vpop.f32.mrf.mxu1 }
 0x7a3   : > { %6408 = vst.msk [vmem:[%s9759_s30 + $0x20] sm:$0xff] %vm3336_vm3, %v6311_v0  ;;  %v6490_v44 = vsub.f32 %v6311_v0, %v6449_v1 }
 0x7a4   : > { %v6660_v5 = vsel %vm3336_vm3, %v6617_v32, 0.0  ;;  %v6795_v16 = vsel %vm3336_vm3, %v6752_v20, 0.0 }
 0x7a5   : > { %v6661_v36 = vadd.f32 %v6660_v5, %v6659_v38  ;;  %v6796_v37 = vadd.f32 %v6795_v16, %v6794_v33  ;;  %v6531_v4 = vmul.f32 %v6490_v44, %v6490_v44  ;;  %v10401_v5 = vld [vmem:[#allocation37_spill] sm:$0xff] }
 0x7a6   : > { %v6112_v62 = vpop.f32.mrf.mxu2 }
 0x7a7   : > { %v6572_v54 = vmul.f32 %v6531_v4, %v10398_v22  ;;  %v6113_v63 = vadd.f32 %v9649_v14, %v6112_v62 }
 0x7a8   : > { %v6312_v34 = vpop.f32.mrf.mxu3 }
 0x7a9   : > { %v6618_v21 = vmul.f32 %v9771_v52, %v6572_v54  ;;  %v6753_v13 = vmul.f32 %v9778_v29, %v6572_v54  ;;  %v6182_v27 = vmax.f32 %v6113_v63, 0.0  ;;  %v6313_v45 = vadd.f32 %v9753_v41, %v6312_v34 }
 0x7ab   : > { %v6662_v47 = vsel %vm3336_vm3, %v6618_v21, 0.0  ;;  %v6797_v9 = vsel %vm3336_vm3, %v6753_v13, 0.0  ;;  %v6211_v48 = vpack.c.bf16 %v6182_v27, %v6181_v50  ;;  %6409 = vst.msk [vmem:[%s9759_s30 + $0x28] sm:$0xff] %vm3336_vm3, %v6313_v45  ;;  %v6491_v40 = vsub.f32 %v6313_v45, %v6450_v25  ;;  %7421 = vmatmul.msk.bf16.gmra.mxu2 %vm5982_vm5, %v5974_v35  ;;  %v10402_v21 = vld [vmem:[#allocation38_spill] sm:$0xff] }
 0x7ac   : > { %v6663_v55 = vadd.f32 %v6662_v47, %v6661_v36  ;;  %v6798_v43 = vadd.f32 %v6797_v9, %v6796_v37  ;;  %v6454_v9 = vld [vmem:[%s9748_s22 + $0x48] sm:$0xff] }
 0x7ad   : > { %v6532_v56 = vmul.f32 %v6491_v40, %v6491_v40  ;;  %7433 = vmatmul.msk.bf16.gmra.mxu3 %vm5982_vm5, %v6211_v48 }
 0x7ae   : > { %v6115_v39 = vpop.f32.mrf.mxu2 }
 0x7af   : > { %v6573_v42 = vmul.f32 %v6532_v56, %v10399_v3  ;;  %v6116_v49 = vadd.f32 %v9649_v14, %v6115_v39 }
 0x7b0   : > { %v6315_v7 = vpop.f32.mrf.mxu3 }
 0x7b1   : > { %v6619_v11 = vmul.f32 %v9771_v52, %v6573_v42  ;;  %v6754_v17 = vmul.f32 %v9778_v29, %v6573_v42  ;;  %v6316_v18 = vadd.f32 %v9753_v41, %v6315_v7  ;;  %v6183_v33 = vmax.f32 %v6116_v49, 0.0 }
 0x7b3   : > { %v6664_v24 = vsel %vm3336_vm3, %v6619_v11, 0.0  ;;  %v6799_v58 = vsel %vm3336_vm3, %v6754_v17, 0.0  ;;  %6410 = vst.msk [vmem:[%s9759_s30 + $0x30] sm:$0xff] %vm3336_vm3, %v6316_v18  ;;  %v6492_v23 = vsub.f32 %v6316_v18, %v6451_v51  ;;  %v10403_v18 = vld [vmem:[#allocation39_spill] sm:$0xff] }
 0x7b4   : > { %v6665_v26 = vadd.f32 %v6664_v24, %v6663_v55  ;;  %v6800_v12 = vadd.f32 %v6799_v58, %v6798_v43 }
 0x7b5   : > { %v6533_v30 = vmul.f32 %v6492_v23, %v6492_v23  ;;  %v6455_v23 = vld [vmem:[%s9748_s22 + $0x50] sm:$0xff] }
 0x7b6   : > { %v6117_v6 = vpop.f32.mrf.mxu2 }
 0x7b7   : > { %v6574_v19 = vmul.f32 %v6533_v30, %v10400_v60  ;;  %v6118_v38 = vadd.f32 %v9649_v14, %v6117_v6 }
 0x7b8   : > { %v6317_v8 = vpop.f32.mrf.mxu3 }
 0x7b9   : > { %v6620_v10 = vmul.f32 %v9771_v52, %v6574_v19  ;;  %v6755_v15 = vmul.f32 %v9778_v29, %v6574_v19  ;;  %v6184_v2 = vmax.f32 %v6118_v38, 0.0  ;;  %v6318_v46 = vadd.f32 %v9753_v41, %v6317_v8 }
 0x7bb   : > { %v6666_v53 = vsel %vm3336_vm3, %v6620_v10, 0.0  ;;  %v6801_v61 = vsel %vm3336_vm3, %v6755_v15, 0.0  ;;  %v6212_v1 = vpack.c.bf16 %v6184_v2, %v6183_v33  ;;  %6411 = vst.msk [vmem:[%s9759_s30 + $0x38] sm:$0xff] %vm3336_vm3, %v6318_v46  ;;  %v6493_v0 = vsub.f32 %v6318_v46, %v6452_v59  ;;  %v10404_v10 = vld [vmem:[#allocation40_spill] sm:$0xff] }
 0x7bc   : > { %v6667_v32 = vadd.f32 %v6666_v53, %v6665_v26  ;;  %v6802_v20 = vadd.f32 %v6801_v61, %v6800_v12  ;;  %v6456_v61 = vld [vmem:[%s9748_s22 + $0x58] sm:$0xff] }
 0x7bd   : > { %v6534_v31 = vmul.f32 %v6493_v0, %v6493_v0  ;;  %7434 = vmatmul.msk.bf16.gmra.mxu3 %vm5982_vm5, %v6212_v1 }
 0x7be   : > { %v6120_v44 = vpop.f32.mrf.mxu2 }
 0x7bf   : > { %v6575_v16 = vmul.f32 %v6534_v31, %v10401_v5  ;;  %v6121_v50 = vadd.f32 %v9649_v14, %v6120_v44 }
 0x7c0   : > { %v6320_v28 = vpop.f32.mrf.mxu3 }
 0x7c1   : > { %v6621_v36 = vmul.f32 %v9771_v52, %v6575_v16  ;;  %v6756_v37 = vmul.f32 %v9778_v29, %v6575_v16  ;;  %v6321_v4 = vadd.f32 %v9753_v41, %v6320_v28  ;;  %v6185_v45 = vmax.f32 %v6121_v50, 0.0 }
 0x7c3   : > { %v6668_v62 = vsel %vm3336_vm3, %v6621_v36, 0.0  ;;  %v6803_v22 = vsel %vm3336_vm3, %v6756_v37, 0.0  ;;  %6412 = vst.msk [vmem:[%s9759_s30 + $0x40] sm:$0xff] %vm3336_vm3, %v6321_v4  ;;  %v6494_v54 = vsub.f32 %v6321_v4, %v6453_v57  ;;  %v10405_v4 = vld [vmem:[#allocation41_spill] sm:$0xff] }
 0x7c4   : > { %v6669_v63 = vadd.f32 %v6668_v62, %v6667_v32  ;;  %v6804_v35 = vadd.f32 %v6803_v22, %v6802_v20 }
 0x7c5   : > { %v6535_v34 = vmul.f32 %v6494_v54, %v6494_v54  ;;  %v6457_v54 = vld [vmem:[%s9748_s22 + $0x60] sm:$0xff] }
 0x7c6   : > { %v6122_v25 = vpop.f32.mrf.mxu2 }
 0x7c7   : > { %v6576_v13 = vmul.f32 %v6535_v34, %v10402_v21  ;;  %v6123_v27 = vadd.f32 %v9649_v14, %v6122_v25 }
 0x7c8   : > { %v6322_v47 = vpop.f32.mrf.mxu3 }
 0x7c9   : > { %v6622_v48 = vmul.f32 %v9771_v52, %v6576_v13  ;;  %v6757_v40 = vmul.f32 %v9778_v29, %v6576_v13  ;;  %v6186_v55 = vmax.f32 %v6123_v27, 0.0  ;;  %v6323_v43 = vadd.f32 %v9753_v41, %v6322_v47 }
 0x7cb   : > { %v6670_v56 = vsel %vm3336_vm3, %v6622_v48, 0.0  ;;  %v6805_v39 = vsel %vm3336_vm3, %v6757_v40, 0.0  ;;  %v6213_v3 = vpack.c.bf16 %v6186_v55, %v6185_v45  ;;  %6413 = vst.msk [vmem:[%s9759_s30 + $0x48] sm:$0xff] %vm3336_vm3, %v6323_v43  ;;  %v6495_v42 = vsub.f32 %v6323_v43, %v6454_v9  ;;  %v10406_v48 = vld [vmem:[#allocation42_spill] sm:$0xff] }
 0x7cc   : > { %v6671_v7 = vadd.f32 %v6670_v56, %v6669_v63  ;;  %v6806_v51 = vadd.f32 %v6805_v39, %v6804_v35  ;;  %v6458_v39 = vld [vmem:[%s9748_s22 + $0x68] sm:$0xff] }
 0x7cd   : > { %v6536_v11 = vmul.f32 %v6495_v42, %v6495_v42  ;;  %7435 = vmatmul.msk.bf16.gmra.mxu3 %vm5982_vm5, %v6213_v3 }
 0x7ce   : > { %v6125_v17 = vpop.f32.mrf.mxu2 }
 0x7cf   : > { %v6577_v24 = vmul.f32 %v6536_v11, %v10403_v18  ;;  %v6126_v33 = vadd.f32 %v9649_v14, %v6125_v17 }
 0x7d0   : > { %v6325_v58 = vpop.f32.mrf.mxu3 }
 0x7d1   : > { %v6623_v26 = vmul.f32 %v9771_v52, %v6577_v24  ;;  %v6758_v12 = vmul.f32 %v9778_v29, %v6577_v24  ;;  %v6326_v49 = vadd.f32 %v9753_v41, %v6325_v58  ;;  %v6187_v46 = vmax.f32 %v6126_v33, 0.0 }
 0x7d3   : > { %v6672_v30 = vsel %vm3336_vm3, %v6623_v26, 0.0  ;;  %v6807_v6 = vsel %vm3336_vm3, %v6758_v12, 0.0  ;;  %6414 = vst.msk [vmem:[%s9759_s30 + $0x50] sm:$0xff] %vm3336_vm3, %v6326_v49  ;;  %v6496_v60 = vsub.f32 %v6326_v49, %v6455_v23  ;;  %v10407_v49 = vld [vmem:[#allocation43_spill] sm:$0xff] }
 0x7d4   : > { %v6673_v19 = vadd.f32 %v6672_v30, %v6671_v7  ;;  %v6808_v38 = vadd.f32 %v6807_v6, %v6806_v51 }
 0x7d5   : > { %v6537_v8 = vmul.f32 %v6496_v60, %v6496_v60  ;;  %v6459_v60 = vld [vmem:[%s9748_s22 + $0x70] sm:$0xff] }
 0x7d6   : > { %v6127_v59 = vpop.f32.mrf.mxu2 }
 0x7d7   : > { %v6578_v15 = vmul.f32 %v6537_v8, %v10404_v10  ;;  %v6128_v2 = vadd.f32 %v9649_v14, %v6127_v59 }
 0x7d8   : > { %v6327_v53 = vpop.f32.mrf.mxu3 }
 0x7d9   : > { %v6624_v1 = vmul.f32 %v9771_v52, %v6578_v15  ;;  %v6759_v0 = vmul.f32 %v9778_v29, %v6578_v15  ;;  %v6188_v32 = vmax.f32 %v6128_v2, 0.0  ;;  %v6328_v20 = vadd.f32 %v9753_v41, %v6327_v53 }
 0x7db   : > { %v6674_v31 = vsel %vm3336_vm3, %v6624_v1, 0.0  ;;  %v6809_v44 = vsel %vm3336_vm3, %v6759_v0, 0.0  ;;  %v6214_v5 = vpack.c.bf16 %v6188_v32, %v6187_v46  ;;  %6415 = vst.msk [vmem:[%s9759_s30 + $0x58] sm:$0xff] %vm3336_vm3, %v6328_v20  ;;  %v6497_v16 = vsub.f32 %v6328_v20, %v6456_v61  ;;  %v10408_v1 = vld [vmem:[#allocation44_spill] sm:$0xff] }
 0x7dc   : > { %v6675_v28 = vadd.f32 %v6674_v31, %v6673_v19  ;;  %v6810_v57 = vadd.f32 %v6809_v44, %v6808_v38  ;;  %v6460_v44 = vld [vmem:[%s9748_s22 + $0x78] sm:$0xff] }
 0x7dd   : > { %v6538_v36 = vmul.f32 %v6497_v16, %v6497_v16  ;;  %7436 = vmatmul.msk.bf16.gmra.mxu3 %vm5982_vm5, %v6214_v5 }
 0x7de   : > { %v6130_v37 = vpop.f32.mrf.mxu2 }
 0x7df   : > { %v6579_v62 = vmul.f32 %v6538_v36, %v10405_v4  ;;  %v6131_v45 = vadd.f32 %v9649_v14, %v6130_v37 }
 0x7e0   : > { %v6330_v22 = vpop.f32.mrf.mxu3 }
 0x7e1   : > { %v6625_v63 = vmul.f32 %v9771_v52, %v6579_v62  ;;  %v6760_v35 = vmul.f32 %v9778_v29, %v6579_v62  ;;  %v6331_v50 = vadd.f32 %v9753_v41, %v6330_v22  ;;  %v6189_v43 = vmax.f32 %v6131_v45, 0.0 }
 0x7e3   : > { %v6676_v34 = vsel %vm3336_vm3, %v6625_v63, 0.0  ;;  %v6811_v25 = vsel %vm3336_vm3, %v6760_v35, 0.0  ;;  %6416 = vst.msk [vmem:[%s9759_s30 + $0x60] sm:$0xff] %vm3336_vm3, %v6331_v50  ;;  %v6498_v21 = vsub.f32 %v6331_v50, %v6457_v54  ;;  %v10409_v50 = vld [vmem:[#allocation45_spill] sm:$0xff] }
 0x7e4   : > { %v6677_v13 = vadd.f32 %v6676_v34, %v6675_v28  ;;  %v6812_v27 = vadd.f32 %v6811_v25, %v6810_v57 }
 0x7e5   : > { %v6539_v47 = vmul.f32 %v6498_v21, %v6498_v21  ;;  %v6461_v21 = vld [vmem:[%s9748_s22 + $0x80] sm:$0xff] }
 0x7e6   : > { %v6132_v9 = vpop.f32.mrf.mxu2 }
 0x7e7   : > { %v6580_v40 = vmul.f32 %v6539_v47, %v10406_v48  ;;  %v6133_v55 = vadd.f32 %v9649_v14, %v6132_v9 }
 0x7e8   : > { %v6332_v56 = vpop.f32.mrf.mxu3 }
 0x7e9   : > { %v6626_v3 = vmul.f32 %v9771_v52, %v6580_v40  ;;  %v6761_v42 = vmul.f32 %v9778_v29, %v6580_v40  ;;  %v6190_v7 = vmax.f32 %v6133_v55, 0.0  ;;  %v6333_v51 = vadd.f32 %v9753_v41, %v6332_v56 }
 0x7eb   : > { %v6678_v11 = vsel %vm3336_vm3, %v6626_v3, 0.0  ;;  %v6813_v17 = vsel %vm3336_vm3, %v6761_v42, 0.0  ;;  %v6215_v18 = vpack.c.bf16 %v6190_v7, %v6189_v43  ;;  %6417 = vst.msk [vmem:[%s9759_s30 + $0x68] sm:$0xff] %vm3336_vm3, %v6333_v51  ;;  %v6499_v24 = vsub.f32 %v6333_v51, %v6458_v39  ;;  %v10410_v3 = vld [vmem:[#allocation46_spill] sm:$0xff] }
 0x7ec   : > { %v6679_v58 = vadd.f32 %v6678_v11, %v6677_v13  ;;  %v6814_v23 = vadd.f32 %v6813_v17, %v6812_v27  ;;  %v6462_v17 = vld [vmem:[%s9748_s22 + $0x88] sm:$0xff] }
 0x7ed   : > { %v6540_v26 = vmul.f32 %v6499_v24, %v6499_v24  ;;  %7437 = vmatmul.msk.bf16.gmra.mxu3 %vm5982_vm5, %v6215_v18 }
 0x7ee   : > { %v6135_v12 = vpop.f32.mrf.mxu2 }
 0x7ef   : > { %v6581_v30 = vmul.f32 %v6540_v26, %v10407_v49  ;;  %v6136_v46 = vadd.f32 %v9649_v14, %v6135_v12 }
 0x7f0   : > { %v6335_v6 = vpop.f32.mrf.mxu3 }
 0x7f1   : > { %v6627_v19 = vmul.f32 %v9771_v52, %v6581_v30  ;;  %v6762_v38 = vmul.f32 %v9778_v29, %v6581_v30  ;;  %v6336_v33 = vadd.f32 %v9753_v41, %v6335_v6  ;;  %v6191_v20 = vmax.f32 %v6136_v46, 0.0 }
 0x7f3   : > { %v6680_v8 = vsel %vm3336_vm3, %v6627_v19, 0.0  ;;  %v6815_v59 = vsel %vm3336_vm3, %v6762_v38, 0.0  ;;  %6418 = vst.msk [vmem:[%s9759_s30 + $0x70] sm:$0xff] %vm3336_vm3, %v6336_v33  ;;  %v6500_v10 = vsub.f32 %v6336_v33, %v6459_v60  ;;  %v10411_v38 = vld [vmem:[#allocation47_spill] sm:$0xff] }
 0x7f4   : > { %v6681_v15 = vadd.f32 %v6680_v8, %v6679_v58  ;;  %v6816_v2 = vadd.f32 %v6815_v59, %v6814_v23  ;;  %v6463_v59 = vld [vmem:[%s9748_s22 + $0x90] sm:$0xff] }
 0x7f5   : > { %v6541_v53 = vmul.f32 %v6500_v10, %v6500_v10 }
 0x7f6   : > { %v6137_v61 = vpop.f32.mrf.mxu2 }
 0x7f7   : > { %v6582_v0 = vmul.f32 %v6541_v53, %v10408_v1  ;;  %v6138_v32 = vadd.f32 %v9649_v14, %v6137_v61 }
 0x7f8   : > { %v6337_v31 = vpop.f32.mrf.mxu3 }
 0x7f9   : > { %v6628_v5 = vmul.f32 %v9771_v52, %v6582_v0  ;;  %v6763_v16 = vmul.f32 %v9778_v29, %v6582_v0  ;;  %v6192_v28 = vmax.f32 %v6138_v32, 0.0  ;;  %v6338_v57 = vadd.f32 %v9753_v41, %v6337_v31  ;;  %v9975_v32 = vld [vmem:[%s10218_s8] ss:$0 sm:$0xff] }
 0x7fb   : > { %v6682_v36 = vsel %vm3336_vm3, %v6628_v5, 0.0  ;;  %v6817_v37 = vsel %vm3336_vm3, %v6763_v16, 0.0  ;;  %v6216_v4 = vpack.c.bf16 %v6192_v28, %v6191_v20  ;;  %6419 = vst.msk [vmem:[%s9759_s30 + $0x78] sm:$0xff] %vm3336_vm3, %v6338_v57  ;;  %v6501_v62 = vsub.f32 %v6338_v57, %v6460_v44  ;;  %v10412_v5 = vld [vmem:[#allocation48_spill] sm:$0xff] }
 0x7fc   : > { %v6683_v22 = vadd.f32 %v6682_v36, %v6681_v15  ;;  %v6818_v54 = vadd.f32 %v6817_v37, %v6816_v2  ;;  %v6464_v37 = vld [vmem:[%s9748_s22 + $0x98] sm:$0xff] }
 0x7fd   : > { %v6542_v63 = vmul.f32 %v6501_v62, %v6501_v62  ;;  %7438 = vmatmul.msk.bf16.gmra.mxu3 %vm5982_vm5, %v6216_v4 }
 0x7fe   : > { %v6140_v35 = vpop.f32.mrf.mxu2 }
 0x7ff   : > { %v6583_v34 = vmul.f32 %v6542_v63, %v10409_v50  ;;  %v6141_v43 = vadd.f32 %v9649_v14, %v6140_v35 }
 0x800   : > { %v6340_v25 = vpop.f32.mrf.mxu3 }
 0x801   : > { %v6629_v13 = vmul.f32 %v9771_v52, %v6583_v34  ;;  %v6764_v27 = vmul.f32 %v9778_v29, %v6583_v34  ;;  %v6341_v45 = vadd.f32 %v9753_v41, %v6340_v25  ;;  %v6193_v51 = vmax.f32 %v6141_v43, 0.0 }
 0x803   : > { %v6684_v47 = vsel %vm3336_vm3, %v6629_v13, 0.0  ;;  %v6819_v9 = vsel %vm3336_vm3, %v6764_v27, 0.0  ;;  %6420 = vst.msk [vmem:[%s9759_s30 + $0x80] sm:$0xff] %vm3336_vm3, %v6341_v45  ;;  %v6502_v48 = vsub.f32 %v6341_v45, %v6461_v21  ;;  %v10413_v45 = vld [vmem:[#allocation49_spill] sm:$0xff] }
 0x804   : > { %v6685_v40 = vadd.f32 %v6684_v47, %v6683_v22  ;;  %v6820_v55 = vadd.f32 %v6819_v9, %v6818_v54 }
 0x805   : > { %v6543_v56 = vmul.f32 %v6502_v48, %v6502_v48  ;;  %v6465_v48 = vld [vmem:[%s9748_s22 + $0xa0] sm:$0xff] }
 0x806   : > { %v6142_v39 = vpop.f32.mrf.mxu2 }
 0x807   : > { %v6584_v42 = vmul.f32 %v6543_v56, %v10410_v3  ;;  %v6143_v7 = vadd.f32 %v9649_v14, %v6142_v39 }
 0x808   : > { %v6342_v11 = vpop.f32.mrf.mxu3 }
 0x809   : > { %v6630_v18 = vmul.f32 %v9771_v52, %v6584_v42  ;;  %v6765_v24 = vmul.f32 %v9778_v29, %v6584_v42  ;;  %v6194_v58 = vmax.f32 %v6143_v7, 0.0  ;;  %v6343_v23 = vadd.f32 %v9753_v41, %v6342_v11 }
 0x80b   : > { %v6686_v26 = vsel %vm3336_vm3, %v6630_v18, 0.0  ;;  %v6821_v12 = vsel %vm3336_vm3, %v6765_v24, 0.0  ;;  %v6217_v49 = vpack.c.bf16 %v6194_v58, %v6193_v51  ;;  %6421 = vst.msk [vmem:[%s9759_s30 + $0x88] sm:$0xff] %vm3336_vm3, %v6343_v23  ;;  %v6503_v14 = vsub.f32 %v6343_v23, %v6462_v17  ;;  %v10414_v18 = vld [vmem:[#allocation50_spill] sm:$0xff] }
 0x80c   : > { %v6687_v30 = vadd.f32 %v6686_v26, %v6685_v40  ;;  %v6822_v6 = vadd.f32 %v6821_v12, %v6820_v55  ;;  %v6466_v12 = vld [vmem:[%s9748_s22 + $0xa8] sm:$0xff] }
 0x80d   : > { %v6544_v60 = vmul.f32 %v6503_v14, %v6503_v14  ;;  %7439 = vmatmul.msk.bf16.gmra.mxu3 %vm5982_vm5, %v6217_v49 }
 0x80e   : > { %v6145_v19 = vpop.f32.mrf.mxu2 }
 0x80f   : > { %v6585_v33 = vmul.f32 %v6544_v60, %v10411_v38  ;;  %v6146_v20 = vadd.f32 %v9975_v32, %v6145_v19 }
 0x810   : > { %v6345_v8 = vpop.f32.mrf.mxu3 }
 0x811   : > { %v6631_v10 = vmul.f32 %v9771_v52, %v6585_v33  ;;  %v6766_v15 = vmul.f32 %v9778_v29, %v6585_v33  ;;  %v6346_v2 = vadd.f32 %v9753_v41, %v6345_v8  ;;  %v6195_v57 = vmax.f32 %v6146_v20, 0.0 }
 0x813   : > { %v6688_v46 = vsel %vm3336_vm3, %v6631_v10, 0.0  ;;  %v6823_v53 = vsel %vm3336_vm3, %v6766_v15, 0.0  ;;  %6422 = vst.msk [vmem:[%s9759_s30 + $0x90] sm:$0xff] %vm3336_vm3, %v6346_v2  ;;  %v6504_v61 = vsub.f32 %v6346_v2, %v6463_v59  ;;  %v10415_v2 = vld [vmem:[#allocation51_spill] sm:$0xff] }
 0x814   : > { %v6689_v1 = vadd.f32 %v6688_v46, %v6687_v30  ;;  %v6824_v0 = vadd.f32 %v6823_v53, %v6822_v6 }
 0x815   : > { %v6545_v31 = vmul.f32 %v6504_v61, %v6504_v61  ;;  %v6467_v61 = vld [vmem:[%s9748_s22 + $0xb0] sm:$0xff] }
 0x816   : > { %v6147_v44 = vpop.f32.mrf.mxu2 }
 0x817   : > { %v6586_v16 = vmul.f32 %v6545_v31, %v10412_v5  ;;  %v6148_v28 = vadd.f32 %v9975_v32, %v6147_v44 }
 0x818   : > { %v6347_v36 = vpop.f32.mrf.mxu3 }
 0x819   : > { %v6632_v4 = vmul.f32 %v9771_v52, %v6586_v16  ;;  %v6767_v62 = vmul.f32 %v9778_v29, %v6586_v16  ;;  %v6196_v22 = vmax.f32 %v6148_v28, 0.0  ;;  %v6348_v54 = vadd.f32 %v9753_v41, %v6347_v36 }
 0x81b   : > { %v6690_v63 = vsel %vm3336_vm3, %v6632_v4, 0.0  ;;  %v6825_v35 = vsel %vm3336_vm3, %v6767_v62, 0.0  ;;  %v6218_v50 = vpack.c.bf16 %v6196_v22, %v6195_v57  ;;  %6423 = vst.msk [vmem:[%s9759_s30 + $0x98] sm:$0xff] %vm3336_vm3, %v6348_v54  ;;  %v6505_v34 = vsub.f32 %v6348_v54, %v6464_v37  ;;  %v10416_v62 = vld [vmem:[#allocation3_spill] sm:$0xff] }
 0x81c   : > { %v6691_v25 = vadd.f32 %v6690_v63, %v6689_v1  ;;  %v6826_v21 = vadd.f32 %v6825_v35, %v6824_v0  ;;  %v6468_v63 = vld [vmem:[%s9748_s22 + $0xb8] sm:$0xff] }
 0x81d   : > { %v6546_v13 = vmul.f32 %v6505_v34, %v6505_v34  ;;  %7440 = vmatmul.msk.bf16.gmra.mxu3 %vm5982_vm5, %v6218_v50 }
 0x81e   : > { %v6150_v27 = vpop.f32.mrf.mxu2 }
 0x81f   : > { %v6587_v47 = vmul.f32 %v6546_v13, %v10413_v45  ;;  %v6151_v51 = vadd.f32 %v9975_v32, %v6150_v27 }
 0x820   : > { %v6350_v9 = vpop.f32.mrf.mxu3 }
 0x821   : > { %v6633_v40 = vmul.f32 %v9771_v52, %v6587_v47  ;;  %v6768_v55 = vmul.f32 %v9778_v29, %v6587_v47  ;;  %v6351_v43 = vadd.f32 %v9753_v41, %v6350_v9  ;;  %v6197_v23 = vmax.f32 %v6151_v51, 0.0  ;;  %v10417_v9 = vld [vmem:[#allocation52_spill] sm:$0xff] }
 0x823   : > { %v6692_v56 = vsel %vm3336_vm3, %v6633_v40, 0.0  ;;  %v6827_v39 = vsel %vm3336_vm3, %v6768_v55, 0.0  ;;  %6424 = vst.msk [vmem:[%s9759_s30 + $0xa0] sm:$0xff] %vm3336_vm3, %v6351_v43  ;;  %v6506_v3 = vsub.f32 %v6351_v43, %v6465_v48  ;;  %v6469_v55 = vld [vmem:[%s9748_s22 + $0xc0] sm:$0xff] }
 0x824   : > { %v6693_v42 = vadd.f32 %v6692_v56, %v6691_v25  ;;  %v6828_v7 = vadd.f32 %v6827_v39, %v6826_v21 }
 0x825   : > { %v6547_v11 = vmul.f32 %v6506_v3, %v6506_v3 }
 0x826   : > { %v6152_v17 = vpop.f32.mrf.mxu2 }
 0x827   : > { %v6588_v24 = vmul.f32 %v6547_v11, %v10414_v18  ;;  %v6153_v58 = vadd.f32 %v9975_v32, %v6152_v17  ;;  %v10418_v18 = vld [vmem:[#allocation53_spill] sm:$0xff] }
 0x828   : > { %v6352_v26 = vpop.f32.mrf.mxu3 }
 0x829   : > { %v6634_v49 = vmul.f32 %v9771_v52, %v6588_v24  ;;  %v6769_v14 = vmul.f32 %v9778_v29, %v6588_v24  ;;  %v6198_v30 = vmax.f32 %v6153_v58, 0.0  ;;  %v6353_v6 = vadd.f32 %v9753_v41, %v6352_v26 }
 0x82b   : > { %v6694_v60 = vsel %vm3336_vm3, %v6634_v49, 0.0  ;;  %v6829_v19 = vsel %vm3336_vm3, %v6769_v14, 0.0  ;;  %v6219_v38 = vpack.c.bf16 %v6198_v30, %v6197_v23  ;;  %6425 = vst.msk [vmem:[%s9759_s30 + $0xa8] sm:$0xff] %vm3336_vm3, %v6353_v6  ;;  %v6507_v33 = vsub.f32 %v6353_v6, %v6466_v12  ;;  %v6470_v23 = vld [vmem:[%s9748_s22 + $0xc8] sm:$0xff] }
 0x82c   : > { %v6695_v8 = vadd.f32 %v6694_v60, %v6693_v42  ;;  %v6830_v59 = vadd.f32 %v6829_v19, %v6828_v7 }
 0x82d   : > { %v6548_v10 = vmul.f32 %v6507_v33, %v6507_v33  ;;  %7441 = vmatmul.msk.bf16.gmra.mxu3 %vm5982_vm5, %v6219_v38  ;;  %v10419_v33 = vld [vmem:[#allocation54_spill] sm:$0xff] }
 0x82e   : > { %v6155_v15 = vpop.f32.mrf.mxu2 }
 0x82f   : > { %v6589_v46 = vmul.f32 %v6548_v10, %v10415_v2  ;;  %v6156_v5 = vadd.f32 %v9975_v32, %v6155_v15  ;;  %v6471_v10 = vld [vmem:[%s9748_s22 + $0xd0] sm:$0xff] }
 0x830   : > { %v6355_v53 = vpop.f32.mrf.mxu3 }
 0x831   : > { %v6635_v1 = vmul.f32 %v9771_v52, %v6589_v46  ;;  %v6770_v0 = vmul.f32 %v9778_v29, %v6589_v46  ;;  %v6356_v20 = vadd.f32 %v9753_v41, %v6355_v53  ;;  %v6199_v4 = vmax.f32 %v6156_v5, 0.0 }
 0x833   : > { %v6696_v31 = vsel %vm3336_vm3, %v6635_v1, 0.0  ;;  %v6831_v44 = vsel %vm3336_vm3, %v6770_v0, 0.0  ;;  %6426 = vst.msk [vmem:[%s9759_s30 + $0xb0] sm:$0xff] %vm3336_vm3, %v6356_v20  ;;  %v6508_v16 = vsub.f32 %v6356_v20, %v6467_v61  ;;  %v6220_v34 = vpack.c.bf16 %v6199_v4, %v6199_v4 }
 0x834   : > { %v6697_v28 = vadd.f32 %v6696_v31, %v6695_v8  ;;  %v6832_v57 = vadd.f32 %v6831_v44, %v6830_v59  ;;  %v10420_v44 = vld [vmem:[#allocation4_spill] sm:$0xff] }
 0x835   : > { %v6549_v36 = vmul.f32 %v6508_v16, %v6508_v16 }
 0x836   : > { %v6157_v37 = vpop.f32.mrf.mxu2 }
 0x837   : > { %v6590_v22 = vmul.f32 %v6549_v36, %v10416_v62 }
 0x838   : > { %v6357_v54 = vpop.f32.mrf.mxu3 }
 0x839   : > { %v6636_v35 = vmul.f32 %v9771_v52, %v6590_v22  ;;  %v6771_v50 = vmul.f32 %v9778_v29, %v6590_v22  ;;  %v6358_v32 = vadd.f32 %v9753_v41, %v6357_v54 }
 0x83b   : > { %v6698_v25 = vsel %vm3336_vm3, %v6636_v35, 0.0  ;;  %v6833_v21 = vsel %vm3336_vm3, %v6771_v50, 0.0  ;;  %6427 = vst.msk [vmem:[%s9759_s30 + $0xb8] sm:$0xff] %vm3336_vm3, %v6358_v32  ;;  %v6509_v13 = vsub.f32 %v6358_v32, %v6468_v63  ;;  %v10421_v50 = vld [vmem:[#allocation5_spill] sm:$0xff] }
 0x83c   : > { %v6699_v27 = vadd.f32 %v6698_v25, %v6697_v28  ;;  %v6834_v45 = vadd.f32 %v6833_v21, %v6832_v57  ;;  %v6472_v28 = vld [vmem:[%s9748_s22 + $0xd8] sm:$0xff]  ;;  %v6473_v25 = vld [vmem:[%s9748_s22 + $0xe0] sm:$0xff] }
 0x83d   : > { %v6550_v47 = vmul.f32 %v6509_v13, %v6509_v13  ;;  %7442 = vmatmul.msk.bf16.gmra.mxu3 %vm5982_vm5, %v6220_v34 }
 0x83f   : > { %v6591_v48 = vmul.f32 %v6550_v47, %v10417_v9 }
 0x840   : > { %v6360_v40 = vpop.f32.mrf.mxu3 }
 0x841   : > { %v6637_v43 = vmul.f32 %v9771_v52, %v6591_v48  ;;  %v6772_v56 = vmul.f32 %v9778_v29, %v6591_v48  ;;  %v6361_v39 = vadd.f32 %v9753_v41, %v6360_v40 }
 0x843   : > { %v6700_v3 = vsel %vm3336_vm3, %v6637_v43, 0.0  ;;  %v6835_v42 = vsel %vm3336_vm3, %v6772_v56, 0.0  ;;  %6428 = vst.msk [vmem:[%s9759_s30 + $0xc0] sm:$0xff] %vm3336_vm3, %v6361_v39  ;;  %v6510_v7 = vsub.f32 %v6361_v39, %v6469_v55  ;;  %v10422_v43 = vld [vmem:[#allocation6_spill] sm:$0xff] }
 0x844   : > { %v6701_v51 = vadd.f32 %v6700_v3, %v6699_v27  ;;  %v6836_v11 = vadd.f32 %v6835_v42, %v6834_v45  ;;  %v6474_v3 = vld [vmem:[%s9748_s22 + $0xe8] sm:$0xff] }
 0x845   : > { %v6551_v17 = vmul.f32 %v6510_v7, %v6510_v7 }
 0x847   : > { %v6592_v24 = vmul.f32 %v6551_v17, %v10418_v18 }
 0x848   : > { %v6362_v58 = vpop.f32.mrf.mxu3 }
 0x849   : > { %v6638_v26 = vmul.f32 %v9771_v52, %v6592_v24  ;;  %v6773_v12 = vmul.f32 %v9778_v29, %v6592_v24  ;;  %v6363_v49 = vadd.f32 %v9753_v41, %v6362_v58 }
 0x84b   : > { %v6702_v14 = vsel %vm3336_vm3, %v6638_v26, 0.0  ;;  %v6837_v30 = vsel %vm3336_vm3, %v6773_v12, 0.0  ;;  %6429 = vst.msk [vmem:[%s9759_s30 + $0xc8] sm:$0xff] %vm3336_vm3, %v6363_v49  ;;  %v6511_v6 = vsub.f32 %v6363_v49, %v6470_v23  ;;  %v10423_v26 = vld [vmem:[#allocation7_spill] sm:$0xff] }
 0x84c   : > { %v6703_v60 = vadd.f32 %v6702_v14, %v6701_v51  ;;  %v6838_v19 = vadd.f32 %v6837_v30, %v6836_v11  ;;  %v10090_v30 = vld [vmem:[%s10220_s10] ss:$0 sm:$0xff] }
 0x84d   : > { %v6552_v38 = vmul.f32 %v6511_v6, %v6511_v6 }
 0x84f   : > { %v6593_v8 = vmul.f32 %v6552_v38, %v10419_v33 }
 0x850   : > { %v6365_v59 = vpop.f32.mrf.mxu3 }
 0x851   : > { %v6639_v15 = vmul.f32 %v9771_v52, %v6593_v8  ;;  %v6774_v2 = vmul.f32 %v9778_v29, %v6593_v8  ;;  %v6366_v46 = vadd.f32 %v9753_v41, %v6365_v59 }
 0x853   : > { %v6704_v53 = vsel %vm3336_vm3, %v6639_v15, 0.0  ;;  %v6839_v61 = vsel %vm3336_vm3, %v6774_v2, 0.0  ;;  %6430 = vst.msk [vmem:[%s9759_s30 + $0xd0] sm:$0xff] %vm3336_vm3, %v6366_v46  ;;  %v6512_v1 = vsub.f32 %v6366_v46, %v6471_v10 }
 0x854   : > { %v6705_v0 = vadd.f32 %v6704_v53, %v6703_v60  ;;  %v6840_v20 = vadd.f32 %v6839_v61, %v6838_v19 }
 0x855   : > { %v6553_v31 = vmul.f32 %v6512_v1, %v6512_v1 }
 0x857   : > { %v6594_v5 = vmul.f32 %v6553_v31, %v10420_v44 }
 0x858   : > { %v6367_v16 = vpop.f32.mrf.mxu3 }
 0x859   : > { %v6640_v57 = vmul.f32 %v9771_v52, %v6594_v5  ;;  %v6775_v36 = vmul.f32 %v9778_v29, %v6594_v5  ;;  %v6368_v37 = vadd.f32 %v9753_v41, %v6367_v16  ;;  %v6476_v16 = vld [vmem:[%s9748_s22 + $0xf8] sm:$0xff] }
 0x85b   : > { %v6706_v4 = vsel %vm3336_vm3, %v6640_v57, 0.0  ;;  %v6841_v62 = vsel %vm3336_vm3, %v6775_v36, 0.0  ;;  %6431 = vst.msk [vmem:[%s9759_s30 + $0xd8] sm:$0xff] %vm3336_vm3, %v6368_v37  ;;  %v6513_v22 = vsub.f32 %v6368_v37, %v6472_v28  ;;  %v6477_v28 = vld [vmem:[%s9748_s22 + $0x100] sm:$0xff]  ;;  %v6478_v37 = vld [vmem:[%s9748_s22 + $0x108] sm:$0xff] }
 0x85c   : > { %v6707_v54 = vadd.f32 %v6706_v4, %v6705_v0  ;;  %v6842_v63 = vadd.f32 %v6841_v62, %v6840_v20  ;;  %v6475_v20 = vld [vmem:[%s9748_s22 + $0xf0] sm:$0xff] }
 0x85d   : > { %v6554_v35 = vmul.f32 %v6513_v22, %v6513_v22  ;;  %v6479_v22 = vld [vmem:[%s9748_s22 + $0x110] sm:$0xff] }
 0x85f   : > { %v6595_v32 = vmul.f32 %v6554_v35, %v10421_v50  ;;  %v10424_v35 = vld [vmem:[#allocation8_spill] sm:$0xff] }
 0x860   : > { %v6370_v34 = vpop.f32.mrf.mxu3 }
 0x861   : > { %v6641_v21 = vmul.f32 %v9771_v52, %v6595_v32  ;;  %v6776_v13 = vmul.f32 %v9778_v29, %v6595_v32  ;;  %v6371_v27 = vadd.f32 %v9753_v41, %v6370_v34 }
 0x863   : > { %v6708_v45 = vsel %vm3336_vm3, %v6641_v21, 0.0  ;;  %v6843_v47 = vsel %vm3336_vm3, %v6776_v13, 0.0  ;;  %6432 = vst.msk [vmem:[%s9759_s30 + $0xe0] sm:$0xff] %vm3336_vm3, %v6371_v27  ;;  %v6514_v9 = vsub.f32 %v6371_v27, %v6473_v25  ;;  %v6480_v21 = vld [vmem:[%s9748_s22 + $0x118] sm:$0xff]  ;;  %v6481_v13 = vld [vmem:[%s9748_s22 + $0x120] sm:$0xff] }
 0x864   : > { %v6709_v48 = vadd.f32 %v6708_v45, %v6707_v54  ;;  %v6844_v40 = vadd.f32 %v6843_v47, %v6842_v63  ;;  %v10425_v47 = vld [vmem:[#allocation9_spill] sm:$0xff] }
 0x865   : > { %v6555_v55 = vmul.f32 %v6514_v9, %v6514_v9 }
 0x867   : > { %v6596_v56 = vmul.f32 %v6555_v55, %v10422_v43  ;;  %v10426_v55 = vld [vmem:[#allocation10_spill] sm:$0xff] }
 0x868   : > { %v6372_v39 = vpop.f32.mrf.mxu3 }
 0x869   : > { %v6642_v42 = vmul.f32 %v9771_v52, %v6596_v56  ;;  %v6777_v7 = vmul.f32 %v9778_v29, %v6596_v56  ;;  %v6373_v51 = vadd.f32 %v9753_v41, %v6372_v39 }
 0x86b   : > { %v6710_v11 = vsel %vm3336_vm3, %v6642_v42, 0.0  ;;  %v6845_v17 = vsel %vm3336_vm3, %v6777_v7, 0.0  ;;  %6433 = vst.msk [vmem:[%s9759_s30 + $0xe8] sm:$0xff] %vm3336_vm3, %v6373_v51  ;;  %v6515_v18 = vsub.f32 %v6373_v51, %v6474_v3  ;;  %v10427_v51 = vld [vmem:[#allocation11_spill] sm:$0xff] }
 0x86c   : > { %v6711_v24 = vadd.f32 %v6710_v11, %v6709_v48  ;;  %v6846_v58 = vadd.f32 %v6845_v17, %v6844_v40  ;;  %v6482_v40 = vld [vmem:[%s9748_s22 + $0x128] sm:$0xff] }
 0x86d   : > { %v6556_v23 = vmul.f32 %v6515_v18, %v6515_v18  ;;  %v6483_v18 = vld [vmem:[%s9748_s22 + $0x130] sm:$0xff] }
 0x86f   : > { %v6597_v12 = vmul.f32 %v6556_v23, %v10423_v26 }
 0x870   : > { %v6375_v49 = vpop.f32.mrf.mxu3 }
 0x871   : > { %v6643_v14 = vmul.f32 %v9771_v52, %v6597_v12  ;;  %v6778_v41 = vmul.f32 %v9778_v29, %v6597_v12  ;;  %v6376_v6 = vadd.f32 %v10090_v30, %v6375_v49  ;;  %v10428_v49 = vld [vmem:[#allocation12_spill] sm:$0xff] }
 0x873   : > { %v6712_v60 = vsel %vm3336_vm3, %v6643_v14, 0.0  ;;  %v6847_v19 = vsel %vm3336_vm3, %v6778_v41, 0.0  ;;  %6434 = vst.msk [vmem:[%s9759_s30 + $0xf0] sm:$0xff] %vm3336_vm3, %v6376_v6  ;;  %v6516_v5 = vsub.f32 %v6376_v6, %v6475_v20 }
 0x874   : > { %v10097_v38 = vadd.f32 %v6712_v60, %v6711_v24  ;;  %v10099_v33 = vadd.f32 %v6847_v19, %v6846_v58 }
 0x875   : > { %v6557_v57 = vmul.f32 %v6516_v5, %v6516_v5  ;;  %v6484_v5 = vld [vmem:[%s9748_s22 + $0x138] sm:$0xff] }
 0x877   : > { %v6598_v50 = vmul.f32 %v6557_v57, %v10424_v35 }
 0x878   : > { %v6377_v8 = vpop.f32.mrf.mxu3 }
 0x879   : > { %v6378_v59 = vadd.f32 %v10090_v30, %v6377_v8  ;;  %v6644_v45 = vmul.f32 %v9771_v52, %v6598_v50  ;;  %v6779_v42 = vmul.f32 %v9778_v29, %v6598_v50 }
 0x87b   : > { %6435 = vst.msk [vmem:[%s9759_s30 + $0xf8] sm:$0xff] %vm3336_vm3, %v6378_v59  ;;  %v6517_v36 = vsub.f32 %v6378_v59, %v6476_v16  ;;  %v6714_v24 = vsel %vm3336_vm3, %v6644_v45, 0.0  ;;  %v6849_v6 = vsel %vm3336_vm3, %v6779_v42, 0.0  ;;  %v10432_v45 = vld [vmem:[#allocation16_spill] sm:$0xff] }
 0x87c   : > { %v6715_v8 = vadd.f32 %v6714_v24, %v10097_v38 }
 0x87d   : > { %v6558_v32 = vmul.f32 %v6517_v36, %v6517_v36 }
 0x87f   : > { %v6599_v9 = vmul.f32 %v6558_v32, %v10425_v47 }
 0x880   : > { %v6380_v10 = vpop.f32.mrf.mxu3 }
 0x881   : > { %v6381_v15 = vadd.f32 %v10090_v30, %v6380_v10  ;;  %v6645_v58 = vmul.f32 %v9771_v52, %v6599_v9  ;;  %v6780_v23 = vmul.f32 %v9778_v29, %v6599_v9 }
 0x883   : > { %6436 = vst.msk [vmem:[%s9759_s30 + $0x100] sm:$0xff] %vm3336_vm3, %v6381_v15  ;;  %v6518_v4 = vsub.f32 %v6381_v15, %v6477_v28  ;;  %v6716_v15 = vsel %vm3336_vm3, %v6645_v58, 0.0 }
 0x885   : > { %v6559_v34 = vmul.f32 %v6518_v4, %v6518_v4 }
 0x887   : > { %v6600_v43 = vmul.f32 %v6559_v34, %v10426_v55 }
 0x888   : > { %v6382_v2 = vpop.f32.mrf.mxu3 }
 0x889   : > { %v6383_v46 = vadd.f32 %v10090_v30, %v6382_v2  ;;  %v6646_v12 = vmul.f32 %v9771_v52, %v6600_v43  ;;  %v6781_v60 = vmul.f32 %v9778_v29, %v6600_v43  ;;  %v6851_v2 = vsel %vm3336_vm3, %v6780_v23, 0.0 }
 0x88b   : > { %6437 = vst.msk [vmem:[%s9759_s30 + $0x108] sm:$0xff] %vm3336_vm3, %v6383_v46  ;;  %v6519_v63 = vsub.f32 %v6383_v46, %v6478_v37  ;;  %v6853_v16 = vsel %vm3336_vm3, %v6781_v60, 0.0  ;;  %v6717_v37 = vadd.f32 %v6716_v15, %v6715_v8 }
 0x88d   : > { %v6560_v27 = vmul.f32 %v6519_v63, %v6519_v63 }
 0x88f   : > { %v6601_v11 = vmul.f32 %v6560_v27, %v10427_v51 }
 0x890   : > { %v6385_v53 = vpop.f32.mrf.mxu3 }
 0x891   : > { %v6386_v61 = vadd.f32 %v10090_v30, %v6385_v53  ;;  %v6647_v59 = vmul.f32 %v9771_v52, %v6601_v11  ;;  %v6782_v46 = vmul.f32 %v9778_v29, %v6601_v11  ;;  %v10429_v53 = vld [vmem:[#allocation13_spill] sm:$0xff] }
 0x893   : > { %6438 = vst.msk [vmem:[%s9759_s30 + $0x110] sm:$0xff] %vm3336_vm3, %v6386_v61  ;;  %v6520_v25 = vsub.f32 %v6386_v61, %v6479_v22 }
 0x895   : > { %v6561_v56 = vmul.f32 %v6520_v25, %v6520_v25 }
 0x897   : > { %v6602_v14 = vmul.f32 %v6561_v56, %v10428_v49 }
 0x898   : > { %v6387_v1 = vpop.f32.mrf.mxu3 }
 0x899   : > { %v6388_v0 = vadd.f32 %v10090_v30, %v6387_v1  ;;  %v6850_v1 = vadd.f32 %v6849_v6, %v10099_v33  ;;  %v6648_v20 = vmul.f32 %v9771_v52, %v6602_v14  ;;  %v6783_v28 = vmul.f32 %v9778_v29, %v6602_v14 }
 0x89a   : > { %v6720_v33 = vsel %vm3336_vm3, %v6647_v59, 0.0 }
 0x89b   : > { %6439 = vst.msk [vmem:[%s9759_s30 + $0x118] sm:$0xff] %vm3336_vm3, %v6388_v0  ;;  %v6521_v48 = vsub.f32 %v6388_v0, %v6480_v21  ;;  %v6718_v0 = vsel %vm3336_vm3, %v6646_v12, 0.0  ;;  %v6852_v4 = vadd.f32 %v6851_v2, %v6850_v1  ;;  %v6722_v25 = vsel %vm3336_vm3, %v6648_v20, 0.0 }
 0x89c   : > { %v6719_v32 = vadd.f32 %v6718_v0, %v6717_v37 }
 0x89d   : > { %v6562_v26 = vmul.f32 %v6521_v48, %v6521_v48  ;;  %v6854_v34 = vadd.f32 %v6853_v16, %v6852_v4 }
 0x89e   : > { %v6721_v48 = vadd.f32 %v6720_v33, %v6719_v32 }
 0x89f   : > { %v6603_v61 = vmul.f32 %v6562_v26, %v10429_v53  ;;  %v10434_v53 = vld [vmem:[#allocation18_spill] sm:$0xff] }
 0x8a0   : > { %v6390_v31 = vpop.f32.mrf.mxu3 }
 0x8a1   : > { %v6391_v44 = vadd.f32 %v10090_v30, %v6390_v31  ;;  %v10430_v31 = vld [vmem:[#allocation14_spill] sm:$0xff]  ;;  %v6649_v63 = vmul.f32 %v9771_v52, %v6603_v61  ;;  %v6784_v35 = vmul.f32 %v9778_v29, %v6603_v61 }
 0x8a3   : > { %6440 = vst.msk [vmem:[%s9759_s30 + $0x120] sm:$0xff] %vm3336_vm3, %v6391_v44  ;;  %v6522_v39 = vsub.f32 %v6391_v44, %v6481_v13  ;;  %v6857_v13 = vsel %vm3336_vm3, %v6783_v28, 0.0  ;;  %v6724_v43 = vsel %vm3336_vm3, %v6649_v63, 0.0  ;;  %v6859_v56 = vsel %vm3336_vm3, %v6784_v35, 0.0 }
 0x8a5   : > { %v6563_v41 = vmul.f32 %v6522_v39, %v6522_v39 }
 0x8a7   : > { %v6604_v38 = vmul.f32 %v6563_v41, %v10430_v31 }
 0x8a8   : > { %v6392_v62 = vpop.f32.mrf.mxu3 }
 0x8a9   : > { %v6393_v54 = vadd.f32 %v10090_v30, %v6392_v62  ;;  %v10431_v62 = vld [vmem:[#allocation15_spill] sm:$0xff]  ;;  %v6650_v21 = vmul.f32 %v9771_v52, %v6604_v38  ;;  %v6785_v27 = vmul.f32 %v9778_v29, %v6604_v38 }
 0x8ab   : > { %6441 = vst.msk [vmem:[%s9759_s30 + $0x128] sm:$0xff] %vm3336_vm3, %v6393_v54  ;;  %v6523_v17 = vsub.f32 %v6393_v54, %v6482_v40  ;;  %v6855_v54 = vsel %vm3336_vm3, %v6782_v46, 0.0  ;;  %v6726_v11 = vsel %vm3336_vm3, %v6650_v21, 0.0  ;;  %v6861_v24 = vsel %vm3336_vm3, %v6785_v27, 0.0 }
 0x8ac   : > { %v6856_v40 = vadd.f32 %v6855_v54, %v6854_v34 }
 0x8ad   : > { %v6564_v10 = vmul.f32 %v6523_v17, %v6523_v17 }
 0x8ae   : > { %v6858_v51 = vadd.f32 %v6857_v13, %v6856_v40 }
 0x8af   : > { %v6605_v22 = vmul.f32 %v6564_v10, %v10431_v62 }
 0x8b0   : > { %v6395_v3 = vpop.f32.mrf.mxu3  ;;  %v6860_v49 = vadd.f32 %v6859_v56, %v6858_v51 }
 0x8b1   : > { %v6396_v7 = vadd.f32 %v10090_v30, %v6395_v3  ;;  %v6786_v55 = vmul.f32 %v9778_v29, %v6605_v22  ;;  %v6651_v39 = vmul.f32 %v9771_v52, %v6605_v22  ;;  %v10433_v3 = vld [vmem:[#allocation17_spill] sm:$0xff] }
 0x8b2   : > { %v6862_v8 = vadd.f32 %v6861_v24, %v6860_v49 }
 0x8b3   : > { %6442 = vst.msk [vmem:[%s9759_s30 + $0x130] sm:$0xff] %vm3336_vm3, %v6396_v7  ;;  %v6524_v19 = vsub.f32 %v6396_v7, %v6483_v18  ;;  %v6723_v7 = vadd.f32 %v6722_v25, %v6721_v48  ;;  %v6485_v18 = vld [vmem:[%s9748_s22 + $0x140] sm:$0xf]  ;;  %v6863_v14 = vsel %vm3336_vm3, %v6786_v55, 0.0 }
 0x8b4   : > { %v6864_v2 = vadd.f32 %v6863_v14, %v6862_v8 }
 0x8b5   : > { %v6565_v57 = vmul.f32 %v6524_v19, %v6524_v19  ;;  %v6725_v12 = vadd.f32 %v6724_v43, %v6723_v7  ;;  %v6728_v19 = vsel %vm3336_vm3, %v6651_v39, 0.0 }
 0x8b7   : > { %v6606_v47 = vmul.f32 %v6565_v57, %v10432_v45  ;;  %v6727_v59 = vadd.f32 %v6726_v11, %v6725_v12 }
 0x8b8   : > { %v6397_v44 = vpop.f32.mrf.mxu3 }
 0x8b9   : > { %v6398_v36 = vadd.f32 %v10090_v30, %v6397_v44  ;;  %v6652_v58 = vmul.f32 %v9771_v52, %v6606_v47  ;;  %v6787_v23 = vmul.f32 %v9778_v29, %v6606_v47  ;;  %v6729_v46 = vadd.f32 %v6728_v19, %v6727_v59 }
 0x8bb   : > { %6443 = vst.msk [vmem:[%s9759_s30 + $0x138] sm:$0xff] %vm3336_vm3, %v6398_v36  ;;  %v6525_v50 = vsub.f32 %v6398_v36, %v6484_v5  ;;  %v6865_v15 = vsel %vm3336_vm3, %v6787_v23, 0.0 }
 0x8bc   : > { %v6866_v31 = vadd.f32 %v6865_v15, %v6864_v2 }
 0x8bd   : > { %v6566_v9 = vmul.f32 %v6525_v50, %v6525_v50 }
 0x8bf   : > { %v6607_v42 = vmul.f32 %v6566_v9, %v10433_v3 }
 0x8c0   : > { %v6400_v17 = vpop.f32.mrf.mxu3 }
 0x8c1   : > { %v6401_v26 = vadd.f32 %v10090_v30, %v6400_v17  ;;  %v6788_v6 = vmul.f32 %v9778_v29, %v6607_v42  ;;  %v6653_v60 = vmul.f32 %v9771_v52, %v6607_v42  ;;  %v6730_v30 = vsel %vm3336_vm3, %v6652_v58, 0.0 }
 0x8c2   : > { %v6731_v38 = vadd.f32 %v6730_v30, %v6729_v46 }
 0x8c3   : > { %6444 = vst.msk [vmem:[%s9759_s30 + $0x140] sm:$0xf] %vm3383_vm4, %v6401_v26  ;;  %v6526_v41 = vsub.f32 %v6401_v26, %v6485_v18  ;;  %v6867_v1 = vsel %vm3336_vm3, %v6788_v6, 0.0  ;;  %v6732_v0 = vsel %vm3336_vm3, %v6653_v60, 0.0 }
 0x8c4   : > { %v6868_v16 = vadd.f32 %v6867_v1, %v6866_v31  ;;  %v6733_v28 = vadd.f32 %v6732_v0, %v6731_v38 }
 0x8c5   : > { %v6567_v10 = vmul.f32 %v6526_v41, %v6526_v41 }
 0x8c7   : > { %v6608_v61 = vmul.f32 %v6567_v10, %v10434_v53 }
 0x8c8   : > { %v6402_v20 = vpop.f32.mrf.mxu3 }
 0x8c9   : > { %v6789_v44 = vmul.f32 %v9778_v29, %v6608_v61  ;;  %v6654_v5 = vmul.f32 %v9771_v52, %v6608_v61 }
 0x8cb   : > { %v6869_v57 = vsel %vm3383_vm4, %v6789_v44, 0.0  ;;  %v6734_v36 = vsel %vm3383_vm4, %v6654_v5, 0.0 }
 0x8cc   : > { %v6870_v37 = vadd.f32 %v6869_v57, %v6868_v16  ;;  %v6735_v4 = vadd.f32 %v6734_v36, %v6733_v28 }
 0x8ce   : > { %6871 = vadd.xlane.f32.xlu0 %v6870_v37  ;;  %6736 = vadd.xlane.f32.xlu2 %v6735_v4 }
 0x941   : > { %v6872_v33 = vpop.xlane.xlu0 %6871  ;;  %v6737_v62 = vpop.xlane.xlu2 %6736 }
 0x942   : > { %v6873_v22 = vrot.slane %v6872_v33, 4  ;;  %v6738_v54 = vrot.slane %v6737_v62, 4 }
 0x944   : > { %v6874_v63 = vadd.f32 %v6873_v22, %v6872_v33  ;;  %v6739_v29 = vadd.f32 %v6738_v54, %v6737_v62 }
 0x946   : > { %v6875_v35 = vrot.slane %v6874_v63, 2  ;;  %v6740_v52 = vrot.slane %v6739_v29, 2 }
 0x948   : > { %v6876_v50 = vadd.f32 %v6875_v35, %v6874_v63  ;;  %v6741_v32 = vadd.f32 %v6740_v52, %v6739_v29 }
 0x94a   : > { %v6742_v34 = vrot.slane %v6741_v32, 1  ;;  %v6877_v25 = vrot.slane %v6876_v50, 1 }
 0x94c   : > { %v6743_v21 = vadd.f32 %v6742_v34, %v6741_v32  ;;  %v6878_v13 = vadd.f32 %v6877_v25, %v6876_v50 }
 0x94e   : > { %7448 = vpush %v6743_v21 }
 0x94f   : > { %7450 = vpush %v6878_v13 }
 0x97f   : > { %s7449_s20 = spop %7448 }
 0x980   : > { %v6745_v27 = vstv %s7449_s20  ;;  %s7451_s27 = spop %7450 }
 0x981   : > { %6747 = vst.msk [vmem:[%s474_s19] sm:$0x1] %vm6746_vm7, %v6745_v27  ;;  %v6880_v45 = vstv %s7451_s27 }
 0x982   : > { %6881 = vst.msk [vmem:[%s477_s24] sm:$0x1] %vm6746_vm7, %v6880_v45 }
 0x983 PF: > { %s24_s25 = sadd.s32 1, %s7478_s25  }
 0x984   : > { %p21_p4 = scmp.ge.s32.totalorder %s24_s25, 4  }
 0x986   :  { %23 = sbr.rel (!%p21_p4) target bundleno = 1 (0x1), region = 137 }

</bundles_post_ra>
